<compile_context>
chip_gen: v7x
topology: tpu7x:2x2x1
jax: 0.10.0
libtpu: 0.0.40
codegen_flags: <defaults>
</compile_context>

<pallas_src>
import math
from functools import partial

import jax
import jax.numpy as jnp
from jax.experimental import pallas as pl
from jax.experimental.pallas import tpu as pltpu


def _silu(x):
    return x * jax.nn.sigmoid(x)


def _softplus(x):
    # matches torch.nn.functional.softplus (beta=1, threshold=20)
    return jnp.where(x > 20.0, x, jnp.log1p(jnp.exp(jnp.minimum(x, 20.0))))


# --------------------------------------------------------------------------
# Stage 1: per-pixel Mamba (in_proj + conv + selective scan + out_proj)
#          and per-tile GroupNorm partial statistics.
# --------------------------------------------------------------------------
def _stage1_kernel(x_ref, w_fused_ref, b_fused_ref, w_big_ref, b_dt_ref,
                   a_ref, s_ref, d_ref, w_out_ref,
                   mout_ref, stats_ref, hc_ref, *,
                   token_num, d_inner, d_state):
    L = token_num
    F = d_inner * d_state          # flattened per-token state width (128 here)
    LD = L * d_inner
    LF = L * F
    mdt = w_fused_ref.dtype        # MXU operand dtype (bf16 or f32)

    x = x_ref[0]                                                    # (TP, C)
    tp = x.shape[0]

    # in_proj (+ fused causal depthwise conv on the x half), all tokens at once.
    xz = jnp.dot(x.astype(mdt), w_fused_ref[...],
                 preferred_element_type=jnp.float32) + b_fused_ref[...]
    u = _silu(xz[:, :LD])                                           # (TP, LD)
    z = xz[:, LD:]                                                  # (TP, LD)

    # ONE fused matmul for B_bcast | C_bcast | dt_pre | u_bcast (4*LF lanes,
    # every slice on a 1024-column boundary).
    proj = jnp.dot(u.astype(mdt), w_big_ref[...],
                   preferred_element_type=jnp.float32)              # (TP, 4*LF)

    a = a_ref[...]                                                  # (1, F)
    bdt = b_dt_ref[...]                                             # (1, F)

    # Sequential selective scan over tokens (L is small & static); da/dbu are
    # computed per token so no full (TP, L*F) slabs stay live.  All slices are
    # static and 128-lane aligned.
    h = jnp.zeros((tp, F), jnp.float32)
    for l in range(L):
        o = l * F
        b_l = proj[:, o:o + F]
        c_l = proj[:, LF + o:LF + o + F]
        dt_l = _softplus(proj[:, 2 * LF + o:2 * LF + o + F] + bdt)
        u_l = proj[:, 3 * LF + o:3 * LF + o + F]
        h = jnp.exp(dt_l * a) * h + (dt_l * b_l) * u_l
        hc_ref[:, o:o + F] = (h * c_l).astype(hc_ref.dtype)

    # Contract the state axis, skip term, gate, out_proj — batched over tokens.
    y = jnp.dot(hc_ref[...], s_ref[...], preferred_element_type=jnp.float32)
    y = y + u * d_ref[...]
    y = y * _silu(z)
    m_out = jnp.dot(y.astype(mdt), w_out_ref[...],
                    preferred_element_type=jnp.float32)             # (TP, C)

    mout_ref[0] = m_out.astype(mout_ref.dtype)

    # Per-tile, per-channel sum and tile-centred sum of squares (f32) — the
    # wrapper combines tiles with the parallel-variance formula, avoiding the
    # E[x^2]-E[x]^2 cancellation.
    s1 = jnp.sum(m_out, axis=0, keepdims=True)                      # (1, C)
    cen = m_out - s1 * (1.0 / tp)
    s2 = jnp.sum(cen * cen, axis=0, keepdims=True)                  # (1, C)
    stats_ref[0, 0] = jnp.concatenate([s1, s2], axis=0)             # (2, C)


# --------------------------------------------------------------------------
# Stage 2: GroupNorm apply (per-channel scale/shift) + SiLU + residual.
# Works on either the lane-dense flattened view or the (TP, C) view.
# --------------------------------------------------------------------------
def _stage2_kernel(x_ref, m_ref, scale_ref, shift_ref, out_ref):
    xn = m_ref[0].astype(jnp.float32) * scale_ref[0] + shift_ref[0]
    out_ref[0] = (x_ref[0].astype(jnp.float32) + _silu(xn)).astype(out_ref.dtype)


# --------------------------------------------------------------------------
# Host-side weight packing (tiny, done once outside the kernel).
# --------------------------------------------------------------------------
def _prepare_weights(params, token_num, mxu_dtype):
    (w_in, conv_w, conv_b, w_xp, w_dt, b_dt, A, Dv, w_out, _gamma, _beta) = params
    f32 = jnp.float32
    L = token_num
    d_inner = w_in.shape[1] // 2
    N = A.shape[1]
    d_conv = conv_w.shape[0]
    dt_rank = w_dt.shape[0]
    eye_L = jnp.eye(L, dtype=f32)

    def bdiag(blk):
        return jnp.kron(eye_L, blk.astype(f32))

    # Causal depthwise conv over the token axis as a (L*d_inner, L*d_inner) matrix.
    rows = []
    for src in range(L):
        cols = []
        for l in range(L):
            k = src - l + d_conv - 1
            if 0 <= k < d_conv:
                cols.append(jnp.diag(conv_w[k].astype(f32)))
            else:
                cols.append(jnp.zeros((d_inner, d_inner), f32))
        rows.append(jnp.concatenate(cols, axis=1))
    w_conv_big = jnp.concatenate(rows, axis=0)                       # (L*d, L*d)

    # in_proj (x half) fused with the conv; z half block-diagonal.
    w_fused = jnp.concatenate(
        [bdiag(w_in[:, :d_inner]) @ w_conv_big, bdiag(w_in[:, d_inner:])], axis=1)
    b_fused = jnp.concatenate(
        [jnp.tile(conv_b.astype(f32), (1, L)),
         jnp.zeros((1, L * d_inner), f32)], axis=1)                  # (1, 2*L*d)

    # ONE fused u-projection: [ B_bcast | C_bcast | dt (x_proj @ dt_proj,
    # pre-broadcast over d_state) | u_bcast ], shape (L*d_inner, 4*L*F).
    w_xp_B = jnp.tile(w_xp[:, dt_rank:dt_rank + N].astype(f32), (1, d_inner))
    w_xp_C = jnp.tile(w_xp[:, dt_rank + N:].astype(f32), (1, d_inner))
    w_dt_comb = w_xp[:, :dt_rank].astype(f32) @ jnp.repeat(w_dt.astype(f32), N, axis=1)
    e_blk = jnp.repeat(jnp.eye(d_inner, dtype=f32), N, axis=1)       # u -> u_bcast
    w_big = jnp.concatenate(
        [bdiag(w_xp_B), bdiag(w_xp_C), bdiag(w_dt_comb), bdiag(e_blk)], axis=1)

    b_dt_vec = jnp.repeat(b_dt.astype(f32), N, axis=1)               # (1, F)
    a_vec = A.astype(f32).reshape(1, d_inner * N)                    # (1, F)

    s_big = bdiag(jnp.repeat(jnp.eye(d_inner, dtype=f32), N, axis=0))  # sum d_state
    d_big = jnp.tile(Dv.astype(f32), (1, L))                         # (1, L*d)
    w_out_big = bdiag(w_out)                                         # (L*d, C)

    mdt = mxu_dtype
    weights = (w_fused.astype(mdt), b_fused, w_big.astype(mdt), b_dt_vec,
               a_vec, s_big.astype(mdt), d_big, w_out_big.astype(mdt))
    return weights, d_inner, N


def _vmem_capacity_bytes():
    try:
        info = pltpu.get_tpu_info()
        cap = getattr(info, "vmem_capacity_bytes", None)
        if cap:
            return int(cap)
    except Exception:
        pass
    return 64 * 1024 * 1024   # conservative (v7x-sized) fallback


def _pick_tile_p(P, max_tile):
    if P <= max_tile:
        return P
    for t in range(max_tile - max_tile % 8, 7, -8):
        if P % t == 0:
            return t
    return P  # fall back to one full-extent tile


# --------------------------------------------------------------------------
# Forward wrapper.
# --------------------------------------------------------------------------
def spe_mamba_forward(x_nchw, params, *, token_num=8, group_num=4,
                      tile_p=None, eps=1e-5, mxu_dtype=jnp.bfloat16):
    B, C, H, W = x_nchw.shape
    g = math.ceil(C / token_num)
    if C != token_num * g:
        # TODO(synk): padding_feature path (C < token_num*g); the original
        # PyTorch residual add is also shape-inconsistent in that case.
        raise ValueError("channels must be a multiple of token_num")
    P = H * W

    vmem_cap = _vmem_capacity_bytes()
    if tile_p is None:
        # 128-MiB-VMEM parts (v5e/v6e): 512; 64-MiB parts (v7x): 256.
        max_tile = 512 if vmem_cap >= 100 * 1024 * 1024 else 256
        tile_p = _pick_tile_p(P, max_tile)
    assert P % tile_p == 0 and (tile_p % 8 == 0 or tile_p == P)
    n_t = P // tile_p
    vmem_limit = int(min(96 * 1024 * 1024, (vmem_cap * 3) // 4))

    x = jnp.transpose(x_nchw, (0, 2, 3, 1)).reshape(B, P, C)
    gamma, beta = params[-2], params[-1]
    weights, d_inner, d_state = _prepare_weights(params, token_num, mxu_dtype)
    F = d_inner * d_state
    interstage_dtype = mxu_dtype

    kernel1 = partial(_stage1_kernel, token_num=token_num,
                      d_inner=d_inner, d_state=d_state)
    w_specs = [pl.BlockSpec(w.shape, lambda b, t: (0, 0)) for w in weights]

    mamba_out, stats = pl.pallas_call(
        kernel1,
        out_shape=(jax.ShapeDtypeStruct((B, P, C), interstage_dtype),
                   jax.ShapeDtypeStruct((B, n_t, 2, C), jnp.float32)),
        grid_spec=pltpu.PrefetchScalarGridSpec(
            num_scalar_prefetch=0,
            grid=(B, n_t),
            in_specs=[pl.BlockSpec((1, tile_p, C), lambda b, t: (b, t, 0))] + w_specs,
            out_specs=[pl.BlockSpec((1, tile_p, C), lambda b, t: (b, t, 0)),
                       pl.BlockSpec((1, 1, 2, C), lambda b, t: (b, t, 0, 0))],
            scratch_shapes=[pltpu.VMEM((tile_p, token_num * F), mxu_dtype)]),
        compiler_params=pltpu.CompilerParams(
            dimension_semantics=("parallel", "parallel"),
            vmem_limit_bytes=vmem_limit),
    )(x, *weights)

    # Combine per-tile partial stats (parallel-variance formula, all f32) into
    # per-channel scale / shift; GroupNorm statistics span the whole H*W.
    cpg = C // group_num
    Nf = jnp.float32(P * cpg)
    tile_cnt = jnp.float32(tile_p)
    s1 = stats[:, :, 0, :]                                           # (B, n_t, C)
    s2c = stats[:, :, 1, :]                                          # (B, n_t, C)
    mean_g = s1.reshape(B, n_t, group_num, cpg).sum(axis=(1, 3)) / Nf   # (B, G)
    within = s2c.reshape(B, n_t, group_num, cpg).sum(axis=(1, 3))       # (B, G)
    dev = s1.reshape(B, n_t, group_num, cpg) / tile_cnt - mean_g[:, None, :, None]
    between = (tile_cnt * dev * dev).sum(axis=(1, 3))
    var_g = jnp.maximum((within + between) / Nf, 0.0)
    inv_g = jax.lax.rsqrt(var_g + eps)
    mean_c = jnp.repeat(mean_g, cpg, axis=1)                          # (B, C)
    inv_c = jnp.repeat(inv_g, cpg, axis=1)
    gam = gamma.reshape(1, C)
    scale_c = inv_c * gam                                             # (B, C)
    shift_c = beta.reshape(1, C) - mean_c * scale_c                   # (B, C)

    # Stage 2: lane-dense flattened view when C divides 128 (unmasked 128-lane
    # loads/stores); otherwise fall back to the per-pixel (TP, C) layout.
    rep = 128 // C if (C <= 128 and 128 % C == 0) else 0
    lane_dense = (rep > 0 and (tile_p * C) % 128 == 0
                  and (n_t == 1 or (tile_p * C) % 1024 == 0))
    if lane_dense:
        R = (P * C) // 128
        tile_r = (tile_p * C) // 128
        x2 = x.reshape(B, R, 128)
        m2 = mamba_out.reshape(B, R, 128)
        scale_in = jnp.tile(scale_c, (1, rep)).reshape(B, 1, 128)
        shift_in = jnp.tile(shift_c, (1, rep)).reshape(B, 1, 128)
        blk, vblk = (1, tile_r, 128), (1, 1, 128)
    else:
        x2, m2 = x, mamba_out
        scale_in = scale_c.reshape(B, 1, C)
        shift_in = shift_c.reshape(B, 1, C)
        blk, vblk = (1, tile_p, C), (1, 1, C)

    out = pl.pallas_call(
        _stage2_kernel,
        out_shape=jax.ShapeDtypeStruct(x2.shape, x_nchw.dtype),
        grid_spec=pltpu.PrefetchScalarGridSpec(
            num_scalar_prefetch=0,
            grid=(B, n_t),
            in_specs=[pl.BlockSpec(blk, lambda b, t: (b, t, 0)),
                      pl.BlockSpec(blk, lambda b, t: (b, t, 0)),
                      pl.BlockSpec(vblk, lambda b, t: (b, 0, 0)),
                      pl.BlockSpec(vblk, lambda b, t: (b, 0, 0))],
            out_specs=pl.BlockSpec(blk, lambda b, t: (b, t, 0))),
        compiler_params=pltpu.CompilerParams(
            dimension_semantics=("parallel", "parallel")),
    )(x2, m2, scale_in, shift_in)

    out = out.reshape(B, P, C)
    return jnp.transpose(out.reshape(B, H, W, C), (0, 3, 1, 2))


# --------------------------------------------------------------------------
# Parameters + pure-JAX reference (original per-token formulation).
# --------------------------------------------------------------------------
def init_params(key, channels, token_num=8, group_num=4, d_state=16,
                d_conv=4, expand=2):
    g = math.ceil(channels / token_num)              # d_model of inner Mamba
    channel_num = token_num * g
    d_inner = expand * g
    dt_rank = max(1, math.ceil(g / 16))

    ks = jax.random.split(key, 9)
    f32 = jnp.float32
    w_in = 0.2 * jax.random.normal(ks[0], (g, 2 * d_inner), f32)
    conv_w = 0.2 * jax.random.normal(ks[1], (d_conv, d_inner), f32)
    conv_b = 0.1 * jax.random.normal(ks[2], (1, d_inner), f32)
    w_xp = 0.2 * jax.random.normal(ks[3], (d_inner, dt_rank + 2 * d_state), f32)
    w_dt = 0.2 * jax.random.normal(ks[4], (dt_rank, d_inner), f32)
    b_dt = 0.1 * jax.random.normal(ks[5], (1, d_inner), f32)
    A = -jnp.broadcast_to(jnp.arange(1, d_state + 1, dtype=f32)[None, :],
                          (d_inner, d_state))
    Dv = jnp.ones((1, d_inner), f32)
    w_out = 0.2 * jax.random.normal(ks[6], (d_inner, g), f32)
    gamma = 1.0 + 0.1 * jax.random.normal(ks[7], (1, channel_num), f32)
    beta = 0.1 * jax.random.normal(ks[8], (1, channel_num), f32)
    return (w_in, conv_w, conv_b, w_xp, w_dt, b_dt, A, Dv, w_out, gamma, beta)


def _reference_forward(x_nchw, params, *, token_num, group_num, eps=1e-5):
    (w_in, conv_w, conv_b, w_xp, w_dt, b_dt, A, Dv, w_out, gamma, beta) = params
    B, C, H, W = x_nchw.shape
    g = C // token_num
    d_inner = w_in.shape[1] // 2
    d_state = A.shape[1]
    d_conv = conv_w.shape[0]
    dt_rank = w_dt.shape[0]
    P = H * W
    L = token_num
    x = jnp.transpose(x_nchw, (0, 2, 3, 1)).reshape(B * P, C)
    xs, zs = [], []
    for l in range(L):
        xz = x[:, l * g:(l + 1) * g] @ w_in
        xs.append(xz[:, :d_inner]); zs.append(xz[:, d_inner:])
    us = []
    for l in range(L):
        acc = jnp.zeros_like(xs[0]) + conv_b
        for k in range(d_conv):
            idx = l - (d_conv - 1) + k
            if idx >= 0:
                acc = acc + xs[idx] * conv_w[k:k + 1]
        us.append(acc * jax.nn.sigmoid(acc))
    h = jnp.zeros((B * P, d_inner, d_state), jnp.float32)
    cols = []
    for l in range(L):
        u = us[l]
        x_dbl = u @ w_xp
        dt = jax.nn.softplus(x_dbl[:, :dt_rank] @ w_dt + b_dt)
        Bm = x_dbl[:, dt_rank:dt_rank + d_state]
        Cm = x_dbl[:, dt_rank + d_state:]
        h = jnp.exp(dt[:, :, None] * A[None]) * h \
            + dt[:, :, None] * Bm[:, None, :] * u[:, :, None]
        y = (h * Cm[:, None, :]).sum(-1) + u * Dv
        y = y * (zs[l] * jax.nn.sigmoid(zs[l]))
        cols.append(y @ w_out)
    m = jnp.concatenate(cols, -1).reshape(B, P, C)
    cpg = C // group_num
    mg = m.reshape(B, P, group_num, cpg)
    mean = mg.mean(axis=(1, 3), keepdims=True)
    var = ((mg - mean) ** 2).mean(axis=(1, 3), keepdims=True)
    xn = ((mg - mean) / jnp.sqrt(var + eps)).reshape(B, P, C) * gamma + beta
    out = x.reshape(B, P, C) + xn * jax.nn.sigmoid(xn)
    return jnp.transpose(out.reshape(B, H, W, C), (0, 3, 1, 2))


if __name__ == "__main__":
    key = jax.random.PRNGKey(0)
    k_x, k_p = jax.random.split(key)

    B, C, H, W = 2, 32, 16, 16        # channels multiple of token_num (no pad)
    token_num, group_num = 8, 4

    x = jax.random.normal(k_x, (B, C, H, W), jnp.float32)
    params = init_params(k_p, C, token_num=token_num, group_num=group_num)

    with jax.default_matmul_precision("float32"):
        ref = _reference_forward(x, params, token_num=token_num,
                                 group_num=group_num)

    # Strict check: full-f32 path. tile_p=128 -> 2 pixel tiles per sample,
    # exercising the per-tile GroupNorm partial-stats reduction.
    out_f32 = spe_mamba_forward(x, params, token_num=token_num,
                                group_num=group_num, tile_p=128,
                                mxu_dtype=jnp.float32)
    out_f32 = jax.block_until_ready(out_f32)
    assert out_f32.shape == (B, C, H, W) and out_f32.dtype == jnp.float32
    err = float(jnp.max(jnp.abs(out_f32 - ref)))
    assert err < 1e-2, f"f32 path max abs diff vs reference: {err}"

    # Performance default: bf16 MXU operands + bf16 inter-stage tensor.
    # GroupNorm divides by a tiny group-std at this random init (~0.01), which
    # amplifies bf16 rounding ~80x in the normalized output, so this path uses
    # a looser max-abs tolerance (mean error stays small).
    out_bf16 = spe_mamba_forward(x, params, token_num=token_num,
                                 group_num=group_num, tile_p=128)
    out_bf16 = jax.block_until_ready(out_bf16)
    assert out_bf16.shape == (B, C, H, W) and out_bf16.dtype == jnp.float32
    err_max = float(jnp.max(jnp.abs(out_bf16 - ref)))
    err_mean = float(jnp.mean(jnp.abs(out_bf16 - ref)))
    assert err_max < 1.5e-1, f"bf16 path max abs diff vs reference: {err_max}"
    assert err_mean < 2e-2, f"bf16 path mean abs diff vs reference: {err_mean}"
    print("KERNEL_OK")
</pallas_src>

<mosaic_0001>
module attributes {stable_mosaic.version = 11 : i64} {
  func.func @_stage1_kernel(%arg0: i32, %arg1: i32, %arg2: memref<1x128x32xf32, #tpu.memory_space<vmem>>, %arg3: memref<32x128xf32, #tpu.memory_space<vmem>>, %arg4: memref<1x128xf32, #tpu.memory_space<vmem>>, %arg5: memref<64x4096xf32, #tpu.memory_space<vmem>>, %arg6: memref<1x128xf32, #tpu.memory_space<vmem>>, %arg7: memref<1x128xf32, #tpu.memory_space<vmem>>, %arg8: memref<1024x64xf32, #tpu.memory_space<vmem>>, %arg9: memref<1x64xf32, #tpu.memory_space<vmem>>, %arg10: memref<64x32xf32, #tpu.memory_space<vmem>>, %arg11: memref<1x128x32xf32, #tpu.memory_space<vmem>>, %arg12: memref<1x1x2x32xf32, #tpu.memory_space<vmem>>, %arg13: memref<128x1024xf32, #tpu.memory_space<vmem>>) attributes {dimension_semantics = [#tpu.dimension_semantics<parallel>, #tpu.dimension_semantics<parallel>], iteration_bounds = array<i64: 2, 2>, scalar_prefetch = 0 : i64, scratch_operands = 1 : i64, tpu.core_type = #tpu.core_type<tc>, window_params = [{transform_indices = @transform_0, window_bounds = array<i64: 1, 128, 32>}, {pipeline_mode = #tpu.pipeline_mode<synchronous>, transform_indices = @transform_1, window_bounds = array<i64: 32, 128>}, {pipeline_mode = #tpu.pipeline_mode<synchronous>, transform_indices = @transform_2, window_bounds = array<i64: 1, 128>}, {pipeline_mode = #tpu.pipeline_mode<synchronous>, transform_indices = @transform_3, window_bounds = array<i64: 64, 4096>}, {pipeline_mode = #tpu.pipeline_mode<synchronous>, transform_indices = @transform_4, window_bounds = array<i64: 1, 128>}, {pipeline_mode = #tpu.pipeline_mode<synchronous>, transform_indices = @transform_5, window_bounds = array<i64: 1, 128>}, {pipeline_mode = #tpu.pipeline_mode<synchronous>, transform_indices = @transform_6, window_bounds = array<i64: 1024, 64>}, {pipeline_mode = #tpu.pipeline_mode<synchronous>, transform_indices = @transform_7, window_bounds = array<i64: 1, 64>}, {pipeline_mode = #tpu.pipeline_mode<synchronous>, transform_indices = @transform_8, window_bounds = array<i64: 64, 32>}, {transform_indices = @transform_9, window_bounds = array<i64: 1, 128, 32>}, {transform_indices = @transform_10, window_bounds = array<i64: 1, 1, 2, 32>}]} {
    %c0 = arith.constant 0 : index
    %c0_0 = arith.constant 0 : index
    %c0_1 = arith.constant 0 : index
    %0 = vector.load %arg2[%c0, %c0_0, %c0_1] : memref<1x128x32xf32, #tpu.memory_space<vmem>>, vector<1x128x32xf32>
    %1 = vector.shape_cast %0 : vector<1x128x32xf32> to vector<128x32xf32>
    %c0_2 = arith.constant 0 : index
    %c0_3 = arith.constant 0 : index
    %2 = vector.load %arg3[%c0_2, %c0_3] : memref<32x128xf32, #tpu.memory_space<vmem>>, vector<32x128xf32>
    %cst = arith.constant dense<0.000000e+00> : vector<128x128xf32>
    %3 = tpu.matmul %1, %2, %cst {dimension_numbers = #tpu.dot_dimension_numbers<[1], [0], [0], [1], [0, 0, 1, 1], [], []>} : vector<128x32xf32>, vector<32x128xf32>, vector<128x128xf32> -> vector<128x128xf32>
    %c0_4 = arith.constant 0 : index
    %c0_5 = arith.constant 0 : index
    %4 = vector.load %arg4[%c0_4, %c0_5] : memref<1x128xf32, #tpu.memory_space<vmem>>, vector<1x128xf32>
    %5 = vector.broadcast %4 : vector<1x128xf32> to vector<128x128xf32>
    %6 = arith.addf %3, %5 : vector<128x128xf32>
    %7 = vector.extract_strided_slice %6 {offsets = [0, 0], sizes = [128, 64], strides = [1, 1]} : vector<128x128xf32> to vector<128x64xf32>
    %8 = arith.negf %7 : vector<128x64xf32>
    %9 = math.exp %8 : vector<128x64xf32>
    %cst_6 = arith.constant 1.000000e+00 : f32
    %10 = vector.broadcast %cst_6 : f32 to vector<128x64xf32>
    %11 = arith.addf %10, %9 : vector<128x64xf32>
    %12 = arith.divf %10, %11 : vector<128x64xf32>
    %13 = arith.mulf %7, %12 : vector<128x64xf32>
    %14 = vector.extract_strided_slice %6 {offsets = [0, 64], sizes = [128, 64], strides = [1, 1]} : vector<128x128xf32> to vector<128x64xf32>
    %c0_7 = arith.constant 0 : index
    %c0_8 = arith.constant 0 : index
    %15 = vector.load %arg5[%c0_7, %c0_8] : memref<64x4096xf32, #tpu.memory_space<vmem>>, vector<64x4096xf32>
    %cst_9 = arith.constant dense<0.000000e+00> : vector<128x4096xf32>
    %16 = tpu.matmul %13, %15, %cst_9 {dimension_numbers = #tpu.dot_dimension_numbers<[1], [0], [0], [1], [0, 0, 1, 1], [], []>} : vector<128x64xf32>, vector<64x4096xf32>, vector<128x4096xf32> -> vector<128x4096xf32>
    %c0_10 = arith.constant 0 : index
    %c0_11 = arith.constant 0 : index
    %17 = vector.load %arg7[%c0_10, %c0_11] : memref<1x128xf32, #tpu.memory_space<vmem>>, vector<1x128xf32>
    %c0_12 = arith.constant 0 : index
    %c0_13 = arith.constant 0 : index
    %18 = vector.load %arg6[%c0_12, %c0_13] : memref<1x128xf32, #tpu.memory_space<vmem>>, vector<1x128xf32>
    %cst_14 = arith.constant 0.000000e+00 : f32
    %19 = vector.broadcast %cst_14 : f32 to vector<128x128xf32>
    %20 = vector.extract_strided_slice %16 {offsets = [0, 0], sizes = [128, 128], strides = [1, 1]} : vector<128x4096xf32> to vector<128x128xf32>
    %21 = vector.extract_strided_slice %16 {offsets = [0, 1024], sizes = [128, 128], strides = [1, 1]} : vector<128x4096xf32> to vector<128x128xf32>
    %22 = vector.extract_strided_slice %16 {offsets = [0, 2048], sizes = [128, 128], strides = [1, 1]} : vector<128x4096xf32> to vector<128x128xf32>
    %23 = vector.broadcast %18 : vector<1x128xf32> to vector<128x128xf32>
    %24 = arith.addf %22, %23 : vector<128x128xf32>
    %cst_15 = arith.constant 2.000000e+01 : f32
    %25 = vector.broadcast %cst_15 : f32 to vector<128x128xf32>
    %26 = arith.cmpf ogt, %24, %25 : vector<128x128xf32>
    %cst_16 = arith.constant 2.000000e+01 : f32
    %27 = vector.broadcast %cst_16 : f32 to vector<128x128xf32>
    %28 = arith.minimumf %24, %27 : vector<128x128xf32>
    %29 = math.exp %28 : vector<128x128xf32>
    %30 = math.log1p %29 : vector<128x128xf32>
    %31 = arith.select %26, %24, %30 : vector<128x128xi1>, vector<128x128xf32>
    %32 = vector.extract_strided_slice %16 {offsets = [0, 3072], sizes = [128, 128], strides = [1, 1]} : vector<128x4096xf32> to vector<128x128xf32>
    %33 = vector.broadcast %17 : vector<1x128xf32> to vector<128x128xf32>
    %34 = arith.mulf %31, %33 : vector<128x128xf32>
    %35 = math.exp %34 : vector<128x128xf32>
    %36 = arith.mulf %35, %19 : vector<128x128xf32>
    %37 = arith.mulf %31, %20 : vector<128x128xf32>
    %38 = arith.mulf %37, %32 : vector<128x128xf32>
    %39 = arith.addf %36, %38 : vector<128x128xf32>
    %40 = arith.mulf %39, %21 : vector<128x128xf32>
    %c0_17 = arith.constant 0 : index
    %c0_18 = arith.constant 0 : index
    %41 = vector.load %arg13[%c0_17, %c0_18] : memref<128x1024xf32, #tpu.memory_space<vmem>>, vector<128x128xf32>
    tpu.vector_store %arg13[%c0_17, %c0_18], %40 {strides = array<i32>} : memref<128x1024xf32, #tpu.memory_space<vmem>>, vector<128x128xf32>,
    %42 = vector.extract_strided_slice %16 {offsets = [0, 128], sizes = [128, 128], strides = [1, 1]} : vector<128x4096xf32> to vector<128x128xf32>
    %43 = vector.extract_strided_slice %16 {offsets = [0, 1152], sizes = [128, 128], strides = [1, 1]} : vector<128x4096xf32> to vector<128x128xf32>
    %44 = vector.extract_strided_slice %16 {offsets = [0, 2176], sizes = [128, 128], strides = [1, 1]} : vector<128x4096xf32> to vector<128x128xf32>
    %45 = vector.broadcast %18 : vector<1x128xf32> to vector<128x128xf32>
    %46 = arith.addf %44, %45 : vector<128x128xf32>
    %cst_19 = arith.constant 2.000000e+01 : f32
    %47 = vector.broadcast %cst_19 : f32 to vector<128x128xf32>
    %48 = arith.cmpf ogt, %46, %47 : vector<128x128xf32>
    %cst_20 = arith.constant 2.000000e+01 : f32
    %49 = vector.broadcast %cst_20 : f32 to vector<128x128xf32>
    %50 = arith.minimumf %46, %49 : vector<128x128xf32>
    %51 = math.exp %50 : vector<128x128xf32>
    %52 = math.log1p %51 : vector<128x128xf32>
    %53 = arith.select %48, %46, %52 : vector<128x128xi1>, vector<128x128xf32>
    %54 = vector.extract_strided_slice %16 {offsets = [0, 3200], sizes = [128, 128], strides = [1, 1]} : vector<128x4096xf32> to vector<128x128xf32>
    %55 = vector.broadcast %17 : vector<1x128xf32> to vector<128x128xf32>
    %56 = arith.mulf %53, %55 : vector<128x128xf32>
    %57 = math.exp %56 : vector<128x128xf32>
    %58 = arith.mulf %57, %39 : vector<128x128xf32>
    %59 = arith.mulf %53, %42 : vector<128x128xf32>
    %60 = arith.mulf %59, %54 : vector<128x128xf32>
    %61 = arith.addf %58, %60 : vector<128x128xf32>
    %62 = arith.mulf %61, %43 : vector<128x128xf32>
    %c0_21 = arith.constant 0 : index
    %c128 = arith.constant 128 : index
    %63 = vector.load %arg13[%c0_21, %c128] : memref<128x1024xf32, #tpu.memory_space<vmem>>, vector<128x128xf32>
    tpu.vector_store %arg13[%c0_21, %c128], %62 {strides = array<i32>} : memref<128x1024xf32, #tpu.memory_space<vmem>>, vector<128x128xf32>,
    %64 = vector.extract_strided_slice %16 {offsets = [0, 256], sizes = [128, 128], strides = [1, 1]} : vector<128x4096xf32> to vector<128x128xf32>
    %65 = vector.extract_strided_slice %16 {offsets = [0, 1280], sizes = [128, 128], strides = [1, 1]} : vector<128x4096xf32> to vector<128x128xf32>
    %66 = vector.extract_strided_slice %16 {offsets = [0, 2304], sizes = [128, 128], strides = [1, 1]} : vector<128x4096xf32> to vector<128x128xf32>
    %67 = vector.broadcast %18 : vector<1x128xf32> to vector<128x128xf32>
    %68 = arith.addf %66, %67 : vector<128x128xf32>
    %cst_22 = arith.constant 2.000000e+01 : f32
    %69 = vector.broadcast %cst_22 : f32 to vector<128x128xf32>
    %70 = arith.cmpf ogt, %68, %69 : vector<128x128xf32>
    %cst_23 = arith.constant 2.000000e+01 : f32
    %71 = vector.broadcast %cst_23 : f32 to vector<128x128xf32>
    %72 = arith.minimumf %68, %71 : vector<128x128xf32>
    %73 = math.exp %72 : vector<128x128xf32>
    %74 = math.log1p %73 : vector<128x128xf32>
    %75 = arith.select %70, %68, %74 : vector<128x128xi1>, vector<128x128xf32>
    %76 = vector.extract_strided_slice %16 {offsets = [0, 3328], sizes = [128, 128], strides = [1, 1]} : vector<128x4096xf32> to vector<128x128xf32>
    %77 = vector.broadcast %17 : vector<1x128xf32> to vector<128x128xf32>
    %78 = arith.mulf %75, %77 : vector<128x128xf32>
    %79 = math.exp %78 : vector<128x128xf32>
    %80 = arith.mulf %79, %61 : vector<128x128xf32>
    %81 = arith.mulf %75, %64 : vector<128x128xf32>
    %82 = arith.mulf %81, %76 : vector<128x128xf32>
    %83 = arith.addf %80, %82 : vector<128x128xf32>
    %84 = arith.mulf %83, %65 : vector<128x128xf32>
    %c0_24 = arith.constant 0 : index
    %c256 = arith.constant 256 : index
    %85 = vector.load %arg13[%c0_24, %c256] : memref<128x1024xf32, #tpu.memory_space<vmem>>, vector<128x128xf32>
    tpu.vector_store %arg13[%c0_24, %c256], %84 {strides = array<i32>} : memref<128x1024xf32, #tpu.memory_space<vmem>>, vector<128x128xf32>,
    %86 = vector.extract_strided_slice %16 {offsets = [0, 384], sizes = [128, 128], strides = [1, 1]} : vector<128x4096xf32> to vector<128x128xf32>
    %87 = vector.extract_strided_slice %16 {offsets = [0, 1408], sizes = [128, 128], strides = [1, 1]} : vector<128x4096xf32> to vector<128x128xf32>
    %88 = vector.extract_strided_slice %16 {offsets = [0, 2432], sizes = [128, 128], strides = [1, 1]} : vector<128x4096xf32> to vector<128x128xf32>
    %89 = vector.broadcast %18 : vector<1x128xf32> to vector<128x128xf32>
    %90 = arith.addf %88, %89 : vector<128x128xf32>
    %cst_25 = arith.constant 2.000000e+01 : f32
    %91 = vector.broadcast %cst_25 : f32 to vector<128x128xf32>
    %92 = arith.cmpf ogt, %90, %91 : vector<128x128xf32>
    %cst_26 = arith.constant 2.000000e+01 : f32
    %93 = vector.broadcast %cst_26 : f32 to vector<128x128xf32>
    %94 = arith.minimumf %90, %93 : vector<128x128xf32>
    %95 = math.exp %94 : vector<128x128xf32>
    %96 = math.log1p %95 : vector<128x128xf32>
    %97 = arith.select %92, %90, %96 : vector<128x128xi1>, vector<128x128xf32>
    %98 = vector.extract_strided_slice %16 {offsets = [0, 3456], sizes = [128, 128], strides = [1, 1]} : vector<128x4096xf32> to vector<128x128xf32>
    %99 = vector.broadcast %17 : vector<1x128xf32> to vector<128x128xf32>
    %100 = arith.mulf %97, %99 : vector<128x128xf32>
    %101 = math.exp %100 : vector<128x128xf32>
    %102 = arith.mulf %101, %83 : vector<128x128xf32>
    %103 = arith.mulf %97, %86 : vector<128x128xf32>
    %104 = arith.mulf %103, %98 : vector<128x128xf32>
    %105 = arith.addf %102, %104 : vector<128x128xf32>
    %106 = arith.mulf %105, %87 : vector<128x128xf32>
    %c0_27 = arith.constant 0 : index
    %c384 = arith.constant 384 : index
    %107 = vector.load %arg13[%c0_27, %c384] : memref<128x1024xf32, #tpu.memory_space<vmem>>, vector<128x128xf32>
    tpu.vector_store %arg13[%c0_27, %c384], %106 {strides = array<i32>} : memref<128x1024xf32, #tpu.memory_space<vmem>>, vector<128x128xf32>,
    %108 = vector.extract_strided_slice %16 {offsets = [0, 512], sizes = [128, 128], strides = [1, 1]} : vector<128x4096xf32> to vector<128x128xf32>
    %109 = vector.extract_strided_slice %16 {offsets = [0, 1536], sizes = [128, 128], strides = [1, 1]} : vector<128x4096xf32> to vector<128x128xf32>
    %110 = vector.extract_strided_slice %16 {offsets = [0, 2560], sizes = [128, 128], strides = [1, 1]} : vector<128x4096xf32> to vector<128x128xf32>
    %111 = vector.broadcast %18 : vector<1x128xf32> to vector<128x128xf32>
    %112 = arith.addf %110, %111 : vector<128x128xf32>
    %cst_28 = arith.constant 2.000000e+01 : f32
    %113 = vector.broadcast %cst_28 : f32 to vector<128x128xf32>
    %114 = arith.cmpf ogt, %112, %113 : vector<128x128xf32>
    %cst_29 = arith.constant 2.000000e+01 : f32
    %115 = vector.broadcast %cst_29 : f32 to vector<128x128xf32>
    %116 = arith.minimumf %112, %115 : vector<128x128xf32>
    %117 = math.exp %116 : vector<128x128xf32>
    %118 = math.log1p %117 : vector<128x128xf32>
    %119 = arith.select %114, %112, %118 : vector<128x128xi1>, vector<128x128xf32>
    %120 = vector.extract_strided_slice %16 {offsets = [0, 3584], sizes = [128, 128], strides = [1, 1]} : vector<128x4096xf32> to vector<128x128xf32>
    %121 = vector.broadcast %17 : vector<1x128xf32> to vector<128x128xf32>
    %122 = arith.mulf %119, %121 : vector<128x128xf32>
    %123 = math.exp %122 : vector<128x128xf32>
    %124 = arith.mulf %123, %105 : vector<128x128xf32>
    %125 = arith.mulf %119, %108 : vector<128x128xf32>
    %126 = arith.mulf %125, %120 : vector<128x128xf32>
    %127 = arith.addf %124, %126 : vector<128x128xf32>
    %128 = arith.mulf %127, %109 : vector<128x128xf32>
    %c0_30 = arith.constant 0 : index
    %c512 = arith.constant 512 : index
    %129 = vector.load %arg13[%c0_30, %c512] : memref<128x1024xf32, #tpu.memory_space<vmem>>, vector<128x128xf32>
    tpu.vector_store %arg13[%c0_30, %c512], %128 {strides = array<i32>} : memref<128x1024xf32, #tpu.memory_space<vmem>>, vector<128x128xf32>,
    %130 = vector.extract_strided_slice %16 {offsets = [0, 640], sizes = [128, 128], strides = [1, 1]} : vector<128x4096xf32> to vector<128x128xf32>
    %131 = vector.extract_strided_slice %16 {offsets = [0, 1664], sizes = [128, 128], strides = [1, 1]} : vector<128x4096xf32> to vector<128x128xf32>
    %132 = vector.extract_strided_slice %16 {offsets = [0, 2688], sizes = [128, 128], strides = [1, 1]} : vector<128x4096xf32> to vector<128x128xf32>
    %133 = vector.broadcast %18 : vector<1x128xf32> to vector<128x128xf32>
    %134 = arith.addf %132, %133 : vector<128x128xf32>
    %cst_31 = arith.constant 2.000000e+01 : f32
    %135 = vector.broadcast %cst_31 : f32 to vector<128x128xf32>
    %136 = arith.cmpf ogt, %134, %135 : vector<128x128xf32>
    %cst_32 = arith.constant 2.000000e+01 : f32
    %137 = vector.broadcast %cst_32 : f32 to vector<128x128xf32>
    %138 = arith.minimumf %134, %137 : vector<128x128xf32>
    %139 = math.exp %138 : vector<128x128xf32>
    %140 = math.log1p %139 : vector<128x128xf32>
    %141 = arith.select %136, %134, %140 : vector<128x128xi1>, vector<128x128xf32>
    %142 = vector.extract_strided_slice %16 {offsets = [0, 3712], sizes = [128, 128], strides = [1, 1]} : vector<128x4096xf32> to vector<128x128xf32>
    %143 = vector.broadcast %17 : vector<1x128xf32> to vector<128x128xf32>
    %144 = arith.mulf %141, %143 : vector<128x128xf32>
    %145 = math.exp %144 : vector<128x128xf32>
    %146 = arith.mulf %145, %127 : vector<128x128xf32>
    %147 = arith.mulf %141, %130 : vector<128x128xf32>
    %148 = arith.mulf %147, %142 : vector<128x128xf32>
    %149 = arith.addf %146, %148 : vector<128x128xf32>
    %150 = arith.mulf %149, %131 : vector<128x128xf32>
    %c0_33 = arith.constant 0 : index
    %c640 = arith.constant 640 : index
    %151 = vector.load %arg13[%c0_33, %c640] : memref<128x1024xf32, #tpu.memory_space<vmem>>, vector<128x128xf32>
    tpu.vector_store %arg13[%c0_33, %c640], %150 {strides = array<i32>} : memref<128x1024xf32, #tpu.memory_space<vmem>>, vector<128x128xf32>,
    %152 = vector.extract_strided_slice %16 {offsets = [0, 768], sizes = [128, 128], strides = [1, 1]} : vector<128x4096xf32> to vector<128x128xf32>
    %153 = vector.extract_strided_slice %16 {offsets = [0, 1792], sizes = [128, 128], strides = [1, 1]} : vector<128x4096xf32> to vector<128x128xf32>
    %154 = vector.extract_strided_slice %16 {offsets = [0, 2816], sizes = [128, 128], strides = [1, 1]} : vector<128x4096xf32> to vector<128x128xf32>
    %155 = vector.broadcast %18 : vector<1x128xf32> to vector<128x128xf32>
    %156 = arith.addf %154, %155 : vector<128x128xf32>
    %cst_34 = arith.constant 2.000000e+01 : f32
    %157 = vector.broadcast %cst_34 : f32 to vector<128x128xf32>
    %158 = arith.cmpf ogt, %156, %157 : vector<128x128xf32>
    %cst_35 = arith.constant 2.000000e+01 : f32
    %159 = vector.broadcast %cst_35 : f32 to vector<128x128xf32>
    %160 = arith.minimumf %156, %159 : vector<128x128xf32>
    %161 = math.exp %160 : vector<128x128xf32>
    %162 = math.log1p %161 : vector<128x128xf32>
    %163 = arith.select %158, %156, %162 : vector<128x128xi1>, vector<128x128xf32>
    %164 = vector.extract_strided_slice %16 {offsets = [0, 3840], sizes = [128, 128], strides = [1, 1]} : vector<128x4096xf32> to vector<128x128xf32>
    %165 = vector.broadcast %17 : vector<1x128xf32> to vector<128x128xf32>
    %166 = arith.mulf %163, %165 : vector<128x128xf32>
    %167 = math.exp %166 : vector<128x128xf32>
    %168 = arith.mulf %167, %149 : vector<128x128xf32>
    %169 = arith.mulf %163, %152 : vector<128x128xf32>
    %170 = arith.mulf %169, %164 : vector<128x128xf32>
    %171 = arith.addf %168, %170 : vector<128x128xf32>
    %172 = arith.mulf %171, %153 : vector<128x128xf32>
    %c0_36 = arith.constant 0 : index
    %c768 = arith.constant 768 : index
    %173 = vector.load %arg13[%c0_36, %c768] : memref<128x1024xf32, #tpu.memory_space<vmem>>, vector<128x128xf32>
    tpu.vector_store %arg13[%c0_36, %c768], %172 {strides = array<i32>} : memref<128x1024xf32, #tpu.memory_space<vmem>>, vector<128x128xf32>,
    %174 = vector.extract_strided_slice %16 {offsets = [0, 896], sizes = [128, 128], strides = [1, 1]} : vector<128x4096xf32> to vector<128x128xf32>
    %175 = vector.extract_strided_slice %16 {offsets = [0, 1920], sizes = [128, 128], strides = [1, 1]} : vector<128x4096xf32> to vector<128x128xf32>
    %176 = vector.extract_strided_slice %16 {offsets = [0, 2944], sizes = [128, 128], strides = [1, 1]} : vector<128x4096xf32> to vector<128x128xf32>
    %177 = vector.broadcast %18 : vector<1x128xf32> to vector<128x128xf32>
    %178 = arith.addf %176, %177 : vector<128x128xf32>
    %cst_37 = arith.constant 2.000000e+01 : f32
    %179 = vector.broadcast %cst_37 : f32 to vector<128x128xf32>
    %180 = arith.cmpf ogt, %178, %179 : vector<128x128xf32>
    %cst_38 = arith.constant 2.000000e+01 : f32
    %181 = vector.broadcast %cst_38 : f32 to vector<128x128xf32>
    %182 = arith.minimumf %178, %181 : vector<128x128xf32>
    %183 = math.exp %182 : vector<128x128xf32>
    %184 = math.log1p %183 : vector<128x128xf32>
    %185 = arith.select %180, %178, %184 : vector<128x128xi1>, vector<128x128xf32>
    %186 = vector.extract_strided_slice %16 {offsets = [0, 3968], sizes = [128, 128], strides = [1, 1]} : vector<128x4096xf32> to vector<128x128xf32>
    %187 = vector.broadcast %17 : vector<1x128xf32> to vector<128x128xf32>
    %188 = arith.mulf %185, %187 : vector<128x128xf32>
    %189 = math.exp %188 : vector<128x128xf32>
    %190 = arith.mulf %189, %171 : vector<128x128xf32>
    %191 = arith.mulf %185, %174 : vector<128x128xf32>
    %192 = arith.mulf %191, %186 : vector<128x128xf32>
    %193 = arith.addf %190, %192 : vector<128x128xf32>
    %194 = arith.mulf %193, %175 : vector<128x128xf32>
    %c0_39 = arith.constant 0 : index
    %c896 = arith.constant 896 : index
    %195 = vector.load %arg13[%c0_39, %c896] : memref<128x1024xf32, #tpu.memory_space<vmem>>, vector<128x128xf32>
    tpu.vector_store %arg13[%c0_39, %c896], %194 {strides = array<i32>} : memref<128x1024xf32, #tpu.memory_space<vmem>>, vector<128x128xf32>,
    %c0_40 = arith.constant 0 : index
    %c0_41 = arith.constant 0 : index
    %196 = vector.load %arg13[%c0_40, %c0_41] : memref<128x1024xf32, #tpu.memory_space<vmem>>, vector<128x1024xf32>
    %c0_42 = arith.constant 0 : index
    %c0_43 = arith.constant 0 : index
    %197 = vector.load %arg8[%c0_42, %c0_43] : memref<1024x64xf32, #tpu.memory_space<vmem>>, vector<1024x64xf32>
    %cst_44 = arith.constant dense<0.000000e+00> : vector<128x64xf32>
    %198 = tpu.matmul %196, %197, %cst_44 {dimension_numbers = #tpu.dot_dimension_numbers<[1], [0], [0], [1], [0, 0, 1, 1], [], []>} : vector<128x1024xf32>, vector<1024x64xf32>, vector<128x64xf32> -> vector<128x64xf32>
    %c0_45 = arith.constant 0 : index
    %c0_46 = arith.constant 0 : index
    %199 = vector.load %arg9[%c0_45, %c0_46] : memref<1x64xf32, #tpu.memory_space<vmem>>, vector<1x64xf32>
    %200 = vector.broadcast %199 : vector<1x64xf32> to vector<128x64xf32>
    %201 = arith.mulf %13, %200 : vector<128x64xf32>
    %202 = arith.addf %198, %201 : vector<128x64xf32>
    %203 = arith.negf %14 : vector<128x64xf32>
    %204 = math.exp %203 : vector<128x64xf32>
    %cst_47 = arith.constant 1.000000e+00 : f32
    %205 = vector.broadcast %cst_47 : f32 to vector<128x64xf32>
    %206 = arith.addf %205, %204 : vector<128x64xf32>
    %207 = arith.divf %205, %206 : vector<128x64xf32>
    %208 = arith.mulf %14, %207 : vector<128x64xf32>
    %209 = arith.mulf %202, %208 : vector<128x64xf32>
    %c0_48 = arith.constant 0 : index
    %c0_49 = arith.constant 0 : index
    %210 = vector.load %arg10[%c0_48, %c0_49] : memref<64x32xf32, #tpu.memory_space<vmem>>, vector<64x32xf32>
    %cst_50 = arith.constant dense<0.000000e+00> : vector<128x32xf32>
    %211 = tpu.matmul %209, %210, %cst_50 {dimension_numbers = #tpu.dot_dimension_numbers<[1], [0], [0], [1], [0, 0, 1, 1], [], []>} : vector<128x64xf32>, vector<64x32xf32>, vector<128x32xf32> -> vector<128x32xf32>
    %c0_51 = arith.constant 0 : index
    %c0_52 = arith.constant 0 : index
    %c0_53 = arith.constant 0 : index
    %212 = vector.load %arg11[%c0_51, %c0_52, %c0_53] : memref<1x128x32xf32, #tpu.memory_space<vmem>>, vector<1x128x32xf32>
    %213 = vector.shape_cast %212 : vector<1x128x32xf32> to vector<128x32xf32>
    %214 = vector.shape_cast %211 : vector<128x32xf32> to vector<1x128x32xf32>
    tpu.vector_store %arg11[%c0_51, %c0_52, %c0_53], %214 {strides = array<i32>} : memref<1x128x32xf32, #tpu.memory_space<vmem>>, vector<1x128x32xf32>,
    %cst_54 = arith.constant dense<0.000000e+00> : vector<32xf32>
    %215 = vector.multi_reduction <add>, %211, %cst_54 [0] : vector<128x32xf32> to vector<32xf32>
    %216 = vector.shape_cast %215 : vector<32xf32> to vector<1x32xf32>
    %cst_55 = arith.constant 7.812500e-03 : f32
    %217 = vector.broadcast %cst_55 : f32 to vector<1x32xf32>
    %218 = arith.mulf %216, %217 : vector<1x32xf32>
    %219 = vector.broadcast %218 : vector<1x32xf32> to vector<128x32xf32>
    %220 = arith.subf %211, %219 : vector<128x32xf32>
    %221 = arith.mulf %220, %220 : vector<128x32xf32>
    %cst_56 = arith.constant dense<0.000000e+00> : vector<32xf32>
    %222 = vector.multi_reduction <add>, %221, %cst_56 [0] : vector<128x32xf32> to vector<32xf32>
    %223 = vector.shape_cast %222 : vector<32xf32> to vector<1x32xf32>
    %224 = tpu.concatenate %216, %223 in 0 : vector<1x32xf32>, vector<1x32xf32> -> vector<2x32xf32>
    %c0_57 = arith.constant 0 : index
    %c0_58 = arith.constant 0 : index
    %c0_59 = arith.constant 0 : index
    %c0_60 = arith.constant 0 : index
    %225 = vector.load %arg12[%c0_57, %c0_58, %c0_59, %c0_60] : memref<1x1x2x32xf32, #tpu.memory_space<vmem>>, vector<1x1x2x32xf32>
    %226 = vector.shape_cast %225 : vector<1x1x2x32xf32> to vector<2x32xf32>
    %227 = vector.shape_cast %224 : vector<2x32xf32> to vector<1x1x2x32xf32>
    tpu.vector_store %arg12[%c0_57, %c0_58, %c0_59, %c0_60], %227 {strides = array<i32>} : memref<1x1x2x32xf32, #tpu.memory_space<vmem>>, vector<1x1x2x32xf32>,
    return
  }
  func.func @transform_0(%arg0: i32, %arg1: i32) -> (i32, i32, i32) {
    %c0_i32 = arith.constant 0 : i32
    %c0_i32_0 = arith.constant 0 : i32
    return %arg0, %arg1, %c0_i32 : i32, i32, i32
  }
  func.func @transform_1(%arg0: i32, %arg1: i32) -> (i32, i32) {
    %c0_i32 = arith.constant 0 : i32
    %c0_i32_0 = arith.constant 0 : i32
    %c0_i32_1 = arith.constant 0 : i32
    return %c0_i32, %c0_i32_0 : i32, i32
  }
  func.func @transform_2(%arg0: i32, %arg1: i32) -> (i32, i32) {
    %c0_i32 = arith.constant 0 : i32
    %c0_i32_0 = arith.constant 0 : i32
    %c0_i32_1 = arith.constant 0 : i32
    return %c0_i32, %c0_i32_0 : i32, i32
  }
  func.func @transform_3(%arg0: i32, %arg1: i32) -> (i32, i32) {
    %c0_i32 = arith.constant 0 : i32
    %c0_i32_0 = arith.constant 0 : i32
    %c0_i32_1 = arith.constant 0 : i32
    return %c0_i32, %c0_i32_0 : i32, i32
  }
  func.func @transform_4(%arg0: i32, %arg1: i32) -> (i32, i32) {
    %c0_i32 = arith.constant 0 : i32
    %c0_i32_0 = arith.constant 0 : i32
    %c0_i32_1 = arith.constant 0 : i32
    return %c0_i32, %c0_i32_0 : i32, i32
  }
  func.func @transform_5(%arg0: i32, %arg1: i32) -> (i32, i32) {
    %c0_i32 = arith.constant 0 : i32
    %c0_i32_0 = arith.constant 0 : i32
    %c0_i32_1 = arith.constant 0 : i32
    return %c0_i32, %c0_i32_0 : i32, i32
  }
  func.func @transform_6(%arg0: i32, %arg1: i32) -> (i32, i32) {
    %c0_i32 = arith.constant 0 : i32
    %c0_i32_0 = arith.constant 0 : i32
    %c0_i32_1 = arith.constant 0 : i32
    return %c0_i32, %c0_i32_0 : i32, i32
  }
  func.func @transform_7(%arg0: i32, %arg1: i32) -> (i32, i32) {
    %c0_i32 = arith.constant 0 : i32
    %c0_i32_0 = arith.constant 0 : i32
    %c0_i32_1 = arith.constant 0 : i32
    return %c0_i32, %c0_i32_0 : i32, i32
  }
  func.func @transform_8(%arg0: i32, %arg1: i32) -> (i32, i32) {
    %c0_i32 = arith.constant 0 : i32
    %c0_i32_0 = arith.constant 0 : i32
    %c0_i32_1 = arith.constant 0 : i32
    return %c0_i32, %c0_i32_0 : i32, i32
  }
  func.func @transform_9(%arg0: i32, %arg1: i32) -> (i32, i32, i32) {
    %c0_i32 = arith.constant 0 : i32
    %c0_i32_0 = arith.constant 0 : i32
    return %arg0, %arg1, %c0_i32 : i32, i32, i32
  }
  func.func @transform_10(%arg0: i32, %arg1: i32) -> (i32, i32, i32, i32) {
    %c0_i32 = arith.constant 0 : i32
    %c0_i32_0 = arith.constant 0 : i32
    %c0_i32_1 = arith.constant 0 : i32
    return %arg0, %arg1, %c0_i32, %c0_i32_0 : i32, i32, i32, i32
  }
}

</mosaic_0001>

<bundles_post_ra>
// kernel: tpu_custom_call.1
= control target key start
LH: loop header
LB: loop body
LE: loop exit
PB: predicated region body
PF: predicated region fallthrough
CT: control target
= control target key end

     0   :  { %s17992_s0 = inlined_call_operand.vmem [shape: f32[2,256,32], index: 0, kind: input, shape index: {}]   ;;  %s17993_s1 = inlined_call_operand.vmem [shape: f32[32,128], index: 1, kind: input, shape index: {}]   ;;  %s17994_s2 = inlined_call_operand.vmem [shape: f32[1,128], index: 2, kind: input, shape index: {}]   ;;  %s17995_s3 = inlined_call_operand.vmem [shape: f32[64,4096], index: 3, kind: input, shape index: {}]   ;;  %s17996_s4 = inlined_call_operand.vmem [shape: f32[1,128], index: 4, kind: input, shape index: {}]   ;;  %s17997_s5 = inlined_call_operand.vmem [shape: f32[1,128], index: 5, kind: input, shape index: {}]   ;;  %s17998_s6 = inlined_call_operand.vmem [shape: f32[1024,64], index: 6, kind: input, shape index: {}]   ;;  %s17999_s7 = inlined_call_operand.vmem [shape: f32[1,64], index: 7, kind: input, shape index: {}]   ;;  %s18000_s8 = inlined_call_operand.vmem [shape: f32[64,32], index: 8, kind: input, shape index: {}]   ;;  %s18001_s9 = inlined_call_operand.vmem [shape: f32[2,256,32], index: 9, kind: output, shape index: {0}]   ;;  %s18002_s10 = inlined_call_operand.hbm [shape: f32[2,2,2,32], index: 10, kind: output, shape index: {1}]  }
   0x1   :  { %18414 = sst [smem:[#allocation529_spill]] %s17992_s0 }
   0x2   :  { %16 = vsyncpa [#allocation4], 0 }
   0x3   :  { %18 = vsyncpa [#allocation4 + $0x1], 0  ;;  %s10350_s13 = smov 0   ;;  %s10352_s14 = smov 0  }
   0x4   :  { %s10354_s15 = smov 0   ;;  %s10356_s16 = smov 0  }
   0x5   :  { %s10358_s17 = smov 0   ;;  %s10360_s18 = smov 0  }
   0x6   :  { %s10362_s19 = smov 0   ;;  %s10364_s20 = smov 0  }
   0x7 LB: > { %18415 = sst [smem:[#allocation6_spill]] %s10282_s18  ;;  %s8107_s21 = sadd.s32 4294967295, %s10290_s20   ;;  %s10290_s20 = sphi %s10364_s20, %s24_s20   ;;  %s10286_s19 = sphi %s10362_s19, %s19909_s19   ;;  %s10282_s18 = sphi %s10360_s18, %s19903_s18   ;;  %s10278_s17 = sphi %s10358_s17, %s19908_s17   ;;  %s10274_s16 = sphi %s10356_s16, %s19902_s16   ;;  %s10270_s15 = sphi %s10354_s15, %s19907_s15   ;;  %s10266_s14 = sphi %s10352_s14, %s19906_s14   ;;  %s10262_s13 = sphi %s10350_s13, %s19905_s13  }
   0x8   : > { %s8108_s22 = sadd.s32 4294967294, %s10290_s20   ;;  %s33_s23 = sadd.s32 1, %s10282_s18 }
   0x9   : > { %p34_p0 = scmp.ge.s32.totalorder %s33_s23, 2  ;;  %s36_s24 = sadd.s32 1, %s10286_s19 }
   0xa   : > { %p279_p1 = scmp.ne.s32.totalorder %s10270_s15, %s10266_s14  ;;  %p280_p2 = scmp.eq.s32.totalorder %s8107_s21, 3 }
   0xb   : > { %s19911_s23 = smov (%p34_p0, %s33_s23), 0  ;;  %s19913_s24 = smov (!%p34_p0, %s36_s24), %s10286_s19 }
   0xc   : > { %18416 = sst [smem:[#allocation7_spill]] %s19911_s23  ;;  %s265_s25 = ssub.s32 %s10282_s18, %s19911_s23 }
   0xd   : > { %p10401_p3 = por %p280_p2, %p279_p1  ;;  %p38_p4 = scmp.ge.s32.totalorder %s19913_s24, 2 }
   0xe   : > { %p285_p5 = scmp.ne.s32.totalorder %s10266_s14, %s10262_s13  ;;  %p286_p6 = scmp.eq.s32.totalorder %s8108_s22, 3 }
   0xf   : > { %p8111_p7 = scmp.ge.s32.totalorder %s10290_s20, 1  ;;  %s19915_s24 = smov (%p38_p4, %s19913_s24), 0 }
  0x10   : > { %18418 = sst [smem:[#allocation8_spill]] %s19915_s24  ;;  %p10410_p8 = por %p286_p6, %p285_p5 }
  0x11   : > { %p341_p9 = scmp.lt.s32.totalorder %s10290_s20, 5  ;;  %s264_s28 = ssub.s32 %s10286_s19, %s19915_s24 }
  0x12   : > { %s269_s29 = sadd.s32 1, %s10270_s15  ;;  %s266_s30 = sor.u32 %s265_s25, %s264_s28 }
  0x13   : > { %p342_p10 = pnand %p8111_p7, %p341_p9  ;;  %p267_p11 = scmp.eq.s32.totalorder %s266_s30, 0 }
  0x15   : > { %s10419_s11 = scalar_select %p267_p11, %s10270_s15, %s269_s29  }
  0x16   : > { %345 = sbr.rel (%p342_p10) target bundleno = 2076 (0x81c), region = 56 }
  0x1d   : > { %v428_v0 = vld [vmem:[%s17993_s1] sm:$0xff]  ;;  %v429_v1 = vld [vmem:[%s17993_s1 + $0x8] sm:$0xff]  ;;  %v430_v2 = vld [vmem:[%s17993_s1 + $0x10] sm:$0xff]  ;;  %s8113_s25 = sshll.u32 %s10274_s16, 4  ;;  %p393_p12 = scmp.lt.s32.totalorder %s10278_s17, 1  ;;  %vm439_vm0 = vcmask 261120  }
  0x1e   : > { %v8868_v3 = vpack.c.bf16 %v429_v1, %v428_v0  ;;  %v431_v4 = vld [vmem:[%s17993_s1 + $0x18] sm:$0xff]  ;;  %p395_p13 = scmp.lt.s32.totalorder %s8113_s25, 31  ;;  %s18420_s0 = sld [smem:[#allocation529_spill]]  ;;  %v747_v25 = vld [vmem:[%s17995_s3 + $0x10] sm:$0xff]  ;;  %v746_v28 = vld [vmem:[%s17995_s3 + $0x8] sm:$0xff]  ;;  %vm1001_vm1 = vcmask 523264  }
  0x1f   : > { %v8872_v5 = vpack.c.bf16 %v431_v4, %v430_v2  ;;  %s394_s30 = scalar_select %p393_p12, %s10278_s17, 1  ;;  %v748_v22 = vld [vmem:[%s17995_s3 + $0x18] sm:$0xff]  ;;  %v779_v26 = vld [vmem:[%s17995_s3 + $0x110] sm:$0xff]  ;;  %v778_v29 = vld [vmem:[%s17995_s3 + $0x108] sm:$0xff] }
  0x20   : > { %8869 = vmatprep.subr.bf16.mxu0 %v8868_v3  ;;  %s19917_s25 = smov (!%p395_p13, %s8113_s25), 31  ;;  %v780_v23 = vld [vmem:[%s17995_s3 + $0x118] sm:$0xff]  ;;  %v8894_v27 = vpack.c.bf16 %v779_v26, %v747_v25  ;;  %v8876_v30 = vpack.c.bf16 %v778_v29, %v746_v28  ;;  %v745_v31 = vld [vmem:[%s17995_s3] sm:$0xff]  ;;  %v810_v36 = vld [vmem:[%s17995_s3 + $0x208] sm:$0xff]  ;;  %s10293_s21 = smov 64  }
  0x21   : > { %8871 = vmatpush3.bf16.msra.mxu0 %v8868_v3  ;;  %s8114_s12 = sshll.u32 %s394_s30, 5  ;;  %v8892_v24 = vpack.c.bf16 %v780_v23, %v748_v22  ;;  %v777_v32 = vld [vmem:[%s17995_s3 + $0x100] sm:$0xff]  ;;  %v812_v34 = vld [vmem:[%s17995_s3 + $0x218] sm:$0xff]  ;;  %v811_v38 = vld [vmem:[%s17995_s3 + $0x210] sm:$0xff] }
  0x22   : > { %8873 = vmatprep.subr.bf16.mxu0 %v8872_v5  ;;  %s10436_s23 = sadd.s32 %s8114_s12, %s19917_s25  ;;  %v8878_v33 = vpack.c.bf16 %v777_v32, %v745_v31  ;;  %8877 = vmatprep.subr.bf16.mxu1 %v8876_v30  ;;  %v844_v35 = vld [vmem:[%s17995_s3 + $0x318] sm:$0xff]  ;;  %v843_v39 = vld [vmem:[%s17995_s3 + $0x310] sm:$0xff]  ;;  %v842_v40 = vld [vmem:[%s17995_s3 + $0x308] sm:$0xff] }
  0x23   : > { %s18006_s18 = sshll.u32 %s10436_s23, 3  ;;  %v8896_v37 = vpack.c.bf16 %v844_v35, %v812_v34  ;;  %v8898_v41 = vpack.c.bf16 %v843_v39, %v811_v38  ;;  %v8880_v42 = vpack.c.bf16 %v842_v40, %v810_v36  ;;  %v809_v43 = vld [vmem:[%s17995_s3 + $0x200] sm:$0xff]  ;;  %v874_v46 = vld [vmem:[%s17995_s3 + $0x408] sm:$0xff]  ;;  %v876_v48 = vld [vmem:[%s17995_s3 + $0x418] sm:$0xff]  ;;  %s19901_s29 = sshll.u32 %s10436_s23, 3 }
  0x24   : > { %s10444_s22 = scalar_lea.vmem %s18420_s0, %s18006_s18  ;;  %8879 = vmatpush1.bf16.msra.mxu1 %v8878_v33  ;;  %v841_v44 = vld [vmem:[%s17995_s3 + $0x300] sm:$0xff]  ;;  %v906_v47 = vld [vmem:[%s17995_s3 + $0x508] sm:$0xff]  ;;  %v908_v50 = vld [vmem:[%s17995_s3 + $0x518] sm:$0xff]  ;;  %s17842_s12 = scalar_lea.vmem %s18001_s9, %s19901_s29 }
  0x25   : > { %8875 = vmatpush3.bf16.msra.mxu0 %v8872_v5  ;;  %v412_v6 = vld [vmem:[%s10444_s22] sm:$0xff]  ;;  %v413_v7 = vld [vmem:[%s10444_s22 + $0x8] sm:$0xff]  ;;  %v414_v8 = vld [vmem:[%s10444_s22 + $0x10] sm:$0xff]  ;;  %v8882_v45 = vpack.c.bf16 %v841_v44, %v809_v43  ;;  %8881 = vmatprep.subr.bf16.mxu1 %v8880_v42  ;;  %v8884_v49 = vpack.c.bf16 %v906_v47, %v874_v46  ;;  %v8900_v53 = vpack.c.bf16 %v908_v50, %v876_v48  ;;  %s389_s23 = sand.u32 1, %s10266_s14   ;;  %s8428_s18 = sshll.u32 %s10278_s17, 1 }
  0x26   : > { %8804 = vmatprep.mubr.msk.f32.mxu0 %vm439_vm0, %v412_v6  ;;  %v415_v9 = vld [vmem:[%s10444_s22 + $0x18] sm:$0xff]  ;;  %v416_v10 = vld [vmem:[%s10444_s22 + $0x20] sm:$0xff]  ;;  %v417_v11 = vld [vmem:[%s10444_s22 + $0x28] sm:$0xff]  ;;  %8893 = vmatprep.subr.bf16.mxu0 %v8892_v24  ;;  %v18007_v6 = vmov 0.0   ;;  %s8112_s24 = sshll.u32 %s389_s23, 1  ;;  %s7988_s0 = sadd.s32 %s10274_s16, %s8428_s18 }
  0x27   : > { %v418_v12 = vld [vmem:[%s10444_s22 + $0x30] sm:$0xff]  ;;  %v419_v13 = vld [vmem:[%s10444_s22 + $0x38] sm:$0xff]  ;;  %v420_v14 = vld [vmem:[%s10444_s22 + $0x40] sm:$0xff]  ;;  %1114 = vmatprep.mubr.f32.mxu1 %v18007_v6  ;;  %s391_s25 = scalar_lea.vmem [#allocation3], %s8112_s24  ;;  %s7973_s16 = scalar_lea.sflag [#allocation4], %s389_s23 }
  0x28   : > { %8805 = vmatmul.mubr.msk.f32.vlgmr.msra.gmra.mrb[0].mxu0 %vm439_vm0, %v413_v7  ;;  %v421_v15 = vld [vmem:[%s10444_s22 + $0x48] sm:$0xff]  ;;  %v422_v16 = vld [vmem:[%s10444_s22 + $0x50] sm:$0xff]  ;;  %v423_v17 = vld [vmem:[%s10444_s22 + $0x58] sm:$0xff]  ;;  %8883 = vmatpush1.bf16.msra.mxu1 %v8882_v45  ;;  %s7992_s28 = sshll.u32 %s391_s25, 4  ;;  %s17940_s28 = int_to_ptr.vmem [resolvable:$true] %s7992_s28 }
  0x29   : > { %8807 = vmatprep.mubr.msk.f32.mxu0 %vm439_vm0, %v414_v8  ;;  %v424_v18 = vld [vmem:[%s10444_s22 + $0x60] sm:$0xff]  ;;  %v425_v19 = vld [vmem:[%s10444_s22 + $0x68] sm:$0xff]  ;;  %v426_v20 = vld [vmem:[%s10444_s22 + $0x70] sm:$0xff]  ;;  %8895 = vmatpush1.bf16.msra.mxu0 %v8894_v27  ;;  %s10196_s17 = scalar_lea.vmem %s17940_s28, 32 }
  0x2a   : > { %v427_v21 = vld [vmem:[%s10444_s22 + $0x78] sm:$0xff]  ;;  %8897 = vmatprep.subr.bf16.mxu0 %v8896_v37  ;;  %v873_v51 = vld [vmem:[%s17995_s3 + $0x400] sm:$0xff]  ;;  %v875_v55 = vld [vmem:[%s17995_s3 + $0x410] sm:$0xff]  ;;  %8885 = vmatprep.subr.bf16.mxu1 %v8884_v49  ;;  %s8429_s22 = sshll.u32 %s7988_s0, 5  ;;  %p10197_p0 = scmp.ne.s32.totalorder %s17940_s28, %s10196_s17 }
  0x2b   : > { %v905_v52 = vld [vmem:[%s17995_s3 + $0x500] sm:$0xff]  ;;  %v907_v56 = vld [vmem:[%s17995_s3 + $0x510] sm:$0xff]  ;;  %v938_v58 = vld [vmem:[%s17995_s3 + $0x608] sm:$0xff] }
  0x2c   : > { %8808 = vmatmul.mubr.msk.f32.gmra.mrb[2].mxu0 %vm439_vm0, %v415_v9  ;;  %v8886_v54 = vpack.c.bf16 %v905_v52, %v873_v51  ;;  %v8902_v57 = vpack.c.bf16 %v907_v56, %v875_v55  ;;  %v970_v59 = vld [vmem:[%s17995_s3 + $0x708] sm:$0xff]  ;;  %v940_v60 = vld [vmem:[%s17995_s3 + $0x618] sm:$0xff]  ;;  %v937_v62 = vld [vmem:[%s17995_s3 + $0x600] sm:$0xff]  ;;  %p10198_p1 = pnand %p10197_p0, %p10401_p3 }
  0x2d   : > { %8810 = vmatprep.mubr.msk.f32.mxu0 %vm439_vm0, %v416_v10  ;;  %8899 = vmatpush1.bf16.msra.mxu0 %v8898_v41  ;;  %v8888_v61 = vpack.c.bf16 %v970_v59, %v938_v58  ;;  %v969_v63 = vld [vmem:[%s17995_s3 + $0x700] sm:$0xff]  ;;  %v972_v0 = vld [vmem:[%s17995_s3 + $0x718] sm:$0xff]  ;;  %v939_v3 = vld [vmem:[%s17995_s3 + $0x610] sm:$0xff] }
  0x2e   : > { %8901 = vmatprep.subr.bf16.mxu0 %v8900_v53  ;;  %8887 = vmatpush1.bf16.msra.mxu1 %v8886_v54  ;;  %v8890_v1 = vpack.c.bf16 %v969_v63, %v937_v62  ;;  %v8904_v2 = vpack.c.bf16 %v972_v0, %v940_v60  ;;  %v971_v4 = vld [vmem:[%s17995_s3 + $0x710] sm:$0xff]  ;;  %v750_v7 = vld [vmem:[%s17995_s3 + $0x28] sm:$0xff]  ;;  %v752_v10 = vld [vmem:[%s17995_s3 + $0x38] sm:$0xff]  ;;  %p10199_p2 = pneg %p10198_p1 }
  0x2f   : > { %8889 = vmatprep.subr.bf16.mxu1 %v8888_v61  ;;  %v8906_v5 = vpack.c.bf16 %v971_v4, %v939_v3  ;;  %v782_v8 = vld [vmem:[%s17995_s3 + $0x128] sm:$0xff]  ;;  %v781_v3 = vld [vmem:[%s17995_s3 + $0x120] sm:$0xff] }
  0x30   : > { %8811 = vmatmul.mubr.msk.f32.gmra.mrb[4].mxu0 %vm439_vm0, %v417_v11  ;;  %v8908_v9 = vpack.c.bf16 %v782_v8, %v750_v7  ;;  %v784_v11 = vld [vmem:[%s17995_s3 + $0x138] sm:$0xff]  ;;  %v751_v7 = vld [vmem:[%s17995_s3 + $0x30] sm:$0xff] }
  0x31   : > { %8813 = vmatprep.mubr.msk.f32.mxu0 %vm439_vm0, %v418_v12  ;;  %8903 = vmatpush1.bf16.msra.mxu0 %v8902_v57  ;;  %v8924_v12 = vpack.c.bf16 %v784_v11, %v752_v10  ;;  %v783_v8 = vld [vmem:[%s17995_s3 + $0x130] sm:$0xff] }
  0x32   : > { %8905 = vmatprep.subr.bf16.mxu0 %v8904_v2  ;;  %8891 = vmatpush1.bf16.msra.mxu1 %v8890_v1  ;;  %v749_v2 = vld [vmem:[%s17995_s3 + $0x20] sm:$0xff] }
  0x33   : > { %8909 = vmatprep.subr.bf16.mxu1 %v8908_v9 }
  0x34   : > { %8814 = vmatmul.mubr.msk.f32.gmra.mrb[6].mxu0 %vm439_vm0, %v419_v13  ;;  %v10591_v13 = vld [vmem:[%s17994_s2] ss:$0 sm:$0xff] }
  0x35   : > { %8816 = vmatprep.mubr.msk.f32.mxu0 %vm439_vm0, %v420_v14  ;;  %8907 = vmatpush1.bf16.msra.mxu0 %v8906_v5 }
  0x36   : > { %8925 = vmatprep.subr.bf16.mxu0 %v8924_v12 }
  0x38   : > { %8817 = vmatmul.mubr.msk.f32.gmra.mrb[8].mxu0 %vm439_vm0, %v421_v15 }
  0x39   : > { %8819 = vmatprep.mubr.msk.f32.mxu0 %vm439_vm0, %v422_v16 }
  0x3c   : > { %8820 = vmatmul.mubr.msk.f32.gmra.mrb[10].mxu0 %vm439_vm0, %v423_v17 }
  0x3d   : > { %8822 = vmatprep.mubr.msk.f32.mxu0 %vm439_vm0, %v424_v18 }
  0x40   : > { %8823 = vmatmul.mubr.msk.f32.gmra.mrb[12].mxu0 %vm439_vm0, %v425_v19 }
  0x41   : > { %8825 = vmatprep.mubr.msk.f32.mxu0 %vm439_vm0, %v426_v20 }
  0x44   : > { %8826 = vmatmul.mubr.msk.f32.gmra.mrb[14].mxu0 %vm439_vm0, %v427_v21 }
  0x45   : > { %1275 = vmatprep.mubr.f32.mxu0 %v18007_v6 }
  0xfb   : > { %v8806_v14 = vpop.f32.mrb[0].mxu0 }
  0xfc   : > { %v10594_v15 = vadd.f32 %v8806_v14, %v10591_v13  ;;  %v554_v16 = vpop.f32.mrb[1].mxu0  ;;  %v814_v14 = vld [vmem:[%s17995_s3 + $0x228] sm:$0xff] }
  0xfd   : > { %v10597_v17 = vadd.f32 %v10591_v13, %v554_v16  ;;  %v846_v16 = vld [vmem:[%s17995_s3 + $0x328] sm:$0xff] }
  0xfe   : > { %v8137_v18 = vmul.f32 -1.442695, %v10594_v15 }
  0xff   : > { %v8136_v19 = vmul.f32 -1.442695, %v10597_v17  ;;  %v8809_v20 = vpop.f32.mrb[2].mxu0 }
 0x100   : > { %9357 = vpow2.f32 %v8137_v18  ;;  %v10602_v21 = vadd.f32 %v8809_v20, %v10591_v13  ;;  %v564_v22 = vpop.f32.mrb[3].mxu0 }
 0x101   : > { %9359 = vpow2.f32 %v8136_v19  ;;  %v10605_v23 = vadd.f32 %v10591_v13, %v564_v22  ;;  %v8910_v22 = vpack.c.bf16 %v781_v3, %v749_v2 }
 0x102   : > { %v8139_v24 = vmul.f32 -1.442695, %v10602_v21 }
 0x103   : > { %v8138_v25 = vmul.f32 -1.442695, %v10605_v23  ;;  %v8812_v26 = vpop.f32.mrb[4].mxu0 }
 0x104   : > { %9361 = vpow2.f32 %v8139_v24  ;;  %v10610_v27 = vadd.f32 %v8812_v26, %v10591_v13  ;;  %v574_v28 = vpop.f32.mrb[5].mxu0 }
 0x105   : > { %9363 = vpow2.f32 %v8138_v25  ;;  %v10613_v29 = vadd.f32 %v10591_v13, %v574_v28  ;;  %v8926_v28 = vpack.c.bf16 %v783_v8, %v751_v7 }
 0x106   : > { %v8141_v30 = vmul.f32 -1.442695, %v10610_v27 }
 0x107   : > { %v8140_v31 = vmul.f32 -1.442695, %v10613_v29  ;;  %v8815_v32 = vpop.f32.mrb[6].mxu0 }
 0x108   : > { %9365 = vpow2.f32 %v8141_v30  ;;  %v10618_v33 = vadd.f32 %v8815_v32, %v10591_v13  ;;  %v584_v34 = vpop.f32.mrb[7].mxu0 }
 0x109   : > { %9367 = vpow2.f32 %v8140_v31  ;;  %v10621_v35 = vadd.f32 %v10591_v13, %v584_v34  ;;  %v8912_v34 = vpack.c.bf16 %v846_v16, %v814_v14 }
 0x10a   : > { %v9358_v36 = vpop.eup %9357  ;;  %v8143_v37 = vmul.f32 -1.442695, %v10618_v33 }
 0x10b   : > { %v9360_v38 = vpop.eup %9359  ;;  %v682_v39 = vadd.f32 1.0, %v9358_v36  ;;  %v8142_v40 = vmul.f32 -1.442695, %v10621_v35  ;;  %v8818_v41 = vpop.f32.mrb[8].mxu0  ;;  %v813_v36 = vld [vmem:[%s17995_s3 + $0x220] sm:$0xff] }
 0x10c   : > { %v681_v42 = vadd.f32 1.0, %v9360_v38  ;;  %9369 = vpow2.f32 %v8143_v37  ;;  %v10626_v43 = vadd.f32 %v8818_v41, %v10591_v13  ;;  %v594_v44 = vpop.f32.mrb[9].mxu0 }
 0x10d   : > { %9371 = vrcp.f32 %v682_v39  ;;  %v10629_v45 = vadd.f32 %v10591_v13, %v594_v44  ;;  %v816_v39 = vld [vmem:[%s17995_s3 + $0x238] sm:$0xff] }
 0x10e   : > { %v9362_v46 = vpop.eup %9361  ;;  %9373 = vrcp.f32 %v681_v42  ;;  %v8145_v47 = vmul.f32 -1.442695, %v10626_v43 }
 0x10f   : > { %v9364_v48 = vpop.eup %9363  ;;  %v684_v49 = vadd.f32 1.0, %v9362_v46  ;;  %9375 = vpow2.f32 %v8142_v40  ;;  %v8144_v50 = vmul.f32 -1.442695, %v10629_v45  ;;  %v8821_v51 = vpop.f32.mrb[10].mxu0  ;;  %v848_v40 = vld [vmem:[%s17995_s3 + $0x338] sm:$0xff] }
 0x110   : > { %v683_v52 = vadd.f32 1.0, %v9364_v48  ;;  %9377 = vpow2.f32 %v8145_v47  ;;  %v10634_v53 = vadd.f32 %v8821_v51, %v10591_v13  ;;  %v604_v54 = vpop.f32.mrb[11].mxu0 }
 0x111   : > { %9379 = vrcp.f32 %v684_v49  ;;  %v10637_v55 = vadd.f32 %v10591_v13, %v604_v54  ;;  %v878_v54 = vld [vmem:[%s17995_s3 + $0x428] sm:$0xff] }
 0x112   : > { %v9366_v56 = vpop.eup %9365  ;;  %9381 = vrcp.f32 %v683_v52  ;;  %v8147_v57 = vmul.f32 -1.442695, %v10634_v53 }
 0x113   : > { %v9368_v58 = vpop.eup %9367  ;;  %v686_v59 = vadd.f32 1.0, %v9366_v56  ;;  %9383 = vpow2.f32 %v8144_v50  ;;  %v8146_v60 = vmul.f32 -1.442695, %v10637_v55  ;;  %v8824_v61 = vpop.f32.mrb[12].mxu0  ;;  %v8928_v50 = vpack.c.bf16 %v848_v40, %v816_v39  ;;  %v910_v56 = vld [vmem:[%s17995_s3 + $0x528] sm:$0xff]  ;;  %v944_v39 = vld [vmem:[%s17995_s3 + $0x638] sm:$0xff] }
 0x114   : > { %v685_v62 = vadd.f32 1.0, %v9368_v58  ;;  %9385 = vpow2.f32 %v8147_v57  ;;  %v10642_v63 = vadd.f32 %v8824_v61, %v10591_v13  ;;  %v614_v0 = vpop.f32.mrb[13].mxu0  ;;  %v877_v58 = vld [vmem:[%s17995_s3 + $0x420] sm:$0xff]  ;;  %v976_v40 = vld [vmem:[%s17995_s3 + $0x738] sm:$0xff] }
 0x115   : > { %9387 = vrcp.f32 %v686_v59  ;;  %v10645_v1 = vadd.f32 %v10591_v13, %v614_v0  ;;  %v909_v59 = vld [vmem:[%s17995_s3 + $0x520] sm:$0xff] }
 0x116   : > { %v9370_v4 = vpop.eup %9369  ;;  %9389 = vrcp.f32 %v685_v62  ;;  %v8149_v5 = vmul.f32 -1.442695, %v10642_v63 }
 0x117   : > { %v9372_v9 = vpop.eup %9371  ;;  %v688_v10 = vadd.f32 1.0, %v9370_v4  ;;  %9391 = vpow2.f32 %v8146_v60  ;;  %v8148_v11 = vmul.f32 -1.442695, %v10645_v1  ;;  %v8827_v12 = vpop.f32.mrb[14].mxu0  ;;  %v8916_v4 = vpack.c.bf16 %v910_v56, %v878_v54 }
 0x118   : > { %v9374_v18 = vpop.eup %9373  ;;  %9393 = vpow2.f32 %v8149_v5  ;;  %v10668_v19 = vadd.f32 %v8827_v12, %v10591_v13  ;;  %v624_v20 = vpop.f32.mrb[15].mxu0  ;;  %v10697_v44 = vmul.f32 %v9372_v9, %v10594_v15  ;;  %v815_v15 = vld [vmem:[%s17995_s3 + $0x230] sm:$0xff]  ;;  %v912_v5 = vld [vmem:[%s17995_s3 + $0x538] sm:$0xff] }
 0x119   : > { %v9376_v24 = vpop.eup %9375  ;;  %v10671_v25 = vmul.f32 %v9374_v18, %v10597_v17  ;;  %v10674_v26 = vadd.f32 %v10591_v13, %v624_v20  ;;  %9395 = vpow2.f32 %v8148_v11  ;;  %v845_v13 = vld [vmem:[%s17995_s3 + $0x320] sm:$0xff]  ;;  %v879_v9 = vld [vmem:[%s17995_s3 + $0x430] sm:$0xff] }
 0x11a   : > { %v9378_v30 = vpop.eup %9377  ;;  %v687_v31 = vadd.f32 1.0, %v9376_v24  ;;  %v8151_v32 = vmul.f32 -1.442695, %v10668_v19  ;;  %9397 = vrcp.f32 %v688_v10  ;;  %v8914_v49 = vpack.c.bf16 %v845_v13, %v813_v36  ;;  %v911_v10 = vld [vmem:[%s17995_s3 + $0x530] sm:$0xff]  ;;  %v942_v24 = vld [vmem:[%s17995_s3 + $0x628] sm:$0xff] }
 0x11b   : > { %v9380_v37 = vpop.eup %9379  ;;  %v690_v38 = vadd.f32 1.0, %v9378_v30  ;;  %v8150_v17 = vmul.f32 -1.442695, %v10674_v26  ;;  %7571 = vrot.lane.b32.xlu0 %v10671_v25, %s10293_s21  ;;  %8152 = vmatmul.mubr.msk.f32.vlgmr.msra.gmra.mrb[0].mxu1 %vm1001_vm1, %v10671_v25 }
 0x11c   : > { %v9382_v41 = vpop.eup %9381  ;;  %9399 = vrcp.f32 %v687_v31  ;;  %8168 = vmatmul.mubr.msk.f32.vlgmr.msra.gmra.mrb[16].mxu0 %vm1001_vm1, %v10671_v25  ;;  %8911 = vmatpush1.bf16.msra.mxu1 %v8910_v22  ;;  %v10731_v61 = vmul.f32 %v9380_v37, %v10602_v21  ;;  %v8918_v21 = vpack.c.bf16 %v909_v59, %v877_v58  ;;  %v973_v31 = vld [vmem:[%s17995_s3 + $0x720] sm:$0xff] }
 0x11d   : > { %v9384_v42 = vpop.eup %9383  ;;  %v10700_v46 = vmul.f32 %v9382_v41, %v10605_v23  ;;  %9401 = vrcp.f32 %v690_v38  ;;  %1120 = vmatprep.mubr.f32.mxu1 %v18007_v6  ;;  %1281 = vmatprep.mubr.f32.mxu0 %v18007_v6  ;;  %v847_v23 = vld [vmem:[%s17995_s3 + $0x330] sm:$0xff] }
 0x11e   : > { %v9386_v47 = vpop.eup %9385  ;;  %v689_v48 = vadd.f32 1.0, %v9384_v42  ;;  %9403 = vpow2.f32 %v8151_v32  ;;  %8927 = vmatpush1.bf16.msra.mxu0 %v8926_v28  ;;  %8913 = vmatprep.subr.bf16.mxu1 %v8912_v34  ;;  %18422 = vst [vmem:[#allocation10_spill] sm:$0xff] %v10731_v61  ;;  %v8930_v3 = vpack.c.bf16 %v847_v23, %v815_v15  ;;  %v974_v28 = vld [vmem:[%s17995_s3 + $0x728] sm:$0xff]  ;;  %v975_v41 = vld [vmem:[%s17995_s3 + $0x730] sm:$0xff] }
 0x11f   : > { %18421 = vst [vmem:[#allocation9_spill] sm:$0xff] %v10700_v46  ;;  %v9388_v51 = vpop.eup %9387  ;;  %v692_v52 = vadd.f32 1.0, %v9386_v47  ;;  %9405 = vpow2.f32 %v8150_v17  ;;  %7575 = vrot.lane.b32.xlu1 %v10700_v46, %s10293_s21  ;;  %7573 = vrot.lane.b32.xlu0 %v10697_v44, %s10293_s21  ;;  %v8920_v17 = vpack.c.bf16 %v974_v28, %v942_v24  ;;  %v786_v23 = vld [vmem:[%s17995_s3 + $0x148] sm:$0xff]  ;;  %v884_v24 = vld [vmem:[%s17995_s3 + $0x458] sm:$0xff] }
 0x120   : > { %v9390_v57 = vpop.eup %9389  ;;  %9407 = vrcp.f32 %v689_v48  ;;  %8153 = vmatmul.mubr.msk.f32.gmra.mrb[2].mxu1 %vm1001_vm1, %v10697_v44  ;;  %8169 = vmatmul.mubr.msk.f32.gmra.mrb[18].mxu0 %vm1001_vm1, %v10697_v44  ;;  %v10759_v12 = vmul.f32 %v9388_v51, %v10610_v27  ;;  %v8934_v27 = vpack.c.bf16 %v911_v10, %v879_v9  ;;  %v788_v51 = vld [vmem:[%s17995_s3 + $0x158] sm:$0xff]  ;;  %v817_v9 = vld [vmem:[%s17995_s3 + $0x240] sm:$0xff] }
 0x121   : > { %v9392_v60 = vpop.eup %9391  ;;  %v10734_v62 = vmul.f32 %v9390_v57, %v10613_v29  ;;  %1126 = vmatprep.mubr.f32.mxu1 %v18007_v6  ;;  %1287 = vmatprep.mubr.f32.mxu0 %v18007_v6  ;;  %9409 = vrcp.f32 %v692_v52  ;;  %v880_v29 = vld [vmem:[%s17995_s3 + $0x438] sm:$0xff]  ;;  %v849_v10 = vld [vmem:[%s17995_s3 + $0x340] sm:$0xff] }
 0x122   : > { %v9394_v0 = vpop.eup %9393  ;;  %v691_v2 = vadd.f32 1.0, %v9392_v60  ;;  %8915 = vmatpush1.bf16.msra.mxu1 %v8914_v49  ;;  %8929 = vmatprep.subr.bf16.mxu0 %v8928_v50  ;;  %18424 = vst [vmem:[#allocation12_spill] sm:$0xff] %v10759_v12  ;;  %v8932_v18 = vpack.c.bf16 %v912_v5, %v880_v29  ;;  %v8936_v49 = vpack.c.bf16 %v976_v40, %v944_v39  ;;  %v820_v29 = vld [vmem:[%s17995_s3 + $0x258] sm:$0xff]  ;;  %v978_v39 = vld [vmem:[%s17995_s3 + $0x748] sm:$0xff] }
 0x123   : > { %18423 = vst [vmem:[#allocation11_spill] sm:$0xff] %v10734_v62  ;;  %7577 = vrot.lane.b32.xlu1 %v10731_v61, %s10293_s21  ;;  %7579 = vrot.lane.b32.xlu0 %v10734_v62, %s10293_s21  ;;  %v9396_v7 = vpop.eup %9395  ;;  %v694_v8 = vadd.f32 1.0, %v9394_v0  ;;  %v852_v5 = vld [vmem:[%s17995_s3 + $0x358] sm:$0xff] }
 0x124   : > { %9411 = vrcp.f32 %v691_v2  ;;  %8154 = vmatmul.mubr.msk.f32.gmra.mrb[4].mxu1 %vm1001_vm1, %v10700_v46  ;;  %8170 = vmatmul.mubr.msk.f32.gmra.mrb[20].mxu0 %vm1001_vm1, %v10700_v46  ;;  %v9398_v11 = vpop.eup %9397  ;;  %v693_v14 = vadd.f32 1.0, %v9396_v7  ;;  %v755_v2 = vld [vmem:[%s17995_s3 + $0x50] sm:$0xff]  ;;  %v916_v28 = vld [vmem:[%s17995_s3 + $0x558] sm:$0xff] }
 0x125   : > { %1132 = vmatprep.mubr.f32.mxu1 %v18007_v6  ;;  %1293 = vmatprep.mubr.f32.mxu0 %v18007_v6  ;;  %v10785_v34 = vmul.f32 %v9398_v11, %v10618_v33  ;;  %v948_v40 = vld [vmem:[%s17995_s3 + $0x658] sm:$0xff] }
 0x126   : > { %v9400_v16 = vpop.eup %9399  ;;  %8931 = vmatpush1.bf16.msra.mxu0 %v8930_v3  ;;  %8917 = vmatprep.subr.bf16.mxu1 %v8916_v4  ;;  %9413 = vrcp.f32 %v693_v14  ;;  %v787_v3 = vld [vmem:[%s17995_s3 + $0x150] sm:$0xff]  ;;  %v818_v4 = vld [vmem:[%s17995_s3 + $0x248] sm:$0xff]  ;;  %v8960_v14 = vpack.c.bf16 %v852_v5, %v820_v29  ;;  %v824_v5 = vld [vmem:[%s17995_s3 + $0x278] sm:$0xff] }
 0x127   : > { %v9402_v20 = vpop.eup %9401  ;;  %v10764_v22 = vmul.f32 %v9400_v16, %v10621_v35  ;;  %7581 = vrot.lane.b32.xlu1 %v10759_v12, %s10293_s21  ;;  %8919 = vmatpush1.bf16.msra.mxu1 %v8918_v21  ;;  %9415 = vrcp.f32 %v694_v8  ;;  %v941_v35 = vld [vmem:[%s17995_s3 + $0x620] sm:$0xff]  ;;  %18426 = vst [vmem:[#allocation14_spill] sm:$0xff] %v10785_v34  ;;  %v850_v21 = vld [vmem:[%s17995_s3 + $0x348] sm:$0xff]  ;;  %v8958_v8 = vpack.c.bf16 %v787_v3, %v755_v2  ;;  %v819_v16 = vld [vmem:[%s17995_s3 + $0x250] sm:$0xff] }
 0x128   : > { %v9404_v30 = vpop.eup %9403  ;;  %8155 = vmatmul.mubr.msk.f32.gmra.mrb[6].mxu1 %vm1001_vm1, %v10731_v61  ;;  %8171 = vmatmul.mubr.msk.f32.gmra.mrb[22].mxu0 %vm1001_vm1, %v10731_v61  ;;  %v8922_v33 = vpack.c.bf16 %v973_v31, %v941_v35  ;;  %v10813_v47 = vmul.f32 %v9402_v20, %v10626_v43  ;;  %v754_v43 = vld [vmem:[%s17995_s3 + $0x48] sm:$0xff]  ;;  %v8944_v11 = vpack.c.bf16 %v850_v21, %v818_v4  ;;  %v881_v31 = vld [vmem:[%s17995_s3 + $0x440] sm:$0xff]  ;;  %v759_v3 = vld [vmem:[%s17995_s3 + $0x70] sm:$0xff] }
 0x129   : > { %18425 = vst [vmem:[#allocation13_spill] sm:$0xff] %v10764_v22  ;;  %v9406_v32 = vpop.eup %9405  ;;  %v696_v36 = vadd.f32 1.0, %v9404_v30  ;;  %7583 = vrot.lane.b32.xlu0 %v10764_v22, %s10293_s21  ;;  %1138 = vmatprep.mubr.f32.mxu1 %v18007_v6  ;;  %v8940_v58 = vpack.c.bf16 %v786_v23, %v754_v43  ;;  %v882_v20 = vld [vmem:[%s17995_s3 + $0x448] sm:$0xff]  ;;  %v8946_v30 = vpack.c.bf16 %v849_v10, %v817_v9  ;;  %v947_v23 = vld [vmem:[%s17995_s3 + $0x650] sm:$0xff]  ;;  %v789_v2 = vld [vmem:[%s17995_s3 + $0x160] sm:$0xff] }
 0x12a   : > { %v9408_v37 = vpop.eup %9407  ;;  %v695_v38 = vadd.f32 1.0, %v9406_v32  ;;  %1299 = vmatprep.mubr.f32.mxu0 %v18007_v6  ;;  %8933 = vmatprep.subr.bf16.mxu0 %v8932_v18  ;;  %18428 = vst [vmem:[#allocation16_spill] sm:$0xff] %v10813_v47  ;;  %v851_v18 = vld [vmem:[%s17995_s3 + $0x350] sm:$0xff]  ;;  %v913_v32 = vld [vmem:[%s17995_s3 + $0x540] sm:$0xff]  ;;  %v822_v21 = vld [vmem:[%s17995_s3 + $0x268] sm:$0xff] }
 0x12b   : > { %v10792_v13 = vmul.f32 %v9408_v37, %v10629_v45  ;;  %9417 = vrcp.f32 %v696_v36  ;;  %7585 = vrot.lane.b32.xlu1 %v10785_v34, %s10293_s21  ;;  %8935 = vmatpush1.bf16.msra.mxu0 %v8934_v27  ;;  %v943_v45 = vld [vmem:[%s17995_s3 + $0x630] sm:$0xff]  ;;  %v9410_v42 = vpop.eup %9409  ;;  %v914_v27 = vld [vmem:[%s17995_s3 + $0x548] sm:$0xff]  ;;  %v8962_v35 = vpack.c.bf16 %v851_v18, %v819_v16  ;;  %v8964_v37 = vpack.c.bf16 %v916_v28, %v884_v24  ;;  %v821_v10 = vld [vmem:[%s17995_s3 + $0x260] sm:$0xff] }
 0x12c   : > { %9419 = vrcp.f32 %v695_v38  ;;  %8156 = vmatmul.mubr.msk.f32.gmra.mrb[8].mxu1 %vm1001_vm1, %v10734_v62  ;;  %8172 = vmatmul.mubr.msk.f32.gmra.mrb[24].mxu0 %vm1001_vm1, %v10734_v62  ;;  %v8938_v15 = vpack.c.bf16 %v975_v41, %v943_v45  ;;  %v10841_v54 = vmul.f32 %v9410_v42, %v10634_v53  ;;  %v8948_v36 = vpack.c.bf16 %v914_v27, %v882_v20  ;;  %v883_v38 = vld [vmem:[%s17995_s3 + $0x450] sm:$0xff]  ;;  %v980_v45 = vld [vmem:[%s17995_s3 + $0x758] sm:$0xff]  ;;  %v854_v29 = vld [vmem:[%s17995_s3 + $0x368] sm:$0xff] }
 0x12d   : > { %18427 = vst [vmem:[#allocation15_spill] sm:$0xff] %v10792_v13  ;;  %7587 = vrot.lane.b32.xlu0 %v10792_v13, %s10293_s21  ;;  %1144 = vmatprep.mubr.f32.mxu1 %v18007_v6  ;;  %v8950_v41 = vpack.c.bf16 %v913_v32, %v881_v31  ;;  %v8968_v43 = vpack.c.bf16 %v980_v45, %v948_v40  ;;  %v791_v4 = vld [vmem:[%s17995_s3 + $0x170] sm:$0xff]  ;;  %v886_v27 = vld [vmem:[%s17995_s3 + $0x468] sm:$0xff]  ;;  %v888_v28 = vld [vmem:[%s17995_s3 + $0x478] sm:$0xff] }
 0x12e   : > { %v9412_v48 = vpop.eup %9411  ;;  %1305 = vmatprep.mubr.f32.mxu0 %v18007_v6  ;;  %8921 = vmatprep.subr.bf16.mxu1 %v8920_v17  ;;  %18430 = vst [vmem:[#allocation18_spill] sm:$0xff] %v10841_v54  ;;  %v915_v17 = vld [vmem:[%s17995_s3 + $0x550] sm:$0xff]  ;;  %v8990_v9 = vpack.c.bf16 %v791_v4, %v759_v3  ;;  %v918_v24 = vld [vmem:[%s17995_s3 + $0x568] sm:$0xff]  ;;  %v885_v32 = vld [vmem:[%s17995_s3 + $0x460] sm:$0xff] }
 0x12f   : > { %v10820_v50 = vmul.f32 %v9412_v48, %v10637_v55  ;;  %7589 = vrot.lane.b32.xlu1 %v10813_v47, %s10293_s21  ;;  %8923 = vmatpush1.bf16.msra.mxu1 %v8922_v33  ;;  %v756_v55 = vld [vmem:[%s17995_s3 + $0x58] sm:$0xff]  ;;  %v946_v33 = vld [vmem:[%s17995_s3 + $0x648] sm:$0xff]  ;;  %v8966_v42 = vpack.c.bf16 %v915_v17, %v883_v38  ;;  %v945_v48 = vld [vmem:[%s17995_s3 + $0x640] sm:$0xff] }
 0x130   : > { %8157 = vmatmul.mubr.msk.f32.gmra.mrb[10].mxu1 %vm1001_vm1, %v10759_v12  ;;  %8173 = vmatmul.mubr.msk.f32.gmra.mrb[26].mxu0 %vm1001_vm1, %v10759_v12  ;;  %v9414_v52 = vpop.eup %9413  ;;  %v8956_v59 = vpack.c.bf16 %v788_v51, %v756_v55  ;;  %v979_v55 = vld [vmem:[%s17995_s3 + $0x750] sm:$0xff]  ;;  %v758_v51 = vld [vmem:[%s17995_s3 + $0x68] sm:$0xff]  ;;  %v952_v45 = vld [vmem:[%s17995_s3 + $0x678] sm:$0xff] }
 0x131   : > { %18429 = vst [vmem:[#allocation17_spill] sm:$0xff] %v10820_v50  ;;  %7591 = vrot.lane.b32.xlu0 %v10820_v50, %s10293_s21  ;;  %1150 = vmatprep.mubr.f32.mxu1 %v18007_v6  ;;  %v9416_v56 = vpop.eup %9415  ;;  %v10847_v57 = vmul.f32 %v9414_v52, %v10645_v1  ;;  %v790_v52 = vld [vmem:[%s17995_s3 + $0x168] sm:$0xff]  ;;  %v823_v18 = vld [vmem:[%s17995_s3 + $0x270] sm:$0xff]  ;;  %v793_v3 = vld [vmem:[%s17995_s3 + $0x180] sm:$0xff] }
 0x132   : > { %1311 = vmatprep.mubr.f32.mxu0 %v18007_v6  ;;  %8937 = vmatprep.subr.bf16.mxu0 %v8936_v49  ;;  %v10857_v60 = vmul.f32 %v9416_v56, %v10642_v63  ;;  %v977_v49 = vld [vmem:[%s17995_s3 + $0x740] sm:$0xff]  ;;  %v760_v56 = vld [vmem:[%s17995_s3 + $0x78] sm:$0xff]  ;;  %v855_v20 = vld [vmem:[%s17995_s3 + $0x370] sm:$0xff] }
 0x133   : > { %18431 = vst [vmem:[#allocation19_spill] sm:$0xff] %v10847_v57  ;;  %7593 = vrot.lane.b32.xlu1 %v10841_v54, %s10293_s21  ;;  %8939 = vmatpush1.bf16.msra.mxu0 %v8938_v15  ;;  %v8952_v15 = vpack.c.bf16 %v978_v39, %v946_v33  ;;  %v8994_v31 = vpack.c.bf16 %v855_v20, %v823_v18  ;;  %v887_v17 = vld [vmem:[%s17995_s3 + $0x470] sm:$0xff]  ;;  %v950_v39 = vld [vmem:[%s17995_s3 + $0x668] sm:$0xff] }
 0x134   : > { %8158 = vmatmul.mubr.msk.f32.gmra.mrb[12].mxu1 %vm1001_vm1, %v10764_v22  ;;  %8174 = vmatmul.mubr.msk.f32.gmra.mrb[28].mxu0 %vm1001_vm1, %v10764_v22  ;;  %18432 = vst [vmem:[#allocation20_spill] sm:$0xff] %v10857_v60  ;;  %v919_v33 = vld [vmem:[%s17995_s3 + $0x570] sm:$0xff]  ;;  %v982_v40 = vld [vmem:[%s17995_s3 + $0x768] sm:$0xff] }
 0x135   : > { %v9418_v53 = vpop.eup %9417  ;;  %7595 = vrot.lane.b32.xlu0 %v10847_v57, %s10293_s21  ;;  %1156 = vmatprep.mubr.f32.mxu1 %v18007_v6  ;;  %v763_v4 = vld [vmem:[%s17995_s3 + $0x90] sm:$0xff] }
 0x136   : > { %v9420_v1 = vpop.eup %9419  ;;  %1317 = vmatprep.mubr.f32.mxu0 %v18007_v6  ;;  %8941 = vmatprep.subr.bf16.mxu1 %v8940_v58  ;;  %v10873_v63 = vmul.f32 %v9418_v53, %v10668_v19  ;;  %v753_v19 = vld [vmem:[%s17995_s3 + $0x40] sm:$0xff]  ;;  %v792_v58 = vld [vmem:[%s17995_s3 + $0x178] sm:$0xff]  ;;  %v8970_v53 = vpack.c.bf16 %v979_v55, %v947_v23  ;;  %v951_v55 = vld [vmem:[%s17995_s3 + $0x670] sm:$0xff] }
 0x137   : > { %v10864_v0 = vmul.f32 %v9420_v1, %v10674_v26  ;;  %7597 = vrot.lane.b32.xlu1 %v10857_v60, %s10293_s21  ;;  %8957 = vmatprep.subr.bf16.mxu0 %v8956_v59  ;;  %v785_v26 = vld [vmem:[%s17995_s3 + $0x140] sm:$0xff]  ;;  %v8954_v59 = vpack.c.bf16 %v977_v49, %v945_v48  ;;  %v8972_v1 = vpack.c.bf16 %v790_v52, %v758_v51  ;;  %v983_v51 = vld [vmem:[%s17995_s3 + $0x770] sm:$0xff]  ;;  %v762_v52 = vld [vmem:[%s17995_s3 + $0x88] sm:$0xff] }
 0x138   : > { %8159 = vmatmul.mubr.msk.f32.gmra.mrb[14].mxu1 %vm1001_vm1, %v10785_v34  ;;  %8175 = vmatmul.mubr.msk.f32.gmra.mrb[30].mxu0 %vm1001_vm1, %v10785_v34  ;;  %18434 = vst [vmem:[#allocation22_spill] sm:$0xff] %v10873_v63  ;;  %v8942_v7 = vpack.c.bf16 %v785_v26, %v753_v19  ;;  %v8988_v19 = vpack.c.bf16 %v792_v58, %v760_v56  ;;  %v757_v26 = vld [vmem:[%s17995_s3 + $0x60] sm:$0xff]  ;;  %v794_v56 = vld [vmem:[%s17995_s3 + $0x188] sm:$0xff]  ;;  %v764_v58 = vld [vmem:[%s17995_s3 + $0x98] sm:$0xff] }
 0x139   : > { %18433 = vst [vmem:[#allocation21_spill] sm:$0xff] %v10864_v0  ;;  %7599 = vrot.lane.b32.xlu0 %v10864_v0, %s10293_s21  ;;  %1162 = vmatprep.mubr.f32.mxu1 %v18007_v6  ;;  %v8998_v48 = vpack.c.bf16 %v919_v33, %v887_v17  ;;  %v949_v49 = vld [vmem:[%s17995_s3 + $0x660] sm:$0xff]  ;;  %v827_v20 = vld [vmem:[%s17995_s3 + $0x290] sm:$0xff] }
 0x13a   : > { %1323 = vmatprep.mubr.f32.mxu0 %v18007_v6  ;;  %v891_v33 = vld [vmem:[%s17995_s3 + $0x490] sm:$0xff] }
 0x13b   : > { %7601 = vrot.lane.b32.xlu1 %v10873_v63, %s10293_s21  ;;  %s17938_s21 = scalar_lea.hbm %s18002_s10, %s8429_s22 }
 0x13c   : > { %8160 = vmatmul.mubr.msk.f32.gmra.mrb[16].mxu1 %vm1001_vm1, %v10792_v13  ;;  %8176 = vmatmul.mubr.msk.f32.gmra.mrb[32].mxu0 %vm1001_vm1, %v10792_v13 }
 0x13d   : > { %1168 = vmatprep.mubr.f32.mxu1 %v18007_v6  ;;  %1329 = vmatprep.mubr.f32.mxu0 %v18007_v6 }
 0x140   : > { %8161 = vmatmul.mubr.msk.f32.gmra.mrb[18].mxu1 %vm1001_vm1, %v10813_v47  ;;  %8177 = vmatmul.mubr.msk.f32.gmra.mrb[34].mxu0 %vm1001_vm1, %v10813_v47 }
 0x141   : > { %1174 = vmatprep.mubr.f32.mxu1 %v18007_v6  ;;  %1335 = vmatprep.mubr.f32.mxu0 %v18007_v6 }
 0x144   : > { %8162 = vmatmul.mubr.msk.f32.gmra.mrb[20].mxu1 %vm1001_vm1, %v10820_v50  ;;  %8178 = vmatmul.mubr.msk.f32.gmra.mrb[36].mxu0 %vm1001_vm1, %v10820_v50 }
 0x145   : > { %1180 = vmatprep.mubr.f32.mxu1 %v18007_v6  ;;  %1341 = vmatprep.mubr.f32.mxu0 %v18007_v6 }
 0x148   : > { %8163 = vmatmul.mubr.msk.f32.gmra.mrb[22].mxu1 %vm1001_vm1, %v10841_v54  ;;  %8179 = vmatmul.mubr.msk.f32.gmra.mrb[38].mxu0 %vm1001_vm1, %v10841_v54 }
 0x149   : > { %1186 = vmatprep.mubr.f32.mxu1 %v18007_v6  ;;  %1347 = vmatprep.mubr.f32.mxu0 %v18007_v6 }
 0x14c   : > { %8164 = vmatmul.mubr.msk.f32.gmra.mrb[24].mxu1 %vm1001_vm1, %v10847_v57  ;;  %8180 = vmatmul.mubr.msk.f32.gmra.mrb[40].mxu0 %vm1001_vm1, %v10847_v57 }
 0x14d   : > { %1192 = vmatprep.mubr.f32.mxu1 %v18007_v6  ;;  %1353 = vmatprep.mubr.f32.mxu0 %v18007_v6 }
 0x150   : > { %8165 = vmatmul.mubr.msk.f32.gmra.mrb[26].mxu1 %vm1001_vm1, %v10857_v60  ;;  %8181 = vmatmul.mubr.msk.f32.gmra.mrb[42].mxu0 %vm1001_vm1, %v10857_v60 }
 0x151   : > { %1198 = vmatprep.mubr.f32.mxu1 %v18007_v6  ;;  %1359 = vmatprep.mubr.f32.mxu0 %v18007_v6 }
 0x154   : > { %8166 = vmatmul.mubr.msk.f32.gmra.mrb[28].mxu1 %vm1001_vm1, %v10864_v0  ;;  %8182 = vmatmul.mubr.msk.f32.gmra.mrb[44].mxu0 %vm1001_vm1, %v10864_v0 }
 0x155   : > { %1204 = vmatprep.mubr.f32.mxu1 %v18007_v6  ;;  %1365 = vmatprep.mubr.f32.mxu0 %v18007_v6 }
 0x158   : > { %8167 = vmatmul.mubr.msk.f32.gmra.mrb[30].mxu1 %vm1001_vm1, %v10873_v63  ;;  %8183 = vmatmul.mubr.msk.f32.gmra.mrb[46].mxu0 %vm1001_vm1, %v10873_v63 }
 0x159   : > { %1436 = vmatprep.mubr.f32.mxu1 %v18007_v6  ;;  %1597 = vmatprep.mubr.f32.mxu0 %v18007_v6 }
 0x15c   : > { %8184 = vmatmul.mubr.msk.f32.vlgmr.msra.gmra.mrb[32].mxu1 %vm1001_vm1, %v10671_v25  ;;  %8200 = vmatmul.mubr.msk.f32.vlgmr.msra.gmra.mrb[48].mxu0 %vm1001_vm1, %v10671_v25 }
 0x15d   : > { %8943 = vmatpush1.bf16.msra.mxu1 %v8942_v7  ;;  %1442 = vmatprep.mubr.f32.mxu1 %v18007_v6  ;;  %v856_v7 = vld [vmem:[%s17995_s3 + $0x378] sm:$0xff] }
 0x15e   : > { %1603 = vmatprep.mubr.f32.mxu0 %v18007_v6  ;;  %8959 = vmatpush1.bf16.msra.mxu0 %v8958_v8  ;;  %v8974_v8 = vpack.c.bf16 %v789_v2, %v757_v26  ;;  %v8992_v16 = vpack.c.bf16 %v856_v7, %v824_v5  ;;  %v761_v2 = vld [vmem:[%s17995_s3 + $0x80] sm:$0xff]  ;;  %v858_v5 = vld [vmem:[%s17995_s3 + $0x388] sm:$0xff]  ;;  %v828_v7 = vld [vmem:[%s17995_s3 + $0x298] sm:$0xff] }
 0x15f   : > { %8945 = vmatprep.subr.bf16.mxu1 %v8944_v11  ;;  %8961 = vmatprep.subr.bf16.mxu0 %v8960_v14  ;;  %v853_v11 = vld [vmem:[%s17995_s3 + $0x360] sm:$0xff]  ;;  %v8976_v14 = vpack.c.bf16 %v854_v29, %v822_v21  ;;  %v795_v21 = vld [vmem:[%s17995_s3 + $0x190] sm:$0xff]  ;;  %v826_v29 = vld [vmem:[%s17995_s3 + $0x288] sm:$0xff] }
 0x160   : > { %8185 = vmatmul.mubr.msk.f32.gmra.mrb[34].mxu1 %vm1001_vm1, %v10697_v44  ;;  %8201 = vmatmul.mubr.msk.f32.gmra.mrb[50].mxu0 %vm1001_vm1, %v10697_v44 }
 0x161   : > { %1448 = vmatprep.mubr.f32.mxu1 %v18007_v6  ;;  %1609 = vmatprep.mubr.f32.mxu0 %v18007_v6 }
 0x162   : > { %8947 = vmatpush1.bf16.msra.mxu1 %v8946_v30  ;;  %8963 = vmatpush1.bf16.msra.mxu0 %v8962_v35  ;;  %v920_v30 = vld [vmem:[%s17995_s3 + $0x578] sm:$0xff]  ;;  %v8978_v35 = vpack.c.bf16 %v853_v11, %v821_v10  ;;  %v9022_v10 = vpack.c.bf16 %v795_v21, %v763_v4  ;;  %v825_v11 = vld [vmem:[%s17995_s3 + $0x280] sm:$0xff] }
 0x163   : > { %8949 = vmatprep.subr.bf16.mxu1 %v8948_v36  ;;  %8965 = vmatprep.subr.bf16.mxu0 %v8964_v37  ;;  %v917_v36 = vld [vmem:[%s17995_s3 + $0x560] sm:$0xff]  ;;  %v8980_v37 = vpack.c.bf16 %v918_v24, %v886_v27  ;;  %v8996_v38 = vpack.c.bf16 %v920_v30, %v888_v28  ;;  %v859_v27 = vld [vmem:[%s17995_s3 + $0x390] sm:$0xff]  ;;  %v890_v24 = vld [vmem:[%s17995_s3 + $0x488] sm:$0xff] }
 0x164   : > { %8186 = vmatmul.mubr.msk.f32.gmra.mrb[36].mxu1 %vm1001_vm1, %v10700_v46  ;;  %8202 = vmatmul.mubr.msk.f32.gmra.mrb[52].mxu0 %vm1001_vm1, %v10700_v46  ;;  %v922_v28 = vld [vmem:[%s17995_s3 + $0x588] sm:$0xff]  ;;  %v892_v30 = vld [vmem:[%s17995_s3 + $0x498] sm:$0xff] }
 0x165   : > { %1454 = vmatprep.mubr.f32.mxu1 %v18007_v6  ;;  %1615 = vmatprep.mubr.f32.mxu0 %v18007_v6 }
 0x166   : > { %8951 = vmatpush1.bf16.msra.mxu1 %v8950_v41  ;;  %8967 = vmatpush1.bf16.msra.mxu0 %v8966_v42  ;;  %v984_v41 = vld [vmem:[%s17995_s3 + $0x778] sm:$0xff]  ;;  %v8982_v42 = vpack.c.bf16 %v917_v36, %v885_v32  ;;  %v9026_v32 = vpack.c.bf16 %v859_v27, %v827_v20  ;;  %v889_v36 = vld [vmem:[%s17995_s3 + $0x480] sm:$0xff] }
 0x167   : > { %8953 = vmatprep.subr.bf16.mxu1 %v8952_v15  ;;  %8969 = vmatprep.subr.bf16.mxu0 %v8968_v43  ;;  %v981_v15 = vld [vmem:[%s17995_s3 + $0x760] sm:$0xff]  ;;  %v8984_v43 = vpack.c.bf16 %v982_v40, %v950_v39  ;;  %v9000_v23 = vpack.c.bf16 %v984_v41, %v952_v45  ;;  %v923_v39 = vld [vmem:[%s17995_s3 + $0x590] sm:$0xff]  ;;  %v954_v40 = vld [vmem:[%s17995_s3 + $0x688] sm:$0xff] }
 0x168   : > { %8187 = vmatmul.mubr.msk.f32.gmra.mrb[38].mxu1 %vm1001_vm1, %v10731_v61  ;;  %8203 = vmatmul.mubr.msk.f32.gmra.mrb[54].mxu0 %vm1001_vm1, %v10731_v61  ;;  %v986_v45 = vld [vmem:[%s17995_s3 + $0x788] sm:$0xff]  ;;  %v956_v41 = vld [vmem:[%s17995_s3 + $0x698] sm:$0xff] }
 0x169   : > { %1460 = vmatprep.mubr.f32.mxu1 %v18007_v6  ;;  %1621 = vmatprep.mubr.f32.mxu0 %v18007_v6 }
 0x16a   : > { %8955 = vmatpush1.bf16.msra.mxu1 %v8954_v59  ;;  %8971 = vmatpush1.bf16.msra.mxu0 %v8970_v53  ;;  %v796_v59 = vld [vmem:[%s17995_s3 + $0x198] sm:$0xff]  ;;  %v8986_v53 = vpack.c.bf16 %v981_v15, %v949_v49  ;;  %v9030_v49 = vpack.c.bf16 %v923_v39, %v891_v33  ;;  %v953_v15 = vld [vmem:[%s17995_s3 + $0x680] sm:$0xff] }
 0x16b   : > { %8973 = vmatprep.subr.bf16.mxu1 %v8972_v1  ;;  %8989 = vmatprep.subr.bf16.mxu0 %v8988_v19  ;;  %v9002_v1 = vpack.c.bf16 %v983_v51, %v951_v55  ;;  %v9004_v19 = vpack.c.bf16 %v794_v56, %v762_v52  ;;  %v9020_v26 = vpack.c.bf16 %v796_v59, %v764_v58  ;;  %v955_v51 = vld [vmem:[%s17995_s3 + $0x690] sm:$0xff]  ;;  %v766_v56 = vld [vmem:[%s17995_s3 + $0xa8] sm:$0xff]  ;;  %v768_v59 = vld [vmem:[%s17995_s3 + $0xb8] sm:$0xff] }
 0x16c   : > { %8188 = vmatmul.mubr.msk.f32.gmra.mrb[40].mxu1 %vm1001_vm1, %v10734_v62  ;;  %8204 = vmatmul.mubr.msk.f32.gmra.mrb[56].mxu0 %vm1001_vm1, %v10734_v62  ;;  %v987_v52 = vld [vmem:[%s17995_s3 + $0x790] sm:$0xff]  ;;  %v798_v58 = vld [vmem:[%s17995_s3 + $0x1a8] sm:$0xff] }
 0x16d   : > { %1466 = vmatprep.mubr.f32.mxu1 %v18007_v6  ;;  %1627 = vmatprep.mubr.f32.mxu0 %v18007_v6 }
 0x170   : > { %8189 = vmatmul.mubr.msk.f32.gmra.mrb[42].mxu1 %vm1001_vm1, %v10759_v12  ;;  %8205 = vmatmul.mubr.msk.f32.gmra.mrb[58].mxu0 %vm1001_vm1, %v10759_v12 }
 0x171   : > { %1472 = vmatprep.mubr.f32.mxu1 %v18007_v6  ;;  %1633 = vmatprep.mubr.f32.mxu0 %v18007_v6 }
 0x174   : > { %8190 = vmatmul.mubr.msk.f32.gmra.mrb[44].mxu1 %vm1001_vm1, %v10764_v22  ;;  %8206 = vmatmul.mubr.msk.f32.gmra.mrb[60].mxu0 %vm1001_vm1, %v10764_v22 }
 0x175   : > { %1478 = vmatprep.mubr.f32.mxu1 %v18007_v6  ;;  %1639 = vmatprep.mubr.f32.mxu0 %v18007_v6 }
 0x178   : > { %8191 = vmatmul.mubr.msk.f32.gmra.mrb[46].mxu1 %vm1001_vm1, %v10785_v34  ;;  %8207 = vmatmul.mubr.msk.f32.gmra.mrb[62].mxu0 %vm1001_vm1, %v10785_v34 }
 0x179   : > { %1484 = vmatprep.mubr.f32.mxu1 %v18007_v6  ;;  %1645 = vmatprep.mubr.f32.mxu0 %v18007_v6 }
 0x17c   : > { %8192 = vmatmul.mubr.msk.f32.gmra.mrb[48].mxu1 %vm1001_vm1, %v10792_v13  ;;  %8208 = vmatmul.mubr.msk.f32.gmra.mrb[64].mxu0 %vm1001_vm1, %v10792_v13 }
 0x17d   : > { %1490 = vmatprep.mubr.f32.mxu1 %v18007_v6  ;;  %1651 = vmatprep.mubr.f32.mxu0 %v18007_v6 }
 0x180   : > { %8193 = vmatmul.mubr.msk.f32.gmra.mrb[50].mxu1 %vm1001_vm1, %v10813_v47  ;;  %8209 = vmatmul.mubr.msk.f32.gmra.mrb[66].mxu0 %vm1001_vm1, %v10813_v47 }
 0x181   : > { %1496 = vmatprep.mubr.f32.mxu1 %v18007_v6  ;;  %1657 = vmatprep.mubr.f32.mxu0 %v18007_v6 }
 0x184   : > { %8194 = vmatmul.mubr.msk.f32.gmra.mrb[52].mxu1 %vm1001_vm1, %v10820_v50  ;;  %8210 = vmatmul.mubr.msk.f32.gmra.mrb[68].mxu0 %vm1001_vm1, %v10820_v50 }
 0x185   : > { %1502 = vmatprep.mubr.f32.mxu1 %v18007_v6  ;;  %1663 = vmatprep.mubr.f32.mxu0 %v18007_v6 }
 0x188   : > { %8195 = vmatmul.mubr.msk.f32.gmra.mrb[54].mxu1 %vm1001_vm1, %v10841_v54  ;;  %8211 = vmatmul.mubr.msk.f32.gmra.mrb[70].mxu0 %vm1001_vm1, %v10841_v54 }
 0x189   : > { %1508 = vmatprep.mubr.f32.mxu1 %v18007_v6  ;;  %1669 = vmatprep.mubr.f32.mxu0 %v18007_v6 }
 0x18c   : > { %8196 = vmatmul.mubr.msk.f32.gmra.mrb[56].mxu1 %vm1001_vm1, %v10847_v57  ;;  %8212 = vmatmul.mubr.msk.f32.gmra.mrb[72].mxu0 %vm1001_vm1, %v10847_v57 }
 0x18d   : > { %1514 = vmatprep.mubr.f32.mxu1 %v18007_v6  ;;  %1675 = vmatprep.mubr.f32.mxu0 %v18007_v6 }
 0x190   : > { %8197 = vmatmul.mubr.msk.f32.gmra.mrb[58].mxu1 %vm1001_vm1, %v10857_v60  ;;  %8213 = vmatmul.mubr.msk.f32.gmra.mrb[74].mxu0 %vm1001_vm1, %v10857_v60 }
 0x191   : > { %1520 = vmatprep.mubr.f32.mxu1 %v18007_v6  ;;  %1681 = vmatprep.mubr.f32.mxu0 %v18007_v6 }
 0x194   : > { %8198 = vmatmul.mubr.msk.f32.gmra.mrb[60].mxu1 %vm1001_vm1, %v10864_v0  ;;  %8214 = vmatmul.mubr.msk.f32.gmra.mrb[76].mxu0 %vm1001_vm1, %v10864_v0 }
 0x195   : > { %1526 = vmatprep.mubr.f32.mxu1 %v18007_v6  ;;  %1687 = vmatprep.mubr.f32.mxu0 %v18007_v6 }
 0x198   : > { %8199 = vmatmul.mubr.msk.f32.gmra.mrb[62].mxu1 %vm1001_vm1, %v10873_v63  ;;  %8215 = vmatmul.mubr.msk.f32.gmra.mrb[78].mxu0 %vm1001_vm1, %v10873_v63 }
 0x199   : > { %1758 = vmatprep.mubr.f32.mxu1 %v18007_v6  ;;  %1919 = vmatprep.mubr.f32.mxu0 %v18007_v6 }
 0x19c   : > { %8216 = vmatmul.mubr.msk.f32.vlgmr.msra.gmra.mrb[64].mxu1 %vm1001_vm1, %v10671_v25  ;;  %8232 = vmatmul.mubr.msk.f32.vlgmr.msra.gmra.mrb[80].mxu0 %vm1001_vm1, %v10671_v25 }
 0x19d   : > { %8975 = vmatpush1.bf16.msra.mxu1 %v8974_v8  ;;  %1764 = vmatprep.mubr.f32.mxu1 %v18007_v6  ;;  %v860_v8 = vld [vmem:[%s17995_s3 + $0x398] sm:$0xff] }
 0x19e   : > { %1925 = vmatprep.mubr.f32.mxu0 %v18007_v6  ;;  %8991 = vmatpush1.bf16.msra.mxu0 %v8990_v9  ;;  %v9006_v9 = vpack.c.bf16 %v793_v3, %v761_v2  ;;  %v9024_v18 = vpack.c.bf16 %v860_v8, %v828_v7 }
 0x19f   : > { %8977 = vmatprep.subr.bf16.mxu1 %v8976_v14  ;;  %8993 = vmatprep.subr.bf16.mxu0 %v8992_v16  ;;  %v857_v14 = vld [vmem:[%s17995_s3 + $0x380] sm:$0xff]  ;;  %v9008_v16 = vpack.c.bf16 %v858_v5, %v826_v29 }
 0x1a0   : > { %8217 = vmatmul.mubr.msk.f32.gmra.mrb[66].mxu1 %vm1001_vm1, %v10697_v44  ;;  %8233 = vmatmul.mubr.msk.f32.gmra.mrb[82].mxu0 %vm1001_vm1, %v10697_v44 }
 0x1a1   : > { %1770 = vmatprep.mubr.f32.mxu1 %v18007_v6  ;;  %1931 = vmatprep.mubr.f32.mxu0 %v18007_v6 }
 0x1a2   : > { %8979 = vmatpush1.bf16.msra.mxu1 %v8978_v35  ;;  %8995 = vmatpush1.bf16.msra.mxu0 %v8994_v31  ;;  %v924_v35 = vld [vmem:[%s17995_s3 + $0x598] sm:$0xff]  ;;  %v9010_v31 = vpack.c.bf16 %v857_v14, %v825_v11 }
 0x1a3   : > { %8981 = vmatprep.subr.bf16.mxu1 %v8980_v37  ;;  %8997 = vmatprep.subr.bf16.mxu0 %v8996_v38  ;;  %v921_v37 = vld [vmem:[%s17995_s3 + $0x580] sm:$0xff]  ;;  %v9012_v38 = vpack.c.bf16 %v922_v28, %v890_v24  ;;  %v9028_v17 = vpack.c.bf16 %v924_v35, %v892_v30 }
 0x1a4   : > { %8218 = vmatmul.mubr.msk.f32.gmra.mrb[68].mxu1 %vm1001_vm1, %v10700_v46  ;;  %8234 = vmatmul.mubr.msk.f32.gmra.mrb[84].mxu0 %vm1001_vm1, %v10700_v46 }
 0x1a5   : > { %1776 = vmatprep.mubr.f32.mxu1 %v18007_v6  ;;  %1937 = vmatprep.mubr.f32.mxu0 %v18007_v6 }
 0x1a6   : > { %8983 = vmatpush1.bf16.msra.mxu1 %v8982_v42  ;;  %8999 = vmatpush1.bf16.msra.mxu0 %v8998_v48  ;;  %v988_v42 = vld [vmem:[%s17995_s3 + $0x798] sm:$0xff]  ;;  %v9014_v48 = vpack.c.bf16 %v921_v37, %v889_v36 }
 0x1a7   : > { %8985 = vmatprep.subr.bf16.mxu1 %v8984_v43  ;;  %9001 = vmatprep.subr.bf16.mxu0 %v9000_v23  ;;  %v985_v43 = vld [vmem:[%s17995_s3 + $0x780] sm:$0xff]  ;;  %v9016_v23 = vpack.c.bf16 %v986_v45, %v954_v40  ;;  %v9032_v55 = vpack.c.bf16 %v988_v42, %v956_v41 }
 0x1a8   : > { %8219 = vmatmul.mubr.msk.f32.gmra.mrb[70].mxu1 %vm1001_vm1, %v10731_v61  ;;  %8235 = vmatmul.mubr.msk.f32.gmra.mrb[86].mxu0 %vm1001_vm1, %v10731_v61 }
 0x1a9   : > { %1782 = vmatprep.mubr.f32.mxu1 %v18007_v6  ;;  %1943 = vmatprep.mubr.f32.mxu0 %v18007_v6 }
 0x1aa   : > { %8987 = vmatpush1.bf16.msra.mxu1 %v8986_v53  ;;  %9003 = vmatpush1.bf16.msra.mxu0 %v9002_v1  ;;  %v800_v53 = vld [vmem:[%s17995_s3 + $0x1b8] sm:$0xff]  ;;  %v9018_v1 = vpack.c.bf16 %v985_v43, %v953_v15 }
 0x1ab   : > { %9005 = vmatprep.subr.bf16.mxu1 %v9004_v19  ;;  %9021 = vmatprep.subr.bf16.mxu0 %v9020_v26  ;;  %v9034_v19 = vpack.c.bf16 %v987_v52, %v955_v51  ;;  %v9036_v26 = vpack.c.bf16 %v798_v58, %v766_v56  ;;  %v9052_v2 = vpack.c.bf16 %v800_v53, %v768_v59  ;;  %v765_v58 = vld [vmem:[%s17995_s3 + $0xa0] sm:$0xff] }
 0x1ac   : > { %8220 = vmatmul.mubr.msk.f32.gmra.mrb[72].mxu1 %vm1001_vm1, %v10734_v62  ;;  %8236 = vmatmul.mubr.msk.f32.gmra.mrb[88].mxu0 %vm1001_vm1, %v10734_v62  ;;  %v797_v59 = vld [vmem:[%s17995_s3 + $0x1a0] sm:$0xff] }
 0x1ad   : > { %1788 = vmatprep.mubr.f32.mxu1 %v18007_v6  ;;  %1949 = vmatprep.mubr.f32.mxu0 %v18007_v6 }
 0x1b0   : > { %8221 = vmatmul.mubr.msk.f32.gmra.mrb[74].mxu1 %vm1001_vm1, %v10759_v12  ;;  %8237 = vmatmul.mubr.msk.f32.gmra.mrb[90].mxu0 %vm1001_vm1, %v10759_v12 }
 0x1b1   : > { %1794 = vmatprep.mubr.f32.mxu1 %v18007_v6  ;;  %1955 = vmatprep.mubr.f32.mxu0 %v18007_v6 }
 0x1b4   : > { %8222 = vmatmul.mubr.msk.f32.gmra.mrb[76].mxu1 %vm1001_vm1, %v10764_v22  ;;  %8238 = vmatmul.mubr.msk.f32.gmra.mrb[92].mxu0 %vm1001_vm1, %v10764_v22 }
 0x1b5   : > { %1800 = vmatprep.mubr.f32.mxu1 %v18007_v6  ;;  %1961 = vmatprep.mubr.f32.mxu0 %v18007_v6 }
 0x1b8   : > { %8223 = vmatmul.mubr.msk.f32.gmra.mrb[78].mxu1 %vm1001_vm1, %v10785_v34  ;;  %8239 = vmatmul.mubr.msk.f32.gmra.mrb[94].mxu0 %vm1001_vm1, %v10785_v34 }
 0x1b9   : > { %1806 = vmatprep.mubr.f32.mxu1 %v18007_v6  ;;  %1967 = vmatprep.mubr.f32.mxu0 %v18007_v6 }
 0x1bc   : > { %8224 = vmatmul.mubr.msk.f32.gmra.mrb[80].mxu1 %vm1001_vm1, %v10792_v13  ;;  %8240 = vmatmul.mubr.msk.f32.gmra.mrb[96].mxu0 %vm1001_vm1, %v10792_v13 }
 0x1bd   : > { %1812 = vmatprep.mubr.f32.mxu1 %v18007_v6  ;;  %1973 = vmatprep.mubr.f32.mxu0 %v18007_v6 }
 0x1c0   : > { %8225 = vmatmul.mubr.msk.f32.gmra.mrb[82].mxu1 %vm1001_vm1, %v10813_v47  ;;  %8241 = vmatmul.mubr.msk.f32.gmra.mrb[98].mxu0 %vm1001_vm1, %v10813_v47 }
 0x1c1   : > { %1818 = vmatprep.mubr.f32.mxu1 %v18007_v6  ;;  %1979 = vmatprep.mubr.f32.mxu0 %v18007_v6 }
 0x1c4   : > { %8226 = vmatmul.mubr.msk.f32.gmra.mrb[84].mxu1 %vm1001_vm1, %v10820_v50  ;;  %8242 = vmatmul.mubr.msk.f32.gmra.mrb[100].mxu0 %vm1001_vm1, %v10820_v50 }
 0x1c5   : > { %1824 = vmatprep.mubr.f32.mxu1 %v18007_v6  ;;  %1985 = vmatprep.mubr.f32.mxu0 %v18007_v6 }
 0x1c8   : > { %8227 = vmatmul.mubr.msk.f32.gmra.mrb[86].mxu1 %vm1001_vm1, %v10841_v54  ;;  %8243 = vmatmul.mubr.msk.f32.gmra.mrb[102].mxu0 %vm1001_vm1, %v10841_v54 }
 0x1c9   : > { %1830 = vmatprep.mubr.f32.mxu1 %v18007_v6  ;;  %1991 = vmatprep.mubr.f32.mxu0 %v18007_v6 }
 0x1cc   : > { %8228 = vmatmul.mubr.msk.f32.gmra.mrb[88].mxu1 %vm1001_vm1, %v10847_v57  ;;  %8244 = vmatmul.mubr.msk.f32.gmra.mrb[104].mxu0 %vm1001_vm1, %v10847_v57 }
 0x1cd   : > { %1836 = vmatprep.mubr.f32.mxu1 %v18007_v6  ;;  %1997 = vmatprep.mubr.f32.mxu0 %v18007_v6 }
 0x1d0   : > { %8229 = vmatmul.mubr.msk.f32.gmra.mrb[90].mxu1 %vm1001_vm1, %v10857_v60  ;;  %8245 = vmatmul.mubr.msk.f32.gmra.mrb[106].mxu0 %vm1001_vm1, %v10857_v60 }
 0x1d1   : > { %1842 = vmatprep.mubr.f32.mxu1 %v18007_v6  ;;  %2003 = vmatprep.mubr.f32.mxu0 %v18007_v6 }
 0x1d4   : > { %8230 = vmatmul.mubr.msk.f32.gmra.mrb[92].mxu1 %vm1001_vm1, %v10864_v0  ;;  %8246 = vmatmul.mubr.msk.f32.gmra.mrb[108].mxu0 %vm1001_vm1, %v10864_v0 }
 0x1d5   : > { %1848 = vmatprep.mubr.f32.mxu1 %v18007_v6  ;;  %2009 = vmatprep.mubr.f32.mxu0 %v18007_v6 }
 0x1d8   : > { %8231 = vmatmul.mubr.msk.f32.gmra.mrb[94].mxu1 %vm1001_vm1, %v10873_v63  ;;  %8247 = vmatmul.mubr.msk.f32.gmra.mrb[110].mxu0 %vm1001_vm1, %v10873_v63 }
 0x1d9   : > { %2080 = vmatprep.mubr.f32.mxu1 %v18007_v6  ;;  %2241 = vmatprep.mubr.f32.mxu0 %v18007_v6 }
 0x1dc   : > { %8248 = vmatmul.mubr.msk.f32.vlgmr.msra.gmra.mrb[96].mxu1 %vm1001_vm1, %v10671_v25  ;;  %8264 = vmatmul.mubr.msk.f32.vlgmr.msra.gmra.mrb[112].mxu0 %vm1001_vm1, %v10671_v25 }
 0x1dd   : > { %9007 = vmatpush1.bf16.msra.mxu1 %v9006_v9  ;;  %2086 = vmatprep.mubr.f32.mxu1 %v18007_v6 }
 0x1de   : > { %2247 = vmatprep.mubr.f32.mxu0 %v18007_v6  ;;  %9023 = vmatpush1.bf16.msra.mxu0 %v9022_v10 }
 0x1df   : > { %9009 = vmatprep.subr.bf16.mxu1 %v9008_v16  ;;  %9025 = vmatprep.subr.bf16.mxu0 %v9024_v18 }
 0x1e0   : > { %8249 = vmatmul.mubr.msk.f32.gmra.mrb[98].mxu1 %vm1001_vm1, %v10697_v44  ;;  %8265 = vmatmul.mubr.msk.f32.gmra.mrb[114].mxu0 %vm1001_vm1, %v10697_v44 }
 0x1e1   : > { %2092 = vmatprep.mubr.f32.mxu1 %v18007_v6  ;;  %2253 = vmatprep.mubr.f32.mxu0 %v18007_v6 }
 0x1e2   : > { %9011 = vmatpush1.bf16.msra.mxu1 %v9010_v31  ;;  %9027 = vmatpush1.bf16.msra.mxu0 %v9026_v32 }
 0x1e3   : > { %9013 = vmatprep.subr.bf16.mxu1 %v9012_v38  ;;  %9029 = vmatprep.subr.bf16.mxu0 %v9028_v17 }
 0x1e4   : > { %8250 = vmatmul.mubr.msk.f32.gmra.mrb[100].mxu1 %vm1001_vm1, %v10700_v46  ;;  %8266 = vmatmul.mubr.msk.f32.gmra.mrb[116].mxu0 %vm1001_vm1, %v10700_v46 }
 0x1e5   : > { %2098 = vmatprep.mubr.f32.mxu1 %v18007_v6  ;;  %2259 = vmatprep.mubr.f32.mxu0 %v18007_v6 }
 0x1e6   : > { %9015 = vmatpush1.bf16.msra.mxu1 %v9014_v48  ;;  %9031 = vmatpush1.bf16.msra.mxu0 %v9030_v49 }
 0x1e7   : > { %9017 = vmatprep.subr.bf16.mxu1 %v9016_v23  ;;  %9033 = vmatprep.subr.bf16.mxu0 %v9032_v55 }
 0x1e8   : > { %8251 = vmatmul.mubr.msk.f32.gmra.mrb[102].mxu1 %vm1001_vm1, %v10731_v61  ;;  %8267 = vmatmul.mubr.msk.f32.gmra.mrb[118].mxu0 %vm1001_vm1, %v10731_v61 }
 0x1e9   : > { %2104 = vmatprep.mubr.f32.mxu1 %v18007_v6  ;;  %2265 = vmatprep.mubr.f32.mxu0 %v18007_v6 }
 0x1ea   : > { %9019 = vmatpush1.bf16.msra.mxu1 %v9018_v1  ;;  %9035 = vmatpush1.bf16.msra.mxu0 %v9034_v19  ;;  %v767_v19 = vld [vmem:[%s17995_s3 + $0xb0] sm:$0xff] }
 0x1eb   : > { %9037 = vmatprep.subr.bf16.mxu1 %v9036_v26  ;;  %9053 = vmatprep.subr.bf16.mxu0 %v9052_v2  ;;  %v799_v26 = vld [vmem:[%s17995_s3 + $0x1b0] sm:$0xff]  ;;  %v830_v2 = vld [vmem:[%s17995_s3 + $0x2a8] sm:$0xff] }
 0x1ec   : > { %8252 = vmatmul.mubr.msk.f32.gmra.mrb[104].mxu1 %vm1001_vm1, %v10734_v62  ;;  %8268 = vmatmul.mubr.msk.f32.gmra.mrb[120].mxu0 %vm1001_vm1, %v10734_v62 }
 0x1ed   : > { %2110 = vmatprep.mubr.f32.mxu1 %v18007_v6  ;;  %2271 = vmatprep.mubr.f32.mxu0 %v18007_v6 }
 0x1ee   : > { %v11439_v3 = vpop.f32.mrb[0].mxu1 }
 0x1ef   : > { %18435 = vst [vmem:[#allocation23_spill] sm:$0xff] %v11439_v3  ;;  %v11441_v4 = vpop.f32.mrb[16].mxu0  ;;  %v11443_v21 = vpop.f32.mrb[1].mxu1 }
 0x1f0   : > { %18436 = vst [vmem:[#allocation24_spill] sm:$0xff] %v11441_v4  ;;  %18437 = vst [vmem:[#allocation25_spill] sm:$0xff] %v11443_v21  ;;  %v11445_v29 = vpop.f32.mrb[17].mxu0  ;;  %8253 = vmatmul.mubr.msk.f32.gmra.mrb[106].mxu1 %vm1001_vm1, %v10759_v12  ;;  %8269 = vmatmul.mubr.msk.f32.gmra.mrb[122].mxu0 %vm1001_vm1, %v10759_v12 }
 0x1f1   : > { %18438 = vst [vmem:[#allocation26_spill] sm:$0xff] %v11445_v29  ;;  %2116 = vmatprep.mubr.f32.mxu1 %v18007_v6  ;;  %2277 = vmatprep.mubr.f32.mxu0 %v18007_v6 }
 0x1f3   : > { %v11453_v5 = vpop.f32.mrb[2].mxu1  ;;  %v11455_v7 = vpop.f32.mrb[18].mxu0 }
 0x1f4   : > { %18439 = vst [vmem:[#allocation27_spill] sm:$0xff] %v11453_v5  ;;  %18440 = vst [vmem:[#allocation28_spill] sm:$0xff] %v11455_v7  ;;  %v11457_v8 = vpop.f32.mrb[3].mxu1  ;;  %v11459_v9 = vpop.f32.mrb[19].mxu0  ;;  %8254 = vmatmul.mubr.msk.f32.gmra.mrb[108].mxu1 %vm1001_vm1, %v10764_v22  ;;  %8270 = vmatmul.mubr.msk.f32.gmra.mrb[124].mxu0 %vm1001_vm1, %v10764_v22 }
 0x1f5   : > { %18441 = vst [vmem:[#allocation29_spill] sm:$0xff] %v11457_v8  ;;  %18442 = vst [vmem:[#allocation30_spill] sm:$0xff] %v11459_v9  ;;  %2122 = vmatprep.mubr.f32.mxu1 %v18007_v6  ;;  %2283 = vmatprep.mubr.f32.mxu0 %v18007_v6 }
 0x1f7   : > { %v11467_v10 = vpop.f32.mrb[4].mxu1  ;;  %v11469_v11 = vpop.f32.mrb[20].mxu0 }
 0x1f8   : > { %18443 = vst [vmem:[#allocation31_spill] sm:$0xff] %v11467_v10  ;;  %18444 = vst [vmem:[#allocation32_spill] sm:$0xff] %v11469_v11  ;;  %v11471_v14 = vpop.f32.mrb[5].mxu1  ;;  %v11473_v16 = vpop.f32.mrb[21].mxu0  ;;  %8255 = vmatmul.mubr.msk.f32.gmra.mrb[110].mxu1 %vm1001_vm1, %v10785_v34  ;;  %8271 = vmatmul.mubr.msk.f32.gmra.mrb[126].mxu0 %vm1001_vm1, %v10785_v34 }
 0x1f9   : > { %18445 = vst [vmem:[#allocation33_spill] sm:$0xff] %v11471_v14  ;;  %18446 = vst [vmem:[#allocation34_spill] sm:$0xff] %v11473_v16  ;;  %2128 = vmatprep.mubr.f32.mxu1 %v18007_v6  ;;  %2289 = vmatprep.mubr.f32.mxu0 %v18007_v6 }
 0x1fb   : > { %v11481_v18 = vpop.f32.mrb[6].mxu1  ;;  %v11483_v20 = vpop.f32.mrb[22].mxu0 }
 0x1fc   : > { %18447 = vst [vmem:[#allocation35_spill] sm:$0xff] %v11481_v18  ;;  %18448 = vst [vmem:[#allocation36_spill] sm:$0xff] %v11483_v20  ;;  %v11485_v27 = vpop.f32.mrb[7].mxu1  ;;  %v11487_v24 = vpop.f32.mrb[23].mxu0  ;;  %8256 = vmatmul.mubr.msk.f32.gmra.mrb[112].mxu1 %vm1001_vm1, %v10792_v13  ;;  %8272 = vmatmul.mubr.msk.f32.gmra.mrb[128].mxu0 %vm1001_vm1, %v10792_v13 }
 0x1fd   : > { %18449 = vst [vmem:[#allocation37_spill] sm:$0xff] %v11485_v27  ;;  %18450 = vst [vmem:[#allocation38_spill] sm:$0xff] %v11487_v24  ;;  %2134 = vmatprep.mubr.f32.mxu1 %v18007_v6  ;;  %2295 = vmatprep.mubr.f32.mxu0 %v18007_v6 }
 0x1ff   : > { %v11495_v28 = vpop.f32.mrb[8].mxu1  ;;  %v11497_v30 = vpop.f32.mrb[24].mxu0 }
 0x200   : > { %18451 = vst [vmem:[#allocation39_spill] sm:$0xff] %v11495_v28  ;;  %18452 = vst [vmem:[#allocation40_spill] sm:$0xff] %v11497_v30  ;;  %v11499_v35 = vpop.f32.mrb[9].mxu1  ;;  %v11501_v31 = vpop.f32.mrb[25].mxu0  ;;  %8257 = vmatmul.mubr.msk.f32.gmra.mrb[114].mxu1 %vm1001_vm1, %v10813_v47  ;;  %8273 = vmatmul.mubr.msk.f32.gmra.mrb[130].mxu0 %vm1001_vm1, %v10813_v47 }
 0x201   : > { %18453 = vst [vmem:[#allocation41_spill] sm:$0xff] %v11499_v35  ;;  %18454 = vst [vmem:[#allocation42_spill] sm:$0xff] %v11501_v31  ;;  %2140 = vmatprep.mubr.f32.mxu1 %v18007_v6  ;;  %2301 = vmatprep.mubr.f32.mxu0 %v18007_v6  ;;  %v839_v31 = vld [vmem:[%s17995_s3 + $0x2f0] sm:$0xff] }
 0x203   : > { %v11509_v32 = vpop.f32.mrb[10].mxu1  ;;  %v11511_v36 = vpop.f32.mrb[26].mxu0 }
 0x204   : > { %18455 = vst [vmem:[#allocation43_spill] sm:$0xff] %v11509_v32  ;;  %18456 = vst [vmem:[#allocation44_spill] sm:$0xff] %v11511_v36  ;;  %v11513_v37 = vpop.f32.mrb[11].mxu1  ;;  %v11515_v38 = vpop.f32.mrb[27].mxu0  ;;  %8258 = vmatmul.mubr.msk.f32.gmra.mrb[116].mxu1 %vm1001_vm1, %v10820_v50  ;;  %8274 = vmatmul.mubr.msk.f32.gmra.mrb[132].mxu0 %vm1001_vm1, %v10820_v50  ;;  %v837_v36 = vld [vmem:[%s17995_s3 + $0x2e0] sm:$0xff] }
 0x205   : > { %18457 = vst [vmem:[#allocation45_spill] sm:$0xff] %v11513_v37  ;;  %18458 = vst [vmem:[#allocation46_spill] sm:$0xff] %v11515_v38  ;;  %2146 = vmatprep.mubr.f32.mxu1 %v18007_v6  ;;  %2307 = vmatprep.mubr.f32.mxu0 %v18007_v6 }
 0x207   : > { %v11523_v17 = vpop.f32.mrb[12].mxu1  ;;  %v11525_v33 = vpop.f32.mrb[28].mxu0 }
 0x208   : > { %18459 = vst [vmem:[#allocation47_spill] sm:$0xff] %v11523_v17  ;;  %18460 = vst [vmem:[#allocation48_spill] sm:$0xff] %v11525_v33  ;;  %v11527_v39 = vpop.f32.mrb[13].mxu1  ;;  %v11529_v40 = vpop.f32.mrb[29].mxu0  ;;  %8259 = vmatmul.mubr.msk.f32.gmra.mrb[118].mxu1 %vm1001_vm1, %v10841_v54  ;;  %8275 = vmatmul.mubr.msk.f32.gmra.mrb[134].mxu0 %vm1001_vm1, %v10841_v54  ;;  %v838_v17 = vld [vmem:[%s17995_s3 + $0x2e8] sm:$0xff] }
 0x209   : > { %18461 = vst [vmem:[#allocation49_spill] sm:$0xff] %v11527_v39  ;;  %18462 = vst [vmem:[#allocation50_spill] sm:$0xff] %v11529_v40  ;;  %2152 = vmatprep.mubr.f32.mxu1 %v18007_v6  ;;  %2313 = vmatprep.mubr.f32.mxu0 %v18007_v6 }
 0x20b   : > { %v11537_v45 = vpop.f32.mrb[14].mxu1  ;;  %v11539_v41 = vpop.f32.mrb[30].mxu0 }
 0x20c   : > { %18463 = vst [vmem:[#allocation51_spill] sm:$0xff] %v11537_v45  ;;  %18464 = vst [vmem:[#allocation52_spill] sm:$0xff] %v11539_v41  ;;  %v11541_v42 = vpop.f32.mrb[15].mxu1  ;;  %v11543_v48 = vpop.f32.mrb[31].mxu0  ;;  %8260 = vmatmul.mubr.msk.f32.gmra.mrb[120].mxu1 %vm1001_vm1, %v10847_v57  ;;  %8276 = vmatmul.mubr.msk.f32.gmra.mrb[136].mxu0 %vm1001_vm1, %v10847_v57 }
 0x20d   : > { %18465 = vst [vmem:[#allocation53_spill] sm:$0xff] %v11541_v42  ;;  %18466 = vst [vmem:[#allocation54_spill] sm:$0xff] %v11543_v48  ;;  %2158 = vmatprep.mubr.f32.mxu1 %v18007_v6  ;;  %2319 = vmatprep.mubr.f32.mxu0 %v18007_v6  ;;  %v831_v42 = vld [vmem:[%s17995_s3 + $0x2b0] sm:$0xff] }
 0x20f   : > { %v11551_v49 = vpop.f32.mrb[16].mxu1  ;;  %v11553_v15 = vpop.f32.mrb[32].mxu0 }
 0x210   : > { %18467 = vst [vmem:[#allocation55_spill] sm:$0xff] %v11551_v49  ;;  %18468 = vst [vmem:[#allocation56_spill] sm:$0xff] %v11553_v15  ;;  %v11555_v43 = vpop.f32.mrb[17].mxu1  ;;  %v11557_v23 = vpop.f32.mrb[33].mxu0  ;;  %8261 = vmatmul.mubr.msk.f32.gmra.mrb[122].mxu1 %vm1001_vm1, %v10857_v60  ;;  %8277 = vmatmul.mubr.msk.f32.gmra.mrb[138].mxu0 %vm1001_vm1, %v10857_v60 }
 0x211   : > { %18469 = vst [vmem:[#allocation57_spill] sm:$0xff] %v11555_v43  ;;  %18470 = vst [vmem:[#allocation58_spill] sm:$0xff] %v11557_v23  ;;  %2164 = vmatprep.mubr.f32.mxu1 %v18007_v6  ;;  %2325 = vmatprep.mubr.f32.mxu0 %v18007_v6  ;;  %v861_v23 = vld [vmem:[%s17995_s3 + $0x3a0] sm:$0xff] }
 0x213   : > { %v11565_v55 = vpop.f32.mrb[18].mxu1  ;;  %v11567_v51 = vpop.f32.mrb[34].mxu0 }
 0x214   : > { %18471 = vst [vmem:[#allocation59_spill] sm:$0xff] %v11565_v55  ;;  %18472 = vst [vmem:[#allocation60_spill] sm:$0xff] %v11567_v51  ;;  %v11569_v52 = vpop.f32.mrb[19].mxu1  ;;  %v11571_v56 = vpop.f32.mrb[35].mxu0  ;;  %8262 = vmatmul.mubr.msk.f32.gmra.mrb[124].mxu1 %vm1001_vm1, %v10864_v0  ;;  %8278 = vmatmul.mubr.msk.f32.gmra.mrb[140].mxu0 %vm1001_vm1, %v10864_v0  ;;  %v9054_v51 = vpack.c.bf16 %v799_v26, %v767_v19  ;;  %v829_v55 = vld [vmem:[%s17995_s3 + $0x2a0] sm:$0xff] }
 0x215   : > { %18473 = vst [vmem:[#allocation61_spill] sm:$0xff] %v11569_v52  ;;  %18474 = vst [vmem:[#allocation62_spill] sm:$0xff] %v11571_v56  ;;  %2170 = vmatprep.mubr.f32.mxu1 %v18007_v6  ;;  %2331 = vmatprep.mubr.f32.mxu0 %v18007_v6  ;;  %v18479_v52 = vmov 0.0  }
 0x217   : > { %v11585_v53 = vpop.f32.mrb[20].mxu1  ;;  %v11587_v1 = vpop.f32.mrb[36].mxu0 }
 0x218   : > { %18475 = vst [vmem:[#allocation63_spill] sm:$0xff] %v11585_v53  ;;  %18476 = vst [vmem:[#allocation64_spill] sm:$0xff] %v11587_v1  ;;  %v11598_v6 = vpop.f32.mrb[21].mxu1  ;;  %v11600_v56 = vpop.f32.mrb[37].mxu0  ;;  %8263 = vmatmul.mubr.msk.f32.gmra.mrb[126].mxu1 %vm1001_vm1, %v10873_v63  ;;  %8279 = vmatmul.mubr.msk.f32.gmra.mrb[142].mxu0 %vm1001_vm1, %v10873_v63  ;;  %v862_v1 = vld [vmem:[%s17995_s3 + $0x3a8] sm:$0xff]  ;;  %v832_v53 = vld [vmem:[%s17995_s3 + $0x2b8] sm:$0xff] }
 0x219   : > { %18477 = vst [vmem:[#allocation65_spill] sm:$0xff] %v11598_v6  ;;  %18478 = vst [vmem:[#allocation66_spill] sm:$0xff] %v11600_v56  ;;  %v864_v6 = vld [vmem:[%s17995_s3 + $0x3b8] sm:$0xff]  ;;  %2402 = vmatprep.mubr.f32.mxu1 %v18479_v52  ;;  %2563 = vmatprep.mubr.f32.mxu0 %v18479_v52  ;;  %v9038_v56 = vpack.c.bf16 %v797_v59, %v765_v58  ;;  %v9040_v49 = vpack.c.bf16 %v862_v1, %v830_v2  ;;  %v863_v58 = vld [vmem:[%s17995_s3 + $0x3b0] sm:$0xff] }
 0x21a   : > { %v9056_v48 = vpack.c.bf16 %v864_v6, %v832_v53  ;;  %v894_v59 = vld [vmem:[%s17995_s3 + $0x4a8] sm:$0xff]  ;;  %v896_v53 = vld [vmem:[%s17995_s3 + $0x4b8] sm:$0xff]  ;;  %v9042_v2 = vpack.c.bf16 %v861_v23, %v829_v55  ;;  %v927_v23 = vld [vmem:[%s17995_s3 + $0x5b0] sm:$0xff] }
 0x21b   : > { %v11623_v43 = vpop.f32.mrb[22].mxu1  ;;  %v11625_v15 = vpop.f32.mrb[38].mxu0  ;;  %v926_v6 = vld [vmem:[%s17995_s3 + $0x5a8] sm:$0xff]  ;;  %v928_v1 = vld [vmem:[%s17995_s3 + $0x5b8] sm:$0xff] }
 0x21c   : > { %18480 = vst [vmem:[#allocation67_spill] sm:$0xff] %v11623_v43  ;;  %18481 = vst [vmem:[#allocation68_spill] sm:$0xff] %v11625_v15  ;;  %v11636_v19 = vpop.f32.mrb[23].mxu1  ;;  %v11638_v26 = vpop.f32.mrb[39].mxu0  ;;  %8280 = vmatmul.mubr.msk.f32.vlgmr.msra.gmra.mrb[128].mxu1 %vm1001_vm1, %v10671_v25  ;;  %8296 = vmatmul.mubr.msk.f32.vlgmr.msra.gmra.mrb[144].mxu0 %vm1001_vm1, %v10671_v25  ;;  %v925_v15 = vld [vmem:[%s17995_s3 + $0x5a0] sm:$0xff]  ;;  %v9060_v45 = vpack.c.bf16 %v928_v1, %v896_v53  ;;  %v958_v55 = vld [vmem:[%s17995_s3 + $0x6a8] sm:$0xff] }
 0x21d   : > { %18482 = vst [vmem:[#allocation69_spill] sm:$0xff] %v11636_v19  ;;  %18483 = vst [vmem:[#allocation70_spill] sm:$0xff] %v11638_v26  ;;  %9039 = vmatpush1.bf16.msra.mxu1 %v9038_v56  ;;  %2408 = vmatprep.mubr.f32.mxu1 %v18479_v52  ;;  %v9058_v26 = vpack.c.bf16 %v863_v58, %v831_v42  ;;  %v893_v19 = vld [vmem:[%s17995_s3 + $0x4a0] sm:$0xff]  ;;  %v9044_v56 = vpack.c.bf16 %v926_v6, %v894_v59  ;;  %v895_v42 = vld [vmem:[%s17995_s3 + $0x4b0] sm:$0xff] }
 0x21e   : > { %2569 = vmatprep.mubr.f32.mxu0 %v18479_v52  ;;  %9055 = vmatpush1.bf16.msra.mxu0 %v9054_v51  ;;  %v992_v59 = vld [vmem:[%s17995_s3 + $0x7b8] sm:$0xff]  ;;  %v9046_v6 = vpack.c.bf16 %v925_v15, %v893_v19  ;;  %v9062_v53 = vpack.c.bf16 %v927_v23, %v895_v42  ;;  %v957_v1 = vld [vmem:[%s17995_s3 + $0x6a0] sm:$0xff]  ;;  %v959_v15 = vld [vmem:[%s17995_s3 + $0x6b0] sm:$0xff] }
 0x21f   : > { %v11661_v43 = vpop.f32.mrb[24].mxu1  ;;  %v11663_v41 = vpop.f32.mrb[40].mxu0  ;;  %9041 = vmatprep.subr.bf16.mxu1 %v9040_v49  ;;  %9057 = vmatprep.subr.bf16.mxu0 %v9056_v48  ;;  %v990_v48 = vld [vmem:[%s17995_s3 + $0x7a8] sm:$0xff]  ;;  %v960_v49 = vld [vmem:[%s17995_s3 + $0x6b8] sm:$0xff]  ;;  %v991_v19 = vld [vmem:[%s17995_s3 + $0x7b0] sm:$0xff] }
 0x220   : > { %18484 = vst [vmem:[#allocation71_spill] sm:$0xff] %v11661_v43  ;;  %18485 = vst [vmem:[#allocation72_spill] sm:$0xff] %v11663_v41  ;;  %v11674_v51 = vpop.f32.mrb[25].mxu1  ;;  %v11676_v58 = vpop.f32.mrb[41].mxu0  ;;  %8281 = vmatmul.mubr.msk.f32.gmra.mrb[130].mxu1 %vm1001_vm1, %v10697_v44  ;;  %8297 = vmatmul.mubr.msk.f32.gmra.mrb[146].mxu0 %vm1001_vm1, %v10697_v44  ;;  %v9048_v43 = vpack.c.bf16 %v990_v48, %v958_v55  ;;  %v9064_v40 = vpack.c.bf16 %v992_v59, %v960_v49  ;;  %v804_v23 = vld [vmem:[%s17995_s3 + $0x1d8] sm:$0xff] }
 0x221   : > { %18486 = vst [vmem:[#allocation73_spill] sm:$0xff] %v11674_v51  ;;  %18487 = vst [vmem:[#allocation74_spill] sm:$0xff] %v11676_v58  ;;  %2414 = vmatprep.mubr.f32.mxu1 %v18479_v52  ;;  %2575 = vmatprep.mubr.f32.mxu0 %v18479_v52  ;;  %v989_v58 = vld [vmem:[%s17995_s3 + $0x7a0] sm:$0xff]  ;;  %v9066_v48 = vpack.c.bf16 %v991_v19, %v959_v15 }
 0x222   : > { %9043 = vmatpush1.bf16.msra.mxu1 %v9042_v2  ;;  %9059 = vmatpush1.bf16.msra.mxu0 %v9058_v26  ;;  %v770_v26 = vld [vmem:[%s17995_s3 + $0xc8] sm:$0xff]  ;;  %v9050_v55 = vpack.c.bf16 %v989_v58, %v957_v1 }
 0x223   : > { %v11699_v51 = vpop.f32.mrb[26].mxu1  ;;  %v11701_v41 = vpop.f32.mrb[42].mxu0  ;;  %9045 = vmatprep.subr.bf16.mxu1 %v9044_v56  ;;  %9061 = vmatprep.subr.bf16.mxu0 %v9060_v45  ;;  %v802_v45 = vld [vmem:[%s17995_s3 + $0x1c8] sm:$0xff]  ;;  %v772_v56 = vld [vmem:[%s17995_s3 + $0xd8] sm:$0xff] }
 0x224   : > { %18488 = vst [vmem:[#allocation75_spill] sm:$0xff] %v11699_v51  ;;  %18489 = vst [vmem:[#allocation76_spill] sm:$0xff] %v11701_v41  ;;  %v11712_v2 = vpop.f32.mrb[27].mxu1  ;;  %v11714_v42 = vpop.f32.mrb[43].mxu0  ;;  %8282 = vmatmul.mubr.msk.f32.gmra.mrb[132].mxu1 %vm1001_vm1, %v10700_v46  ;;  %8298 = vmatmul.mubr.msk.f32.gmra.mrb[148].mxu0 %vm1001_vm1, %v10700_v46 }
 0x225   : > { %18490 = vst [vmem:[#allocation77_spill] sm:$0xff] %v11712_v2  ;;  %18491 = vst [vmem:[#allocation78_spill] sm:$0xff] %v11714_v42  ;;  %2420 = vmatprep.mubr.f32.mxu1 %v18479_v52  ;;  %2581 = vmatprep.mubr.f32.mxu0 %v18479_v52  ;;  %v9068_v42 = vpack.c.bf16 %v802_v45, %v770_v26  ;;  %v9084_v2 = vpack.c.bf16 %v804_v23, %v772_v56 }
 0x226   : > { %9047 = vmatpush1.bf16.msra.mxu1 %v9046_v6  ;;  %9063 = vmatpush1.bf16.msra.mxu0 %v9062_v53 }
 0x227   : > { %v11731_v49 = vpop.f32.mrb[28].mxu1  ;;  %v11733_v59 = vpop.f32.mrb[44].mxu0  ;;  %9049 = vmatprep.subr.bf16.mxu1 %v9048_v43  ;;  %9065 = vmatprep.subr.bf16.mxu0 %v9064_v40 }
 0x228   : > { %18492 = vst [vmem:[#allocation79_spill] sm:$0xff] %v11731_v49  ;;  %18493 = vst [vmem:[#allocation80_spill] sm:$0xff] %v11733_v59  ;;  %v11735_v41 = vpop.f32.mrb[29].mxu1  ;;  %v11737_v51 = vpop.f32.mrb[45].mxu0  ;;  %8283 = vmatmul.mubr.msk.f32.gmra.mrb[134].mxu1 %vm1001_vm1, %v10731_v61  ;;  %8299 = vmatmul.mubr.msk.f32.gmra.mrb[150].mxu0 %vm1001_vm1, %v10731_v61 }
 0x229   : > { %18494 = vst [vmem:[#allocation81_spill] sm:$0xff] %v11735_v41  ;;  %18495 = vst [vmem:[#allocation82_spill] sm:$0xff] %v11737_v51  ;;  %2426 = vmatprep.mubr.f32.mxu1 %v18479_v52  ;;  %2587 = vmatprep.mubr.f32.mxu0 %v18479_v52  ;;  %v835_v51 = vld [vmem:[%s17995_s3 + $0x2d0] sm:$0xff] }
 0x22a   : > { %9051 = vmatpush1.bf16.msra.mxu1 %v9050_v55  ;;  %9067 = vmatpush1.bf16.msra.mxu0 %v9066_v48 }
 0x22b   : > { %v11745_v43 = vpop.f32.mrb[30].mxu1  ;;  %v11747_v40 = vpop.f32.mrb[46].mxu0  ;;  %9069 = vmatprep.subr.bf16.mxu1 %v9068_v42  ;;  %9085 = vmatprep.subr.bf16.mxu0 %v9084_v2 }
 0x22c   : > { %18496 = vst [vmem:[#allocation83_spill] sm:$0xff] %v11745_v43  ;;  %18497 = vst [vmem:[#allocation84_spill] sm:$0xff] %v11747_v40  ;;  %v11749_v58 = vpop.f32.mrb[31].mxu1  ;;  %v11751_v6 = vpop.f32.mrb[47].mxu0  ;;  %8284 = vmatmul.mubr.msk.f32.gmra.mrb[136].mxu1 %vm1001_vm1, %v10734_v62  ;;  %8300 = vmatmul.mubr.msk.f32.gmra.mrb[152].mxu0 %vm1001_vm1, %v10734_v62 }
 0x22d   : > { %18498 = vst [vmem:[#allocation85_spill] sm:$0xff] %v11749_v58  ;;  %18499 = vst [vmem:[#allocation86_spill] sm:$0xff] %v11751_v6  ;;  %2432 = vmatprep.mubr.f32.mxu1 %v18479_v52  ;;  %2593 = vmatprep.mubr.f32.mxu0 %v18479_v52 }
 0x22f   : > { %v11759_v53 = vpop.f32.mrb[32].mxu1  ;;  %v11761_v1 = vpop.f32.mrb[48].mxu0 }
 0x230   : > { %18500 = vst [vmem:[#allocation87_spill] sm:$0xff] %v11759_v53  ;;  %18501 = vst [vmem:[#allocation88_spill] sm:$0xff] %v11761_v1  ;;  %v11763_v15 = vpop.f32.mrb[33].mxu1  ;;  %v11765_v19 = vpop.f32.mrb[49].mxu0  ;;  %8285 = vmatmul.mubr.msk.f32.gmra.mrb[138].mxu1 %vm1001_vm1, %v10759_v12  ;;  %8301 = vmatmul.mubr.msk.f32.gmra.mrb[154].mxu0 %vm1001_vm1, %v10759_v12  ;;  %v833_v1 = vld [vmem:[%s17995_s3 + $0x2c0] sm:$0xff] }
 0x231   : > { %18502 = vst [vmem:[#allocation89_spill] sm:$0xff] %v11763_v15  ;;  %18503 = vst [vmem:[#allocation90_spill] sm:$0xff] %v11765_v19  ;;  %2438 = vmatprep.mubr.f32.mxu1 %v18479_v52  ;;  %2599 = vmatprep.mubr.f32.mxu0 %v18479_v52  ;;  %v865_v53 = vld [vmem:[%s17995_s3 + $0x3c0] sm:$0xff] }
 0x233   : > { %v11773_v26 = vpop.f32.mrb[34].mxu1  ;;  %v11775_v2 = vpop.f32.mrb[50].mxu0 }
 0x234   : > { %18504 = vst [vmem:[#allocation91_spill] sm:$0xff] %v11773_v26  ;;  %18505 = vst [vmem:[#allocation92_spill] sm:$0xff] %v11775_v2  ;;  %v11777_v42 = vpop.f32.mrb[35].mxu1  ;;  %v11779_v45 = vpop.f32.mrb[51].mxu0  ;;  %8286 = vmatmul.mubr.msk.f32.gmra.mrb[140].mxu1 %vm1001_vm1, %v10764_v22  ;;  %8302 = vmatmul.mubr.msk.f32.gmra.mrb[156].mxu0 %vm1001_vm1, %v10764_v22  ;;  %v834_v2 = vld [vmem:[%s17995_s3 + $0x2c8] sm:$0xff] }
 0x235   : > { %18506 = vst [vmem:[#allocation93_spill] sm:$0xff] %v11777_v42  ;;  %18507 = vst [vmem:[#allocation94_spill] sm:$0xff] %v11779_v45  ;;  %2444 = vmatprep.mubr.f32.mxu1 %v18479_v52  ;;  %2605 = vmatprep.mubr.f32.mxu0 %v18479_v52 }
 0x237   : > { %v11787_v56 = vpop.f32.mrb[36].mxu1  ;;  %v11789_v23 = vpop.f32.mrb[52].mxu0 }
 0x238   : > { %18508 = vst [vmem:[#allocation95_spill] sm:$0xff] %v11787_v56  ;;  %18509 = vst [vmem:[#allocation96_spill] sm:$0xff] %v11789_v23  ;;  %v11791_v55 = vpop.f32.mrb[37].mxu1  ;;  %v11793_v48 = vpop.f32.mrb[53].mxu0  ;;  %8287 = vmatmul.mubr.msk.f32.gmra.mrb[142].mxu1 %vm1001_vm1, %v10785_v34  ;;  %8303 = vmatmul.mubr.msk.f32.gmra.mrb[158].mxu0 %vm1001_vm1, %v10785_v34 }
 0x239   : > { %18510 = vst [vmem:[#allocation97_spill] sm:$0xff] %v11791_v55  ;;  %18511 = vst [vmem:[#allocation98_spill] sm:$0xff] %v11793_v48  ;;  %2450 = vmatprep.mubr.f32.mxu1 %v18479_v52  ;;  %2611 = vmatprep.mubr.f32.mxu0 %v18479_v52 }
 0x23b   : > { %v11801_v45 = vpop.f32.mrb[38].mxu1  ;;  %v11803_v42 = vpop.f32.mrb[54].mxu0 }
 0x23c   : > { %18512 = vst [vmem:[#allocation99_spill] sm:$0xff] %v11801_v45  ;;  %18513 = vst [vmem:[#allocation100_spill] sm:$0xff] %v11803_v42  ;;  %v11805_v56 = vpop.f32.mrb[39].mxu1  ;;  %v11807_v23 = vpop.f32.mrb[55].mxu0  ;;  %8288 = vmatmul.mubr.msk.f32.gmra.mrb[144].mxu1 %vm1001_vm1, %v10792_v13  ;;  %8304 = vmatmul.mubr.msk.f32.gmra.mrb[160].mxu0 %vm1001_vm1, %v10792_v13 }
 0x23d   : > { %18514 = vst [vmem:[#allocation101_spill] sm:$0xff] %v11805_v56  ;;  %18515 = vst [vmem:[#allocation102_spill] sm:$0xff] %v11807_v23  ;;  %2456 = vmatprep.mubr.f32.mxu1 %v18479_v52  ;;  %2617 = vmatprep.mubr.f32.mxu0 %v18479_v52 }
 0x23f   : > { %v11815_v48 = vpop.f32.mrb[40].mxu1  ;;  %v11817_v55 = vpop.f32.mrb[56].mxu0 }
 0x240   : > { %18516 = vst [vmem:[#allocation103_spill] sm:$0xff] %v11815_v48  ;;  %18517 = vst [vmem:[#allocation104_spill] sm:$0xff] %v11817_v55  ;;  %v11819_v45 = vpop.f32.mrb[41].mxu1  ;;  %v11821_v42 = vpop.f32.mrb[57].mxu0  ;;  %8289 = vmatmul.mubr.msk.f32.gmra.mrb[146].mxu1 %vm1001_vm1, %v10813_v47  ;;  %8305 = vmatmul.mubr.msk.f32.gmra.mrb[162].mxu0 %vm1001_vm1, %v10813_v47 }
 0x241   : > { %18518 = vst [vmem:[#allocation105_spill] sm:$0xff] %v11819_v45  ;;  %18519 = vst [vmem:[#allocation106_spill] sm:$0xff] %v11821_v42  ;;  %2462 = vmatprep.mubr.f32.mxu1 %v18479_v52  ;;  %2623 = vmatprep.mubr.f32.mxu0 %v18479_v52 }
 0x243   : > { %v11829_v23 = vpop.f32.mrb[42].mxu1  ;;  %v11831_v56 = vpop.f32.mrb[58].mxu0 }
 0x244   : > { %18520 = vst [vmem:[#allocation107_spill] sm:$0xff] %v11829_v23  ;;  %18521 = vst [vmem:[#allocation108_spill] sm:$0xff] %v11831_v56  ;;  %v11833_v48 = vpop.f32.mrb[43].mxu1  ;;  %v11835_v55 = vpop.f32.mrb[59].mxu0  ;;  %8290 = vmatmul.mubr.msk.f32.gmra.mrb[148].mxu1 %vm1001_vm1, %v10820_v50  ;;  %8306 = vmatmul.mubr.msk.f32.gmra.mrb[164].mxu0 %vm1001_vm1, %v10820_v50 }
 0x245   : > { %18522 = vst [vmem:[#allocation109_spill] sm:$0xff] %v11833_v48  ;;  %18523 = vst [vmem:[#allocation110_spill] sm:$0xff] %v11835_v55  ;;  %2468 = vmatprep.mubr.f32.mxu1 %v18479_v52  ;;  %2629 = vmatprep.mubr.f32.mxu0 %v18479_v52 }
 0x247   : > { %v11843_v42 = vpop.f32.mrb[44].mxu1  ;;  %v11845_v45 = vpop.f32.mrb[60].mxu0 }
 0x248   : > { %18524 = vst [vmem:[#allocation111_spill] sm:$0xff] %v11843_v42  ;;  %18525 = vst [vmem:[#allocation112_spill] sm:$0xff] %v11845_v45  ;;  %v11847_v23 = vpop.f32.mrb[45].mxu1  ;;  %v11849_v56 = vpop.f32.mrb[61].mxu0  ;;  %8291 = vmatmul.mubr.msk.f32.gmra.mrb[150].mxu1 %vm1001_vm1, %v10841_v54  ;;  %8307 = vmatmul.mubr.msk.f32.gmra.mrb[166].mxu0 %vm1001_vm1, %v10841_v54 }
 0x249   : > { %18526 = vst [vmem:[#allocation113_spill] sm:$0xff] %v11847_v23  ;;  %18527 = vst [vmem:[#allocation114_spill] sm:$0xff] %v11849_v56  ;;  %2474 = vmatprep.mubr.f32.mxu1 %v18479_v52  ;;  %2635 = vmatprep.mubr.f32.mxu0 %v18479_v52 }
 0x24b   : > { %v11857_v55 = vpop.f32.mrb[46].mxu1  ;;  %v11859_v48 = vpop.f32.mrb[62].mxu0 }
 0x24c   : > { %18528 = vst [vmem:[#allocation115_spill] sm:$0xff] %v11857_v55  ;;  %18529 = vst [vmem:[#allocation116_spill] sm:$0xff] %v11859_v48  ;;  %v11861_v42 = vpop.f32.mrb[47].mxu1  ;;  %v11863_v45 = vpop.f32.mrb[63].mxu0  ;;  %8292 = vmatmul.mubr.msk.f32.gmra.mrb[152].mxu1 %vm1001_vm1, %v10847_v57  ;;  %8308 = vmatmul.mubr.msk.f32.gmra.mrb[168].mxu0 %vm1001_vm1, %v10847_v57 }
 0x24d   : > { %18530 = vst [vmem:[#allocation117_spill] sm:$0xff] %v11861_v42  ;;  %18531 = vst [vmem:[#allocation118_spill] sm:$0xff] %v11863_v45  ;;  %2480 = vmatprep.mubr.f32.mxu1 %v18479_v52  ;;  %2641 = vmatprep.mubr.f32.mxu0 %v18479_v52 }
 0x24f   : > { %v11871_v56 = vpop.f32.mrb[48].mxu1  ;;  %v11873_v23 = vpop.f32.mrb[64].mxu0 }
 0x250   : > { %18532 = vst [vmem:[#allocation119_spill] sm:$0xff] %v11871_v56  ;;  %18533 = vst [vmem:[#allocation120_spill] sm:$0xff] %v11873_v23  ;;  %v11875_v55 = vpop.f32.mrb[49].mxu1  ;;  %v11877_v48 = vpop.f32.mrb[65].mxu0  ;;  %8293 = vmatmul.mubr.msk.f32.gmra.mrb[154].mxu1 %vm1001_vm1, %v10857_v60  ;;  %8309 = vmatmul.mubr.msk.f32.gmra.mrb[170].mxu0 %vm1001_vm1, %v10857_v60 }
 0x251   : > { %18534 = vst [vmem:[#allocation121_spill] sm:$0xff] %v11875_v55  ;;  %18535 = vst [vmem:[#allocation122_spill] sm:$0xff] %v11877_v48  ;;  %2486 = vmatprep.mubr.f32.mxu1 %v18479_v52  ;;  %2647 = vmatprep.mubr.f32.mxu0 %v18479_v52  ;;  %v771_v48 = vld [vmem:[%s17995_s3 + $0xd0] sm:$0xff] }
 0x252   : > { %v803_v55 = vld [vmem:[%s17995_s3 + $0x1d0] sm:$0xff] }
 0x253   : > { %v11885_v45 = vpop.f32.mrb[50].mxu1  ;;  %v11887_v42 = vpop.f32.mrb[66].mxu0  ;;  %v9086_v15 = vpack.c.bf16 %v803_v55, %v771_v48 }
 0x254   : > { %18536 = vst [vmem:[#allocation123_spill] sm:$0xff] %v11885_v45  ;;  %18537 = vst [vmem:[#allocation124_spill] sm:$0xff] %v11887_v42  ;;  %v11889_v56 = vpop.f32.mrb[51].mxu1  ;;  %v11891_v23 = vpop.f32.mrb[67].mxu0  ;;  %8294 = vmatmul.mubr.msk.f32.gmra.mrb[156].mxu1 %vm1001_vm1, %v10864_v0  ;;  %8310 = vmatmul.mubr.msk.f32.gmra.mrb[172].mxu0 %vm1001_vm1, %v10864_v0  ;;  %v769_v45 = vld [vmem:[%s17995_s3 + $0xc0] sm:$0xff] }
 0x255   : > { %18538 = vst [vmem:[#allocation125_spill] sm:$0xff] %v11889_v56  ;;  %18539 = vst [vmem:[#allocation126_spill] sm:$0xff] %v11891_v23  ;;  %2492 = vmatprep.mubr.f32.mxu1 %v18479_v52  ;;  %2653 = vmatprep.mubr.f32.mxu0 %v18479_v52  ;;  %v801_v56 = vld [vmem:[%s17995_s3 + $0x1c0] sm:$0xff] }
 0x257   : > { %v11905_v42 = vpop.f32.mrb[52].mxu1  ;;  %v11907_v23 = vpop.f32.mrb[68].mxu0 }
 0x258   : > { %18540 = vst [vmem:[#allocation127_spill] sm:$0xff] %v11905_v42  ;;  %18541 = vst [vmem:[#allocation128_spill] sm:$0xff] %v11907_v23  ;;  %v11918_v26 = vpop.f32.mrb[53].mxu1  ;;  %v11920_v19 = vpop.f32.mrb[69].mxu0  ;;  %8295 = vmatmul.mubr.msk.f32.gmra.mrb[158].mxu1 %vm1001_vm1, %v10873_v63  ;;  %8311 = vmatmul.mubr.msk.f32.gmra.mrb[174].mxu0 %vm1001_vm1, %v10873_v63  ;;  %v866_v23 = vld [vmem:[%s17995_s3 + $0x3c8] sm:$0xff]  ;;  %v836_v42 = vld [vmem:[%s17995_s3 + $0x2d8] sm:$0xff] }
 0x259   : > { %18542 = vst [vmem:[#allocation129_spill] sm:$0xff] %v11918_v26  ;;  %18543 = vst [vmem:[#allocation130_spill] sm:$0xff] %v11920_v19  ;;  %v868_v26 = vld [vmem:[%s17995_s3 + $0x3d8] sm:$0xff]  ;;  %2724 = vmatprep.mubr.f32.mxu1 %v18479_v52  ;;  %2885 = vmatprep.mubr.f32.mxu0 %v18479_v52  ;;  %v9070_v19 = vpack.c.bf16 %v801_v56, %v769_v45  ;;  %v9072_v40 = vpack.c.bf16 %v866_v23, %v834_v2  ;;  %v867_v45 = vld [vmem:[%s17995_s3 + $0x3d0] sm:$0xff] }
 0x25a   : > { %v9088_v43 = vpack.c.bf16 %v868_v26, %v836_v42  ;;  %v898_v56 = vld [vmem:[%s17995_s3 + $0x4c8] sm:$0xff]  ;;  %v900_v2 = vld [vmem:[%s17995_s3 + $0x4d8] sm:$0xff]  ;;  %v9074_v23 = vpack.c.bf16 %v865_v53, %v833_v1  ;;  %v931_v53 = vld [vmem:[%s17995_s3 + $0x5d0] sm:$0xff] }
 0x25b   : > { %v11943_v6 = vpop.f32.mrb[54].mxu1  ;;  %v11945_v58 = vpop.f32.mrb[70].mxu0  ;;  %v930_v26 = vld [vmem:[%s17995_s3 + $0x5c8] sm:$0xff]  ;;  %v932_v42 = vld [vmem:[%s17995_s3 + $0x5d8] sm:$0xff] }
 0x25c   : > { %18544 = vst [vmem:[#allocation131_spill] sm:$0xff] %v11943_v6  ;;  %18545 = vst [vmem:[#allocation132_spill] sm:$0xff] %v11945_v58  ;;  %v11956_v55 = vpop.f32.mrb[55].mxu1  ;;  %v11958_v48 = vpop.f32.mrb[71].mxu0  ;;  %8312 = vmatmul.mubr.msk.f32.vlgmr.msra.gmra.mrb[160].mxu1 %vm1001_vm1, %v10671_v25  ;;  %8328 = vmatmul.mubr.msk.f32.vlgmr.msra.gmra.mrb[176].mxu0 %vm1001_vm1, %v10671_v25  ;;  %v929_v58 = vld [vmem:[%s17995_s3 + $0x5c0] sm:$0xff]  ;;  %v9092_v59 = vpack.c.bf16 %v932_v42, %v900_v2  ;;  %v962_v1 = vld [vmem:[%s17995_s3 + $0x6c8] sm:$0xff] }
 0x25d   : > { %18546 = vst [vmem:[#allocation133_spill] sm:$0xff] %v11956_v55  ;;  %18547 = vst [vmem:[#allocation134_spill] sm:$0xff] %v11958_v48  ;;  %9071 = vmatpush1.bf16.msra.mxu1 %v9070_v19  ;;  %2730 = vmatprep.mubr.f32.mxu1 %v18479_v52  ;;  %v9090_v48 = vpack.c.bf16 %v867_v45, %v835_v51  ;;  %v897_v55 = vld [vmem:[%s17995_s3 + $0x4c0] sm:$0xff]  ;;  %v9076_v19 = vpack.c.bf16 %v930_v26, %v898_v56  ;;  %v899_v51 = vld [vmem:[%s17995_s3 + $0x4d0] sm:$0xff] }
 0x25e   : > { %2891 = vmatprep.mubr.f32.mxu0 %v18479_v52  ;;  %9087 = vmatpush1.bf16.msra.mxu0 %v9086_v15  ;;  %v996_v56 = vld [vmem:[%s17995_s3 + $0x7d8] sm:$0xff]  ;;  %v9078_v26 = vpack.c.bf16 %v929_v58, %v897_v55  ;;  %v9094_v2 = vpack.c.bf16 %v931_v53, %v899_v51  ;;  %v961_v42 = vld [vmem:[%s17995_s3 + $0x6c0] sm:$0xff]  ;;  %v963_v58 = vld [vmem:[%s17995_s3 + $0x6d0] sm:$0xff] }
 0x25f   : > { %v11981_v6 = vpop.f32.mrb[56].mxu1  ;;  %v11983_v41 = vpop.f32.mrb[72].mxu0  ;;  %9073 = vmatprep.subr.bf16.mxu1 %v9072_v40  ;;  %9089 = vmatprep.subr.bf16.mxu0 %v9088_v43  ;;  %v994_v43 = vld [vmem:[%s17995_s3 + $0x7c8] sm:$0xff]  ;;  %v964_v40 = vld [vmem:[%s17995_s3 + $0x6d8] sm:$0xff]  ;;  %v995_v55 = vld [vmem:[%s17995_s3 + $0x7d0] sm:$0xff] }
 0x260   : > { %18548 = vst [vmem:[#allocation135_spill] sm:$0xff] %v11981_v6  ;;  %18549 = vst [vmem:[#allocation136_spill] sm:$0xff] %v11983_v41  ;;  %v11994_v15 = vpop.f32.mrb[57].mxu1  ;;  %v11996_v45 = vpop.f32.mrb[73].mxu0  ;;  %8313 = vmatmul.mubr.msk.f32.gmra.mrb[162].mxu1 %vm1001_vm1, %v10697_v44  ;;  %8329 = vmatmul.mubr.msk.f32.gmra.mrb[178].mxu0 %vm1001_vm1, %v10697_v44  ;;  %v9080_v6 = vpack.c.bf16 %v994_v43, %v962_v1  ;;  %v9096_v49 = vpack.c.bf16 %v996_v56, %v964_v40  ;;  %v808_v53 = vld [vmem:[%s17995_s3 + $0x1f8] sm:$0xff] }
 0x261   : > { %18550 = vst [vmem:[#allocation137_spill] sm:$0xff] %v11994_v15  ;;  %18551 = vst [vmem:[#allocation138_spill] sm:$0xff] %v11996_v45  ;;  %2736 = vmatprep.mubr.f32.mxu1 %v18479_v52  ;;  %2897 = vmatprep.mubr.f32.mxu0 %v18479_v52  ;;  %v993_v45 = vld [vmem:[%s17995_s3 + $0x7c0] sm:$0xff]  ;;  %v9098_v43 = vpack.c.bf16 %v995_v55, %v963_v58 }
 0x262   : > { %9075 = vmatpush1.bf16.msra.mxu1 %v9074_v23  ;;  %9091 = vmatpush1.bf16.msra.mxu0 %v9090_v48  ;;  %v774_v48 = vld [vmem:[%s17995_s3 + $0xe8] sm:$0xff]  ;;  %v9082_v1 = vpack.c.bf16 %v993_v45, %v961_v42 }
 0x263   : > { %v12019_v15 = vpop.f32.mrb[58].mxu1  ;;  %v12021_v41 = vpop.f32.mrb[74].mxu0  ;;  %9077 = vmatprep.subr.bf16.mxu1 %v9076_v19  ;;  %9093 = vmatprep.subr.bf16.mxu0 %v9092_v59  ;;  %v806_v59 = vld [vmem:[%s17995_s3 + $0x1e8] sm:$0xff]  ;;  %v776_v19 = vld [vmem:[%s17995_s3 + $0xf8] sm:$0xff] }
 0x264   : > { %18552 = vst [vmem:[#allocation139_spill] sm:$0xff] %v12019_v15  ;;  %18553 = vst [vmem:[#allocation140_spill] sm:$0xff] %v12021_v41  ;;  %v12032_v23 = vpop.f32.mrb[59].mxu1  ;;  %v12034_v51 = vpop.f32.mrb[75].mxu0  ;;  %8314 = vmatmul.mubr.msk.f32.gmra.mrb[164].mxu1 %vm1001_vm1, %v10700_v46  ;;  %8330 = vmatmul.mubr.msk.f32.gmra.mrb[180].mxu0 %vm1001_vm1, %v10700_v46 }
 0x265   : > { %18554 = vst [vmem:[#allocation141_spill] sm:$0xff] %v12032_v23  ;;  %18555 = vst [vmem:[#allocation142_spill] sm:$0xff] %v12034_v51  ;;  %2742 = vmatprep.mubr.f32.mxu1 %v18479_v52  ;;  %2903 = vmatprep.mubr.f32.mxu0 %v18479_v52  ;;  %v9100_v51 = vpack.c.bf16 %v806_v59, %v774_v48  ;;  %v9116_v23 = vpack.c.bf16 %v808_v53, %v776_v19 }
 0x266   : > { %9079 = vmatpush1.bf16.msra.mxu1 %v9078_v26  ;;  %9095 = vmatpush1.bf16.msra.mxu0 %v9094_v2 }
 0x267   : > { %v12051_v40 = vpop.f32.mrb[60].mxu1  ;;  %v12053_v56 = vpop.f32.mrb[76].mxu0  ;;  %9081 = vmatprep.subr.bf16.mxu1 %v9080_v6  ;;  %9097 = vmatprep.subr.bf16.mxu0 %v9096_v49 }
 0x268   : > { %18556 = vst [vmem:[#allocation143_spill] sm:$0xff] %v12051_v40  ;;  %18557 = vst [vmem:[#allocation144_spill] sm:$0xff] %v12053_v56  ;;  %v12055_v41 = vpop.f32.mrb[61].mxu1  ;;  %v12057_v15 = vpop.f32.mrb[77].mxu0  ;;  %8315 = vmatmul.mubr.msk.f32.gmra.mrb[166].mxu1 %vm1001_vm1, %v10731_v61  ;;  %8331 = vmatmul.mubr.msk.f32.gmra.mrb[182].mxu0 %vm1001_vm1, %v10731_v61 }
 0x269   : > { %18558 = vst [vmem:[#allocation145_spill] sm:$0xff] %v12055_v41  ;;  %18559 = vst [vmem:[#allocation146_spill] sm:$0xff] %v12057_v15  ;;  %2748 = vmatprep.mubr.f32.mxu1 %v18479_v52  ;;  %2909 = vmatprep.mubr.f32.mxu0 %v18479_v52 }
 0x26a   : > { %9083 = vmatpush1.bf16.msra.mxu1 %v9082_v1  ;;  %9099 = vmatpush1.bf16.msra.mxu0 %v9098_v43 }
 0x26b   : > { %v12065_v6 = vpop.f32.mrb[62].mxu1  ;;  %v12067_v49 = vpop.f32.mrb[78].mxu0  ;;  %9101 = vmatprep.subr.bf16.mxu1 %v9100_v51  ;;  %9117 = vmatprep.subr.bf16.mxu0 %v9116_v23 }
 0x26c   : > { %18560 = vst [vmem:[#allocation147_spill] sm:$0xff] %v12065_v6  ;;  %18561 = vst [vmem:[#allocation148_spill] sm:$0xff] %v12067_v49  ;;  %v12069_v45 = vpop.f32.mrb[63].mxu1  ;;  %v12071_v26 = vpop.f32.mrb[79].mxu0  ;;  %8316 = vmatmul.mubr.msk.f32.gmra.mrb[168].mxu1 %vm1001_vm1, %v10734_v62  ;;  %8332 = vmatmul.mubr.msk.f32.gmra.mrb[184].mxu0 %vm1001_vm1, %v10734_v62 }
 0x26d   : > { %18562 = vst [vmem:[#allocation149_spill] sm:$0xff] %v12069_v45  ;;  %18563 = vst [vmem:[#allocation150_spill] sm:$0xff] %v12071_v26  ;;  %2754 = vmatprep.mubr.f32.mxu1 %v18479_v52  ;;  %2915 = vmatprep.mubr.f32.mxu0 %v18479_v52 }
 0x26f   : > { %v12079_v2 = vpop.f32.mrb[64].mxu1  ;;  %v12081_v42 = vpop.f32.mrb[80].mxu0 }
 0x270   : > { %18564 = vst [vmem:[#allocation151_spill] sm:$0xff] %v12079_v2  ;;  %18565 = vst [vmem:[#allocation152_spill] sm:$0xff] %v12081_v42  ;;  %v12083_v58 = vpop.f32.mrb[65].mxu1  ;;  %v12085_v55 = vpop.f32.mrb[81].mxu0  ;;  %8317 = vmatmul.mubr.msk.f32.gmra.mrb[170].mxu1 %vm1001_vm1, %v10759_v12  ;;  %8333 = vmatmul.mubr.msk.f32.gmra.mrb[186].mxu0 %vm1001_vm1, %v10759_v12 }
 0x271   : > { %18566 = vst [vmem:[#allocation153_spill] sm:$0xff] %v12083_v58  ;;  %18567 = vst [vmem:[#allocation154_spill] sm:$0xff] %v12085_v55  ;;  %2760 = vmatprep.mubr.f32.mxu1 %v18479_v52  ;;  %2921 = vmatprep.mubr.f32.mxu0 %v18479_v52 }
 0x273   : > { %v12093_v48 = vpop.f32.mrb[66].mxu1  ;;  %v12095_v23 = vpop.f32.mrb[82].mxu0 }
 0x274   : > { %18568 = vst [vmem:[#allocation155_spill] sm:$0xff] %v12093_v48  ;;  %18569 = vst [vmem:[#allocation156_spill] sm:$0xff] %v12095_v23  ;;  %v12097_v51 = vpop.f32.mrb[67].mxu1  ;;  %v12099_v59 = vpop.f32.mrb[83].mxu0  ;;  %8318 = vmatmul.mubr.msk.f32.gmra.mrb[172].mxu1 %vm1001_vm1, %v10764_v22  ;;  %8334 = vmatmul.mubr.msk.f32.gmra.mrb[188].mxu0 %vm1001_vm1, %v10764_v22 }
 0x275   : > { %18570 = vst [vmem:[#allocation157_spill] sm:$0xff] %v12097_v51  ;;  %18571 = vst [vmem:[#allocation158_spill] sm:$0xff] %v12099_v59  ;;  %2766 = vmatprep.mubr.f32.mxu1 %v18479_v52  ;;  %2927 = vmatprep.mubr.f32.mxu0 %v18479_v52 }
 0x277   : > { %v12107_v19 = vpop.f32.mrb[68].mxu1  ;;  %v12109_v53 = vpop.f32.mrb[84].mxu0 }
 0x278   : > { %18572 = vst [vmem:[#allocation159_spill] sm:$0xff] %v12107_v19  ;;  %18573 = vst [vmem:[#allocation160_spill] sm:$0xff] %v12109_v53  ;;  %v12111_v1 = vpop.f32.mrb[69].mxu1  ;;  %v12113_v43 = vpop.f32.mrb[85].mxu0  ;;  %8319 = vmatmul.mubr.msk.f32.gmra.mrb[174].mxu1 %vm1001_vm1, %v10785_v34  ;;  %8335 = vmatmul.mubr.msk.f32.gmra.mrb[190].mxu0 %vm1001_vm1, %v10785_v34 }
 0x279   : > { %18574 = vst [vmem:[#allocation161_spill] sm:$0xff] %v12111_v1  ;;  %18575 = vst [vmem:[#allocation162_spill] sm:$0xff] %v12113_v43  ;;  %2772 = vmatprep.mubr.f32.mxu1 %v18479_v52  ;;  %2933 = vmatprep.mubr.f32.mxu0 %v18479_v52 }
 0x27b   : > { %v12121_v26 = vpop.f32.mrb[70].mxu1  ;;  %v12123_v45 = vpop.f32.mrb[86].mxu0 }
 0x27c   : > { %18576 = vst [vmem:[#allocation163_spill] sm:$0xff] %v12121_v26  ;;  %18577 = vst [vmem:[#allocation164_spill] sm:$0xff] %v12123_v45  ;;  %v12125_v49 = vpop.f32.mrb[71].mxu1  ;;  %v12127_v6 = vpop.f32.mrb[87].mxu0  ;;  %8320 = vmatmul.mubr.msk.f32.gmra.mrb[176].mxu1 %vm1001_vm1, %v10792_v13  ;;  %8336 = vmatmul.mubr.msk.f32.gmra.mrb[192].mxu0 %vm1001_vm1, %v10792_v13 }
 0x27d   : > { %18578 = vst [vmem:[#allocation165_spill] sm:$0xff] %v12125_v49  ;;  %18579 = vst [vmem:[#allocation166_spill] sm:$0xff] %v12127_v6  ;;  %2778 = vmatprep.mubr.f32.mxu1 %v18479_v52  ;;  %2939 = vmatprep.mubr.f32.mxu0 %v18479_v52 }
 0x27f   : > { %v12135_v15 = vpop.f32.mrb[72].mxu1  ;;  %v12137_v41 = vpop.f32.mrb[88].mxu0 }
 0x280   : > { %18580 = vst [vmem:[#allocation167_spill] sm:$0xff] %v12135_v15  ;;  %18581 = vst [vmem:[#allocation168_spill] sm:$0xff] %v12137_v41  ;;  %v12139_v56 = vpop.f32.mrb[73].mxu1  ;;  %v12141_v40 = vpop.f32.mrb[89].mxu0  ;;  %8321 = vmatmul.mubr.msk.f32.gmra.mrb[178].mxu1 %vm1001_vm1, %v10813_v47  ;;  %8337 = vmatmul.mubr.msk.f32.gmra.mrb[194].mxu0 %vm1001_vm1, %v10813_v47  ;;  %v869_v15 = vld [vmem:[%s17995_s3 + $0x3e0] sm:$0xff] }
 0x281   : > { %18582 = vst [vmem:[#allocation169_spill] sm:$0xff] %v12139_v56  ;;  %18583 = vst [vmem:[#allocation170_spill] sm:$0xff] %v12141_v40  ;;  %2784 = vmatprep.mubr.f32.mxu1 %v18479_v52  ;;  %2945 = vmatprep.mubr.f32.mxu0 %v18479_v52 }
 0x283   : > { %v12149_v6 = vpop.f32.mrb[74].mxu1  ;;  %v12151_v39 = vpop.f32.mrb[90].mxu0 }
 0x284   : > { %18584 = vst [vmem:[#allocation171_spill] sm:$0xff] %v12149_v6  ;;  %18585 = vst [vmem:[#allocation172_spill] sm:$0xff] %v12151_v39  ;;  %v12153_v43 = vpop.f32.mrb[75].mxu1  ;;  %v12155_v33 = vpop.f32.mrb[91].mxu0  ;;  %8322 = vmatmul.mubr.msk.f32.gmra.mrb[180].mxu1 %vm1001_vm1, %v10820_v50  ;;  %8338 = vmatmul.mubr.msk.f32.gmra.mrb[196].mxu0 %vm1001_vm1, %v10820_v50 }
 0x285   : > { %18586 = vst [vmem:[#allocation173_spill] sm:$0xff] %v12153_v43  ;;  %18587 = vst [vmem:[#allocation174_spill] sm:$0xff] %v12155_v33  ;;  %2790 = vmatprep.mubr.f32.mxu1 %v18479_v52  ;;  %2951 = vmatprep.mubr.f32.mxu0 %v18479_v52 }
 0x287   : > { %v12163_v40 = vpop.f32.mrb[76].mxu1  ;;  %v12165_v56 = vpop.f32.mrb[92].mxu0 }
 0x288   : > { %18588 = vst [vmem:[#allocation175_spill] sm:$0xff] %v12163_v40  ;;  %18589 = vst [vmem:[#allocation176_spill] sm:$0xff] %v12165_v56  ;;  %v12167_v6 = vpop.f32.mrb[77].mxu1  ;;  %v12169_v39 = vpop.f32.mrb[93].mxu0  ;;  %8323 = vmatmul.mubr.msk.f32.gmra.mrb[182].mxu1 %vm1001_vm1, %v10841_v54  ;;  %8339 = vmatmul.mubr.msk.f32.gmra.mrb[198].mxu0 %vm1001_vm1, %v10841_v54 }
 0x289   : > { %18590 = vst [vmem:[#allocation177_spill] sm:$0xff] %v12167_v6  ;;  %18591 = vst [vmem:[#allocation178_spill] sm:$0xff] %v12169_v39  ;;  %2796 = vmatprep.mubr.f32.mxu1 %v18479_v52  ;;  %2957 = vmatprep.mubr.f32.mxu0 %v18479_v52 }
 0x28b   : > { %v12177_v33 = vpop.f32.mrb[78].mxu1  ;;  %v12179_v43 = vpop.f32.mrb[94].mxu0 }
 0x28c   : > { %18592 = vst [vmem:[#allocation179_spill] sm:$0xff] %v12177_v33  ;;  %18593 = vst [vmem:[#allocation180_spill] sm:$0xff] %v12179_v43  ;;  %v12181_v40 = vpop.f32.mrb[79].mxu1  ;;  %v12183_v56 = vpop.f32.mrb[95].mxu0  ;;  %8324 = vmatmul.mubr.msk.f32.gmra.mrb[184].mxu1 %vm1001_vm1, %v10847_v57  ;;  %8340 = vmatmul.mubr.msk.f32.gmra.mrb[200].mxu0 %vm1001_vm1, %v10847_v57 }
 0x28d   : > { %18594 = vst [vmem:[#allocation181_spill] sm:$0xff] %v12181_v40  ;;  %18595 = vst [vmem:[#allocation182_spill] sm:$0xff] %v12183_v56  ;;  %2802 = vmatprep.mubr.f32.mxu1 %v18479_v52  ;;  %2963 = vmatprep.mubr.f32.mxu0 %v18479_v52 }
 0x28f   : > { %v12191_v39 = vpop.f32.mrb[80].mxu1  ;;  %v12193_v6 = vpop.f32.mrb[96].mxu0 }
 0x290   : > { %18596 = vst [vmem:[#allocation183_spill] sm:$0xff] %v12191_v39  ;;  %18597 = vst [vmem:[#allocation184_spill] sm:$0xff] %v12193_v6  ;;  %v12195_v33 = vpop.f32.mrb[81].mxu1  ;;  %v12197_v43 = vpop.f32.mrb[97].mxu0  ;;  %8325 = vmatmul.mubr.msk.f32.gmra.mrb[186].mxu1 %vm1001_vm1, %v10857_v60  ;;  %8341 = vmatmul.mubr.msk.f32.gmra.mrb[202].mxu0 %vm1001_vm1, %v10857_v60 }
 0x291   : > { %18598 = vst [vmem:[#allocation185_spill] sm:$0xff] %v12195_v33  ;;  %18599 = vst [vmem:[#allocation186_spill] sm:$0xff] %v12197_v43  ;;  %2808 = vmatprep.mubr.f32.mxu1 %v18479_v52  ;;  %2969 = vmatprep.mubr.f32.mxu0 %v18479_v52  ;;  %v773_v43 = vld [vmem:[%s17995_s3 + $0xe0] sm:$0xff]  ;;  %v807_v33 = vld [vmem:[%s17995_s3 + $0x1f0] sm:$0xff] }
 0x293   : > { %v12205_v56 = vpop.f32.mrb[82].mxu1  ;;  %v12207_v40 = vpop.f32.mrb[98].mxu0 }
 0x294   : > { %18600 = vst [vmem:[#allocation187_spill] sm:$0xff] %v12205_v56  ;;  %18601 = vst [vmem:[#allocation188_spill] sm:$0xff] %v12207_v40  ;;  %v12209_v39 = vpop.f32.mrb[83].mxu1  ;;  %v12211_v6 = vpop.f32.mrb[99].mxu0  ;;  %8326 = vmatmul.mubr.msk.f32.gmra.mrb[188].mxu1 %vm1001_vm1, %v10864_v0  ;;  %8342 = vmatmul.mubr.msk.f32.gmra.mrb[204].mxu0 %vm1001_vm1, %v10864_v0  ;;  %v775_v56 = vld [vmem:[%s17995_s3 + $0xf0] sm:$0xff] }
 0x295   : > { %18602 = vst [vmem:[#allocation189_spill] sm:$0xff] %v12209_v39  ;;  %18603 = vst [vmem:[#allocation190_spill] sm:$0xff] %v12211_v6  ;;  %2814 = vmatprep.mubr.f32.mxu1 %v18479_v52  ;;  %2975 = vmatprep.mubr.f32.mxu0 %v18479_v52  ;;  %v805_v39 = vld [vmem:[%s17995_s3 + $0x1e0] sm:$0xff]  ;;  %v9118_v41 = vpack.c.bf16 %v807_v33, %v775_v56  ;;  %v871_v33 = vld [vmem:[%s17995_s3 + $0x3f0] sm:$0xff] }
 0x297   : > { %v12225_v40 = vpop.f32.mrb[84].mxu1  ;;  %v12227_v6 = vpop.f32.mrb[100].mxu0 }
 0x298   : > { %18604 = vst [vmem:[#allocation191_spill] sm:$0xff] %v12225_v40  ;;  %18605 = vst [vmem:[#allocation192_spill] sm:$0xff] %v12227_v6  ;;  %v12238_v38 = vpop.f32.mrb[85].mxu1  ;;  %v12240_v37 = vpop.f32.mrb[101].mxu0  ;;  %8327 = vmatmul.mubr.msk.f32.gmra.mrb[190].mxu1 %vm1001_vm1, %v10873_v63  ;;  %8343 = vmatmul.mubr.msk.f32.gmra.mrb[206].mxu0 %vm1001_vm1, %v10873_v63  ;;  %v870_v6 = vld [vmem:[%s17995_s3 + $0x3e8] sm:$0xff]  ;;  %v840_v40 = vld [vmem:[%s17995_s3 + $0x2f8] sm:$0xff] }
 0x299   : > { %18606 = vst [vmem:[#allocation193_spill] sm:$0xff] %v12238_v38  ;;  %18607 = vst [vmem:[#allocation194_spill] sm:$0xff] %v12240_v37  ;;  %v872_v38 = vld [vmem:[%s17995_s3 + $0x3f8] sm:$0xff]  ;;  %3046 = vmatprep.mubr.f32.mxu1 %v18479_v52  ;;  %3207 = vmatprep.mubr.f32.mxu0 %v18479_v52  ;;  %v9102_v37 = vpack.c.bf16 %v805_v39, %v773_v43  ;;  %v9104_v49 = vpack.c.bf16 %v870_v6, %v838_v17  ;;  %v902_v39 = vld [vmem:[%s17995_s3 + $0x4e8] sm:$0xff] }
 0x29a   : > { %v9120_v45 = vpack.c.bf16 %v872_v38, %v840_v40  ;;  %v934_v38 = vld [vmem:[%s17995_s3 + $0x5e8] sm:$0xff]  ;;  %v904_v17 = vld [vmem:[%s17995_s3 + $0x4f8] sm:$0xff]  ;;  %v9106_v6 = vpack.c.bf16 %v869_v15, %v837_v36  ;;  %v935_v36 = vld [vmem:[%s17995_s3 + $0x5f0] sm:$0xff] }
 0x29b   : > { %v12263_v32 = vpop.f32.mrb[86].mxu1  ;;  %v12265_v59 = vpop.f32.mrb[102].mxu0  ;;  %v936_v40 = vld [vmem:[%s17995_s3 + $0x5f8] sm:$0xff] }
 0x29c   : > { %18608 = vst [vmem:[#allocation195_spill] sm:$0xff] %v12263_v32  ;;  %18609 = vst [vmem:[#allocation196_spill] sm:$0xff] %v12265_v59  ;;  %v12276_v56 = vpop.f32.mrb[87].mxu1  ;;  %v12278_v43 = vpop.f32.mrb[103].mxu0  ;;  %8344 = vmatmul.mubr.msk.f32.vlgmr.msra.gmra.mrb[192].mxu1 %vm1001_vm1, %v10671_v25  ;;  %8360 = vmatmul.mubr.msk.f32.vlgmr.msra.gmra.mrb[208].mxu0 %vm1001_vm1, %v10671_v25  ;;  %v933_v59 = vld [vmem:[%s17995_s3 + $0x5e0] sm:$0xff]  ;;  %v9124_v30 = vpack.c.bf16 %v936_v40, %v904_v17 }
 0x29d   : > { %18610 = vst [vmem:[#allocation197_spill] sm:$0xff] %v12276_v56  ;;  %18611 = vst [vmem:[#allocation198_spill] sm:$0xff] %v12278_v43  ;;  %9103 = vmatpush1.bf16.msra.mxu1 %v9102_v37  ;;  %3052 = vmatprep.mubr.f32.mxu1 %v18479_v52  ;;  %v9122_v43 = vpack.c.bf16 %v871_v33, %v839_v31  ;;  %v901_v56 = vld [vmem:[%s17995_s3 + $0x4e0] sm:$0xff]  ;;  %v9108_v37 = vpack.c.bf16 %v934_v38, %v902_v39  ;;  %v903_v31 = vld [vmem:[%s17995_s3 + $0x4f0] sm:$0xff] }
 0x29e   : > { %3213 = vmatprep.mubr.f32.mxu0 %v18479_v52  ;;  %9119 = vmatpush1.bf16.msra.mxu0 %v9118_v41  ;;  %v966_v41 = vld [vmem:[%s17995_s3 + $0x6e8] sm:$0xff]  ;;  %v1000_v39 = vld [vmem:[%s17995_s3 + $0x7f8] sm:$0xff]  ;;  %v9110_v38 = vpack.c.bf16 %v933_v59, %v901_v56  ;;  %v9126_v17 = vpack.c.bf16 %v935_v36, %v903_v31  ;;  %v965_v40 = vld [vmem:[%s17995_s3 + $0x6e0] sm:$0xff] }
 0x29f   : > { %v12301_v32 = vpop.f32.mrb[88].mxu1  ;;  %v12303_v35 = vpop.f32.mrb[104].mxu0  ;;  %9105 = vmatprep.subr.bf16.mxu1 %v9104_v49  ;;  %9121 = vmatprep.subr.bf16.mxu0 %v9120_v45  ;;  %v998_v49 = vld [vmem:[%s17995_s3 + $0x7e8] sm:$0xff]  ;;  %v968_v45 = vld [vmem:[%s17995_s3 + $0x6f8] sm:$0xff]  ;;  %v967_v59 = vld [vmem:[%s17995_s3 + $0x6f0] sm:$0xff] }
 0x2a0   : > { %18612 = vst [vmem:[#allocation199_spill] sm:$0xff] %v12301_v32  ;;  %18613 = vst [vmem:[#allocation200_spill] sm:$0xff] %v12303_v35  ;;  %v12314_v15 = vpop.f32.mrb[89].mxu1  ;;  %v12316_v33 = vpop.f32.mrb[105].mxu0  ;;  %8345 = vmatmul.mubr.msk.f32.gmra.mrb[194].mxu1 %vm1001_vm1, %v10697_v44  ;;  %8361 = vmatmul.mubr.msk.f32.gmra.mrb[210].mxu0 %vm1001_vm1, %v10697_v44  ;;  %v9112_v35 = vpack.c.bf16 %v998_v49, %v966_v41  ;;  %v997_v32 = vld [vmem:[%s17995_s3 + $0x7e0] sm:$0xff]  ;;  %v9128_v28 = vpack.c.bf16 %v1000_v39, %v968_v45  ;;  %v999_v56 = vld [vmem:[%s17995_s3 + $0x7f0] sm:$0xff] }
 0x2a1   : > { %18614 = vst [vmem:[#allocation201_spill] sm:$0xff] %v12314_v15  ;;  %18615 = vst [vmem:[#allocation202_spill] sm:$0xff] %v12316_v33  ;;  %3058 = vmatprep.mubr.f32.mxu1 %v18479_v52  ;;  %3219 = vmatprep.mubr.f32.mxu0 %v18479_v52 }
 0x2a2   : > { %9107 = vmatpush1.bf16.msra.mxu1 %v9106_v6  ;;  %9123 = vmatpush1.bf16.msra.mxu0 %v9122_v43 }
 0x2a3   : > { %v12336_v33 = vpop.f32.mrb[90].mxu1  ;;  %v12338_v15 = vpop.f32.mrb[106].mxu0  ;;  %9109 = vmatprep.subr.bf16.mxu1 %v9108_v37  ;;  %9125 = vmatprep.subr.bf16.mxu0 %v9124_v30  ;;  %v9114_v30 = vpack.c.bf16 %v997_v32, %v965_v40  ;;  %v9130_v37 = vpack.c.bf16 %v999_v56, %v967_v59 }
 0x2a4   : > { %18616 = vst [vmem:[#allocation203_spill] sm:$0xff] %v12336_v33  ;;  %18617 = vst [vmem:[#allocation204_spill] sm:$0xff] %v12338_v15  ;;  %v12349_v43 = vpop.f32.mrb[91].mxu1  ;;  %v12351_v6 = vpop.f32.mrb[107].mxu0  ;;  %8346 = vmatmul.mubr.msk.f32.gmra.mrb[196].mxu1 %vm1001_vm1, %v10700_v46  ;;  %8362 = vmatmul.mubr.msk.f32.gmra.mrb[212].mxu0 %vm1001_vm1, %v10700_v46 }
 0x2a5   : > { %18618 = vst [vmem:[#allocation205_spill] sm:$0xff] %v12349_v43  ;;  %18619 = vst [vmem:[#allocation206_spill] sm:$0xff] %v12351_v6  ;;  %3064 = vmatprep.mubr.f32.mxu1 %v18479_v52  ;;  %3225 = vmatprep.mubr.f32.mxu0 %v18479_v52 }
 0x2a6   : > { %9111 = vmatpush1.bf16.msra.mxu1 %v9110_v38  ;;  %9127 = vmatpush1.bf16.msra.mxu0 %v9126_v17 }
 0x2a7   : > { %v12359_v31 = vpop.f32.mrb[92].mxu1  ;;  %v12361_v36 = vpop.f32.mrb[108].mxu0  ;;  %9113 = vmatprep.subr.bf16.mxu1 %v9112_v35  ;;  %9129 = vmatprep.subr.bf16.mxu0 %v9128_v28 }
 0x2a8   : > { %18620 = vst [vmem:[#allocation207_spill] sm:$0xff] %v12359_v31  ;;  %18621 = vst [vmem:[#allocation208_spill] sm:$0xff] %v12361_v36  ;;  %v12363_v41 = vpop.f32.mrb[93].mxu1  ;;  %v12365_v49 = vpop.f32.mrb[109].mxu0  ;;  %8347 = vmatmul.mubr.msk.f32.gmra.mrb[198].mxu1 %vm1001_vm1, %v10731_v61  ;;  %8363 = vmatmul.mubr.msk.f32.gmra.mrb[214].mxu0 %vm1001_vm1, %v10731_v61  ;;  %v12728_v36 = vld [vmem:[%s17996_s4] ss:$0 sm:$0xff] }
 0x2a9   : > { %18622 = vst [vmem:[#allocation209_spill] sm:$0xff] %v12363_v41  ;;  %18623 = vst [vmem:[#allocation210_spill] sm:$0xff] %v12365_v49  ;;  %3070 = vmatprep.mubr.f32.mxu1 %v18479_v52  ;;  %3231 = vmatprep.mubr.f32.mxu0 %v18479_v52  ;;  %v6889_v49 = vld [vmem:[%s17998_s6 + $0x188] sm:$0xff] }
 0x2aa   : > { %9115 = vmatpush1.bf16.msra.mxu1 %v9114_v30  ;;  %9131 = vmatpush1.bf16.msra.mxu0 %v9130_v37 }
 0x2ab   : > { %v12373_v32 = vpop.f32.mrb[94].mxu1  ;;  %v12375_v35 = vpop.f32.mrb[110].mxu0 }
 0x2ac   : > { %18624 = vst [vmem:[#allocation211_spill] sm:$0xff] %v12373_v32  ;;  %18625 = vst [vmem:[#allocation212_spill] sm:$0xff] %v12375_v35  ;;  %v12377_v28 = vpop.f32.mrb[95].mxu1  ;;  %v12379_v45 = vpop.f32.mrb[111].mxu0  ;;  %8348 = vmatmul.mubr.msk.f32.gmra.mrb[200].mxu1 %vm1001_vm1, %v10734_v62  ;;  %8364 = vmatmul.mubr.msk.f32.gmra.mrb[216].mxu0 %vm1001_vm1, %v10734_v62 }
 0x2ad   : > { %18626 = vst [vmem:[#allocation213_spill] sm:$0xff] %v12377_v28  ;;  %18627 = vst [vmem:[#allocation214_spill] sm:$0xff] %v12379_v45  ;;  %3076 = vmatprep.mubr.f32.mxu1 %v18479_v52  ;;  %3237 = vmatprep.mubr.f32.mxu0 %v18479_v52 }
 0x2af   : > { %v12387_v39 = vpop.f32.mrb[96].mxu1  ;;  %v12389_v38 = vpop.f32.mrb[112].mxu0 }
 0x2b0   : > { %18628 = vst [vmem:[#allocation215_spill] sm:$0xff] %v12387_v39  ;;  %18629 = vst [vmem:[#allocation216_spill] sm:$0xff] %v12389_v38  ;;  %v12391_v17 = vpop.f32.mrb[97].mxu1  ;;  %v12393_v40 = vpop.f32.mrb[113].mxu0  ;;  %8349 = vmatmul.mubr.msk.f32.gmra.mrb[202].mxu1 %vm1001_vm1, %v10759_v12  ;;  %8365 = vmatmul.mubr.msk.f32.gmra.mrb[218].mxu0 %vm1001_vm1, %v10759_v12 }
 0x2b1   : > { %18630 = vst [vmem:[#allocation217_spill] sm:$0xff] %v12391_v17  ;;  %18631 = vst [vmem:[#allocation218_spill] sm:$0xff] %v12393_v40  ;;  %3082 = vmatprep.mubr.f32.mxu1 %v18479_v52  ;;  %3243 = vmatprep.mubr.f32.mxu0 %v18479_v52 }
 0x2b3   : > { %v12401_v59 = vpop.f32.mrb[98].mxu1  ;;  %v12403_v56 = vpop.f32.mrb[114].mxu0 }
 0x2b4   : > { %18632 = vst [vmem:[#allocation219_spill] sm:$0xff] %v12401_v59  ;;  %18633 = vst [vmem:[#allocation220_spill] sm:$0xff] %v12403_v56  ;;  %v12405_v30 = vpop.f32.mrb[99].mxu1  ;;  %v12407_v37 = vpop.f32.mrb[115].mxu0  ;;  %8350 = vmatmul.mubr.msk.f32.gmra.mrb[204].mxu1 %vm1001_vm1, %v10764_v22  ;;  %8366 = vmatmul.mubr.msk.f32.gmra.mrb[220].mxu0 %vm1001_vm1, %v10764_v22 }
 0x2b5   : > { %18634 = vst [vmem:[#allocation221_spill] sm:$0xff] %v12405_v30  ;;  %18635 = vst [vmem:[#allocation222_spill] sm:$0xff] %v12407_v37  ;;  %3088 = vmatprep.mubr.f32.mxu1 %v18479_v52  ;;  %3249 = vmatprep.mubr.f32.mxu0 %v18479_v52 }
 0x2b7   : > { %v12415_v40 = vpop.f32.mrb[100].mxu1  ;;  %v12417_v45 = vpop.f32.mrb[116].mxu0 }
 0x2b8   : > { %18636 = vst [vmem:[#allocation223_spill] sm:$0xff] %v12415_v40  ;;  %18637 = vst [vmem:[#allocation224_spill] sm:$0xff] %v12417_v45  ;;  %v12419_v17 = vpop.f32.mrb[101].mxu1  ;;  %v12421_v56 = vpop.f32.mrb[117].mxu0  ;;  %8351 = vmatmul.mubr.msk.f32.gmra.mrb[206].mxu1 %vm1001_vm1, %v10785_v34  ;;  %8367 = vmatmul.mubr.msk.f32.gmra.mrb[222].mxu0 %vm1001_vm1, %v10785_v34 }
 0x2b9   : > { %18638 = vst [vmem:[#allocation225_spill] sm:$0xff] %v12419_v17  ;;  %18639 = vst [vmem:[#allocation226_spill] sm:$0xff] %v12421_v56  ;;  %3094 = vmatprep.mubr.f32.mxu1 %v18479_v52  ;;  %3255 = vmatprep.mubr.f32.mxu0 %v18479_v52 }
 0x2bb   : > { %v12429_v37 = vpop.f32.mrb[102].mxu1  ;;  %v12431_v30 = vpop.f32.mrb[118].mxu0 }
 0x2bc   : > { %18640 = vst [vmem:[#allocation227_spill] sm:$0xff] %v12429_v37  ;;  %18641 = vst [vmem:[#allocation228_spill] sm:$0xff] %v12431_v30  ;;  %v12433_v40 = vpop.f32.mrb[103].mxu1  ;;  %v12435_v45 = vpop.f32.mrb[119].mxu0  ;;  %8352 = vmatmul.mubr.msk.f32.gmra.mrb[208].mxu1 %vm1001_vm1, %v10792_v13  ;;  %8368 = vmatmul.mubr.msk.f32.gmra.mrb[224].mxu0 %vm1001_vm1, %v10792_v13 }
 0x2bd   : > { %18642 = vst [vmem:[#allocation229_spill] sm:$0xff] %v12433_v40  ;;  %18643 = vst [vmem:[#allocation230_spill] sm:$0xff] %v12435_v45  ;;  %3100 = vmatprep.mubr.f32.mxu1 %v18479_v52  ;;  %3261 = vmatprep.mubr.f32.mxu0 %v18479_v52 }
 0x2bf   : > { %v12443_v56 = vpop.f32.mrb[104].mxu1  ;;  %v12445_v17 = vpop.f32.mrb[120].mxu0 }
 0x2c0   : > { %18644 = vst [vmem:[#allocation231_spill] sm:$0xff] %v12443_v56  ;;  %18645 = vst [vmem:[#allocation232_spill] sm:$0xff] %v12445_v17  ;;  %v12447_v37 = vpop.f32.mrb[105].mxu1  ;;  %v12449_v30 = vpop.f32.mrb[121].mxu0  ;;  %8353 = vmatmul.mubr.msk.f32.gmra.mrb[210].mxu1 %vm1001_vm1, %v10813_v47  ;;  %8369 = vmatmul.mubr.msk.f32.gmra.mrb[226].mxu0 %vm1001_vm1, %v10813_v47 }
 0x2c1   : > { %18646 = vst [vmem:[#allocation233_spill] sm:$0xff] %v12447_v37  ;;  %18647 = vst [vmem:[#allocation234_spill] sm:$0xff] %v12449_v30  ;;  %3106 = vmatprep.mubr.f32.mxu1 %v18479_v52  ;;  %3267 = vmatprep.mubr.f32.mxu0 %v18479_v52 }
 0x2c3   : > { %v12457_v45 = vpop.f32.mrb[106].mxu1  ;;  %v12459_v40 = vpop.f32.mrb[122].mxu0 }
 0x2c4   : > { %18648 = vst [vmem:[#allocation235_spill] sm:$0xff] %v12457_v45  ;;  %18649 = vst [vmem:[#allocation236_spill] sm:$0xff] %v12459_v40  ;;  %v12461_v56 = vpop.f32.mrb[107].mxu1  ;;  %v12463_v17 = vpop.f32.mrb[123].mxu0  ;;  %8354 = vmatmul.mubr.msk.f32.gmra.mrb[212].mxu1 %vm1001_vm1, %v10820_v50  ;;  %8370 = vmatmul.mubr.msk.f32.gmra.mrb[228].mxu0 %vm1001_vm1, %v10820_v50 }
 0x2c5   : > { %18650 = vst [vmem:[#allocation237_spill] sm:$0xff] %v12461_v56  ;;  %18651 = vst [vmem:[#allocation238_spill] sm:$0xff] %v12463_v17  ;;  %3112 = vmatprep.mubr.f32.mxu1 %v18479_v52  ;;  %3273 = vmatprep.mubr.f32.mxu0 %v18479_v52 }
 0x2c7   : > { %v12471_v30 = vpop.f32.mrb[108].mxu1  ;;  %v12473_v37 = vpop.f32.mrb[124].mxu0 }
 0x2c8   : > { %18652 = vst [vmem:[#allocation239_spill] sm:$0xff] %v12471_v30  ;;  %18653 = vst [vmem:[#allocation240_spill] sm:$0xff] %v12473_v37  ;;  %v12475_v45 = vpop.f32.mrb[109].mxu1  ;;  %v12477_v40 = vpop.f32.mrb[125].mxu0  ;;  %8355 = vmatmul.mubr.msk.f32.gmra.mrb[214].mxu1 %vm1001_vm1, %v10841_v54  ;;  %8371 = vmatmul.mubr.msk.f32.gmra.mrb[230].mxu0 %vm1001_vm1, %v10841_v54 }
 0x2c9   : > { %18654 = vst [vmem:[#allocation241_spill] sm:$0xff] %v12475_v45  ;;  %18655 = vst [vmem:[#allocation242_spill] sm:$0xff] %v12477_v40  ;;  %3118 = vmatprep.mubr.f32.mxu1 %v18479_v52  ;;  %3279 = vmatprep.mubr.f32.mxu0 %v18479_v52 }
 0x2cb   : > { %v12485_v17 = vpop.f32.mrb[110].mxu1  ;;  %v12487_v56 = vpop.f32.mrb[126].mxu0 }
 0x2cc   : > { %18656 = vst [vmem:[#allocation243_spill] sm:$0xff] %v12485_v17  ;;  %18657 = vst [vmem:[#allocation244_spill] sm:$0xff] %v12487_v56  ;;  %v12489_v30 = vpop.f32.mrb[111].mxu1  ;;  %v12491_v37 = vpop.f32.mrb[127].mxu0  ;;  %8356 = vmatmul.mubr.msk.f32.gmra.mrb[216].mxu1 %vm1001_vm1, %v10847_v57  ;;  %8372 = vmatmul.mubr.msk.f32.gmra.mrb[232].mxu0 %vm1001_vm1, %v10847_v57 }
 0x2cd   : > { %18658 = vst [vmem:[#allocation245_spill] sm:$0xff] %v12489_v30  ;;  %18659 = vst [vmem:[#allocation246_spill] sm:$0xff] %v12491_v37  ;;  %3124 = vmatprep.mubr.f32.mxu1 %v18479_v52  ;;  %3285 = vmatprep.mubr.f32.mxu0 %v18479_v52 }
 0x2cf   : > { %v12499_v40 = vpop.f32.mrb[112].mxu1  ;;  %v12501_v45 = vpop.f32.mrb[128].mxu0 }
 0x2d0   : > { %18660 = vst [vmem:[#allocation247_spill] sm:$0xff] %v12499_v40  ;;  %18661 = vst [vmem:[#allocation248_spill] sm:$0xff] %v12501_v45  ;;  %v12503_v17 = vpop.f32.mrb[113].mxu1  ;;  %v12505_v56 = vpop.f32.mrb[129].mxu0  ;;  %8357 = vmatmul.mubr.msk.f32.gmra.mrb[218].mxu1 %vm1001_vm1, %v10857_v60  ;;  %8373 = vmatmul.mubr.msk.f32.gmra.mrb[234].mxu0 %vm1001_vm1, %v10857_v60 }
 0x2d1   : > { %18662 = vst [vmem:[#allocation249_spill] sm:$0xff] %v12503_v17  ;;  %18663 = vst [vmem:[#allocation250_spill] sm:$0xff] %v12505_v56  ;;  %3130 = vmatprep.mubr.f32.mxu1 %v18479_v52  ;;  %3291 = vmatprep.mubr.f32.mxu0 %v18479_v52 }
 0x2d3   : > { %v12513_v37 = vpop.f32.mrb[114].mxu1  ;;  %v12515_v30 = vpop.f32.mrb[130].mxu0 }
 0x2d4   : > { %18664 = vst [vmem:[#allocation251_spill] sm:$0xff] %v12513_v37  ;;  %18665 = vst [vmem:[#allocation252_spill] sm:$0xff] %v12515_v30  ;;  %v12517_v40 = vpop.f32.mrb[115].mxu1  ;;  %v12519_v45 = vpop.f32.mrb[131].mxu0  ;;  %8358 = vmatmul.mubr.msk.f32.gmra.mrb[220].mxu1 %vm1001_vm1, %v10864_v0  ;;  %8374 = vmatmul.mubr.msk.f32.gmra.mrb[236].mxu0 %vm1001_vm1, %v10864_v0 }
 0x2d5   : > { %18666 = vst [vmem:[#allocation253_spill] sm:$0xff] %v12517_v40  ;;  %18667 = vst [vmem:[#allocation254_spill] sm:$0xff] %v12519_v45  ;;  %3136 = vmatprep.mubr.f32.mxu1 %v18479_v52  ;;  %3297 = vmatprep.mubr.f32.mxu0 %v18479_v52 }
 0x2d7   : > { %v12527_v56 = vpop.f32.mrb[116].mxu1  ;;  %v12529_v17 = vpop.f32.mrb[132].mxu0 }
 0x2d8   : > { %18668 = vst [vmem:[#allocation255_spill] sm:$0xff] %v12527_v56  ;;  %18669 = vst [vmem:[#allocation256_spill] sm:$0xff] %v12529_v17  ;;  %v12531_v37 = vpop.f32.mrb[117].mxu1  ;;  %v12533_v30 = vpop.f32.mrb[133].mxu0  ;;  %8359 = vmatmul.mubr.msk.f32.gmra.mrb[222].mxu1 %vm1001_vm1, %v10873_v63  ;;  %8375 = vmatmul.mubr.msk.f32.gmra.mrb[238].mxu0 %vm1001_vm1, %v10873_v63 }
 0x2d9   : > { %18670 = vst [vmem:[#allocation257_spill] sm:$0xff] %v12531_v37  ;;  %18671 = vst [vmem:[#allocation258_spill] sm:$0xff] %v12533_v30  ;;  %3368 = vmatprep.mubr.f32.mxu1 %v18479_v52  ;;  %3529 = vmatprep.mubr.f32.mxu0 %v18479_v52  ;;  %v6856_v30 = vld [vmem:[%s17998_s6 + $0x80] sm:$0xff] }
 0x2da   : > { %v6888_v37 = vld [vmem:[%s17998_s6 + $0x180] sm:$0xff] }
 0x2db   : > { %v12541_v45 = vpop.f32.mrb[118].mxu1  ;;  %v12543_v40 = vpop.f32.mrb[134].mxu0  ;;  %v9164_v38 = vpack.c.bf16 %v6889_v49, %v6888_v37 }
 0x2dc   : > { %18672 = vst [vmem:[#allocation259_spill] sm:$0xff] %v12541_v45  ;;  %18673 = vst [vmem:[#allocation260_spill] sm:$0xff] %v12543_v40  ;;  %v12545_v56 = vpop.f32.mrb[119].mxu1  ;;  %v12547_v17 = vpop.f32.mrb[135].mxu0  ;;  %8376 = vmatmul.mubr.msk.f32.vlgmr.msra.gmra.mrb[224].mxu1 %vm1001_vm1, %v10671_v25  ;;  %8392 = vmatmul.mubr.msk.f32.vlgmr.msra.gmra.mrb[240].mxu0 %vm1001_vm1, %v10671_v25  ;;  %v6857_v45 = vld [vmem:[%s17998_s6 + $0x88] sm:$0xff] }
 0x2dd   : > { %18674 = vst [vmem:[#allocation261_spill] sm:$0xff] %v12545_v56  ;;  %18675 = vst [vmem:[#allocation262_spill] sm:$0xff] %v12547_v17  ;;  %v6840_v56 = vld [vmem:[%s17998_s6] sm:$0xff]  ;;  %3374 = vmatprep.mubr.f32.mxu1 %v18479_v52  ;;  %3535 = vmatprep.mubr.f32.mxu0 %v18479_v52  ;;  %v9132_v17 = vpack.c.bf16 %v6857_v45, %v6856_v30  ;;  %v6841_v40 = vld [vmem:[%s17998_s6 + $0x8] sm:$0xff] }
 0x2de   : > { %v9134_v59 = vpack.c.bf16 %v6841_v40, %v6840_v56  ;;  %v6872_v45 = vld [vmem:[%s17998_s6 + $0x100] sm:$0xff]  ;;  %v6873_v30 = vld [vmem:[%s17998_s6 + $0x108] sm:$0xff]  ;;  %9165 = vmatprep.subr.bf16.mxu0 %v9164_v38  ;;  %v6858_v38 = vld [vmem:[%s17998_s6 + $0x90] sm:$0xff] }
 0x2df   : > { %v12573_v6 = vpop.f32.mrb[120].mxu1  ;;  %v12575_v39 = vpop.f32.mrb[136].mxu0  ;;  %9133 = vmatprep.subr.bf16.mxu1 %v9132_v17  ;;  %v9166_v49 = vpack.c.bf16 %v6873_v30, %v6872_v45  ;;  %v6842_v45 = vld [vmem:[%s17998_s6 + $0x10] sm:$0xff] }
 0x2e0   : > { %18676 = vst [vmem:[#allocation263_spill] sm:$0xff] %v12573_v6  ;;  %18677 = vst [vmem:[#allocation264_spill] sm:$0xff] %v12575_v39  ;;  %v12583_v28 = vpop.f32.mrb[121].mxu1  ;;  %v12585_v35 = vpop.f32.mrb[137].mxu0  ;;  %8377 = vmatmul.mubr.msk.f32.gmra.mrb[226].mxu1 %vm1001_vm1, %v10697_v44  ;;  %8393 = vmatmul.mubr.msk.f32.gmra.mrb[242].mxu0 %vm1001_vm1, %v10697_v44 }
 0x2e1   : > { %18678 = vst [vmem:[#allocation265_spill] sm:$0xff] %v12583_v28  ;;  %18679 = vst [vmem:[#allocation266_spill] sm:$0xff] %v12585_v35  ;;  %3380 = vmatprep.mubr.f32.mxu1 %v18479_v52  ;;  %3541 = vmatprep.mubr.f32.mxu0 %v18479_v52  ;;  %v6890_v35 = vld [vmem:[%s17998_s6 + $0x190] sm:$0xff] }
 0x2e2   : > { %9135 = vmatpush3.bf16.msra.mxu1 %v9134_v59  ;;  %9167 = vmatpush3.bf16.msra.mxu0 %v9166_v49  ;;  %v6859_v59 = vld [vmem:[%s17998_s6 + $0x98] sm:$0xff] }
 0x2e3   : > { %v12593_v17 = vpop.f32.mrb[122].mxu1  ;;  %v12595_v40 = vpop.f32.mrb[138].mxu0 }
 0x2e4   : > { %18680 = vst [vmem:[#allocation267_spill] sm:$0xff] %v12593_v17  ;;  %18681 = vst [vmem:[#allocation268_spill] sm:$0xff] %v12595_v40  ;;  %v12597_v56 = vpop.f32.mrb[123].mxu1  ;;  %v12599_v37 = vpop.f32.mrb[139].mxu0  ;;  %8378 = vmatmul.mubr.msk.f32.gmra.mrb[228].mxu1 %vm1001_vm1, %v10700_v46  ;;  %8394 = vmatmul.mubr.msk.f32.gmra.mrb[244].mxu0 %vm1001_vm1, %v10700_v46  ;;  %v9136_v46 = vpack.c.bf16 %v6859_v59, %v6858_v38 }
 0x2e5   : > { %18682 = vst [vmem:[#allocation269_spill] sm:$0xff] %v12597_v56  ;;  %18683 = vst [vmem:[#allocation270_spill] sm:$0xff] %v12599_v37  ;;  %3386 = vmatprep.mubr.f32.mxu1 %v18479_v52  ;;  %3547 = vmatprep.mubr.f32.mxu0 %v18479_v52  ;;  %v6843_v37 = vld [vmem:[%s17998_s6 + $0x18] sm:$0xff] }
 0x2e6   : > { %v6891_v56 = vld [vmem:[%s17998_s6 + $0x198] sm:$0xff]  ;;  %v9138_v38 = vpack.c.bf16 %v6843_v37, %v6842_v45  ;;  %9137 = vmatprep.subr.bf16.mxu1 %v9136_v46 }
 0x2e7   : > { %v12616_v30 = vpop.f32.mrb[124].mxu1  ;;  %v12618_v49 = vpop.f32.mrb[140].mxu0  ;;  %v9168_v59 = vpack.c.bf16 %v6891_v56, %v6890_v35 }
 0x2e8   : > { %18684 = vst [vmem:[#allocation271_spill] sm:$0xff] %v12616_v30  ;;  %18685 = vst [vmem:[#allocation272_spill] sm:$0xff] %v12618_v49  ;;  %v12629_v40 = vpop.f32.mrb[125].mxu1  ;;  %v12631_v17 = vpop.f32.mrb[141].mxu0  ;;  %8379 = vmatmul.mubr.msk.f32.gmra.mrb[230].mxu1 %vm1001_vm1, %v10731_v61  ;;  %8395 = vmatmul.mubr.msk.f32.gmra.mrb[246].mxu0 %vm1001_vm1, %v10731_v61  ;;  %v6874_v49 = vld [vmem:[%s17998_s6 + $0x110] sm:$0xff] }
 0x2e9   : > { %18686 = vst [vmem:[#allocation273_spill] sm:$0xff] %v12629_v40  ;;  %18687 = vst [vmem:[#allocation274_spill] sm:$0xff] %v12631_v17  ;;  %3392 = vmatprep.mubr.f32.mxu1 %v18479_v52  ;;  %3553 = vmatprep.mubr.f32.mxu0 %v18479_v52  ;;  %v6875_v17 = vld [vmem:[%s17998_s6 + $0x118] sm:$0xff] }
 0x2ea   : > { %9169 = vmatprep.subr.bf16.mxu0 %v9168_v59  ;;  %v9170_v40 = vpack.c.bf16 %v6875_v17, %v6874_v49  ;;  %9139 = vmatpush3.bf16.msra.mxu1 %v9138_v38  ;;  %v6860_v49 = vld [vmem:[%s17998_s6 + $0xa0] sm:$0xff]  ;;  %v6861_v38 = vld [vmem:[%s17998_s6 + $0xa8] sm:$0xff] }
 0x2eb   : > { %v12645_v30 = vpop.f32.mrb[126].mxu1  ;;  %v12647_v61 = vpop.f32.mrb[142].mxu0 }
 0x2ec   : > { %18688 = vst [vmem:[#allocation275_spill] sm:$0xff] %v12645_v30  ;;  %18689 = vst [vmem:[#allocation276_spill] sm:$0xff] %v12647_v61  ;;  %v12649_v35 = vpop.f32.mrb[127].mxu1  ;;  %v12651_v56 = vpop.f32.mrb[143].mxu0  ;;  %8380 = vmatmul.mubr.msk.f32.gmra.mrb[232].mxu1 %vm1001_vm1, %v10734_v62  ;;  %8396 = vmatmul.mubr.msk.f32.gmra.mrb[248].mxu0 %vm1001_vm1, %v10734_v62 }
 0x2ed   : > { %18690 = vst [vmem:[#allocation277_spill] sm:$0xff] %v12649_v35  ;;  %18691 = vst [vmem:[#allocation278_spill] sm:$0xff] %v12651_v56  ;;  %3398 = vmatprep.mubr.f32.mxu1 %v18479_v52  ;;  %3559 = vmatprep.mubr.f32.mxu0 %v18479_v52 }
 0x2ee   : > { %9171 = vmatpush3.bf16.msra.mxu0 %v9170_v40  ;;  %v9140_v40 = vpack.c.bf16 %v6861_v38, %v6860_v49 }
 0x2ef   : > { %v2404_v46 = vpop.f32.mrb[128].mxu1  ;;  %v2565_v17 = vpop.f32.mrb[144].mxu0 }
 0x2f0   : > { %v2406_v37 = vpop.f32.mrb[129].mxu1  ;;  %v2567_v45 = vpop.f32.mrb[145].mxu0  ;;  %8381 = vmatmul.mubr.msk.f32.gmra.mrb[234].mxu1 %vm1001_vm1, %v10759_v12  ;;  %8397 = vmatmul.mubr.msk.f32.gmra.mrb[250].mxu0 %vm1001_vm1, %v10759_v12  ;;  %v12748_v55 = vadd.f32 %v12728_v36, %v2565_v17 }
 0x2f1   : > { %3404 = vmatprep.mubr.f32.mxu1 %v18479_v52  ;;  %3565 = vmatprep.mubr.f32.mxu0 %v18479_v52  ;;  %v12764_v17 = vadd.f32 %v12728_v36, %v2567_v45 }
 0x2f2   : > { %9141 = vmatprep.subr.bf16.mxu1 %v9140_v40  ;;  %18692 = vst [vmem:[#allocation279_spill] sm:$0xff] %v12748_v55 }
 0x2f3   : > { %v2410_v59 = vpop.f32.mrb[130].mxu1  ;;  %v2571_v56 = vpop.f32.mrb[146].mxu0  ;;  %18694 = vst [vmem:[#allocation281_spill] sm:$0xff] %v12764_v17 }
 0x2f4   : > { %v2412_v61 = vpop.f32.mrb[131].mxu1  ;;  %v12671_v35 = vpop.f32.mrb[147].mxu0  ;;  %8382 = vmatmul.mubr.msk.f32.gmra.mrb[236].mxu1 %vm1001_vm1, %v10764_v22  ;;  %8398 = vmatmul.mubr.msk.f32.gmra.mrb[252].mxu0 %vm1001_vm1, %v10764_v22  ;;  %v12768_v53 = vadd.f32 %v12728_v36, %v2410_v59 }
 0x2f5   : > { %3410 = vmatprep.mubr.f32.mxu1 %v18479_v52  ;;  %3571 = vmatprep.mubr.f32.mxu0 %v18479_v52  ;;  %v12788_v59 = vadd.f32 %v12728_v36, %v2412_v61  ;;  %v12795_v18 = vadd.f32 %v12728_v36, %v12671_v35 }
 0x2f6   : > { %18695 = vst [vmem:[#allocation282_spill] sm:$0xff] %v12768_v53  ;;  %v3667_v19 = vmin.f32 %v12768_v53, 20.0 }
 0x2f7   : > { %v12679_v30 = vpop.f32.mrb[132].mxu1  ;;  %v12681_v12 = vpop.f32.mrb[148].mxu0  ;;  %18697 = vst [vmem:[#allocation284_spill] sm:$0xff] %v12788_v59  ;;  %18698 = vst [vmem:[#allocation285_spill] sm:$0xff] %v12795_v18  ;;  %v4057_v48 = vmin.f32 %v12788_v59, 20.0  ;;  %v4825_v58 = vmin.f32 %v12795_v18, 20.0 }
 0x2f8   : > { %v12683_v49 = vpop.f32.mrb[133].mxu1  ;;  %v12685_v38 = vpop.f32.mrb[149].mxu0  ;;  %8383 = vmatmul.mubr.msk.f32.gmra.mrb[238].mxu1 %vm1001_vm1, %v10785_v34  ;;  %8399 = vmatmul.mubr.msk.f32.gmra.mrb[254].mxu0 %vm1001_vm1, %v10785_v34  ;;  %v12809_v42 = vadd.f32 %v12728_v36, %v12681_v12 }
 0x2f9   : > { %3416 = vmatprep.mubr.f32.mxu1 %v18479_v52  ;;  %3577 = vmatprep.mubr.f32.mxu0 %v18479_v52  ;;  %v12829_v2 = vadd.f32 %v12728_v36, %v12685_v38 }
 0x2fa   : > { %18700 = vst [vmem:[#allocation287_spill] sm:$0xff] %v12809_v42  ;;  %v4442_v8 = vmin.f32 %v12809_v42, 20.0 }
 0x2fb   : > { %v12693_v40 = vpop.f32.mrb[134].mxu1  ;;  %v12695_v22 = vpop.f32.mrb[150].mxu0  ;;  %18702 = vst [vmem:[#allocation289_spill] sm:$0xff] %v12829_v2  ;;  %v4826_v42 = vmin.f32 %v12829_v2, 20.0 }
 0x2fc   : > { %v12697_v62 = vpop.f32.mrb[135].mxu1  ;;  %v12699_v28 = vpop.f32.mrb[151].mxu0  ;;  %8384 = vmatmul.mubr.msk.f32.gmra.mrb[240].mxu1 %vm1001_vm1, %v10792_v13  ;;  %8400 = vmatmul.mubr.msk.f32.gmra.mrb[0].mxu0 %vm1001_vm1, %v10792_v13  ;;  %v12834_v10 = vadd.f32 %v12728_v36, %v12693_v40  ;;  %v12843_v38 = vadd.f32 %v12728_v36, %v12695_v22  ;;  %v4074_v40 = vmul.f32 1.442695, %v4057_v48  ;;  %v4842_v22 = vmul.f32 1.442695, %v4825_v58 }
 0x2fd   : > { %3422 = vmatprep.mubr.f32.mxu1 %v18479_v52  ;;  %3583 = vmatprep.mubr.f32.mxu0 %v18479_v52  ;;  %v12863_v7 = vadd.f32 %v12728_v36, %v12699_v28 }
 0x2fe   : > { %18703 = vst [vmem:[#allocation290_spill] sm:$0xff] %v12834_v10  ;;  %18704 = vst [vmem:[#allocation291_spill] sm:$0xff] %v12843_v38  ;;  %v4443_v58 = vmin.f32 %v12843_v38, 20.0 }
 0x2ff   : > { %v12707_v34 = vpop.f32.mrb[136].mxu1  ;;  %v12709_v39 = vpop.f32.mrb[152].mxu0  ;;  %18706 = vst [vmem:[#allocation293_spill] sm:$0xff] %v12863_v7 }
 0x300   : > { %v12711_v6 = vpop.f32.mrb[137].mxu1  ;;  %v12713_v32 = vpop.f32.mrb[153].mxu0  ;;  %8385 = vmatmul.mubr.msk.f32.gmra.mrb[242].mxu1 %vm1001_vm1, %v10813_v47  ;;  %8401 = vmatmul.mubr.msk.f32.gmra.mrb[2].mxu0 %vm1001_vm1, %v10813_v47  ;;  %v12741_v47 = vadd.f32 %v12728_v36, %v2404_v46  ;;  %v12759_v46 = vadd.f32 %v12728_v36, %v2406_v37  ;;  %v12776_v37 = vadd.f32 %v12728_v36, %v2571_v56  ;;  %v4824_v56 = vmin.f32 %v12764_v17, 20.0 }
 0x301   : > { %3428 = vmatprep.mubr.f32.mxu1 %v18479_v52  ;;  %3589 = vmatprep.mubr.f32.mxu0 %v18479_v52  ;;  %v12877_v28 = vadd.f32 %v12728_v36, %v12709_v39  ;;  %v4844_v39 = vmul.f32 1.442695, %v4826_v42  ;;  %v12895_v38 = vadd.f32 %v12728_v36, %v12713_v32  ;;  %v4462_v42 = vmul.f32 1.442695, %v4443_v58 }
 0x302   : > { %18693 = vst [vmem:[#allocation280_spill] sm:$0xff] %v12759_v46  ;;  %18696 = vst [vmem:[#allocation283_spill] sm:$0xff] %v12776_v37  ;;  %v4056_v45 = vmin.f32 %v12759_v46, 20.0  ;;  %v4441_v11 = vmin.f32 %v12776_v37, 20.0  ;;  %v4840_v12 = vmul.f32 1.442695, %v4824_v56 }
 0x303   : > { %v12721_v13 = vpop.f32.mrb[138].mxu1  ;;  %v12723_v41 = vpop.f32.mrb[154].mxu0  ;;  %18708 = vst [vmem:[#allocation295_spill] sm:$0xff] %v12877_v28  ;;  %18710 = vst [vmem:[#allocation297_spill] sm:$0xff] %v12895_v38  ;;  %vm3650_vm3 = vcmp.gt.f32.partialorder %v12741_v47, 20.0 }
 0x304   : > { %v12730_v43 = vpop.f32.mrb[139].mxu1  ;;  %v12732_v31 = vpop.f32.mrb[155].mxu0  ;;  %8386 = vmatmul.mubr.msk.f32.gmra.mrb[244].mxu1 %vm1001_vm1, %v10820_v50  ;;  %8402 = vmatmul.mubr.msk.f32.gmra.mrb[4].mxu0 %vm1001_vm1, %v10820_v50  ;;  %v3666_v50 = vmin.f32 %v12741_v47, 20.0  ;;  %v4458_v56 = vmul.f32 1.442695, %v4441_v11  ;;  %v12909_v32 = vadd.f32 %v12728_v36, %v12723_v41  ;;  %v4828_v41 = vmin.f32 %v12895_v38, 20.0 }
 0x305   : > { %3434 = vmatprep.mubr.f32.mxu1 %v18479_v52  ;;  %3595 = vmatprep.mubr.f32.mxu0 %v18479_v52 }
 0x306   : > { %v3682_v16 = vmul.f32 1.442695, %v3666_v50  ;;  %18712 = vst [vmem:[#allocation299_spill] sm:$0xff] %v12909_v32 }
 0x307   : > { %v12743_v15 = vpop.f32.mrb[140].mxu1  ;;  %v12745_v33 = vpop.f32.mrb[156].mxu0 }
 0x308   : > { %v12750_v1 = vpop.f32.mrb[141].mxu1  ;;  %v12752_v26 = vpop.f32.mrb[157].mxu0  ;;  %8387 = vmatmul.mubr.msk.f32.gmra.mrb[246].mxu1 %vm1001_vm1, %v10841_v54  ;;  %8403 = vmatmul.mubr.msk.f32.gmra.mrb[6].mxu0 %vm1001_vm1, %v10841_v54  ;;  %v4440_v54 = vmin.f32 %v12748_v55, 20.0  ;;  %9421 = vpow2.f32 %v3682_v16 }
 0x309   : > { %3440 = vmatprep.mubr.f32.mxu1 %v18479_v52  ;;  %3601 = vmatprep.mubr.f32.mxu0 %v18479_v52 }
 0x30a   : > { %v4456_v23 = vmul.f32 1.442695, %v4440_v54  ;;  %v12822_v54 = vadd.f32 %v12728_v36, %v12683_v49 }
 0x30b   : > { %v12770_v24 = vpop.f32.mrb[142].mxu1  ;;  %v12772_v27 = vpop.f32.mrb[158].mxu0 }
 0x30c   : > { %v12778_v51 = vpop.f32.mrb[143].mxu1  ;;  %v12780_v20 = vpop.f32.mrb[159].mxu0  ;;  %8388 = vmatmul.mubr.msk.f32.gmra.mrb[248].mxu1 %vm1001_vm1, %v10847_v57  ;;  %8404 = vmatmul.mubr.msk.f32.gmra.mrb[8].mxu0 %vm1001_vm1, %v10847_v57  ;;  %v12800_v57 = vadd.f32 %v12728_v36, %v12679_v30  ;;  %v4072_v30 = vmul.f32 1.442695, %v4056_v45  ;;  %18701 = vst [vmem:[#allocation288_spill] sm:$0xff] %v12822_v54  ;;  %9423 = vpow2.f32 %v4456_v23  ;;  %v4058_v11 = vmin.f32 %v12822_v54, 20.0 }
 0x30d   : > { %3446 = vmatprep.mubr.f32.mxu1 %v18479_v52  ;;  %3607 = vmatprep.mubr.f32.mxu0 %v18479_v52  ;;  %v12856_v23 = vadd.f32 %v12728_v36, %v12697_v62  ;;  %v12868_v62 = vadd.f32 %v12728_v36, %v12707_v34  ;;  %v12999_v59 = vadd.f32 %v12728_v36, %v12780_v20 }
 0x30e   : > { %18699 = vst [vmem:[#allocation286_spill] sm:$0xff] %v12800_v57  ;;  %v3668_v45 = vmin.f32 %v12800_v57, 20.0  ;;  %9425 = vpow2.f32 %v4072_v30  ;;  %v3669_v30 = vmin.f32 %v12834_v10, 20.0  ;;  %v4076_v34 = vmul.f32 1.442695, %v4058_v11 }
 0x30f   : > { %v12802_v14 = vpop.f32.mrb[144].mxu1  ;;  %v12804_v61 = vpop.f32.mrb[160].mxu0  ;;  %18705 = vst [vmem:[#allocation292_spill] sm:$0xff] %v12856_v23  ;;  %9427 = vpow2.f32 %v4840_v12  ;;  %18707 = vst [vmem:[#allocation294_spill] sm:$0xff] %v12868_v62  ;;  %v12963_v57 = vadd.f32 %v12728_v36, %v12752_v26 }
 0x310   : > { %v12811_v35 = vpop.f32.mrb[145].mxu1  ;;  %v12813_v50 = vpop.f32.mrb[161].mxu0  ;;  %8389 = vmatmul.mubr.msk.f32.gmra.mrb[250].mxu1 %vm1001_vm1, %v10857_v60  ;;  %8405 = vmatmul.mubr.msk.f32.gmra.mrb[10].mxu0 %vm1001_vm1, %v10857_v60  ;;  %v3684_v60 = vmul.f32 1.442695, %v3667_v19  ;;  %v3686_v48 = vmul.f32 1.442695, %v3668_v45  ;;  %v12890_v45 = vadd.f32 %v12728_v36, %v12711_v6 }
 0x311   : > { %3452 = vmatprep.mubr.f32.mxu1 %v18479_v52  ;;  %3613 = vmatprep.mubr.f32.mxu0 %v18479_v52  ;;  %v3688_v10 = vmul.f32 1.442695, %v3669_v30  ;;  %18718 = vst [vmem:[#allocation305_spill] sm:$0xff] %v12963_v57  ;;  %18726 = vst [vmem:[#allocation313_spill] sm:$0xff] %v12999_v59 }
 0x312   : > { %9429 = vpow2.f32 %v3684_v60  ;;  %18709 = vst [vmem:[#allocation296_spill] sm:$0xff] %v12890_v45 }
 0x313   : > { %v12836_v49 = vpop.f32.mrb[146].mxu1  ;;  %v12838_v9 = vpop.f32.mrb[162].mxu0  ;;  %9431 = vpow2.f32 %v4458_v56  ;;  %v4827_v56 = vmin.f32 %v12863_v7, 20.0  ;;  %v4060_v7 = vmin.f32 %v12890_v45, 20.0 }
 0x314   : > { %v12845_v16 = vpop.f32.mrb[147].mxu1  ;;  %v12847_v19 = vpop.f32.mrb[163].mxu0  ;;  %8390 = vmatmul.mubr.msk.f32.gmra.mrb[252].mxu1 %vm1001_vm1, %v10864_v0  ;;  %8406 = vmatmul.mubr.msk.f32.gmra.mrb[12].mxu0 %vm1001_vm1, %v10864_v0  ;;  %9433 = vpow2.f32 %v4074_v40  ;;  %v12900_v40 = vadd.f32 %v12728_v36, %v12721_v13 }
 0x315   : > { %3458 = vmatprep.mubr.f32.mxu1 %v18479_v52  ;;  %3619 = vmatprep.mubr.f32.mxu0 %v18479_v52  ;;  %v4460_v52 = vmul.f32 1.442695, %v4442_v8  ;;  %v4059_v8 = vmin.f32 %v12856_v23, 20.0  ;;  %9435 = vpow2.f32 %v4842_v22  ;;  %v4444_v22 = vmin.f32 %v12877_v28, 20.0 }
 0x316   : > { %9437 = vpow2.f32 %v3686_v48  ;;  %18711 = vst [vmem:[#allocation298_spill] sm:$0xff] %v12900_v40  ;;  %v4846_v28 = vmul.f32 1.442695, %v4827_v56  ;;  %v12927_v23 = vadd.f32 %v12728_v36, %v12732_v31  ;;  %v4445_v31 = vmin.f32 %v12909_v32, 20.0 }
 0x317   : > { %v12870_v0 = vpop.f32.mrb[148].mxu1  ;;  %v12872_v54 = vpop.f32.mrb[164].mxu0  ;;  %9439 = vpow2.f32 %v4460_v52  ;;  %v4078_v13 = vmul.f32 1.442695, %v4059_v8  ;;  %v12920_v52 = vadd.f32 %v12728_v36, %v12730_v43  ;;  %v3671_v8 = vmin.f32 %v12900_v40, 20.0 }
 0x318   : > { %v12879_v60 = vpop.f32.mrb[149].mxu1  ;;  %v12881_v12 = vpop.f32.mrb[165].mxu0  ;;  %8391 = vmatmul.mubr.msk.f32.gmra.mrb[254].mxu1 %vm1001_vm1, %v10873_v63  ;;  %8407 = vmatmul.mubr.msk.f32.gmra.mrb[14].mxu0 %vm1001_vm1, %v10873_v63  ;;  %v3670_v63 = vmin.f32 %v12868_v62, 20.0  ;;  %9441 = vpow2.f32 %v4076_v34  ;;  %18714 = vst [vmem:[#allocation301_spill] sm:$0xff] %v12927_v23  ;;  %v12934_v43 = vadd.f32 %v12728_v36, %v12743_v15  ;;  %v4464_v38 = vmul.f32 1.442695, %v4444_v22 }
 0x319   : > { %v12915_v62 = vpop.eup %9421  ;;  %18713 = vst [vmem:[#allocation300_spill] sm:$0xff] %v12920_v52  ;;  %9443 = vpow2.f32 %v4844_v39  ;;  %v4080_v5 = vmul.f32 1.442695, %v4060_v7  ;;  %v4061_v29 = vmin.f32 %v12920_v52, 20.0  ;;  %v4848_v32 = vmul.f32 1.442695, %v4828_v41 }
 0x31a   : > { %v12922_v58 = vpop.eup %9423  ;;  %9445 = vpow2.f32 %v3688_v10  ;;  %v3690_v34 = vmul.f32 1.442695, %v3670_v63  ;;  %18715 = vst [vmem:[#allocation302_spill] sm:$0xff] %v12934_v43  ;;  %v12945_v10 = vadd.f32 %v12728_v36, %v12745_v33  ;;  %v4829_v33 = vmin.f32 %v12927_v23, 20.0 }
 0x31b   : > { %v12902_v11 = vpop.f32.mrb[150].mxu1  ;;  %v12904_v6 = vpop.f32.mrb[166].mxu0  ;;  %9447 = vpow2.f32 %v4462_v42  ;;  %v12956_v42 = vadd.f32 %v12728_v36, %v12750_v1  ;;  %v3692_v7 = vmul.f32 1.442695, %v3671_v8  ;;  %v12970_v1 = vadd.f32 %v12728_v36, %v12770_v24 }
 0x31c   : > { %v12911_v48 = vpop.f32.mrb[151].mxu1  ;;  %v12913_v30 = vpop.f32.mrb[167].mxu0  ;;  %18716 = vst [vmem:[#allocation303_spill] sm:$0xff] %v12945_v10  ;;  %9449 = vpow2.f32 %v4078_v13  ;;  %v3672_v13 = vmin.f32 %v12934_v43, 20.0  ;;  %v4466_v23 = vmul.f32 1.442695, %v4445_v31 }
 0x31d   : > { %v12929_v2 = vpop.eup %9425  ;;  %18717 = vst [vmem:[#allocation304_spill] sm:$0xff] %v12956_v42  ;;  %9451 = vpow2.f32 %v4846_v28  ;;  %18720 = vst [vmem:[#allocation307_spill] sm:$0xff] %v12970_v1  ;;  %v4446_v26 = vmin.f32 %v12945_v10, 20.0  ;;  %v4082_v21 = vmul.f32 1.442695, %v4061_v29  ;;  %v4062_v4 = vmin.f32 %v12956_v42, 20.0 }
 0x31e   : > { %v12940_v56 = vpop.eup %9427  ;;  %9453 = vpow2.f32 %v3690_v34  ;;  %v12981_v34 = vadd.f32 %v12728_v36, %v12772_v27  ;;  %v4850_v10 = vmul.f32 1.442695, %v4829_v33  ;;  %v4830_v27 = vmin.f32 %v12963_v57, 20.0 }
 0x31f   : > { %v12936_v45 = vpop.f32.mrb[152].mxu1  ;;  %v12938_v39 = vpop.f32.mrb[168].mxu0  ;;  %9455 = vpow2.f32 %v4464_v38  ;;  %v12992_v38 = vadd.f32 %v12728_v36, %v12778_v51  ;;  %v3694_v29 = vmul.f32 1.442695, %v3672_v13  ;;  %v13006_v51 = vadd.f32 %v12728_v36, %v12802_v14 }
 0x320   : > { %v12947_v63 = vpop.f32.mrb[153].mxu1  ;;  %v12949_v40 = vpop.f32.mrb[169].mxu0  ;;  %18722 = vst [vmem:[#allocation309_spill] sm:$0xff] %v12981_v34  ;;  %9457 = vpow2.f32 %v4080_v5  ;;  %v3673_v5 = vmin.f32 %v12970_v1, 20.0  ;;  %v4468_v57 = vmul.f32 1.442695, %v4446_v26 }
 0x321   : > { %v12951_v15 = vpop.eup %9429  ;;  %18724 = vst [vmem:[#allocation311_spill] sm:$0xff] %v12992_v38  ;;  %9459 = vpow2.f32 %v4848_v32  ;;  %18728 = vst [vmem:[#allocation315_spill] sm:$0xff] %v13006_v51  ;;  %v4447_v20 = vmin.f32 %v12981_v34, 20.0  ;;  %v4852_v34 = vmul.f32 1.442695, %v4830_v27 }
 0x322   : > { %v12958_v22 = vpop.eup %9431  ;;  %9461 = vpow2.f32 %v3692_v7  ;;  %v13017_v7 = vadd.f32 %v12728_v36, %v12804_v61  ;;  %v4831_v61 = vmin.f32 %v12999_v59, 20.0 }
 0x323   : > { %v12965_v18 = vpop.eup %9433  ;;  %v12972_v52 = vpop.f32.mrb[154].mxu1  ;;  %9463 = vpow2.f32 %v4466_v23  ;;  %v13028_v23 = vadd.f32 %v12728_v36, %v12811_v35  ;;  %v13042_v35 = vadd.f32 %v12728_v36, %v12836_v49  ;;  %v4470_v59 = vmul.f32 1.442695, %v4447_v20 }
 0x324   : > { %18719 = vst [vmem:[#allocation306_spill] sm:$0xff] %v12965_v18  ;;  %v12974_v28 = vpop.f32.mrb[170].mxu0  ;;  %v12976_v41 = vpop.eup %9435  ;;  %18730 = vst [vmem:[#allocation317_spill] sm:$0xff] %v13017_v7  ;;  %9465 = vpow2.f32 %v4082_v21  ;;  %v3674_v21 = vmin.f32 %v13006_v51, 20.0 }
 0x325   : > { %18721 = vst [vmem:[#allocation308_spill] sm:$0xff] %v12976_v41  ;;  %v12983_v8 = vpop.f32.mrb[155].mxu1  ;;  %v12985_v43 = vpop.f32.mrb[171].mxu0  ;;  %18732 = vst [vmem:[#allocation319_spill] sm:$0xff] %v13028_v23  ;;  %9467 = vpow2.f32 %v4850_v10 }
 0x326   : > { %v12987_v24 = vpop.eup %9437  ;;  %9469 = vpow2.f32 %v3694_v29  ;;  %18736 = vst [vmem:[#allocation323_spill] sm:$0xff] %v13042_v35  ;;  %v13053_v29 = vadd.f32 %v12728_v36, %v12838_v9 }
 0x327   : > { %18723 = vst [vmem:[#allocation310_spill] sm:$0xff] %v12987_v24  ;;  %v12994_v31 = vpop.eup %9439  ;;  %v13008_v42 = vpop.f32.mrb[156].mxu1  ;;  %9471 = vpow2.f32 %v4468_v57  ;;  %v13064_v57 = vadd.f32 %v12728_v36, %v12845_v16  ;;  %v13078_v16 = vadd.f32 %v12728_v36, %v12870_v0 }
 0x328   : > { %18725 = vst [vmem:[#allocation312_spill] sm:$0xff] %v12994_v31  ;;  %v13001_v3 = vpop.eup %9441  ;;  %v13010_v32 = vpop.f32.mrb[172].mxu0  ;;  %v4063_v31 = vmin.f32 %v12992_v38, 20.0  ;;  %18738 = vst [vmem:[#allocation325_spill] sm:$0xff] %v13053_v29 }
 0x329   : > { %18727 = vst [vmem:[#allocation314_spill] sm:$0xff] %v13001_v3  ;;  %v13012_v33 = vpop.eup %9443  ;;  %v13019_v13 = vpop.f32.mrb[157].mxu1  ;;  %v4084_v3 = vmul.f32 1.442695, %v4062_v4  ;;  %v3696_v4 = vmul.f32 1.442695, %v3673_v5 }
 0x32a   : > { %18729 = vst [vmem:[#allocation316_spill] sm:$0xff] %v13012_v33  ;;  %v13021_v1 = vpop.f32.mrb[173].mxu0  ;;  %v13023_v14 = vpop.eup %9445  ;;  %v13035_v33 = vadd.f32 %v12728_v36, %v12813_v50  ;;  %v4448_v50 = vmin.f32 %v13017_v7, 20.0  ;;  %18740 = vst [vmem:[#allocation327_spill] sm:$0xff] %v13064_v57  ;;  %v4854_v7 = vmul.f32 1.442695, %v4831_v61 }
 0x32b   : > { %18731 = vst [vmem:[#allocation318_spill] sm:$0xff] %v13023_v14  ;;  %v13030_v26 = vpop.eup %9447  ;;  %v13044_v38 = vpop.f32.mrb[158].mxu1  ;;  %9473 = vpow2.f32 %v4084_v3  ;;  %v3698_v3 = vmul.f32 1.442695, %v3674_v21  ;;  %18744 = vst [vmem:[#allocation331_spill] sm:$0xff] %v13078_v16 }
 0x32c   : > { %18733 = vst [vmem:[#allocation320_spill] sm:$0xff] %v13030_v26  ;;  %18734 = vst [vmem:[#allocation321_spill] sm:$0xff] %v13035_v33  ;;  %v13037_v37 = vpop.eup %9449  ;;  %v13046_v10 = vpop.f32.mrb[174].mxu0  ;;  %v4064_v26 = vmin.f32 %v13028_v23, 20.0  ;;  %9475 = vpow2.f32 %v4852_v34  ;;  %v4832_v9 = vmin.f32 %v13035_v33, 20.0 }
 0x32d   : > { %18735 = vst [vmem:[#allocation322_spill] sm:$0xff] %v13037_v37  ;;  %v13048_v27 = vpop.eup %9451  ;;  %v13055_v5 = vpop.f32.mrb[159].mxu1  ;;  %v4086_v37 = vmul.f32 1.442695, %v4063_v31  ;;  %9477 = vpow2.f32 %v3696_v4  ;;  %v3675_v31 = vmin.f32 %v13042_v35, 20.0  ;;  %v13089_v4 = vadd.f32 %v12728_v36, %v12872_v54 }
 0x32e   : > { %18737 = vst [vmem:[#allocation324_spill] sm:$0xff] %v13048_v27  ;;  %v13057_v51 = vpop.f32.mrb[175].mxu0  ;;  %v13059_v49 = vpop.eup %9453  ;;  %v13071_v27 = vadd.f32 %v12728_v36, %v12847_v19  ;;  %9479 = vpow2.f32 %v4470_v59  ;;  %v4472_v33 = vmul.f32 1.442695, %v4448_v50  ;;  %v4449_v19 = vmin.f32 %v13053_v29, 20.0 }
 0x32f   : > { %18739 = vst [vmem:[#allocation326_spill] sm:$0xff] %v13059_v49  ;;  %v13066_v20 = vpop.eup %9455  ;;  %v13080_v23 = vpop.f32.mrb[160].mxu1  ;;  %18746 = vst [vmem:[#allocation333_spill] sm:$0xff] %v13089_v4  ;;  %9481 = vpow2.f32 %v4086_v37  ;;  %v13100_v59 = vadd.f32 %v12728_v36, %v12879_v60  ;;  %v4856_v29 = vmul.f32 1.442695, %v4832_v9  ;;  %v13114_v60 = vadd.f32 %v12728_v36, %v12902_v11 }
 0x330   : > { %18741 = vst [vmem:[#allocation328_spill] sm:$0xff] %v13066_v20  ;;  %18742 = vst [vmem:[#allocation329_spill] sm:$0xff] %v13071_v27  ;;  %v13073_v14 = vpop.eup %9457  ;;  %v13082_v34 = vpop.f32.mrb[176].mxu0  ;;  %v4065_v20 = vmin.f32 %v13064_v57, 20.0  ;;  %9483 = vpow2.f32 %v4854_v7  ;;  %v4833_v54 = vmin.f32 %v13071_v27, 20.0 }
 0x331   : > { %18743 = vst [vmem:[#allocation330_spill] sm:$0xff] %v13073_v14  ;;  %v13084_v61 = vpop.eup %9459  ;;  %v13091_v21 = vpop.f32.mrb[161].mxu1  ;;  %v4088_v14 = vmul.f32 1.442695, %v4064_v26  ;;  %18748 = vst [vmem:[#allocation335_spill] sm:$0xff] %v13100_v59  ;;  %9485 = vpow2.f32 %v3698_v3  ;;  %v3676_v26 = vmin.f32 %v13078_v16, 20.0  ;;  %v13125_v3 = vadd.f32 %v12728_v36, %v12904_v6 }
 0x332   : > { %18745 = vst [vmem:[#allocation332_spill] sm:$0xff] %v13084_v61  ;;  %v13093_v35 = vpop.f32.mrb[177].mxu0  ;;  %v13095_v0 = vpop.eup %9461  ;;  %v13107_v61 = vadd.f32 %v12728_v36, %v12881_v12  ;;  %v3700_v37 = vmul.f32 1.442695, %v3675_v31  ;;  %18752 = vst [vmem:[#allocation339_spill] sm:$0xff] %v13114_v60  ;;  %9487 = vpow2.f32 %v4472_v33  ;;  %v4450_v12 = vmin.f32 %v13089_v4, 20.0 }
 0x333   : > { %18747 = vst [vmem:[#allocation334_spill] sm:$0xff] %v13095_v0  ;;  %v13102_v50 = vpop.eup %9463  ;;  %v13116_v57 = vpop.f32.mrb[162].mxu1  ;;  %v4474_v27 = vmul.f32 1.442695, %v4449_v19  ;;  %18754 = vst [vmem:[#allocation341_spill] sm:$0xff] %v13125_v3  ;;  %9489 = vpow2.f32 %v4088_v14  ;;  %v13136_v33 = vadd.f32 %v12728_v36, %v12911_v48  ;;  %v13150_v48 = vadd.f32 %v12728_v36, %v12936_v45 }
 0x334   : > { %18749 = vst [vmem:[#allocation336_spill] sm:$0xff] %v13102_v50  ;;  %18750 = vst [vmem:[#allocation337_spill] sm:$0xff] %v13107_v61  ;;  %v13109_v49 = vpop.eup %9465  ;;  %v13118_v7 = vpop.f32.mrb[178].mxu0  ;;  %v4066_v50 = vmin.f32 %v13100_v59, 20.0  ;;  %9491 = vpow2.f32 %v4856_v29  ;;  %v4858_v4 = vmul.f32 1.442695, %v4833_v54 }
 0x335   : > { %18751 = vst [vmem:[#allocation338_spill] sm:$0xff] %v13109_v49  ;;  %v13120_v9 = vpop.eup %9467  ;;  %v13127_v31 = vpop.f32.mrb[163].mxu1  ;;  %v4090_v49 = vmul.f32 1.442695, %v4065_v20  ;;  %18756 = vst [vmem:[#allocation343_spill] sm:$0xff] %v13136_v33  ;;  %v4834_v6 = vmin.f32 %v13107_v61, 20.0  ;;  %9493 = vpow2.f32 %v3700_v37  ;;  %v13161_v37 = vadd.f32 %v12728_v36, %v12938_v39 }
 0x336   : > { %18753 = vst [vmem:[#allocation340_spill] sm:$0xff] %v13120_v9  ;;  %v13129_v16 = vpop.f32.mrb[179].mxu0  ;;  %v13131_v11 = vpop.eup %9469  ;;  %v13143_v9 = vadd.f32 %v12728_v36, %v12913_v30  ;;  %v3702_v14 = vmul.f32 1.442695, %v3676_v26  ;;  %v3677_v20 = vmin.f32 %v13114_v60, 20.0  ;;  %18760 = vst [vmem:[#allocation347_spill] sm:$0xff] %v13150_v48  ;;  %9495 = vpow2.f32 %v4474_v27 }
 0x337   : > { %18755 = vst [vmem:[#allocation342_spill] sm:$0xff] %v13131_v11  ;;  %v13138_v19 = vpop.eup %9471  ;;  %v13152_v59 = vpop.f32.mrb[164].mxu1  ;;  %v4476_v61 = vmul.f32 1.442695, %v4450_v12  ;;  %v4451_v30 = vmin.f32 %v13125_v3, 20.0  ;;  %18762 = vst [vmem:[#allocation349_spill] sm:$0xff] %v13161_v37  ;;  %9497 = vpow2.f32 %v4090_v49  ;;  %v13172_v27 = vadd.f32 %v12728_v36, %v12947_v63 }
 0x338   : > { %18757 = vst [vmem:[#allocation344_spill] sm:$0xff] %v13138_v19  ;;  %18758 = vst [vmem:[#allocation345_spill] sm:$0xff] %v13143_v9  ;;  %v13145_v0 = vpop.eup %9473  ;;  %v13154_v29 = vpop.f32.mrb[180].mxu0  ;;  %v4067_v19 = vmin.f32 %v13136_v33, 20.0  ;;  %9499 = vpow2.f32 %v4858_v4  ;;  %v4860_v3 = vmul.f32 1.442695, %v4834_v6  ;;  %v13186_v63 = vadd.f32 %v12728_v36, %v12972_v52 }
 0x339   : > { %18759 = vst [vmem:[#allocation346_spill] sm:$0xff] %v13145_v0  ;;  %v13156_v54 = vpop.eup %9475  ;;  %v13163_v26 = vpop.f32.mrb[165].mxu1  ;;  %v4092_v0 = vmul.f32 1.442695, %v4066_v50  ;;  %18764 = vst [vmem:[#allocation351_spill] sm:$0xff] %v13172_v27  ;;  %v4835_v39 = vmin.f32 %v13143_v9, 20.0  ;;  %9501 = vpow2.f32 %v3702_v14  ;;  %v13197_v14 = vadd.f32 %v12728_v36, %v12974_v28 }
 0x33a   : > { %18761 = vst [vmem:[#allocation348_spill] sm:$0xff] %v13156_v54  ;;  %v13165_v60 = vpop.f32.mrb[181].mxu0  ;;  %v13167_v45 = vpop.eup %9477  ;;  %v13179_v54 = vadd.f32 %v12728_v36, %v12949_v40  ;;  %v3704_v49 = vmul.f32 1.442695, %v3677_v20  ;;  %v3678_v50 = vmin.f32 %v13150_v48, 20.0  ;;  %18768 = vst [vmem:[#allocation355_spill] sm:$0xff] %v13186_v63  ;;  %9503 = vpow2.f32 %v4476_v61 }
 0x33b   : > { %18763 = vst [vmem:[#allocation350_spill] sm:$0xff] %v13167_v45  ;;  %v13174_v12 = vpop.eup %9479  ;;  %v13188_v33 = vpop.f32.mrb[166].mxu1  ;;  %v4478_v9 = vmul.f32 1.442695, %v4451_v30  ;;  %v4452_v40 = vmin.f32 %v13161_v37, 20.0  ;;  %18770 = vst [vmem:[#allocation357_spill] sm:$0xff] %v13197_v14  ;;  %9505 = vpow2.f32 %v4092_v0  ;;  %v13208_v61 = vadd.f32 %v12728_v36, %v12983_v8 }
 0x33c   : > { %18765 = vst [vmem:[#allocation352_spill] sm:$0xff] %v13174_v12  ;;  %18766 = vst [vmem:[#allocation353_spill] sm:$0xff] %v13179_v54  ;;  %v13181_v11 = vpop.eup %9481  ;;  %v13190_v4 = vpop.f32.mrb[182].mxu0  ;;  %v4068_v12 = vmin.f32 %v13172_v27, 20.0  ;;  %9507 = vpow2.f32 %v4860_v3  ;;  %v4862_v37 = vmul.f32 1.442695, %v4835_v39  ;;  %v13222_v8 = vadd.f32 %v12728_v36, %v13008_v42 }
 0x33d   : > { %18767 = vst [vmem:[#allocation354_spill] sm:$0xff] %v13181_v11  ;;  %v13192_v6 = vpop.eup %9483  ;;  %v13199_v20 = vpop.f32.mrb[167].mxu1  ;;  %v4094_v11 = vmul.f32 1.442695, %v4067_v19  ;;  %18772 = vst [vmem:[#allocation359_spill] sm:$0xff] %v13208_v61  ;;  %v4836_v28 = vmin.f32 %v13179_v54, 20.0  ;;  %9509 = vpow2.f32 %v3704_v49  ;;  %v13233_v49 = vadd.f32 %v12728_v36, %v13010_v32 }
 0x33e   : > { %18769 = vst [vmem:[#allocation356_spill] sm:$0xff] %v13192_v6  ;;  %v13201_v48 = vpop.f32.mrb[183].mxu0  ;;  %v13203_v52 = vpop.eup %9485  ;;  %v13215_v6 = vadd.f32 %v12728_v36, %v12985_v43  ;;  %v3706_v0 = vmul.f32 1.442695, %v3678_v50  ;;  %v3679_v19 = vmin.f32 %v13186_v63, 20.0  ;;  %18776 = vst [vmem:[#allocation363_spill] sm:$0xff] %v13222_v8  ;;  %9511 = vpow2.f32 %v4478_v9 }
 0x33f   : > { %18771 = vst [vmem:[#allocation358_spill] sm:$0xff] %v13203_v52  ;;  %v13210_v30 = vpop.eup %9487  ;;  %v13224_v27 = vpop.f32.mrb[168].mxu1  ;;  %v4480_v54 = vmul.f32 1.442695, %v4452_v40  ;;  %v4453_v43 = vmin.f32 %v13197_v14, 20.0  ;;  %18778 = vst [vmem:[#allocation365_spill] sm:$0xff] %v13233_v49  ;;  %9513 = vpow2.f32 %v4094_v11  ;;  %v13244_v9 = vadd.f32 %v12728_v36, %v13019_v13 }
 0x340   : > { %18773 = vst [vmem:[#allocation360_spill] sm:$0xff] %v13210_v30  ;;  %18774 = vst [vmem:[#allocation361_spill] sm:$0xff] %v13215_v6  ;;  %v13217_v45 = vpop.eup %9489  ;;  %v13226_v3 = vpop.f32.mrb[184].mxu0  ;;  %v4069_v30 = vmin.f32 %v13208_v61, 20.0  ;;  %9515 = vpow2.f32 %v4862_v37  ;;  %v4864_v14 = vmul.f32 1.442695, %v4836_v28  ;;  %v13258_v13 = vadd.f32 %v12728_v36, %v13044_v38 }
 0x341   : > { %18775 = vst [vmem:[#allocation362_spill] sm:$0xff] %v13217_v45  ;;  %v13228_v39 = vpop.eup %9491  ;;  %v13235_v50 = vpop.f32.mrb[169].mxu1  ;;  %v4096_v45 = vmul.f32 1.442695, %v4068_v12  ;;  %18780 = vst [vmem:[#allocation367_spill] sm:$0xff] %v13244_v9  ;;  %v4837_v32 = vmin.f32 %v13215_v6, 20.0  ;;  %9517 = vpow2.f32 %v3706_v0  ;;  %v13269_v0 = vadd.f32 %v12728_v36, %v13046_v10 }
 0x342   : > { %18777 = vst [vmem:[#allocation364_spill] sm:$0xff] %v13228_v39  ;;  %v13237_v63 = vpop.f32.mrb[185].mxu0  ;;  %v13239_v42 = vpop.eup %9493  ;;  %v13251_v39 = vadd.f32 %v12728_v36, %v13021_v1  ;;  %v3708_v11 = vmul.f32 1.442695, %v3679_v19  ;;  %v3680_v12 = vmin.f32 %v13222_v8, 20.0  ;;  %18784 = vst [vmem:[#allocation371_spill] sm:$0xff] %v13258_v13  ;;  %9519 = vpow2.f32 %v4480_v54 }
 0x343   : > { %18779 = vst [vmem:[#allocation366_spill] sm:$0xff] %v13239_v42  ;;  %v13246_v40 = vpop.eup %9495  ;;  %v13260_v61 = vpop.f32.mrb[170].mxu1  ;;  %v4482_v6 = vmul.f32 1.442695, %v4453_v43  ;;  %v4454_v1 = vmin.f32 %v13233_v49, 20.0  ;;  %18786 = vst [vmem:[#allocation373_spill] sm:$0xff] %v13269_v0  ;;  %9521 = vpow2.f32 %v4096_v45  ;;  %v13280_v54 = vadd.f32 %v12728_v36, %v13055_v5 }
 0x344   : > { %18781 = vst [vmem:[#allocation368_spill] sm:$0xff] %v13246_v40  ;;  %18782 = vst [vmem:[#allocation369_spill] sm:$0xff] %v13251_v39  ;;  %v13253_v52 = vpop.eup %9497  ;;  %v13262_v37 = vpop.f32.mrb[186].mxu0  ;;  %v4070_v40 = vmin.f32 %v13244_v9, 20.0  ;;  %9523 = vpow2.f32 %v4864_v14  ;;  %v4866_v49 = vmul.f32 1.442695, %v4837_v32  ;;  %v13294_v5 = vadd.f32 %v12728_v36, %v13080_v23 }
 0x345   : > { %18783 = vst [vmem:[#allocation370_spill] sm:$0xff] %v13253_v52  ;;  %v13264_v28 = vpop.eup %9499  ;;  %v13271_v19 = vpop.f32.mrb[171].mxu1  ;;  %v4098_v52 = vmul.f32 1.442695, %v4069_v30  ;;  %18788 = vst [vmem:[#allocation375_spill] sm:$0xff] %v13280_v54  ;;  %v4838_v10 = vmin.f32 %v13251_v39, 20.0  ;;  %9525 = vpow2.f32 %v3708_v11  ;;  %v13305_v11 = vadd.f32 %v12728_v36, %v13082_v34 }
 0x346   : > { %18785 = vst [vmem:[#allocation372_spill] sm:$0xff] %v13264_v28  ;;  %v13273_v8 = vpop.f32.mrb[187].mxu0  ;;  %v13275_v38 = vpop.eup %9501  ;;  %v13287_v28 = vadd.f32 %v12728_v36, %v13057_v51  ;;  %v3710_v45 = vmul.f32 1.442695, %v3680_v12  ;;  %v3681_v30 = vmin.f32 %v13258_v13, 20.0  ;;  %18792 = vst [vmem:[#allocation379_spill] sm:$0xff] %v13294_v5  ;;  %9527 = vpow2.f32 %v4482_v6 }
 0x347   : > { %18787 = vst [vmem:[#allocation374_spill] sm:$0xff] %v13275_v38  ;;  %v13282_v43 = vpop.eup %9503  ;;  %v13296_v9 = vpop.f32.mrb[172].mxu1  ;;  %v4484_v39 = vmul.f32 1.442695, %v4454_v1  ;;  %v4455_v51 = vmin.f32 %v13269_v0, 20.0  ;;  %18794 = vst [vmem:[#allocation381_spill] sm:$0xff] %v13305_v11  ;;  %9529 = vpow2.f32 %v4098_v52  ;;  %v13316_v6 = vadd.f32 %v12728_v36, %v13091_v21 }
 0x348   : > { %18789 = vst [vmem:[#allocation376_spill] sm:$0xff] %v13282_v43  ;;  %18790 = vst [vmem:[#allocation377_spill] sm:$0xff] %v13287_v28  ;;  %v13289_v42 = vpop.eup %9505  ;;  %v13298_v14 = vpop.f32.mrb[188].mxu0  ;;  %v4071_v43 = vmin.f32 %v13280_v54, 20.0  ;;  %9531 = vpow2.f32 %v4866_v49  ;;  %v4868_v0 = vmul.f32 1.442695, %v4838_v10  ;;  %v13330_v21 = vadd.f32 %v12728_v36, %v13116_v57 }
 0x349   : > { %18791 = vst [vmem:[#allocation378_spill] sm:$0xff] %v13289_v42  ;;  %v13300_v32 = vpop.eup %9507  ;;  %v13307_v12 = vpop.f32.mrb[173].mxu1  ;;  %v4100_v42 = vmul.f32 1.442695, %v4070_v40  ;;  %18796 = vst [vmem:[#allocation383_spill] sm:$0xff] %v13316_v6  ;;  %v4839_v34 = vmin.f32 %v13287_v28, 20.0  ;;  %9533 = vpow2.f32 %v3710_v45  ;;  %v13341_v45 = vadd.f32 %v12728_v36, %v13118_v7 }
 0x34a   : > { %18793 = vst [vmem:[#allocation380_spill] sm:$0xff] %v13300_v32  ;;  %v13309_v13 = vpop.f32.mrb[189].mxu0  ;;  %v13311_v23 = vpop.eup %9509  ;;  %v13323_v32 = vadd.f32 %v12728_v36, %v13093_v35  ;;  %v3712_v52 = vmul.f32 1.442695, %v3681_v30  ;;  %v5208_v40 = vmin.f32 %v13294_v5, 20.0  ;;  %18800 = vst [vmem:[#allocation387_spill] sm:$0xff] %v13330_v21  ;;  %9535 = vpow2.f32 %v4484_v39 }
 0x34b   : > { %18795 = vst [vmem:[#allocation382_spill] sm:$0xff] %v13311_v23  ;;  %v13318_v1 = vpop.eup %9511  ;;  %v13332_v54 = vpop.f32.mrb[174].mxu1  ;;  %v4486_v28 = vmul.f32 1.442695, %v4455_v51  ;;  %v5976_v35 = vmin.f32 %v13305_v11, 20.0  ;;  %18802 = vst [vmem:[#allocation389_spill] sm:$0xff] %v13341_v45  ;;  %9537 = vpow2.f32 %v4100_v42  ;;  %v13352_v39 = vadd.f32 %v12728_v36, %v13127_v31 }
 0x34c   : > { %18797 = vst [vmem:[#allocation384_spill] sm:$0xff] %v13318_v1  ;;  %18798 = vst [vmem:[#allocation385_spill] sm:$0xff] %v13323_v32  ;;  %v13325_v38 = vpop.eup %9513  ;;  %v13334_v49 = vpop.f32.mrb[190].mxu0  ;;  %v5592_v1 = vmin.f32 %v13316_v6, 20.0  ;;  %9539 = vpow2.f32 %v4868_v0  ;;  %v4870_v11 = vmul.f32 1.442695, %v4839_v34  ;;  %v13366_v31 = vadd.f32 %v12728_v36, %v13152_v59 }
 0x34d   : > { %18799 = vst [vmem:[#allocation386_spill] sm:$0xff] %v13325_v38  ;;  %v13336_v10 = vpop.eup %9515  ;;  %v13343_v30 = vpop.f32.mrb[175].mxu1  ;;  %v4102_v38 = vmul.f32 1.442695, %v4071_v43  ;;  %18804 = vst [vmem:[#allocation391_spill] sm:$0xff] %v13352_v39  ;;  %v6360_v7 = vmin.f32 %v13323_v32, 20.0  ;;  %9541 = vpow2.f32 %v3712_v52  ;;  %v13377_v52 = vadd.f32 %v12728_v36, %v13154_v29 }
 0x34e   : > { %18801 = vst [vmem:[#allocation388_spill] sm:$0xff] %v13336_v10  ;;  %v13345_v5 = vpop.f32.mrb[191].mxu0  ;;  %v13347_v57 = vpop.eup %9517  ;;  %v13359_v10 = vadd.f32 %v12728_v36, %v13129_v16  ;;  %v5224_v42 = vmul.f32 1.442695, %v5208_v40  ;;  %v5209_v43 = vmin.f32 %v13330_v21, 20.0  ;;  %18808 = vst [vmem:[#allocation395_spill] sm:$0xff] %v13366_v31  ;;  %9543 = vpow2.f32 %v4486_v28 }
 0x34f   : > { %18803 = vst [vmem:[#allocation390_spill] sm:$0xff] %v13347_v57  ;;  %v13354_v51 = vpop.eup %9519  ;;  %v13368_v6 = vpop.f32.mrb[176].mxu1  ;;  %v5992_v32 = vmul.f32 1.442695, %v5976_v35  ;;  %v5977_v16 = vmin.f32 %v13341_v45, 20.0  ;;  %18810 = vst [vmem:[#allocation397_spill] sm:$0xff] %v13377_v52  ;;  %9545 = vpow2.f32 %v4102_v38  ;;  %v13388_v28 = vadd.f32 %v12728_v36, %v13163_v26 }
 0x350   : > { %18805 = vst [vmem:[#allocation392_spill] sm:$0xff] %v13354_v51  ;;  %18806 = vst [vmem:[#allocation393_spill] sm:$0xff] %v13359_v10  ;;  %v13361_v23 = vpop.eup %9521  ;;  %v13370_v0 = vpop.f32.mrb[192].mxu0  ;;  %v5593_v51 = vmin.f32 %v13352_v39, 20.0  ;;  %9547 = vpow2.f32 %v4870_v11  ;;  %v6376_v45 = vmul.f32 1.442695, %v6360_v7  ;;  %v13402_v26 = vadd.f32 %v12728_v36, %v13188_v33 }
 0x351   : > { %18807 = vst [vmem:[#allocation394_spill] sm:$0xff] %v13361_v23  ;;  %v13372_v34 = vpop.eup %9523  ;;  %v13379_v40 = vpop.f32.mrb[177].mxu1  ;;  %v5608_v23 = vmul.f32 1.442695, %v5592_v1  ;;  %18812 = vst [vmem:[#allocation399_spill] sm:$0xff] %v13388_v28  ;;  %v6361_v29 = vmin.f32 %v13359_v10, 20.0  ;;  %9549 = vpow2.f32 %v5224_v42  ;;  %v13413_v42 = vadd.f32 %v12728_v36, %v13190_v4 }
 0x352   : > { %18809 = vst [vmem:[#allocation396_spill] sm:$0xff] %v13372_v34  ;;  %v13381_v21 = vpop.f32.mrb[193].mxu0  ;;  %v13383_v59 = vpop.eup %9525  ;;  %v13395_v34 = vadd.f32 %v12728_v36, %v13165_v60  ;;  %v5226_v38 = vmul.f32 1.442695, %v5209_v43  ;;  %v5210_v1 = vmin.f32 %v13366_v31, 20.0  ;;  %18816 = vst [vmem:[#allocation403_spill] sm:$0xff] %v13402_v26  ;;  %9551 = vpow2.f32 %v5992_v32 }
 0x353   : > { %18811 = vst [vmem:[#allocation398_spill] sm:$0xff] %v13383_v59  ;;  %v13390_v35 = vpop.eup %9527  ;;  %v13404_v39 = vpop.f32.mrb[178].mxu1  ;;  %v5994_v10 = vmul.f32 1.442695, %v5977_v16  ;;  %v5978_v60 = vmin.f32 %v13377_v52, 20.0  ;;  %18818 = vst [vmem:[#allocation405_spill] sm:$0xff] %v13413_v42  ;;  %9553 = vpow2.f32 %v5608_v23  ;;  %v13424_v32 = vadd.f32 %v12728_v36, %v13199_v20 }
 0x354   : > { %18813 = vst [vmem:[#allocation400_spill] sm:$0xff] %v13390_v35  ;;  %18814 = vst [vmem:[#allocation401_spill] sm:$0xff] %v13395_v34  ;;  %v13397_v57 = vpop.eup %9529  ;;  %v13406_v11 = vpop.f32.mrb[194].mxu0  ;;  %v5594_v35 = vmin.f32 %v13388_v28, 20.0  ;;  %9555 = vpow2.f32 %v6376_v45  ;;  %v6378_v52 = vmul.f32 1.442695, %v6361_v29  ;;  %v13438_v20 = vadd.f32 %v12728_v36, %v13224_v27 }
 0x355   : > { %18815 = vst [vmem:[#allocation402_spill] sm:$0xff] %v13397_v57  ;;  %v13408_v7 = vpop.eup %9531  ;;  %v13415_v43 = vpop.f32.mrb[179].mxu1  ;;  %v5610_v57 = vmul.f32 1.442695, %v5593_v51  ;;  %18820 = vst [vmem:[#allocation407_spill] sm:$0xff] %v13424_v32  ;;  %v6362_v4 = vmin.f32 %v13395_v34, 20.0  ;;  %9557 = vpow2.f32 %v5226_v38  ;;  %v13449_v38 = vadd.f32 %v12728_v36, %v13226_v3 }
 0x356   : > { %18817 = vst [vmem:[#allocation404_spill] sm:$0xff] %v13408_v7  ;;  %v13417_v31 = vpop.f32.mrb[195].mxu0  ;;  %v13419_v33 = vpop.eup %9533  ;;  %v13431_v7 = vadd.f32 %v12728_v36, %v13201_v48  ;;  %v5228_v23 = vmul.f32 1.442695, %v5210_v1  ;;  %v5211_v51 = vmin.f32 %v13402_v26, 20.0  ;;  %18824 = vst [vmem:[#allocation411_spill] sm:$0xff] %v13438_v20  ;;  %9559 = vpow2.f32 %v5994_v10 }
 0x357   : > { %18819 = vst [vmem:[#allocation406_spill] sm:$0xff] %v13419_v33  ;;  %v13426_v16 = vpop.eup %9535  ;;  %v13440_v28 = vpop.f32.mrb[180].mxu1  ;;  %v5996_v34 = vmul.f32 1.442695, %v5978_v60  ;;  %v5979_v48 = vmin.f32 %v13413_v42, 20.0  ;;  %18826 = vst [vmem:[#allocation413_spill] sm:$0xff] %v13449_v38  ;;  %9561 = vpow2.f32 %v5610_v57  ;;  %v13460_v10 = vadd.f32 %v12728_v36, %v13235_v50 }
 0x358   : > { %18821 = vst [vmem:[#allocation408_spill] sm:$0xff] %v13426_v16  ;;  %18822 = vst [vmem:[#allocation409_spill] sm:$0xff] %v13431_v7  ;;  %v13433_v59 = vpop.eup %9537  ;;  %v13442_v45 = vpop.f32.mrb[196].mxu0  ;;  %v5595_v16 = vmin.f32 %v13424_v32, 20.0  ;;  %9563 = vpow2.f32 %v6378_v52  ;;  %v6380_v42 = vmul.f32 1.442695, %v6362_v4  ;;  %v13474_v50 = vadd.f32 %v12728_v36, %v13260_v61 }
 0x359   : > { %18823 = vst [vmem:[#allocation410_spill] sm:$0xff] %v13433_v59  ;;  %v13444_v29 = vpop.eup %9539  ;;  %v13451_v1 = vpop.f32.mrb[181].mxu1  ;;  %v5612_v59 = vmul.f32 1.442695, %v5594_v35  ;;  %18828 = vst [vmem:[#allocation415_spill] sm:$0xff] %v13460_v10  ;;  %v6363_v3 = vmin.f32 %v13431_v7, 20.0  ;;  %9565 = vpow2.f32 %v5228_v23  ;;  %v13485_v23 = vadd.f32 %v12728_v36, %v13262_v37 }
 0x35a   : > { %18825 = vst [vmem:[#allocation412_spill] sm:$0xff] %v13444_v29  ;;  %v13453_v26 = vpop.f32.mrb[197].mxu0  ;;  %v13455_v27 = vpop.eup %9541  ;;  %v13467_v29 = vadd.f32 %v12728_v36, %v13237_v63  ;;  %v5230_v57 = vmul.f32 1.442695, %v5211_v51  ;;  %v5212_v35 = vmin.f32 %v13438_v20, 20.0  ;;  %18832 = vst [vmem:[#allocation419_spill] sm:$0xff] %v13474_v50  ;;  %9567 = vpow2.f32 %v5996_v34 }
 0x35b   : > { %18827 = vst [vmem:[#allocation414_spill] sm:$0xff] %v13455_v27  ;;  %v13462_v60 = vpop.eup %9543  ;;  %v13476_v32 = vpop.f32.mrb[182].mxu1  ;;  %v5998_v7 = vmul.f32 1.442695, %v5979_v48  ;;  %v5980_v63 = vmin.f32 %v13449_v38, 20.0  ;;  %18834 = vst [vmem:[#allocation421_spill] sm:$0xff] %v13485_v23  ;;  %9569 = vpow2.f32 %v5612_v59  ;;  %v13496_v34 = vadd.f32 %v12728_v36, %v13271_v19 }
 0x35c   : > { %18829 = vst [vmem:[#allocation416_spill] sm:$0xff] %v13462_v60  ;;  %18830 = vst [vmem:[#allocation417_spill] sm:$0xff] %v13467_v29  ;;  %v13469_v33 = vpop.eup %9545  ;;  %v13478_v52 = vpop.f32.mrb[198].mxu0  ;;  %v5596_v60 = vmin.f32 %v13460_v10, 20.0  ;;  %9571 = vpow2.f32 %v6380_v42  ;;  %v6382_v38 = vmul.f32 1.442695, %v6363_v3  ;;  %v13510_v19 = vadd.f32 %v12728_v36, %v13296_v9 }
 0x35d   : > { %18831 = vst [vmem:[#allocation418_spill] sm:$0xff] %v13469_v33  ;;  %v13480_v4 = vpop.eup %9547  ;;  %v13487_v51 = vpop.f32.mrb[183].mxu1  ;;  %v5614_v33 = vmul.f32 1.442695, %v5595_v16  ;;  %18836 = vst [vmem:[#allocation423_spill] sm:$0xff] %v13496_v34  ;;  %v6364_v37 = vmin.f32 %v13467_v29, 20.0  ;;  %9573 = vpow2.f32 %v5230_v57 }
 0x35e   : > { %18833 = vst [vmem:[#allocation420_spill] sm:$0xff] %v13480_v4  ;;  %v13489_v20 = vpop.f32.mrb[199].mxu0  ;;  %v13491_v61 = vpop.eup %9549  ;;  %v13503_v4 = vadd.f32 %v12728_v36, %v13273_v8  ;;  %v5232_v59 = vmul.f32 1.442695, %v5212_v35  ;;  %v5213_v16 = vmin.f32 %v13474_v50, 20.0  ;;  %18840 = vst [vmem:[#allocation427_spill] sm:$0xff] %v13510_v19  ;;  %9575 = vpow2.f32 %v5998_v7 }
 0x35f   : > { %18835 = vst [vmem:[#allocation422_spill] sm:$0xff] %v13491_v61  ;;  %v13498_v48 = vpop.eup %9551  ;;  %v13512_v10 = vpop.f32.mrb[184].mxu1  ;;  %v6000_v29 = vmul.f32 1.442695, %v5980_v63  ;;  %v5981_v8 = vmin.f32 %v13485_v23, 20.0  ;;  %9577 = vpow2.f32 %v5614_v33  ;;  %v5597_v36 = vmin.f32 %v13496_v34, 20.0 }
 0x360   : > { %18837 = vst [vmem:[#allocation424_spill] sm:$0xff] %v13498_v48  ;;  %18838 = vst [vmem:[#allocation425_spill] sm:$0xff] %v13503_v4  ;;  %v13505_v27 = vpop.eup %9553  ;;  %v13514_v42 = vpop.f32.mrb[200].mxu0  ;;  %v5616_v50 = vmul.f32 1.442695, %v5596_v60  ;;  %9579 = vpow2.f32 %v6382_v38 }
 0x361   : > { %18839 = vst [vmem:[#allocation426_spill] sm:$0xff] %v13505_v27  ;;  %v13516_v3 = vpop.eup %9555  ;;  %v13519_v48 = vpop.f32.mrb[185].mxu1  ;;  %v13529_v9 = vld [vmem:[%s17996_s4] ss:$0 sm:$0xff]  ;;  %v6384_v23 = vmul.f32 1.442695, %v6364_v37  ;;  %9581 = vpow2.f32 %v5232_v59 }
 0x362   : > { %18841 = vst [vmem:[#allocation428_spill] sm:$0xff] %v13516_v3  ;;  %v13521_v57 = vpop.f32.mrb[201].mxu0  ;;  %v13523_v35 = vpop.eup %9557  ;;  %v13533_v7 = vadd.f32 %v13529_v9, %v13298_v14  ;;  %v6365_v3 = vmin.f32 %v13503_v4, 20.0  ;;  %v13540_v33 = vadd.f32 %v13529_v9, %v13307_v12  ;;  %v5234_v34 = vmul.f32 1.442695, %v5213_v16 }
 0x363   : > { %18842 = vst [vmem:[#allocation429_spill] sm:$0xff] %v13523_v35  ;;  %v13535_v63 = vpop.eup %9559  ;;  %v5214_v35 = vmin.f32 %v13510_v19, 20.0  ;;  %v13547_v14 = vadd.f32 %v13529_v9, %v13309_v13  ;;  %v13549_v27 = vpop.f32.mrb[186].mxu1  ;;  %9583 = vpow2.f32 %v6000_v29  ;;  %v6002_v4 = vmul.f32 1.442695, %v5981_v8 }
 0x364   : > { %18843 = vst [vmem:[#allocation430_spill] sm:$0xff] %v13533_v7  ;;  %18844 = vst [vmem:[#allocation431_spill] sm:$0xff] %v13535_v63  ;;  %v13542_v60 = vpop.eup %9561  ;;  %v13551_v38 = vpop.f32.mrb[202].mxu0  ;;  %9585 = vpow2.f32 %v5616_v50  ;;  %v5618_v16 = vmul.f32 1.442695, %v5597_v36  ;;  %v5982_v19 = vmin.f32 %v13533_v7, 20.0  ;;  %v13564_v13 = vadd.f32 %v13529_v9, %v13332_v54 }
 0x365   : > { %18845 = vst [vmem:[#allocation432_spill] sm:$0xff] %v13540_v33  ;;  %18846 = vst [vmem:[#allocation433_spill] sm:$0xff] %v13542_v60  ;;  %v13553_v37 = vpop.eup %9563  ;;  %v13555_v12 = vpop.f32.mrb[187].mxu1  ;;  %9587 = vpow2.f32 %v6384_v23  ;;  %v5598_v29 = vmin.f32 %v13540_v33, 20.0  ;;  %v13571_v8 = vadd.f32 %v13529_v9, %v13334_v49  ;;  %v5236_v50 = vmul.f32 1.442695, %v5214_v35 }
 0x366   : > { %18847 = vst [vmem:[#allocation434_spill] sm:$0xff] %v13547_v14  ;;  %18848 = vst [vmem:[#allocation435_spill] sm:$0xff] %v13553_v37  ;;  %v13557_v63 = vpop.f32.mrb[203].mxu0  ;;  %v13559_v59 = vpop.eup %9565  ;;  %v6386_v37 = vmul.f32 1.442695, %v6365_v3  ;;  %9589 = vpow2.f32 %v5234_v34  ;;  %v6366_v36 = vmin.f32 %v13547_v14, 20.0  ;;  %v13578_v54 = vadd.f32 %v13529_v9, %v13343_v30 }
 0x367   : > { %18849 = vst [vmem:[#allocation436_spill] sm:$0xff] %v13559_v59  ;;  %18850 = vst [vmem:[#allocation437_spill] sm:$0xff] %v13564_v13  ;;  %v13566_v60 = vpop.eup %9567  ;;  %v13580_v7 = vpop.f32.mrb[188].mxu1  ;;  %9591 = vpow2.f32 %v6002_v4  ;;  %v13588_v49 = vadd.f32 %v13529_v9, %v13345_v5  ;;  %v6844_v34 = vld [vmem:[%s17998_s6 + $0x20] sm:$0xff]  ;;  %v6004_v33 = vmul.f32 1.442695, %v5982_v19  ;;  %v13602_v4 = vadd.f32 %v13529_v9, %v13368_v6 }
 0x368   : > { %18851 = vst [vmem:[#allocation438_spill] sm:$0xff] %v13566_v60  ;;  %18852 = vst [vmem:[#allocation439_spill] sm:$0xff] %v13571_v8  ;;  %v13573_v61 = vpop.eup %9569  ;;  %v13582_v23 = vpop.f32.mrb[204].mxu0  ;;  %9593 = vpow2.f32 %v5618_v16  ;;  %v6845_v5 = vld [vmem:[%s17998_s6 + $0x28] sm:$0xff]  ;;  %v5620_v19 = vmul.f32 1.442695, %v5598_v29  ;;  %v13618_v6 = vadd.f32 %v13529_v9, %v13370_v0  ;;  %v13638_v17 = vadd.f32 %v13529_v9, %v13379_v40 }
 0x369   : > { %18853 = vst [vmem:[#allocation440_spill] sm:$0xff] %v13573_v61  ;;  %18854 = vst [vmem:[#allocation441_spill] sm:$0xff] %v13578_v54  ;;  %v13584_v3 = vpop.eup %9571  ;;  %v13593_v35 = vpop.f32.mrb[189].mxu1  ;;  %v5215_v61 = vmin.f32 %v13564_v13, 20.0  ;;  %9595 = vpow2.f32 %v6386_v37  ;;  %v5983_v13 = vmin.f32 %v13571_v8, 20.0  ;;  %v6876_v60 = vld [vmem:[%s17998_s6 + $0x120] sm:$0xff]  ;;  %v13652_v40 = vadd.f32 %v13529_v9, %v13381_v21 }
 0x36a   : > { %18855 = vst [vmem:[#allocation442_spill] sm:$0xff] %v13584_v3  ;;  %18856 = vst [vmem:[#allocation443_spill] sm:$0xff] %v13588_v49  ;;  %v13595_v14 = vpop.f32.mrb[205].mxu0  ;;  %v13597_v30 = vpop.eup %9573  ;;  %v6892_v3 = vld [vmem:[%s17998_s6 + $0x1a0] sm:$0xff]  ;;  %9597 = vpow2.f32 %v5236_v50  ;;  %v6388_v53 = vmul.f32 1.442695, %v6366_v36  ;;  %v9142_v50 = vpack.c.bf16 %v6845_v5, %v6844_v34 }
 0x36b   : > { %18857 = vst [vmem:[#allocation444_spill] sm:$0xff] %v13597_v30  ;;  %18858 = vst [vmem:[#allocation445_spill] sm:$0xff] %v13602_v4  ;;  %v6893_v30 = vld [vmem:[%s17998_s6 + $0x1a8] sm:$0xff]  ;;  %v13613_v16 = vpop.eup %9575  ;;  %v5599_v24 = vmin.f32 %v13578_v54, 20.0  ;;  %v13629_v29 = vpop.f32.mrb[190].mxu1  ;;  %9599 = vpow2.f32 %v6004_v33  ;;  %v5216_v46 = vmin.f32 %v13602_v4, 20.0 }
 0x36c   : > { %18859 = vst [vmem:[#allocation446_spill] sm:$0xff] %v13613_v16  ;;  %18860 = vst [vmem:[#allocation447_spill] sm:$0xff] %v13618_v6  ;;  %v13623_v59 = vpop.eup %9577  ;;  %v6877_v37 = vld [vmem:[%s17998_s6 + $0x128] sm:$0xff]  ;;  %v13631_v8 = vpop.f32.mrb[206].mxu0  ;;  %v6367_v16 = vmin.f32 %v13588_v49, 20.0  ;;  %v9172_v36 = vpack.c.bf16 %v6893_v30, %v6892_v3  ;;  %v5984_v49 = vmin.f32 %v13618_v6, 20.0  ;;  %9143 = vmatpush3.bf16.msra.mxu1 %v9142_v50  ;;  %9601 = vpow2.f32 %v5620_v19 }
 0x36d   : > { %18861 = vst [vmem:[#allocation448_spill] sm:$0xff] %v13623_v59  ;;  %v13633_v0 = vpop.eup %9579  ;;  %18863 = vst [vmem:[#allocation450_spill] sm:$0xff] %v13638_v17  ;;  %v13640_v59 = vpop.f32.mrb[191].mxu1  ;;  %v5238_v18 = vmul.f32 1.442695, %v5215_v61  ;;  %v9174_v3 = vpack.c.bf16 %v6877_v37, %v6876_v60  ;;  %v13658_v61 = vadd.f32 %v13529_v9, %v13404_v39  ;;  %9603 = vpow2.f32 %v6388_v53  ;;  %v6847_v4 = vld [vmem:[%s17998_s6 + $0x38] sm:$0xff] }
 0x36e   : > { %18862 = vst [vmem:[#allocation449_spill] sm:$0xff] %v13633_v0  ;;  %v13642_v54 = vpop.f32.mrb[207].mxu0  ;;  %v13644_v41 = vpop.eup %9581  ;;  %v6006_v0 = vmul.f32 1.442695, %v5983_v13  ;;  %18867 = vst [vmem:[#allocation454_spill] sm:$0xff] %v13652_v40  ;;  %9173 = vmatprep.subr.bf16.mxu0 %v9172_v36  ;;  %v5600_v50 = vmin.f32 %v13638_v17, 20.0  ;;  %v13669_v60 = vadd.f32 %v13529_v9, %v13406_v11  ;;  %v13682_v17 = vadd.f32 %v13529_v9, %v13415_v43 }
 0x36f   : > { %18864 = vst [vmem:[#allocation451_spill] sm:$0xff] %v13642_v54  ;;  %18865 = vst [vmem:[#allocation452_spill] sm:$0xff] %v13644_v41  ;;  %v13647_v55 = vpop.eup %9583  ;;  %v5622_v30 = vmul.f32 1.442695, %v5599_v24  ;;  %v13660_v33 = vpop.f32.mrb[192].mxu1  ;;  %9175 = vmatpush3.bf16.msra.mxu0 %v9174_v3  ;;  %9605 = vpow2.f32 %v5238_v18  ;;  %v5217_v3 = vmin.f32 %v13658_v61, 20.0  ;;  %v13689_v6 = vadd.f32 %v13529_v9, %v13417_v31 }
 0x370   : > { %18866 = vst [vmem:[#allocation453_spill] sm:$0xff] %v13647_v55  ;;  %v13654_v34 = vpop.eup %9585  ;;  %18869 = vst [vmem:[#allocation456_spill] sm:$0xff] %v13658_v61  ;;  %v13662_v13 = vpop.f32.mrb[208].mxu0  ;;  %v6390_v21 = vmul.f32 1.442695, %v6367_v16  ;;  %9607 = vpow2.f32 %v6006_v0  ;;  %v6368_v16 = vmin.f32 %v13652_v40, 20.0  ;;  %v13709_v40 = vadd.f32 %v13529_v9, %v13440_v28 }
 0x371   : > { %18868 = vst [vmem:[#allocation455_spill] sm:$0xff] %v13654_v34  ;;  %v13664_v5 = vpop.eup %9587  ;;  %18871 = vst [vmem:[#allocation458_spill] sm:$0xff] %v13669_v60  ;;  %v13671_v24 = vpop.f32.mrb[193].mxu1  ;;  %v5240_v37 = vmul.f32 1.442695, %v5216_v46  ;;  %9609 = vpow2.f32 %v5622_v30  ;;  %v6862_v18 = vld [vmem:[%s17998_s6 + $0xb0] sm:$0xff] }
 0x372   : > { %18870 = vst [vmem:[#allocation457_spill] sm:$0xff] %v13664_v5  ;;  %v13673_v19 = vpop.f32.mrb[209].mxu0  ;;  %v13675_v39 = vpop.eup %9589  ;;  %v6008_v53 = vmul.f32 1.442695, %v5984_v49  ;;  %18874 = vst [vmem:[#allocation461_spill] sm:$0xff] %v13682_v17  ;;  %v6863_v46 = vld [vmem:[%s17998_s6 + $0xb8] sm:$0xff]  ;;  %9611 = vpow2.f32 %v6390_v21  ;;  %v13722_v21 = vadd.f32 %v13529_v9, %v13442_v45 }
 0x373   : > { %18872 = vst [vmem:[#allocation459_spill] sm:$0xff] %v13675_v39  ;;  %v13677_v36 = vpop.eup %9591  ;;  %18876 = vst [vmem:[#allocation463_spill] sm:$0xff] %v13689_v6  ;;  %v6846_v43 = vld [vmem:[%s17998_s6 + $0x30] sm:$0xff]  ;;  %v13700_v49 = vpop.f32.mrb[194].mxu1  ;;  %v5624_v31 = vmul.f32 1.442695, %v5600_v50  ;;  %9613 = vpow2.f32 %v5240_v37  ;;  %v9144_v55 = vpack.c.bf16 %v6863_v46, %v6862_v18  ;;  %v13758_v18 = vadd.f32 %v13529_v9, %v13453_v26 }
 0x374   : > { %18873 = vst [vmem:[#allocation460_spill] sm:$0xff] %v13677_v36  ;;  %v13684_v11 = vpop.eup %9593  ;;  %18877 = vst [vmem:[#allocation464_spill] sm:$0xff] %v13700_v49  ;;  %v13702_v0 = vpop.f32.mrb[210].mxu0  ;;  %v5985_v61 = vmin.f32 %v13669_v60, 20.0  ;;  %v6894_v28 = vld [vmem:[%s17998_s6 + $0x1b0] sm:$0xff]  ;;  %v6895_v50 = vld [vmem:[%s17998_s6 + $0x1b8] sm:$0xff]  ;;  %9615 = vpow2.f32 %v6008_v53  ;;  %v9146_v41 = vpack.c.bf16 %v6847_v4, %v6846_v43  ;;  %v13754_v4 = vadd.f32 %v13529_v9, %v13451_v1 }
 0x375   : > { %18875 = vst [vmem:[#allocation462_spill] sm:$0xff] %v13684_v11  ;;  %18878 = vst [vmem:[#allocation465_spill] sm:$0xff] %v13702_v0  ;;  %v13704_v30 = vpop.eup %9595  ;;  %v13714_v11 = vpop.f32.mrb[195].mxu1  ;;  %v6392_v60 = vmul.f32 1.442695, %v6368_v16  ;;  %v6878_v37 = vld [vmem:[%s17998_s6 + $0x130] sm:$0xff]  ;;  %9617 = vpow2.f32 %v5624_v31  ;;  %9145 = vmatprep.subr.bf16.mxu1 %v9144_v55  ;;  %v13766_v1 = vadd.f32 %v13529_v9, %v13476_v32 }
 0x376   : > { %18879 = vst [vmem:[#allocation466_spill] sm:$0xff] %v13704_v30  ;;  %18880 = vst [vmem:[#allocation467_spill] sm:$0xff] %v13709_v40  ;;  %v13716_v36 = vpop.f32.mrb[211].mxu0  ;;  %v13718_v39 = vpop.eup %9597  ;;  %v5601_v30 = vmin.f32 %v13682_v17, 20.0  ;;  %v6879_v45 = vld [vmem:[%s17998_s6 + $0x138] sm:$0xff]  ;;  %v6369_v34 = vmin.f32 %v13689_v6, 20.0  ;;  %9147 = vmatpush3.bf16.msra.mxu1 %v9146_v41  ;;  %v13776_v41 = vadd.f32 %v13529_v9, %v13478_v52  ;;  %v13794_v52 = vadd.f32 %v13529_v9, %v13489_v20 }
 0x377   : > { %18881 = vst [vmem:[#allocation468_spill] sm:$0xff] %v13714_v11  ;;  %18882 = vst [vmem:[#allocation469_spill] sm:$0xff] %v13716_v36  ;;  %v5242_v5 = vmul.f32 1.442695, %v5217_v3  ;;  %v13740_v54 = vpop.f32.mrb[196].mxu1  ;;  %v13742_v53 = vpop.f32.mrb[212].mxu0  ;;  %v9176_v36 = vpack.c.bf16 %v6895_v50, %v6894_v28  ;;  %9619 = vpow2.f32 %v6392_v60 }
 0x378   : > { %18883 = vst [vmem:[#allocation470_spill] sm:$0xff] %v13718_v39  ;;  %18884 = vst [vmem:[#allocation471_spill] sm:$0xff] %v13722_v21  ;;  %v13737_v39 = vpop.eup %9599  ;;  %v6010_v16 = vmul.f32 1.442695, %v5985_v61  ;;  %v5218_v17 = vmin.f32 %v13709_v40, 20.0  ;;  %v13745_v11 = vpop.f32.mrb[197].mxu1  ;;  %v9178_v61 = vpack.c.bf16 %v6879_v45, %v6878_v37  ;;  %v13786_v37 = vadd.f32 %v13529_v9, %v13487_v51 }
 0x379   : > { %18885 = vst [vmem:[#allocation472_spill] sm:$0xff] %v13737_v39  ;;  %v13747_v0 = vpop.f32.mrb[213].mxu0  ;;  %v13749_v49 = vpop.eup %9601  ;;  %v5986_v3 = vmin.f32 %v13722_v21, 20.0  ;;  %18887 = vst [vmem:[#allocation474_spill] sm:$0xff] %v13754_v4  ;;  %v5626_v43 = vmul.f32 1.442695, %v5601_v30  ;;  %9177 = vmatprep.subr.bf16.mxu0 %v9176_v36  ;;  %9621 = vpow2.f32 %v5242_v5  ;;  %v13804_v51 = vadd.f32 %v13529_v9, %v13512_v10 }
 0x37a   : > { %18886 = vst [vmem:[#allocation473_spill] sm:$0xff] %v13749_v49  ;;  %18888 = vst [vmem:[#allocation475_spill] sm:$0xff] %v13758_v18  ;;  %v13760_v46 = vpop.eup %9603  ;;  %v6394_v28 = vmul.f32 1.442695, %v6369_v34  ;;  %9179 = vmatpush3.bf16.msra.mxu0 %v9178_v61  ;;  %9623 = vpow2.f32 %v6010_v16  ;;  %v5244_v60 = vmul.f32 1.442695, %v5218_v17  ;;  %v13824_v21 = vadd.f32 %v13529_v9, %v13514_v42 }
 0x37b   : > { %18889 = vst [vmem:[#allocation476_spill] sm:$0xff] %v13760_v46  ;;  %v13762_v31 = vpop.eup %9605  ;;  %18891 = vst [vmem:[#allocation478_spill] sm:$0xff] %v13766_v1  ;;  %v13768_v50 = vpop.f32.mrb[198].mxu1  ;;  %v6012_v5 = vmul.f32 1.442695, %v5986_v3  ;;  %v5602_v32 = vmin.f32 %v13754_v4, 20.0  ;;  %9625 = vpow2.f32 %v5626_v43  ;;  %v13848_v46 = vadd.f32 %v13529_v9, %v13519_v48 }
 0x37c   : > { %18890 = vst [vmem:[#allocation477_spill] sm:$0xff] %v13762_v31  ;;  %v13770_v26 = vpop.f32.mrb[214].mxu0  ;;  %v13772_v55 = vpop.eup %9607  ;;  %18893 = vst [vmem:[#allocation480_spill] sm:$0xff] %v13776_v41  ;;  %v6370_v30 = vmin.f32 %v13758_v18, 20.0  ;;  %v6864_v16 = vld [vmem:[%s17998_s6 + $0xc0] sm:$0xff]  ;;  %9627 = vpow2.f32 %v6394_v28  ;;  %v5219_v61 = vmin.f32 %v13766_v1, 20.0  ;;  %v13862_v48 = vadd.f32 %v13529_v9, %v13549_v27 }
 0x37d   : > { %18892 = vst [vmem:[#allocation479_spill] sm:$0xff] %v13772_v55  ;;  %v13778_v36 = vpop.f32.mrb[199].mxu1  ;;  %v13780_v34 = vpop.eup %9609  ;;  %18895 = vst [vmem:[#allocation482_spill] sm:$0xff] %v13786_v37  ;;  %v6865_v43 = vld [vmem:[%s17998_s6 + $0xc8] sm:$0xff]  ;;  %v6848_v20 = vld [vmem:[%s17998_s6 + $0x40] sm:$0xff]  ;;  %9629 = vpow2.f32 %v5244_v60  ;;  %v5987_v10 = vmin.f32 %v13776_v41, 20.0  ;;  %v13875_v27 = vadd.f32 %v13529_v9, %v13555_v12 }
 0x37e   : > { %18894 = vst [vmem:[#allocation481_spill] sm:$0xff] %v13780_v34  ;;  %v13788_v45 = vpop.f32.mrb[215].mxu0  ;;  %v13790_v17 = vpop.eup %9611  ;;  %18897 = vst [vmem:[#allocation484_spill] sm:$0xff] %v13794_v52  ;;  %v6849_v18 = vld [vmem:[%s17998_s6 + $0x48] sm:$0xff]  ;;  %v6896_v40 = vld [vmem:[%s17998_s6 + $0x1c0] sm:$0xff]  ;;  %9631 = vpow2.f32 %v6012_v5  ;;  %v6371_v31 = vmin.f32 %v13794_v52, 20.0  ;;  %v9148_v49 = vpack.c.bf16 %v6865_v43, %v6864_v16 }
 0x37f   : > { %18896 = vst [vmem:[#allocation483_spill] sm:$0xff] %v13790_v17  ;;  %v13799_v3 = vpop.eup %9613  ;;  %18899 = vst [vmem:[#allocation486_spill] sm:$0xff] %v13804_v51  ;;  %v13815_v4 = vpop.f32.mrb[200].mxu1  ;;  %v6897_v6 = vld [vmem:[%s17998_s6 + $0x1c8] sm:$0xff]  ;;  %v5628_v41 = vmul.f32 1.442695, %v5602_v32  ;;  %v9150_v39 = vpack.c.bf16 %v6849_v18, %v6848_v20  ;;  %v13853_v32 = vadd.f32 %v13529_v9, %v13521_v57  ;;  %v13868_v57 = vadd.f32 %v13529_v9, %v13551_v38 }
 0x380   : > { %18898 = vst [vmem:[#allocation485_spill] sm:$0xff] %v13799_v3  ;;  %v13817_v28 = vpop.f32.mrb[216].mxu0  ;;  %v13819_v1 = vpop.eup %9615  ;;  %18901 = vst [vmem:[#allocation488_spill] sm:$0xff] %v13824_v21  ;;  %v6880_v3 = vld [vmem:[%s17998_s6 + $0x140] sm:$0xff]  ;;  %v6396_v42 = vmul.f32 1.442695, %v6370_v30  ;;  %v9180_v30 = vpack.c.bf16 %v6897_v6, %v6896_v40  ;;  %9149 = vmatprep.subr.bf16.mxu1 %v9148_v49  ;;  %v13894_v20 = vadd.f32 %v13529_v9, %v13582_v23 }
 0x381   : > { %18900 = vst [vmem:[#allocation487_spill] sm:$0xff] %v13819_v1  ;;  %v13835_v1 = vpop.f32.mrb[201].mxu1  ;;  %v13837_v60 = vpop.f32.mrb[217].mxu0  ;;  %v5603_v17 = vmin.f32 %v13786_v37, 20.0  ;;  %v6881_v34 = vld [vmem:[%s17998_s6 + $0x148] sm:$0xff]  ;;  %18905 = vst [vmem:[#allocation492_spill] sm:$0xff] %v13848_v46  ;;  %9633 = vpow2.f32 %v5628_v41  ;;  %9151 = vmatpush3.bf16.msra.mxu1 %v9150_v39  ;;  %v13909_v23 = vadd.f32 %v13529_v9, %v13593_v35  ;;  %v13924_v35 = vadd.f32 %v13529_v9, %v13595_v14 }
 0x382   : > { %18902 = vst [vmem:[#allocation489_spill] sm:$0xff] %v13835_v1  ;;  %18903 = vst [vmem:[#allocation490_spill] sm:$0xff] %v13837_v60  ;;  %v13843_v55 = vpop.eup %9617  ;;  %v5246_v60 = vmul.f32 1.442695, %v5219_v61  ;;  %v5220_v5 = vmin.f32 %v13804_v51, 20.0  ;;  %v5988_v52 = vmin.f32 %v13824_v21, 20.0  ;;  %v9182_v18 = vpack.c.bf16 %v6881_v34, %v6880_v3  ;;  %9181 = vmatprep.subr.bf16.mxu0 %v9180_v30 }
 0x383   : > { %18904 = vst [vmem:[#allocation491_spill] sm:$0xff] %v13843_v55  ;;  %18906 = vst [vmem:[#allocation493_spill] sm:$0xff] %v13853_v32  ;;  %v13855_v37 = vpop.f32.mrb[202].mxu1  ;;  %v13857_v1 = vpop.eup %9619  ;;  %v6014_v55 = vmul.f32 1.442695, %v5987_v10  ;;  %9635 = vpow2.f32 %v6396_v42  ;;  %v5604_v49 = vmin.f32 %v13848_v46, 20.0  ;;  %v13880_v34 = vadd.f32 %v13529_v9, %v13557_v63 }
 0x384   : > { %18907 = vst [vmem:[#allocation494_spill] sm:$0xff] %v13857_v1  ;;  %18908 = vst [vmem:[#allocation495_spill] sm:$0xff] %v13862_v48  ;;  %v13864_v16 = vpop.eup %9621  ;;  %v5630_v61 = vmul.f32 1.442695, %v5603_v17  ;;  %v6398_v40 = vmul.f32 1.442695, %v6371_v31  ;;  %9183 = vmatpush3.bf16.msra.mxu0 %v9182_v18  ;;  %9637 = vpow2.f32 %v5246_v60  ;;  %v13887_v3 = vadd.f32 %v13529_v9, %v13580_v7 }
 0x385   : > { %18909 = vst [vmem:[#allocation496_spill] sm:$0xff] %v13864_v16  ;;  %18910 = vst [vmem:[#allocation497_spill] sm:$0xff] %v13868_v57  ;;  %v13870_v6 = vpop.eup %9623  ;;  %v5248_v41 = vmul.f32 1.442695, %v5220_v5  ;;  %v6372_v39 = vmin.f32 %v13853_v32, 20.0  ;;  %9639 = vpow2.f32 %v6014_v55  ;;  %v5221_v31 = vmin.f32 %v13862_v48, 20.0 }
 0x386   : > { %18911 = vst [vmem:[#allocation498_spill] sm:$0xff] %v13870_v6  ;;  %18912 = vst [vmem:[#allocation499_spill] sm:$0xff] %v13875_v27  ;;  %v13882_v38 = vpop.eup %9625  ;;  %v6016_v17 = vmul.f32 1.442695, %v5988_v52  ;;  %9641 = vpow2.f32 %v5630_v61  ;;  %v5989_v43 = vmin.f32 %v13868_v57, 20.0  ;;  %v6866_v63 = vld [vmem:[%s17998_s6 + $0xd0] sm:$0xff] }
 0x387   : > { %18913 = vst [vmem:[#allocation500_spill] sm:$0xff] %v13880_v34  ;;  %18914 = vst [vmem:[#allocation501_spill] sm:$0xff] %v13882_v38  ;;  %v13889_v12 = vpop.eup %9627  ;;  %v6867_v55 = vld [vmem:[%s17998_s6 + $0xd8] sm:$0xff]  ;;  %v13902_v52 = vpop.f32.mrb[218].mxu0  ;;  %9643 = vpow2.f32 %v6398_v40  ;;  %v5632_v10 = vmul.f32 1.442695, %v5604_v49 }
 0x388   : > { %18915 = vst [vmem:[#allocation502_spill] sm:$0xff] %v13887_v3  ;;  %18916 = vst [vmem:[#allocation503_spill] sm:$0xff] %v13889_v12  ;;  %v13904_v7 = vpop.eup %9629  ;;  %v5605_v60 = vmin.f32 %v13875_v27, 20.0  ;;  %v6850_v42 = vld [vmem:[%s17998_s6 + $0x50] sm:$0xff]  ;;  %v6851_v5 = vld [vmem:[%s17998_s6 + $0x58] sm:$0xff]  ;;  %v13917_v30 = vpop.f32.mrb[203].mxu1  ;;  %9645 = vpow2.f32 %v5248_v41  ;;  %v9152_v32 = vpack.c.bf16 %v6867_v55, %v6866_v63 }
 0x389   : > { %18917 = vst [vmem:[#allocation504_spill] sm:$0xff] %v13894_v20  ;;  %18918 = vst [vmem:[#allocation505_spill] sm:$0xff] %v13904_v7  ;;  %v13919_v18 = vpop.eup %9631  ;;  %v6400_v61 = vmul.f32 1.442695, %v6372_v39  ;;  %v6373_v40 = vmin.f32 %v13880_v34, 20.0  ;;  %v6898_v49 = vld [vmem:[%s17998_s6 + $0x1d0] sm:$0xff]  ;;  %9647 = vpow2.f32 %v6016_v17  ;;  %v9154_v46 = vpack.c.bf16 %v6851_v5, %v6850_v42 }
 0x38a   : > { %18919 = vst [vmem:[#allocation506_spill] sm:$0xff] %v13909_v23  ;;  %18920 = vst [vmem:[#allocation507_spill] sm:$0xff] %v13919_v18  ;;  %v6899_v27 = vld [vmem:[%s17998_s6 + $0x1d8] sm:$0xff]  ;;  %v5250_v57 = vmul.f32 1.442695, %v5221_v31  ;;  %v5222_v48 = vmin.f32 %v13887_v3, 20.0  ;;  %9649 = vpow2.f32 %v5632_v10  ;;  %9153 = vmatprep.subr.bf16.mxu1 %v9152_v32 }
 0x38b   : > { %18921 = vst [vmem:[#allocation508_spill] sm:$0xff] %v13924_v35  ;;  %v6882_v41 = vld [vmem:[%s17998_s6 + $0x150] sm:$0xff]  ;;  %v6883_v14 = vld [vmem:[%s17998_s6 + $0x158] sm:$0xff]  ;;  %v6018_v39 = vmul.f32 1.442695, %v5989_v43  ;;  %v5990_v34 = vmin.f32 %v13894_v20, 20.0  ;;  %v9184_v31 = vpack.c.bf16 %v6899_v27, %v6898_v49  ;;  %v13941_v51 = vpop.eup %9633  ;;  %9651 = vpow2.f32 %v6400_v61  ;;  %9155 = vmatpush3.bf16.msra.mxu1 %v9154_v46 }
 0x38c   : > { %v5634_v21 = vmul.f32 1.442695, %v5605_v60  ;;  %v5606_v17 = vmin.f32 %v13909_v23, 20.0  ;;  %18922 = vst [vmem:[#allocation509_spill] sm:$0xff] %v13941_v51  ;;  %v6402_v3 = vmul.f32 1.442695, %v6373_v40  ;;  %v9186_v7 = vpack.c.bf16 %v6883_v14, %v6882_v41 }
 0x38d   : > { %v6374_v18 = vmin.f32 %v13924_v35, 20.0  ;;  %v13944_v12 = vpop.eup %9635  ;;  %9653 = vpow2.f32 %v5250_v57  ;;  %v5252_v43 = vmul.f32 1.442695, %v5222_v48  ;;  %9185 = vmatprep.subr.bf16.mxu0 %v9184_v31  ;;  %v6020_v55 = vmul.f32 1.442695, %v5990_v34  ;;  %v14016_v20 = vpop.f32.mrb[204].mxu1 }
 0x38e   : > { %18923 = vst [vmem:[#allocation510_spill] sm:$0xff] %v13944_v12  ;;  %v13946_v63 = vpop.eup %9637  ;;  %9655 = vpow2.f32 %v6018_v39  ;;  %9187 = vmatpush3.bf16.msra.mxu0 %v9186_v7  ;;  %v5636_v10 = vmul.f32 1.442695, %v5606_v17  ;;  %v8410_v32 = vld [vmem:[%s17999_s7] ss:$0 sm:$0xff]  ;;  %v3717_v46 = vmul.f32 -0.5, %v12915_v62  ;;  %v13977_v41 = vadd.f32 %v13529_v9, %v13629_v29 }
 0x38f   : > { %18924 = vst [vmem:[#allocation511_spill] sm:$0xff] %v13946_v63  ;;  %v13948_v27 = vpop.eup %9639  ;;  %9657 = vpow2.f32 %v5634_v21  ;;  %v6404_v57 = vmul.f32 1.442695, %v6374_v18  ;;  %v3714_v34 = vadd.f32 1.0, %v12915_v62  ;;  %v13959_v7 = vpop.f32.mrb[219].mxu0  ;;  %v4488_v21 = vadd.f32 1.0, %v12922_v58 }
 0x390   : > { %18925 = vst [vmem:[#allocation512_spill] sm:$0xff] %v13948_v27  ;;  %v13953_v60 = vpop.eup %9641  ;;  %9659 = vpow2.f32 %v6402_v3  ;;  %v4491_v5 = vmul.f32 -0.5, %v12922_v58  ;;  %v13966_v61 = vmul.f32 %v8410_v32, %v10697_v44  ;;  %v4104_v18 = vadd.f32 1.0, %v12929_v2  ;;  %18932 = vst [vmem:[#allocation519_spill] sm:$0xff] %v13977_v41  ;;  %v6868_v39 = vld [vmem:[%s17998_s6 + $0xe0] sm:$0xff]  ;;  %v6869_v17 = vld [vmem:[%s17998_s6 + $0xe8] sm:$0xff] }
 0x391   : > { %18926 = vst [vmem:[#allocation513_spill] sm:$0xff] %v13953_v60  ;;  %v13956_v48 = vpop.eup %9643  ;;  %9661 = vpow2.f32 %v5252_v43  ;;  %v4107_v40 = vmul.f32 -0.5, %v12929_v2  ;;  %v13973_v49 = vmul.f32 %v8410_v32, %v10671_v25  ;;  %v13981_v14 = vadd.f32 %v13529_v9, %v13631_v8  ;;  %v6852_v25 = vld [vmem:[%s17998_s6 + $0x60] sm:$0xff]  ;;  %v6901_v32 = vld [vmem:[%s17998_s6 + $0x1e8] sm:$0xff] }
 0x392   : > { %18927 = vst [vmem:[#allocation514_spill] sm:$0xff] %v13956_v48  ;;  %v13961_v42 = vpop.eup %9645  ;;  %9663 = vpow2.f32 %v6020_v55  ;;  %18929 = vst [vmem:[#allocation516_spill] sm:$0xff] %v13966_v61  ;;  %v3718_v44 = vadd.f32 1.0, %v3717_v46  ;;  %v13996_v29 = vadd.f32 %v13529_v9, %v13640_v59  ;;  %v3720_v8 = vand.u32 2147483647, %v12915_v62  ;;  %v6853_v55 = vld [vmem:[%s17998_s6 + $0x68] sm:$0xff] }
 0x393   : > { %18928 = vst [vmem:[#allocation515_spill] sm:$0xff] %v13961_v42  ;;  %v13968_v3 = vpop.eup %9647  ;;  %9665 = vpow2.f32 %v5636_v10  ;;  %18931 = vst [vmem:[#allocation518_spill] sm:$0xff] %v13973_v49  ;;  %v4872_v43 = vadd.f32 1.0, %v12940_v56  ;;  %v6900_v10 = vld [vmem:[%s17998_s6 + $0x1e0] sm:$0xff]  ;;  %v4492_v59 = vadd.f32 1.0, %v4491_v5  ;;  %v4108_v49 = vadd.f32 1.0, %v4107_v40 }
 0x394   : > { %18930 = vst [vmem:[#allocation517_spill] sm:$0xff] %v13968_v3  ;;  %9667 = vpow2.f32 %v6404_v57  ;;  %18933 = vst [vmem:[#allocation520_spill] sm:$0xff] %v13981_v14  ;;  %v13992_v31 = vpop.eup %9649  ;;  %v4494_v46 = vand.u32 2147483647, %v12922_v58  ;;  %v4110_v35 = vand.u32 2147483647, %v12929_v2  ;;  %v9156_v23 = vpack.c.bf16 %v6869_v17, %v6868_v39 }
 0x395   : > { %18934 = vst [vmem:[#allocation521_spill] sm:$0xff] %v13992_v31  ;;  %18935 = vst [vmem:[#allocation522_spill] sm:$0xff] %v13996_v29  ;;  %9669 = vlog2.f32 %v3714_v34  ;;  %v14009_v57 = vpop.eup %9651  ;;  %v4875_v34 = vmul.f32 -0.5, %v12940_v56  ;;  %v14021_v3 = vmul.f32 %v12915_v62, %v3718_v44  ;;  %v9188_v5 = vpack.c.bf16 %v6901_v32, %v6900_v10  ;;  %v14029_v40 = vpop.f32.mrb[220].mxu0  ;;  %v18951_v42 = vld [vmem:[#allocation306_spill] sm:$0xff] }
 0x396   : > { %18936 = vst [vmem:[#allocation523_spill] sm:$0xff] %v14009_v57  ;;  %9671 = vlog2.f32 %v4488_v21  ;;  %v9158_v21 = vpack.c.bf16 %v6853_v55, %v6852_v25  ;;  %v6884_v57 = vld [vmem:[%s17998_s6 + $0x160] sm:$0xff]  ;;  %v14031_v39 = vpop.f32.mrb[205].mxu1  ;;  %vm14035_vm2 = vcmp.lt.f32.partialorder %v3720_v8, 0.0004427343  ;;  %9157 = vmatprep.subr.bf16.mxu1 %v9156_v23  ;;  %v3726_v55 = vmul.f32 -0.5, %v12951_v15 }
 0x397   : > { %v14013_v61 = vpop.eup %9653  ;;  %9673 = vlog2.f32 %v4104_v18  ;;  %v6885_v18 = vld [vmem:[%s17998_s6 + $0x168] sm:$0xff]  ;;  %v4876_v44 = vadd.f32 1.0, %v4875_v34  ;;  %v4878_v25 = vand.u32 2147483647, %v12940_v56  ;;  %v14046_v32 = vmul.f32 %v12922_v58, %v4492_v59  ;;  %9189 = vmatprep.subr.bf16.mxu0 %v9188_v5  ;;  %v18950_v5 = vld [vmem:[#allocation280_spill] sm:$0xff]  ;;  %v14140_v8 = vpop.f32.mrb[206].mxu1 }
 0x398   : > { %18937 = vst [vmem:[#allocation524_spill] sm:$0xff] %v14013_v61  ;;  %v14018_v31 = vpop.eup %9655  ;;  %9675 = vlog2.f32 %v4872_v43  ;;  %v3723_v43 = vadd.f32 1.0, %v12951_v15  ;;  %vm14048_vm4 = vcmp.lt.f32.partialorder %v4494_v46, 0.0004427343  ;;  %9159 = vmatpush3.bf16.msra.mxu1 %v9158_v21  ;;  %v4497_v34 = vadd.f32 1.0, %v12958_v22  ;;  %v18961_v38 = vld [vmem:[#allocation282_spill] sm:$0xff] }
 0x399   : > { %18938 = vst [vmem:[#allocation525_spill] sm:$0xff] %v14018_v31  ;;  %v14033_v17 = vpop.eup %9657  ;;  %v4500_v23 = vmul.f32 -0.5, %v12958_v22  ;;  %v18946_v31 = vld [vmem:[#allocation279_spill] sm:$0xff]  ;;  %vm14060_vm6 = vcmp.lt.f32.partialorder %v4110_v35, 0.0004427343  ;;  %v3727_v59 = vadd.f32 1.0, %v3726_v55  ;;  %v9190_v46 = vpack.c.bf16 %v6885_v18, %v6884_v57 }
 0x39a   : > { %18939 = vst [vmem:[#allocation526_spill] sm:$0xff] %v14033_v17  ;;  %v14042_v10 = vpop.eup %9659  ;;  %vm4424_vm5 = vcmp.gt.f32.partialorder %v18946_v31, 20.0  ;;  %9677 = vlog2.f32 %v3723_v43  ;;  %vm4040_vm7 = vcmp.gt.f32.partialorder %v18950_v5, 20.0  ;;  %v3729_v61 = vand.u32 2147483647, %v12951_v15  ;;  %v18955_v57 = vld [vmem:[#allocation308_spill] sm:$0xff] }
 0x39b   : > { %18942 = vst [vmem:[#allocation527_spill] sm:$0xff] %v14042_v10  ;;  %v14054_v17 = vpop.eup %9661  ;;  %v14058_v10 = vmul.f32 %v12929_v2, %v4108_v49  ;;  %9679 = vlog2.f32 %v4497_v34  ;;  %v4113_v48 = vadd.f32 1.0, %v18951_v42  ;;  %v14072_v2 = vmul.f32 %v12940_v56, %v4876_v44  ;;  %9191 = vmatpush3.bf16.msra.mxu0 %v9190_v46  ;;  %v14080_v43 = vpop.f32.mrb[221].mxu0  ;;  %v18957_v34 = vld [vmem:[#allocation281_spill] sm:$0xff] }
 0x39c   : > { %18945 = vst [vmem:[#allocation528_spill] sm:$0xff] %v14054_v17  ;;  %v14064_v21 = vpop.eup %9663  ;;  %v4501_v17 = vadd.f32 1.0, %v4500_v23  ;;  %vm14074_vm8 = vcmp.lt.f32.partialorder %v4878_v25, 0.0004427343  ;;  %v4116_v49 = vmul.f32 -0.5, %v18951_v42  ;;  %v4881_v18 = vadd.f32 1.0, %v18955_v57 }
 0x39d   : > { %18949 = vst [vmem:[#allocation279_spill] sm:$0xff] %v14064_v21  ;;  %v14069_v60 = vpop.eup %9665  ;;  %vm4808_vm9 = vcmp.gt.f32.partialorder %v18957_v34, 20.0  ;;  %v14086_v23 = vmul.f32 %v12951_v15, %v3727_v59  ;;  %v4503_v56 = vand.u32 2147483647, %v12958_v22  ;;  %9681 = vlog2.f32 %v4113_v48  ;;  %v18958_v21 = vld [vmem:[#allocation310_spill] sm:$0xff] }
 0x39e   : > { %18952 = vst [vmem:[#allocation280_spill] sm:$0xff] %v14069_v60  ;;  %v14082_v55 = vpop.eup %9667  ;;  %v4884_v44 = vmul.f32 -0.5, %v18955_v57  ;;  %v4117_v46 = vadd.f32 1.0, %v4116_v49  ;;  %v4119_v60 = vand.u32 2147483647, %v18951_v42  ;;  %9683 = vlog2.f32 %v4881_v18 }
 0x39f   : > { %18956 = vst [vmem:[#allocation306_spill] sm:$0xff] %v14082_v55  ;;  %v9670_v25 = vpop.eup %9669  ;;  %v3732_v27 = vadd.f32 1.0, %v18958_v21  ;;  %vm14092_vm10 = vcmp.lt.f32.partialorder %v3729_v61, 0.0004427343  ;;  %v14097_v15 = vmul.f32 %v12958_v22, %v4501_v17  ;;  %v3735_v48 = vmul.f32 -0.5, %v18958_v21 }
 0x3a0   : > { %v9672_v63 = vpop.eup %9671  ;;  %v3716_v12 = vmul.f32 0.6931472, %v9670_v25  ;;  %v4885_v59 = vadd.f32 1.0, %v4884_v44  ;;  %vm3651_vm11 = vcmp.gt.f32.partialorder %v18961_v38, 20.0  ;;  %v14104_v49 = vld [vmem:[%s17997_s5] ss:$0 sm:$0xff]  ;;  %v14107_v61 = vmul.f32 %v18951_v42, %v4117_v46 }
 0x3a1   : > { %v9674_v51 = vpop.eup %9673  ;;  %v4490_v18 = vmul.f32 0.6931472, %v9672_v63  ;;  %v4887_v25 = vand.u32 2147483647, %v18955_v57  ;;  %9685 = vlog2.f32 %v3732_v27  ;;  %vm14113_vm12 = vcmp.lt.f32.partialorder %v4503_v56, 0.0004427343 }
 0x3a2   : > { %v9676_v22 = vpop.eup %9675  ;;  %v3722_v17 = vsel %vm14035_vm2, %v14021_v3, %v3716_v12  ;;  %v4106_v44 = vmul.f32 0.6931472, %v9674_v51  ;;  %v14118_v16 = vmul.f32 %v18955_v57, %v4885_v59  ;;  %v3738_v63 = vand.u32 2147483647, %v18958_v21  ;;  %v18964_v42 = vld [vmem:[#allocation283_spill] sm:$0xff]  ;;  %v14209_v3 = vpop.f32.mrb[222].mxu0 }
 0x3a3   : > { %vm4425_vm13 = vcmp.gt.f32.partialorder %v18964_v42, 20.0  ;;  %v3858_v27 = vsel %vm3650_vm3, %v12741_v47, %v3722_v17  ;;  %v4496_v12 = vsel %vm14048_vm4, %v14046_v32, %v4490_v18  ;;  %v4874_v51 = vmul.f32 0.6931472, %v9676_v22  ;;  %v18967_v56 = vld [vmem:[#allocation23_spill] sm:$0xff] }
 0x3a4   : > { %vm14128_vm14 = vcmp.lt.f32.partialorder %v4119_v60, 0.0004427343  ;;  %v3736_v62 = vadd.f32 1.0, %v3735_v48  ;;  %v3880_v57 = vmul.f32 %v14104_v49, %v3858_v27  ;;  %v3944_v46 = vmul.f32 %v3858_v27, %v18967_v56  ;;  %v9678_v32 = vpop.eup %9677  ;;  %v18968_v60 = vld [vmem:[#allocation284_spill] sm:$0xff]  ;;  %v18972_v56 = vld [vmem:[#allocation25_spill] sm:$0xff] }
 0x3a5   : > { %v4632_v59 = vsel %vm4424_vm5, %v18946_v31, %v4496_v12  ;;  %v4112_v47 = vsel %vm14060_vm6, %v14058_v10, %v4106_v44  ;;  %vm4041_vm15 = vcmp.gt.f32.partialorder %v18968_v60, 20.0  ;;  %v18969_v48 = vld [vmem:[#allocation24_spill] sm:$0xff]  ;;  %v4880_v31 = vsel %vm14074_vm8, %v14072_v2, %v4874_v51  ;;  %v9680_v10 = vpop.eup %9679 }
 0x3a6   : > { %v4648_v18 = vmul.f32 %v14104_v49, %v4632_v59  ;;  %v4712_v22 = vmul.f32 %v4632_v59, %v18969_v48  ;;  %v4248_v17 = vsel %vm4040_vm7, %v18950_v5, %v4112_v47  ;;  %vm14151_vm2 = vcmp.lt.f32.partialorder %v4887_v25, 0.0004427343  ;;  %v18973_v48 = vld [vmem:[#allocation285_spill] sm:$0xff] }
 0x3a7   : > { %v3896_v44 = vmul.f32 1.442695, %v3880_v57  ;;  %v14156_v27 = vmul.f32 %v3944_v46, %v13660_v33  ;;  %v4264_v12 = vmul.f32 %v14104_v49, %v4248_v17  ;;  %v4328_v59 = vmul.f32 %v4248_v17, %v18972_v56  ;;  %v9682_v25 = vpop.eup %9681  ;;  %v18974_v17 = vld [vmem:[#allocation286_spill] sm:$0xff] }
 0x3a8   : > { %vm4809_vm3 = vcmp.gt.f32.partialorder %v18973_v48, 20.0  ;;  %v4664_v5 = vmul.f32 1.442695, %v4648_v18  ;;  %v14162_v47 = vmul.f32 %v4712_v22, %v13662_v13  ;;  %v5016_v2 = vsel %vm4808_vm9, %v18957_v34, %v4880_v31  ;;  %v9684_v46 = vpop.eup %9683  ;;  %v18975_v18 = vld [vmem:[#allocation26_spill] sm:$0xff] }
 0x3a9   : > { %v3725_v35 = vmul.f32 0.6931472, %v9678_v32  ;;  %9687 = vpow2.f32 %v3896_v44  ;;  %v4280_v51 = vmul.f32 1.442695, %v4264_v12  ;;  %v14168_v33 = vmul.f32 %v4328_v59, %v13671_v24  ;;  %v18978_v59 = vld [vmem:[#allocation27_spill] sm:$0xff] }
 0x3aa   : > { %v5032_v57 = vmul.f32 %v14104_v49, %v5016_v2  ;;  %vm3652_vm4 = vcmp.gt.f32.partialorder %v18974_v17, 20.0  ;;  %9689 = vpow2.f32 %v4664_v5  ;;  %v5096_v13 = vmul.f32 %v5016_v2, %v18975_v18  ;;  %v18979_v2 = vld [vmem:[#allocation464_spill] sm:$0xff]  ;;  %v6870_v31 = vld [vmem:[%s17998_s6 + $0xf0] sm:$0xff] }
 0x3ab   : > { %v3731_v22 = vsel %vm14092_vm10, %v14086_v23, %v3725_v35  ;;  %v4499_v34 = vmul.f32 0.6931472, %v9680_v10  ;;  %9691 = vpow2.f32 %v4280_v51  ;;  %v4115_v24 = vmul.f32 0.6931472, %v9682_v25  ;;  %v9686_v44 = vpop.eup %9685  ;;  %v18980_v51 = vld [vmem:[#allocation28_spill] sm:$0xff] }
 0x3ac   : > { %v3859_v32 = vsel %vm3651_vm11, %v18961_v38, %v3731_v22  ;;  %vm14179_vm5 = vcmp.lt.f32.partialorder %v3738_v63, 0.0004427343  ;;  %v14184_v12 = vmul.f32 %v5096_v13, %v13673_v19  ;;  %v5048_v10 = vmul.f32 1.442695, %v5032_v57  ;;  %v14211_v57 = vpop.f32.mrb[207].mxu1  ;;  %v18981_v13 = vld [vmem:[#allocation465_spill] sm:$0xff] }
 0x3ad   : > { %v3881_v56 = vmul.f32 %v14104_v49, %v3859_v32  ;;  %v3945_v55 = vmul.f32 %v3859_v32, %v18978_v59  ;;  %v4505_v23 = vsel %vm14113_vm12, %v14097_v15, %v4499_v34  ;;  %v4121_v63 = vsel %vm14128_vm14, %v14107_v61, %v4115_v24  ;;  %v18982_v32 = vld [vmem:[#allocation29_spill] sm:$0xff] }
 0x3ae   : > { %v4633_v38 = vsel %vm4425_vm13, %v18964_v42, %v4505_v23  ;;  %v4883_v5 = vmul.f32 0.6931472, %v9684_v46  ;;  %v4249_v6 = vsel %vm4041_vm15, %v18968_v60, %v4121_v63  ;;  %v3734_v42 = vmul.f32 0.6931472, %v9686_v44  ;;  %v18985_v23 = vld [vmem:[#allocation468_spill] sm:$0xff] }
 0x3af   : > { %v3898_v19 = vmul.f32 1.442695, %v3881_v56  ;;  %v14198_v35 = vmul.f32 %v3945_v55, %v18979_v2  ;;  %v4649_v25 = vmul.f32 %v14104_v49, %v4633_v38  ;;  %v4713_v18 = vmul.f32 %v4633_v38, %v18980_v51  ;;  %v18984_v56 = vld [vmem:[#allocation30_spill] sm:$0xff] }
 0x3b0   : > { %v4889_v15 = vsel %vm14151_vm2, %v14118_v16, %v4883_v5  ;;  %v3737_v61 = vmul.f32 %v18958_v21, %v3736_v62  ;;  %v4265_v34 = vmul.f32 %v14104_v49, %v4249_v6  ;;  %v4329_v60 = vmul.f32 %v4249_v6, %v18982_v32  ;;  %v18983_v62 = vld [vmem:[#allocation312_spill] sm:$0xff]  ;;  %v18987_v6 = vld [vmem:[#allocation451_spill] sm:$0xff] }
 0x3b1   : > { %9693 = vpow2.f32 %v3898_v19  ;;  %v4666_v46 = vmul.f32 1.442695, %v4649_v25  ;;  %v14214_v22 = vmul.f32 %v4713_v18, %v18981_v13  ;;  %v5017_v16 = vsel %vm4809_vm3, %v18973_v48, %v4889_v15  ;;  %v18986_v25 = vld [vmem:[#allocation469_spill] sm:$0xff] }
 0x3b2   : > { %v3740_v21 = vsel %vm14179_vm5, %v3737_v61, %v3734_v42  ;;  %v4506_v58 = vadd.f32 1.0, %v18983_v62  ;;  %9695 = vpow2.f32 %v5048_v10  ;;  %v4282_v24 = vmul.f32 1.442695, %v4265_v34  ;;  %v6871_v10 = vld [vmem:[%s17998_s6 + $0xf8] sm:$0xff] }
 0x3b3   : > { %v5033_v44 = vmul.f32 %v14104_v49, %v5017_v16  ;;  %v5097_v59 = vmul.f32 %v5017_v16, %v18984_v56  ;;  %v9688_v55 = vpop.eup %9687  ;;  %v14227_v38 = vmul.f32 %v4329_v60, %v18985_v23  ;;  %v3860_v63 = vsel %vm3652_vm4, %v18974_v17, %v3740_v21  ;;  %v14243_v17 = vpop.f32.mrb[223].mxu0  ;;  %v18989_v61 = vld [vmem:[#allocation31_spill] sm:$0xff]  ;;  %v18990_v16 = vld [vmem:[#allocation314_spill] sm:$0xff] }
 0x3b4   : > { %9697 = vlog2.f32 %v4506_v58  ;;  %v4509_v48 = vmul.f32 -0.5, %v18983_v62  ;;  %v9690_v5 = vpop.eup %9689  ;;  %v3928_v2 = vmul.f32 0.0, %v9688_v55  ;;  %v14247_v15 = vadd.f32 %v13529_v9, %v18987_v6  ;;  %v6854_v58 = vld [vmem:[%s17998_s6 + $0x70] sm:$0xff]  ;;  %v14293_v19 = vpop.f32.mrb[224].mxu0 }
 0x3b5   : > { %9699 = vpow2.f32 %v4282_v24  ;;  %v14241_v51 = vmul.f32 %v5097_v59, %v18986_v25  ;;  %v9692_v18 = vpop.eup %9691  ;;  %v3882_v42 = vmul.f32 %v14104_v49, %v3860_v63  ;;  %v3946_v13 = vmul.f32 %v3860_v63, %v18989_v61  ;;  %v6855_v59 = vld [vmem:[%s17998_s6 + $0x78] sm:$0xff]  ;;  %19002 = vst [vmem:[#allocation310_spill] sm:$0xff] %v14293_v19  ;;  %v19006_v19 = vld [vmem:[#allocation289_spill] sm:$0xff] }
 0x3b6   : > { %18988 = vst [vmem:[#allocation308_spill] sm:$0xff] %v14247_v15  ;;  %9701 = vpow2.f32 %v4666_v46  ;;  %v3976_v34 = vadd.f32 %v14156_v27, %v3928_v2  ;;  %v5050_v32 = vmul.f32 1.442695, %v5033_v44  ;;  %v9160_v60 = vpack.c.bf16 %v6871_v10, %v6870_v31  ;;  %v18991_v27 = vld [vmem:[#allocation287_spill] sm:$0xff]  ;;  %v18998_v31 = vld [vmem:[#allocation288_spill] sm:$0xff] }
 0x3b7   : > { %v4122_v21 = vadd.f32 1.0, %v18990_v16  ;;  %v3900_v24 = vmul.f32 1.442695, %v3882_v42  ;;  %v14257_v56 = vmul.f32 %v3946_v13, %v13740_v54  ;;  %v4510_v9 = vadd.f32 1.0, %v4509_v48  ;;  %v18992_v44 = vld [vmem:[#allocation151_spill] sm:$0xff]  ;;  %v18993_v48 = vld [vmem:[#allocation316_spill] sm:$0xff] }
 0x3b8   : > { %v4512_v46 = vand.u32 2147483647, %v18983_v62  ;;  %vm4426_vm6 = vcmp.gt.f32.partialorder %v18991_v27, 20.0  ;;  %v3992_v55 = vmul.f32 %v3976_v34, %v18992_v44  ;;  %v4312_v23 = vmul.f32 %v9692_v18, %v3976_v34  ;;  %9161 = vmatprep.subr.bf16.mxu1 %v9160_v60  ;;  %v6902_v18 = vld [vmem:[%s17998_s6 + $0x1f0] sm:$0xff]  ;;  %v6903_v61 = vld [vmem:[%s17998_s6 + $0x1f8] sm:$0xff]  ;;  %v14277_v13 = vpop.f32.mrb[208].mxu1 }
 0x3b9   : > { %9703 = vlog2.f32 %v4122_v21  ;;  %v4125_v63 = vmul.f32 -0.5, %v18990_v16  ;;  %v4128_v54 = vand.u32 2147483647, %v18990_v16  ;;  %v4890_v10 = vadd.f32 1.0, %v18993_v48  ;;  %18994 = vst [vmem:[#allocation281_spill] sm:$0xff] %v14277_v13  ;;  %v6887_v21 = vld [vmem:[%s17998_s6 + $0x178] sm:$0xff] }
 0x3ba   : > { %9705 = vpow2.f32 %v3900_v24  ;;  %v4360_v25 = vadd.f32 %v14168_v33, %v4312_v23  ;;  %v4893_v6 = vmul.f32 -0.5, %v18993_v48  ;;  %v9162_v42 = vpack.c.bf16 %v6855_v59, %v6854_v58  ;;  %v18997_v59 = vld [vmem:[#allocation153_spill] sm:$0xff] }
 0x3bb   : > { %v9694_v2 = vpop.eup %9693  ;;  %9707 = vpow2.f32 %v5050_v32  ;;  %v4511_v60 = vmul.f32 %v18983_v62, %v4510_v9  ;;  %vm14280_vm7 = vcmp.lt.f32.partialorder %v4512_v46, 0.0004427343  ;;  %v4126_v58 = vadd.f32 1.0, %v4125_v63  ;;  %v19001_v46 = vld [vmem:[#allocation318_spill] sm:$0xff] }
 0x3bc   : > { %v3929_v34 = vmul.f32 0.0, %v9694_v2  ;;  %9709 = vlog2.f32 %v4890_v10  ;;  %v9696_v33 = vpop.eup %9695  ;;  %v4696_v32 = vmul.f32 %v9690_v5, %v4360_v25  ;;  %v4896_v24 = vand.u32 2147483647, %v18993_v48  ;;  %9163 = vmatpush3.bf16.msra.mxu1 %v9162_v42  ;;  %v14295_v5 = vpop.f32.mrb[209].mxu1 }
 0x3bd   : > { %v4376_v44 = vmul.f32 %v4360_v25, %v18997_v59  ;;  %vm4042_vm8 = vcmp.gt.f32.partialorder %v18998_v31, 20.0  ;;  %vm14288_vm9 = vcmp.lt.f32.partialorder %v4128_v54, 0.0004427343  ;;  %v9192_v9 = vpack.c.bf16 %v6903_v61, %v6902_v18  ;;  %19003 = vst [vmem:[#allocation282_spill] sm:$0xff] %v14295_v5  ;;  %v19004_v54 = vld [vmem:[#allocation155_spill] sm:$0xff]  ;;  %v19005_v18 = vld [vmem:[#allocation320_spill] sm:$0xff] }
 0x3be   : > { %v9698_v23 = vpop.eup %9697  ;;  %v3977_v2 = vadd.f32 %v14198_v35, %v3929_v34  ;;  %v3741_v10 = vadd.f32 1.0, %v19001_v46  ;;  %v4744_v42 = vadd.f32 %v14162_v47, %v4696_v32  ;;  %v4894_v59 = vadd.f32 1.0, %v4893_v6  ;;  %v19007_v5 = vld [vmem:[#allocation152_spill] sm:$0xff] }
 0x3bf   : > { %v9700_v63 = vpop.eup %9699  ;;  %v4508_v25 = vmul.f32 0.6931472, %v9698_v23  ;;  %7055 = vmatprep.mubr.f32.mxu1 %v4376_v44  ;;  %v3744_v1 = vmul.f32 -0.5, %v19001_v46  ;;  %9193 = vmatprep.subr.bf16.mxu0 %v9192_v9  ;;  %v4515_v61 = vadd.f32 1.0, %v19005_v18  ;;  %vm4810_vm10 = vcmp.gt.f32.partialorder %v19006_v19, 20.0 }
 0x3c0   : > { %v9702_v35 = vpop.eup %9701  ;;  %v14300_v34 = vmul.f32 %v3977_v2, %v19004_v54  ;;  %v4313_v14 = vmul.f32 %v9700_v63, %v3977_v2  ;;  %9711 = vlog2.f32 %v3741_v10  ;;  %7056 = vmatmul.mubr.f32.vlgmr.msra.gmra.mrb[0].mxu1 %v3992_v55  ;;  %v14305_v13 = vmul.f32 %v4744_v42, %v19007_v5  ;;  %v6886_v55 = vld [vmem:[%s17998_s6 + $0x170] sm:$0xff] }
 0x3c1   : > { %v5080_v47 = vmul.f32 %v9696_v33, %v4744_v42  ;;  %v4514_v6 = vsel %vm14280_vm7, %v4511_v60, %v4508_v25  ;;  %v4127_v32 = vmul.f32 %v18990_v16, %v4126_v58  ;;  %v3745_v2 = vadd.f32 1.0, %v3744_v1  ;;  %v19012_v42 = vld [vmem:[#allocation290_spill] sm:$0xff] }
 0x3c2   : > { %v14311_v44 = vadd.f32 %v14227_v38, %v4313_v14  ;;  %v4634_v23 = vsel %vm4426_vm6, %v18991_v27, %v4514_v6  ;;  %9713 = vlog2.f32 %v4515_v61  ;;  %v19009_v38 = vld [vmem:[#allocation32_spill] sm:$0xff]  ;;  %vm14327_vm11 = vcmp.lt.f32.partialorder %v4896_v24, 0.0004427343  ;;  %v19013_v6 = vld [vmem:[#allocation291_spill] sm:$0xff] }
 0x3c3   : > { %v9704_v60 = vpop.eup %9703  ;;  %v14323_v16 = vadd.f32 %v14184_v12, %v5080_v47  ;;  %v4650_v14 = vmul.f32 %v14104_v49, %v4634_v23  ;;  %v4714_v33 = vmul.f32 %v4634_v23, %v19009_v38  ;;  %v4895_v10 = vmul.f32 %v18993_v48, %v4894_v59  ;;  %v19016_v38 = vld [vmem:[#allocation159_spill] sm:$0xff] }
 0x3c4   : > { %v9706_v1 = vpop.eup %9705  ;;  %v4697_v58 = vmul.f32 %v9702_v35, %v14311_v44  ;;  %v4124_v9 = vmul.f32 0.6931472, %v9704_v60  ;;  %v3747_v5 = vand.u32 2147483647, %v19001_v46  ;;  %vm3653_vm12 = vcmp.gt.f32.partialorder %v19012_v42, 20.0 }
 0x3c5   : > { %19008 = vst [vmem:[#allocation283_spill] sm:$0xff] %v14323_v16  ;;  %v9708_v63 = vpop.eup %9707  ;;  %v3930_v12 = vmul.f32 0.0, %v9706_v1  ;;  %v14336_v25 = vmul.f32 %v4714_v33, %v13742_v53  ;;  %v4518_v24 = vmul.f32 -0.5, %v19005_v18  ;;  %v9194_v54 = vpack.c.bf16 %v6887_v21, %v6886_v55  ;;  %v19017_v1 = vld [vmem:[#allocation322_spill] sm:$0xff] }
 0x3c6   : > { %v9710_v61 = vpop.eup %9709  ;;  %v4745_v47 = vadd.f32 %v14214_v22, %v4697_v58  ;;  %v4130_v35 = vsel %vm14288_vm9, %v4127_v32, %v4124_v9  ;;  %v3746_v48 = vmul.f32 %v19001_v46, %v3745_v2  ;;  %v4521_v59 = vand.u32 2147483647, %v19005_v18  ;;  %v19014_v22 = vld [vmem:[#allocation156_spill] sm:$0xff]  ;;  %v19015_v32 = vld [vmem:[#allocation33_spill] sm:$0xff]  ;;  %v14363_v58 = vpop.f32.mrb[225].mxu0 }
 0x3c7   : > { %vm4427_vm13 = vcmp.gt.f32.partialorder %v19013_v6, 20.0  ;;  %v14346_v23 = vadd.f32 %v14257_v56, %v3930_v12  ;;  %v4668_v53 = vmul.f32 1.442695, %v4650_v14  ;;  %v4250_v55 = vsel %vm4042_vm8, %v18998_v31, %v4130_v35  ;;  %9195 = vmatpush3.bf16.msra.mxu0 %v9194_v54 }
 0x3c8   : > { %v4892_v21 = vmul.f32 0.6931472, %v9710_v61  ;;  %v14352_v60 = vmul.f32 %v4745_v47, %v19014_v22  ;;  %v5081_v62 = vmul.f32 %v9708_v63, %v4745_v47  ;;  %v4266_v46 = vmul.f32 %v14104_v49, %v4250_v55 }
 0x3c9   : > { %v4330_v2 = vmul.f32 %v4250_v55, %v19015_v32  ;;  %v14358_v33 = vmul.f32 %v14346_v23, %v19016_v38  ;;  %v4519_v14 = vadd.f32 1.0, %v4518_v24  ;;  %v4131_v31 = vadd.f32 1.0, %v19017_v1  ;;  %v19020_v55 = vld [vmem:[#allocation324_spill] sm:$0xff] }
 0x3ca   : > { %v4898_v56 = vsel %vm14327_vm11, %v4895_v10, %v4892_v21  ;;  %v9712_v9 = vpop.eup %9711  ;;  %v14366_v12 = vadd.f32 %v14241_v51, %v5081_v62  ;;  %v4284_v63 = vmul.f32 1.442695, %v4266_v46  ;;  %v19019_v10 = vld [vmem:[#allocation34_spill] sm:$0xff]  ;;  %vm3748_vm14 = vcmp.lt.f32.partialorder %v3747_v5, 0.0004427343 }
 0x3cb   : > { %v14369_v54 = vmul.f32 %v4330_v2, %v13745_v11  ;;  %v5018_v61 = vsel %vm4810_vm10, %v19006_v19, %v4898_v56  ;;  %v3743_v47 = vmul.f32 0.6931472, %v9712_v9  ;;  %9715 = vlog2.f32 %v4131_v31  ;;  %v19021_v2 = vld [vmem:[#allocation35_spill] sm:$0xff]  ;;  %v14387_v31 = vpop.f32.mrb[210].mxu1 }
 0x3cc   : > { %19018 = vst [vmem:[#allocation23_spill] sm:$0xff] %v14366_v12  ;;  %v5034_v27 = vmul.f32 %v14104_v49, %v5018_v61  ;;  %v5098_v24 = vmul.f32 %v5018_v61, %v19019_v10  ;;  %v9714_v35 = vpop.eup %9713  ;;  %9717 = vpow2.f32 %v4284_v63  ;;  %v4134_v51 = vmul.f32 -0.5, %v19017_v1  ;;  %v19023_v63 = vld [vmem:[#allocation36_spill] sm:$0xff]  ;;  %v19024_v10 = vld [vmem:[#allocation157_spill] sm:$0xff] }
 0x3cd   : > { %v4899_v21 = vadd.f32 1.0, %v19020_v55  ;;  %v3749_v22 = vsel %vm3748_vm14, %v3746_v48, %v3743_v47  ;;  %v4517_v62 = vmul.f32 0.6931472, %v9714_v35  ;;  %v4520_v19 = vmul.f32 %v19005_v18, %v4519_v14  ;;  %v14404_v35 = vpop.f32.mrb[226].mxu0 }
 0x3ce   : > { %v14379_v11 = vmul.f32 %v5098_v24, %v13747_v0  ;;  %v5052_v46 = vmul.f32 1.442695, %v5034_v27  ;;  %v3861_v32 = vsel %vm3653_vm12, %v19012_v42, %v3749_v22  ;;  %vm4522_vm15 = vcmp.lt.f32.partialorder %v4521_v59, 0.0004427343  ;;  %v19022_v0 = vld [vmem:[#allocation292_spill] sm:$0xff]  ;;  %19026 = vst [vmem:[#allocation284_spill] sm:$0xff] %v14404_v35 }
 0x3cf   : > { %9719 = vlog2.f32 %v4899_v21  ;;  %v3883_v5 = vmul.f32 %v14104_v49, %v3861_v32  ;;  %v3947_v38 = vmul.f32 %v3861_v32, %v19021_v2  ;;  %v4523_v56 = vsel %vm4522_vm15, %v4520_v19, %v4517_v62  ;;  %v14411_v62 = vpop.f32.mrb[211].mxu1  ;;  %v14442_v19 = vpop.f32.mrb[227].mxu0  ;;  %v19052_v35 = vld [vmem:[#allocation163_spill] sm:$0xff] }
 0x3d0   : > { %9721 = vpow2.f32 %v4668_v53  ;;  %vm4043_vm2 = vcmp.gt.f32.partialorder %v19022_v0, 20.0  ;;  %v4635_v18 = vsel %vm4427_vm13, %v19013_v6, %v4523_v56  ;;  %v4135_v48 = vadd.f32 1.0, %v4134_v51  ;;  %v19025_v6 = vld [vmem:[#allocation326_spill] sm:$0xff]  ;;  %v19027_v51 = vld [vmem:[#allocation293_spill] sm:$0xff]  ;;  %19028 = vst [vmem:[#allocation24_spill] sm:$0xff] %v14411_v62  ;;  %19037 = vst [vmem:[#allocation25_spill] sm:$0xff] %v14442_v19 }
 0x3d1   : > { %v4137_v14 = vand.u32 2147483647, %v19017_v1  ;;  %v4902_v42 = vmul.f32 -0.5, %v19020_v55  ;;  %v3902_v59 = vmul.f32 1.442695, %v3883_v5  ;;  %v14396_v53 = vmul.f32 %v3947_v38, %v13768_v50  ;;  %v19051_v62 = vld [vmem:[#allocation297_spill] sm:$0xff] }
 0x3d2   : > { %v4651_v9 = vmul.f32 %v14104_v49, %v4635_v18  ;;  %v4715_v61 = vmul.f32 %v4635_v18, %v19023_v63  ;;  %9723 = vpow2.f32 %v5052_v46  ;;  %v4905_v27 = vand.u32 2147483647, %v19020_v55  ;;  %v19031_v46 = vld [vmem:[#allocation328_spill] sm:$0xff] }
 0x3d3   : > { %v4377_v24 = vmul.f32 %v14311_v44, %v19024_v10  ;;  %v3750_v47 = vadd.f32 1.0, %v19025_v6  ;;  %vm4811_vm3 = vcmp.gt.f32.partialorder %v19027_v51, 20.0  ;;  %9725 = vpow2.f32 %v3902_v59 }
 0x3d4   : > { %v4670_v21 = vmul.f32 1.442695, %v4651_v9  ;;  %v14408_v50 = vmul.f32 %v4715_v61, %v13770_v26  ;;  %v3753_v22 = vmul.f32 -0.5, %v19025_v6  ;;  %vm14413_vm4 = vcmp.lt.f32.partialorder %v4137_v14, 0.0004427343 }
 0x3d5   : > { %v4903_v44 = vadd.f32 1.0, %v4902_v42  ;;  %7060 = vmatprep.mubr.f32.mxu1 %v4377_v24  ;;  %9727 = vlog2.f32 %v3750_v47  ;;  %v4524_v32 = vadd.f32 1.0, %v19031_v46  ;;  %v9716_v5 = vpop.eup %9715  ;;  %v4136_v2 = vmul.f32 %v19017_v1, %v4135_v48  ;;  %v19032_v42 = vld [vmem:[#allocation330_spill] sm:$0xff] }
 0x3d6   : > { %v3754_v38 = vadd.f32 1.0, %v3753_v22  ;;  %v3756_v26 = vand.u32 2147483647, %v19025_v6  ;;  %v4527_v56 = vmul.f32 -0.5, %v19031_v46  ;;  %7061 = vmatmul.mubr.f32.gmra.mrb[2].mxu1 %v14300_v34  ;;  %v9718_v18 = vpop.eup %9717  ;;  %v4133_v14 = vmul.f32 0.6931472, %v9716_v5 }
 0x3d7   : > { %9729 = vlog2.f32 %v4524_v32  ;;  %v4530_v59 = vand.u32 2147483647, %v19031_v46  ;;  %v4140_v9 = vadd.f32 1.0, %v19032_v42  ;;  %v4314_v63 = vmul.f32 %v9718_v18, %v14346_v23  ;;  %v19039_v5 = vld [vmem:[#allocation37_spill] sm:$0xff] }
 0x3d8   : > { %9731 = vpow2.f32 %v4670_v21  ;;  %vm14425_vm5 = vcmp.lt.f32.partialorder %v4905_v27, 0.0004427343  ;;  %v4528_v1 = vadd.f32 1.0, %v4527_v56  ;;  %v4139_v10 = vsel %vm14413_vm4, %v4136_v2, %v4133_v14  ;;  %v19043_v14 = vld [vmem:[#allocation332_spill] sm:$0xff] }
 0x3d9   : > { %v9720_v48 = vpop.eup %9719  ;;  %v4904_v34 = vmul.f32 %v19020_v55, %v4903_v44  ;;  %9733 = vlog2.f32 %v4140_v9  ;;  %v4143_v24 = vmul.f32 -0.5, %v19032_v42  ;;  %v4362_v22 = vadd.f32 %v14369_v54, %v4314_v63  ;;  %v19038_v55 = vld [vmem:[#allocation294_spill] sm:$0xff] }
 0x3da   : > { %v9722_v47 = vpop.eup %9721  ;;  %v4251_v23 = vsel %vm4043_vm2, %v19022_v0, %v4139_v10  ;;  %v4901_v27 = vmul.f32 0.6931472, %v9720_v48  ;;  %v3755_v21 = vmul.f32 %v19025_v6, %v3754_v38  ;;  %vm14438_vm6 = vcmp.lt.f32.partialorder %v3756_v26, 0.0004427343  ;;  %v19042_v6 = vld [vmem:[#allocation295_spill] sm:$0xff] }
 0x3db   : > { %vm3654_vm7 = vcmp.gt.f32.partialorder %v19038_v55, 20.0  ;;  %v4267_v44 = vmul.f32 %v14104_v49, %v4251_v23  ;;  %v4331_v2 = vmul.f32 %v4251_v23, %v19039_v5  ;;  %vm14447_vm8 = vcmp.lt.f32.partialorder %v4530_v59, 0.0004427343 }
 0x3dc   : > { %v4144_v0 = vadd.f32 1.0, %v4143_v24  ;;  %v4146_v56 = vand.u32 2147483647, %v19032_v42  ;;  %vm4428_vm9 = vcmp.gt.f32.partialorder %v19042_v6, 20.0  ;;  %v4698_v38 = vmul.f32 %v9722_v47, %v4362_v22  ;;  %v9724_v63 = vpop.eup %9723  ;;  %v19044_v47 = vld [vmem:[#allocation296_spill] sm:$0xff] }
 0x3dd   : > { %v4907_v26 = vsel %vm14425_vm5, %v4904_v34, %v4901_v27  ;;  %v4529_v18 = vmul.f32 %v19031_v46, %v4528_v1  ;;  %v4908_v9 = vadd.f32 1.0, %v19043_v14  ;;  %v4286_v48 = vmul.f32 1.442695, %v4267_v44  ;;  %v9726_v23 = vpop.eup %9725  ;;  %v19045_v1 = vld [vmem:[#allocation38_spill] sm:$0xff] }
 0x3de   : > { %v14458_v59 = vmul.f32 %v4331_v2, %v13778_v36  ;;  %v5019_v10 = vsel %vm4811_vm3, %v19027_v51, %v4907_v26  ;;  %v4911_v24 = vmul.f32 -0.5, %v19043_v14  ;;  %vm4044_vm10 = vcmp.gt.f32.partialorder %v19044_v47, 20.0  ;;  %v6920_v51 = vld [vmem:[%s17998_s6 + $0x280] sm:$0xff] }
 0x3df   : > { %v4746_v61 = vadd.f32 %v14336_v25, %v4698_v38  ;;  %v5035_v46 = vmul.f32 %v14104_v49, %v5019_v10  ;;  %v5099_v34 = vmul.f32 %v5019_v10, %v19045_v1  ;;  %9735 = vlog2.f32 %v4908_v9  ;;  %v9728_v27 = vpop.eup %9727  ;;  %v6921_v25 = vld [vmem:[%s17998_s6 + $0x288] sm:$0xff]  ;;  %v19048_v2 = vld [vmem:[#allocation160_spill] sm:$0xff] }
 0x3e0   : > { %v3931_v44 = vmul.f32 0.0, %v9726_v23  ;;  %9737 = vpow2.f32 %v4286_v48  ;;  %v4145_v36 = vmul.f32 %v19032_v42, %v4144_v0  ;;  %vm14469_vm11 = vcmp.lt.f32.partialorder %v4146_v56, 0.0004427343  ;;  %v6904_v42 = vld [vmem:[%s17998_s6 + $0x200] sm:$0xff]  ;;  %v6905_v0 = vld [vmem:[%s17998_s6 + $0x208] sm:$0xff]  ;;  %v14491_v56 = vpop.f32.mrb[212].mxu1 }
 0x3e1   : > { %v14480_v38 = vmul.f32 %v4746_v61, %v19048_v2  ;;  %v5082_v26 = vmul.f32 %v9724_v63, %v4746_v61  ;;  %v5054_v9 = vmul.f32 1.442695, %v5035_v46  ;;  %v14483_v48 = vmul.f32 %v5099_v34, %v13788_v45  ;;  %19049 = vst [vmem:[#allocation285_spill] sm:$0xff] %v14491_v56  ;;  %v9730_v10 = vpop.eup %9729 }
 0x3e2   : > { %v3979_v23 = vadd.f32 %v14396_v53, %v3931_v44  ;;  %v3752_v1 = vmul.f32 0.6931472, %v9728_v27  ;;  %v4912_v2 = vadd.f32 1.0, %v4911_v24  ;;  %v4914_v63 = vand.u32 2147483647, %v19043_v14  ;;  %v14495_v61 = vpop.eup %9731  ;;  %v19053_v27 = vld [vmem:[#allocation161_spill] sm:$0xff] }
 0x3e3   : > { %v14498_v45 = vadd.f32 %v14379_v11, %v5082_v26  ;;  %9739 = vpow2.f32 %v5054_v9  ;;  %v4526_v46 = vmul.f32 0.6931472, %v9730_v10  ;;  %v9196_v34 = vpack.c.bf16 %v6921_v25, %v6920_v51  ;;  %v9734_v19 = vpop.eup %9733  ;;  %v6952_v11 = vld [vmem:[%s17998_s6 + $0x380] sm:$0xff]  ;;  %v6953_v51 = vld [vmem:[%s17998_s6 + $0x388] sm:$0xff]  ;;  %v19055_v9 = vld [vmem:[#allocation39_spill] sm:$0xff] }
 0x3e4   : > { %vm4812_vm12 = vcmp.gt.f32.partialorder %v19051_v62, 20.0  ;;  %v14502_v56 = vmul.f32 %v3979_v23, %v19052_v35  ;;  %v3758_v53 = vsel %vm14438_vm6, %v3755_v21, %v3752_v1  ;;  %v9198_v24 = vpack.c.bf16 %v6905_v0, %v6904_v42  ;;  %v19054_v21 = vld [vmem:[#allocation154_spill] sm:$0xff] }
 0x3e5   : > { %19050 = vst [vmem:[#allocation286_spill] sm:$0xff] %v14498_v45  ;;  %v4378_v44 = vmul.f32 %v4362_v22, %v19053_v27  ;;  %v3862_v25 = vsel %vm3654_vm7, %v19038_v55, %v3758_v53  ;;  %v4532_v35 = vsel %vm14447_vm8, %v4529_v18, %v4526_v46  ;;  %v4142_v32 = vmul.f32 0.6931472, %v9734_v19  ;;  %9197 = vmatprep.subr.bf16.mxu1 %v9196_v34  ;;  %v19056_v10 = vld [vmem:[#allocation334_spill] sm:$0xff]  ;;  %v19057_v18 = vld [vmem:[#allocation40_spill] sm:$0xff] }
 0x3e6   : > { %v5144_v22 = vmul.f32 %v14323_v16, %v19054_v21  ;;  %v3884_v26 = vmul.f32 %v14104_v49, %v3862_v25  ;;  %v3948_v42 = vmul.f32 %v3862_v25, %v19055_v9  ;;  %v4636_v0 = vsel %vm4428_vm9, %v19042_v6, %v4532_v35  ;;  %9199 = vmatpush3.bf16.msra.mxu1 %v9198_v24 }
 0x3e7   : > { %7065 = vmatprep.mubr.f32.mxu1 %v4378_v44  ;;  %v3759_v55 = vadd.f32 1.0, %v19056_v10  ;;  %v4652_v54 = vmul.f32 %v14104_v49, %v4636_v0  ;;  %v4716_v19 = vmul.f32 %v4636_v0, %v19057_v18  ;;  %v4148_v1 = vsel %vm14469_vm11, %v4145_v36, %v4142_v32  ;;  %v19059_v44 = vld [vmem:[#allocation41_spill] sm:$0xff] }
 0x3e8   : > { %7200 = vmatprep.mubr.f32.mxu0 %v5144_v22  ;;  %v9228_v46 = vpack.c.bf16 %v6953_v51, %v6952_v11  ;;  %v3904_v34 = vmul.f32 1.442695, %v3884_v26  ;;  %v14531_v53 = vmul.f32 %v3948_v42, %v13815_v4  ;;  %v4252_v6 = vsel %vm4044_vm10, %v19044_v47, %v4148_v1  ;;  %7066 = vmatmul.mubr.f32.gmra.mrb[4].mxu1 %v14358_v33  ;;  %v14547_v51 = vpop.f32.mrb[228].mxu0  ;;  %v14549_v47 = vpop.f32.mrb[213].mxu1  ;;  %v6936_v26 = vld [vmem:[%s17998_s6 + $0x300] sm:$0xff] }
 0x3e9   : > { %9741 = vlog2.f32 %v3759_v55  ;;  %7201 = vmatmul.mubr.f32.vlgmr.msra.gmra.mrb[16].mxu0 %v14305_v13  ;;  %v9736_v24 = vpop.eup %9735  ;;  %v19058_v27 = vmin.f32 %v13977_v41, 20.0  ;;  %v14543_v36 = vmul.f32 %v4716_v19, %v13817_v28  ;;  %v4268_v4 = vmul.f32 %v14104_v49, %v4252_v6  ;;  %v19060_v28 = vld [vmem:[#allocation489_spill] sm:$0xff]  ;;  %v19061_v55 = vld [vmem:[#allocation336_spill] sm:$0xff] }
 0x3ea   : > { %v4332_v11 = vmul.f32 %v4252_v6, %v19059_v44  ;;  %9229 = vmatprep.subr.bf16.mxu0 %v9228_v46  ;;  %v9738_v33 = vpop.eup %9737  ;;  %9743 = vpow2.f32 %v3904_v34  ;;  %v4910_v13 = vmul.f32 0.6931472, %v9736_v24  ;;  %v4913_v25 = vmul.f32 %v19043_v14, %v4912_v2  ;;  %v6937_v14 = vld [vmem:[%s17998_s6 + $0x308] sm:$0xff] }
 0x3eb   : > { %v14540_v5 = vmul.f32 1.442695, %v19058_v27  ;;  %v3762_v35 = vmul.f32 -0.5, %v19056_v10  ;;  %v4315_v32 = vmul.f32 %v9738_v33, %v3979_v23  ;;  %v4288_v21 = vmul.f32 1.442695, %v4268_v4  ;;  %v19062_v2 = vld [vmem:[#allocation298_spill] sm:$0xff] }
 0x3ec   : > { %v14554_v22 = vmul.f32 %v4332_v11, %v19060_v28  ;;  %vm4915_vm13 = vcmp.lt.f32.partialorder %v4914_v63, 0.0004427343  ;;  %v4672_v9 = vmul.f32 1.442695, %v4652_v54  ;;  %v3765_v0 = vand.u32 2147483647, %v19056_v10 }
 0x3ed   : > { %v4916_v42 = vsel %vm4915_vm13, %v4913_v25, %v4910_v13  ;;  %v4533_v18 = vadd.f32 1.0, %v19061_v55  ;;  %v9740_v23 = vpop.eup %9739  ;;  %vm3655_vm14 = vcmp.gt.f32.partialorder %v19062_v2, 20.0  ;;  %v4363_v19 = vadd.f32 %v14458_v59, %v4315_v32  ;;  %v19063_v46 = vld [vmem:[#allocation42_spill] sm:$0xff]  ;;  %v14574_v59 = vpop.f32.mrb[229].mxu0 }
 0x3ee   : > { %9745 = vpow2.f32 %v4288_v21  ;;  %v5020_v63 = vsel %vm4812_vm12, %v19051_v62, %v4916_v42  ;;  %v4536_v54 = vmul.f32 -0.5, %v19061_v55  ;;  %v3763_v6 = vadd.f32 1.0, %v3762_v35  ;;  %v19064_v11 = vld [vmem:[#allocation490_spill] sm:$0xff] }
 0x3ef   : > { %v5036_v1 = vmul.f32 %v14104_v49, %v5020_v63  ;;  %v5100_v34 = vmul.f32 %v5020_v63, %v19063_v46  ;;  %9747 = vlog2.f32 %v4533_v18  ;;  %v4699_v27 = vmul.f32 %v14495_v61, %v4363_v19  ;;  %v19065_v13 = vld [vmem:[#allocation338_spill] sm:$0xff]  ;;  %v19068_v18 = vld [vmem:[#allocation340_spill] sm:$0xff] }
 0x3f0   : > { %v4537_v4 = vadd.f32 1.0, %v4536_v54  ;;  %v9230_v44 = vpack.c.bf16 %v6937_v14, %v6936_v26  ;;  %v4539_v62 = vand.u32 2147483647, %v19061_v55  ;;  %v4149_v25 = vadd.f32 1.0, %v19065_v13  ;;  %v19069_v54 = vld [vmem:[#allocation164_spill] sm:$0xff] }
 0x3f1   : > { %v14577_v33 = vmul.f32 %v5100_v34, %v19064_v11  ;;  %v4152_v32 = vmul.f32 -0.5, %v19065_v13  ;;  %v4747_v35 = vadd.f32 %v14408_v50, %v4699_v27  ;;  %9749 = vpow2.f32 %v4672_v9 }
 0x3f2   : > { %v5056_v21 = vmul.f32 1.442695, %v5036_v1  ;;  %vm14583_vm15 = vcmp.lt.f32.partialorder %v3765_v0, 0.0004427343  ;;  %9231 = vmatpush3.bf16.msra.mxu0 %v9230_v44  ;;  %v3764_v26 = vmul.f32 %v19056_v10, %v3763_v6  ;;  %v4917_v14 = vadd.f32 1.0, %v19068_v18  ;;  %v19070_v0 = vld [vmem:[#allocation299_spill] sm:$0xff] }
 0x3f3   : > { %v9742_v61 = vpop.eup %9741  ;;  %v4153_v42 = vadd.f32 1.0, %v4152_v32  ;;  %v4920_v63 = vmul.f32 -0.5, %v19068_v18  ;;  %v14591_v46 = vmul.f32 %v4747_v35, %v19069_v54  ;;  %v5083_v34 = vmul.f32 %v9740_v23, %v4747_v35  ;;  %v14614_v35 = vpop.f32.mrb[214].mxu1 }
 0x3f4   : > { %v3761_v50 = vmul.f32 0.6931472, %v9742_v61  ;;  %9751 = vlog2.f32 %v4149_v25  ;;  %v9744_v9 = vpop.eup %9743  ;;  %vm4429_vm2 = vcmp.gt.f32.partialorder %v19070_v0, 20.0  ;;  %v4538_v1 = vmul.f32 %v19061_v55, %v4537_v4  ;;  %v19074_v4 = vld [vmem:[#allocation165_spill] sm:$0xff]  ;;  %v19075_v25 = vld [vmem:[#allocation158_spill] sm:$0xff]  ;;  %v19076_v61 = vld [vmem:[#allocation43_spill] sm:$0xff] }
 0x3f5   : > { %vm14595_vm3 = vcmp.lt.f32.partialorder %v4539_v62, 0.0004427343  ;;  %v4155_v10 = vand.u32 2147483647, %v19065_v13  ;;  %9753 = vlog2.f32 %v4917_v14  ;;  %v14601_v6 = vadd.f32 %v14483_v48, %v5083_v34 }
 0x3f6   : > { %v3932_v44 = vmul.f32 0.0, %v9744_v9  ;;  %9755 = vpow2.f32 %v5056_v21  ;;  %v3767_v23 = vsel %vm14583_vm15, %v3764_v26, %v3761_v50  ;;  %v14609_v55 = vmul.f32 %v19065_v13, %v4153_v42  ;;  %v19079_v50 = vld [vmem:[#allocation344_spill] sm:$0xff] }
 0x3f7   : > { %19073 = vst [vmem:[#allocation26_spill] sm:$0xff] %v14601_v6  ;;  %v3863_v11 = vsel %vm3655_vm14, %v19062_v2, %v3767_v23  ;;  %v4379_v62 = vmul.f32 %v4363_v19, %v19074_v4  ;;  %v5145_v32 = vmul.f32 %v14366_v12, %v19075_v25  ;;  %v4921_v14 = vadd.f32 1.0, %v4920_v63  ;;  %v19077_v2 = vld [vmem:[#allocation300_spill] sm:$0xff]  ;;  %v19078_v19 = vld [vmem:[#allocation342_spill] sm:$0xff]  ;;  %v14624_v23 = vpop.f32.mrb[230].mxu0 }
 0x3f8   : > { %v9746_v48 = vpop.eup %9745  ;;  %v3980_v21 = vadd.f32 %v14531_v53, %v3932_v44  ;;  %v3885_v28 = vmul.f32 %v14104_v49, %v3863_v11  ;;  %v3949_v26 = vmul.f32 %v3863_v11, %v19076_v61  ;;  %vm4045_vm4 = vcmp.gt.f32.partialorder %v19077_v2, 20.0  ;;  %v19080_v53 = vld [vmem:[#allocation301_spill] sm:$0xff]  ;;  %v19081_v44 = vld [vmem:[#allocation167_spill] sm:$0xff] }
 0x3f9   : > { %v9748_v54 = vpop.eup %9747  ;;  %v4923_v13 = vand.u32 2147483647, %v19068_v18  ;;  %7070 = vmatprep.mubr.f32.mxu1 %v4379_v62  ;;  %7205 = vmatprep.mubr.f32.mxu0 %v5145_v32  ;;  %v3768_v42 = vadd.f32 1.0, %v19078_v19  ;;  %v3771_v34 = vmul.f32 -0.5, %v19078_v19  ;;  %v4542_v9 = vadd.f32 1.0, %v19079_v50  ;;  %v14635_v62 = vpop.f32.mrb[215].mxu1 }
 0x3fa   : > { %vm4813_vm5 = vcmp.gt.f32.partialorder %v19080_v53, 20.0  ;;  %v14628_v11 = vmul.f32 %v3980_v21, %v19081_v44  ;;  %v4316_v63 = vmul.f32 %v9746_v48, %v3980_v21  ;;  %v3906_v4 = vmul.f32 1.442695, %v3885_v28  ;;  %7071 = vmatmul.mubr.f32.gmra.mrb[6].mxu1 %v14502_v56  ;;  %7206 = vmatmul.mubr.f32.gmra.mrb[18].mxu0 %v14352_v60  ;;  %v19084_v21 = vld [vmem:[#allocation346_spill] sm:$0xff] }
 0x3fb   : > { %v14631_v25 = vmul.f32 %v3949_v26, %v13855_v37  ;;  %v4535_v32 = vmul.f32 0.6931472, %v9748_v54  ;;  %vm14637_vm6 = vcmp.lt.f32.partialorder %v4155_v10, 0.0004427343  ;;  %9757 = vlog2.f32 %v3768_v42  ;;  %v9750_v24 = vpop.eup %9749  ;;  %v6923_v42 = vld [vmem:[%s17998_s6 + $0x298] sm:$0xff] }
 0x3fc   : > { %v3774_v44 = vand.u32 2147483647, %v19078_v19  ;;  %v14643_v48 = vadd.f32 %v14554_v22, %v4316_v63  ;;  %9759 = vpow2.f32 %v3906_v4  ;;  %v4922_v37 = vmul.f32 %v19068_v18, %v4921_v14  ;;  %v19087_v14 = vld [vmem:[#allocation44_spill] sm:$0xff]  ;;  %v19090_v4 = vld [vmem:[#allocation302_spill] sm:$0xff] }
 0x3fd   : > { %v3772_v56 = vadd.f32 1.0, %v3771_v34  ;;  %v4541_v60 = vsel %vm14595_vm3, %v4538_v1, %v4535_v32  ;;  %9761 = vlog2.f32 %v4542_v9  ;;  %v4545_v10 = vmul.f32 -0.5, %v19079_v50 }
 0x3fe   : > { %v4158_v28 = vadd.f32 1.0, %v19084_v21  ;;  %v9752_v26 = vpop.eup %9751  ;;  %v4700_v54 = vmul.f32 %v9750_v24, %v14643_v48  ;;  %v4637_v22 = vsel %vm4429_vm2, %v19070_v0, %v4541_v60  ;;  %vm14654_vm7 = vcmp.lt.f32.partialorder %v4923_v13, 0.0004427343 }
 0x3ff   : > { %v4548_v18 = vand.u32 2147483647, %v19079_v50  ;;  %v9754_v27 = vpop.eup %9753  ;;  %v4653_v1 = vmul.f32 %v14104_v49, %v4637_v22  ;;  %v4717_v34 = vmul.f32 %v4637_v22, %v19087_v14  ;;  %v4151_v9 = vmul.f32 0.6931472, %v9752_v26  ;;  %v19092_v22 = vld [vmem:[#allocation168_spill] sm:$0xff] }
 0x400   : > { %vm14661_vm8 = vcmp.lt.f32.partialorder %v3774_v44, 0.0004427343  ;;  %9763 = vlog2.f32 %v4158_v28  ;;  %v9756_v24 = vpop.eup %9755  ;;  %vm3656_vm9 = vcmp.gt.f32.partialorder %v19090_v4, 20.0  ;;  %v4748_v0 = vadd.f32 %v14543_v36, %v4700_v54  ;;  %v19091_v28 = vld [vmem:[#allocation303_spill] sm:$0xff]  ;;  %v19093_v54 = vld [vmem:[#allocation45_spill] sm:$0xff] }
 0x401   : > { %v4919_v13 = vmul.f32 0.6931472, %v9754_v27  ;;  %v3773_v32 = vmul.f32 %v19078_v19, %v3772_v56  ;;  %v4161_v60 = vmul.f32 -0.5, %v19084_v21  ;;  %v4674_v41 = vmul.f32 1.442695, %v4653_v1 }
 0x402   : > { %v14670_v12 = vmul.f32 %v4717_v34, %v13902_v52  ;;  %v4157_v44 = vsel %vm14637_vm6, %v14609_v55, %v4151_v9  ;;  %v4546_v26 = vadd.f32 1.0, %v4545_v10  ;;  %vm4430_vm10 = vcmp.gt.f32.partialorder %v19091_v28, 20.0  ;;  %v19095_v34 = vld [vmem:[#allocation46_spill] sm:$0xff] }
 0x403   : > { %v14677_v14 = vmul.f32 %v4748_v0, %v19092_v22  ;;  %v5084_v36 = vmul.f32 %v9756_v24, %v4748_v0  ;;  %v4253_v19 = vsel %vm4045_vm4, %v19077_v2, %v4157_v44  ;;  %v4925_v56 = vsel %vm14654_vm7, %v4922_v37, %v4919_v13  ;;  %v6922_v37 = vld [vmem:[%s17998_s6 + $0x290] sm:$0xff]  ;;  %v19099_v13 = vld [vmem:[#allocation348_spill] sm:$0xff]  ;;  %v14710_v44 = vpop.f32.mrb[231].mxu0 }
 0x404   : > { %v4269_v52 = vmul.f32 %v14104_v49, %v4253_v19  ;;  %v4333_v27 = vmul.f32 %v4253_v19, %v19093_v54  ;;  %v5021_v55 = vsel %vm4813_vm5, %v19080_v53, %v4925_v56  ;;  %v4164_v61 = vand.u32 2147483647, %v19084_v21  ;;  %v19096_v53 = vld [vmem:[#allocation304_spill] sm:$0xff] }
 0x405   : > { %v14691_v10 = vadd.f32 %v14577_v33, %v5084_v36  ;;  %v5037_v1 = vmul.f32 %v14104_v49, %v5021_v55  ;;  %v5101_v2 = vmul.f32 %v5021_v55, %v19095_v34  ;;  %v4162_v9 = vadd.f32 1.0, %v4161_v60  ;;  %v9758_v24 = vpop.eup %9757  ;;  %v14750_v49 = vpop.f32.mrb[216].mxu1 }
 0x406   : > { %vm4046_vm11 = vcmp.gt.f32.partialorder %v19096_v53, 20.0  ;;  %v4290_v0 = vmul.f32 1.442695, %v4269_v52  ;;  %v14703_v33 = vmul.f32 %v4333_v27, %v13917_v30  ;;  %vm14705_vm12 = vcmp.lt.f32.partialorder %v4548_v18, 0.0004427343  ;;  %v9760_v22 = vpop.eup %9759 }
 0x407   : > { %19094 = vst [vmem:[#allocation27_spill] sm:$0xff] %v14691_v10  ;;  %v4926_v60 = vadd.f32 1.0, %v19099_v13  ;;  %9765 = vpow2.f32 %v4674_v41  ;;  %v14713_v36 = vmul.f32 %v5101_v2, %v13959_v7  ;;  %v3770_v19 = vmul.f32 0.6931472, %v9758_v24  ;;  %v9762_v52 = vpop.eup %9761 }
 0x408   : > { %v4547_v56 = vmul.f32 %v19079_v50, %v4546_v26  ;;  %v3933_v54 = vmul.f32 0.0, %v9760_v22  ;;  %9767 = vpow2.f32 %v4290_v0  ;;  %v5058_v30 = vmul.f32 1.442695, %v5037_v1 }
 0x409   : > { %vm14716_vm13 = vcmp.lt.f32.partialorder %v4164_v61, 0.0004427343  ;;  %v3776_v27 = vsel %vm14661_vm8, %v3773_v32, %v3770_v19  ;;  %v4544_v55 = vmul.f32 0.6931472, %v9762_v52  ;;  %v4163_v41 = vmul.f32 %v19084_v21, %v4162_v9  ;;  %v14731_v61 = vld [vmem:[%s17997_s5] ss:$0 sm:$0xff] }
 0x40a   : > { %v9200_v34 = vpack.c.bf16 %v6923_v42, %v6922_v37  ;;  %v9764_v7 = vpop.eup %9763  ;;  %v3981_v2 = vadd.f32 %v14631_v25, %v3933_v54  ;;  %v3864_v50 = vsel %vm3656_vm9, %v19090_v4, %v3776_v27  ;;  %9769 = vlog2.f32 %v4926_v60  ;;  %v19102_v32 = vld [vmem:[#allocation47_spill] sm:$0xff]  ;;  %v14765_v27 = vpop.f32.mrb[217].mxu1 }
 0x40b   : > { %v4929_v26 = vmul.f32 -0.5, %v19099_v13  ;;  %v3886_v63 = vmul.f32 %v14731_v61, %v3864_v50  ;;  %v3950_v21 = vmul.f32 %v3864_v50, %v19102_v32  ;;  %v4550_v1 = vsel %vm14705_vm12, %v4547_v56, %v4544_v55  ;;  %v6906_v4 = vld [vmem:[%s17998_s6 + $0x210] sm:$0xff]  ;;  %v6907_v9 = vld [vmem:[%s17998_s6 + $0x218] sm:$0xff]  ;;  %v19107_v32 = vld [vmem:[#allocation305_spill] sm:$0xff] }
 0x40c   : > { %v4160_v25 = vmul.f32 0.6931472, %v9764_v7  ;;  %9201 = vmatprep.subr.bf16.mxu1 %v9200_v34  ;;  %v19103_v37 = vld [vmem:[#allocation171_spill] sm:$0xff]  ;;  %9771 = vpow2.f32 %v5058_v30  ;;  %v4638_v24 = vsel %vm4430_vm10, %v19091_v28, %v4550_v1  ;;  %v4932_v0 = vand.u32 2147483647, %v19099_v13  ;;  %v19104_v56 = vld [vmem:[#allocation48_spill] sm:$0xff] }
 0x40d   : > { %v14744_v42 = vmul.f32 %v3981_v2, %v19103_v37  ;;  %v3908_v60 = vmul.f32 1.442695, %v3886_v63  ;;  %v14753_v22 = vmul.f32 %v3950_v21, %v14016_v20  ;;  %v4654_v19 = vmul.f32 %v14731_v61, %v4638_v24  ;;  %v6954_v54 = vld [vmem:[%s17998_s6 + $0x390] sm:$0xff]  ;;  %v6955_v28 = vld [vmem:[%s17998_s6 + $0x398] sm:$0xff]  ;;  %v14763_v30 = vpop.f32.mrb[232].mxu0  ;;  %v19105_v34 = vld [vmem:[#allocation169_spill] sm:$0xff] }
 0x40e   : > { %v4718_v52 = vmul.f32 %v4638_v24, %v19104_v56  ;;  %v4166_v20 = vsel %vm14716_vm13, %v4163_v41, %v4160_v25  ;;  %v9202_v55 = vpack.c.bf16 %v6907_v9, %v6906_v4  ;;  %v4380_v7 = vmul.f32 %v14643_v48, %v19105_v34  ;;  %v19106_v50 = vld [vmem:[#allocation162_spill] sm:$0xff]  ;;  %v19108_v41 = vld [vmem:[#allocation49_spill] sm:$0xff] }
 0x40f   : > { %v5146_v63 = vmul.f32 %v14498_v45, %v19106_v50  ;;  %vm4814_vm14 = vcmp.gt.f32.partialorder %v19107_v32, 20.0  ;;  %9773 = vpow2.f32 %v3908_v60  ;;  %v4254_v1 = vsel %vm4046_vm11, %v19096_v53, %v4166_v20  ;;  %v19109_v4 = vld [vmem:[#allocation350_spill] sm:$0xff] }
 0x410   : > { %v14775_v21 = vmul.f32 %v4718_v52, %v14029_v40  ;;  %v4930_v37 = vadd.f32 1.0, %v4929_v26  ;;  %v4270_v18 = vmul.f32 %v14731_v61, %v4254_v1  ;;  %v4334_v25 = vmul.f32 %v4254_v1, %v19108_v41  ;;  %9203 = vmatpush3.bf16.msra.mxu1 %v9202_v55  ;;  %7075 = vmatprep.mubr.f32.mxu1 %v4380_v7  ;;  %v6938_v24 = vld [vmem:[%s17998_s6 + $0x310] sm:$0xff]  ;;  %v6939_v40 = vld [vmem:[%s17998_s6 + $0x318] sm:$0xff] }
 0x411   : > { %v9232_v48 = vpack.c.bf16 %v6955_v28, %v6954_v54  ;;  %v3777_v9 = vadd.f32 1.0, %v19109_v4  ;;  %v9766_v60 = vpop.eup %9765  ;;  %v4676_v53 = vmul.f32 1.442695, %v4654_v19  ;;  %7210 = vmatprep.mubr.f32.mxu0 %v5146_v63  ;;  %v3780_v26 = vmul.f32 -0.5, %v19109_v4  ;;  %v19110_v52 = vld [vmem:[#allocation352_spill] sm:$0xff]  ;;  %7076 = vmatmul.mubr.f32.gmra.mrb[8].mxu1 %v14628_v11  ;;  %v14798_v19 = vpop.f32.mrb[233].mxu0 }
 0x412   : > { %v3783_v56 = vand.u32 2147483647, %v19109_v4  ;;  %v4551_v20 = vadd.f32 1.0, %v19110_v52  ;;  %v9768_v54 = vpop.eup %9767  ;;  %v4292_v28 = vmul.f32 1.442695, %v4270_v18  ;;  %v14794_v55 = vmul.f32 %v4334_v25, %v14031_v39  ;;  %7211 = vmatmul.mubr.f32.gmra.mrb[20].mxu0 %v14480_v38  ;;  %v19113_v38 = vld [vmem:[#allocation354_spill] sm:$0xff] }
 0x413   : > { %9233 = vmatprep.subr.bf16.mxu0 %v9232_v48  ;;  %9775 = vlog2.f32 %v3777_v9  ;;  %v4554_v34 = vmul.f32 -0.5, %v19110_v52  ;;  %v4317_v7 = vmul.f32 %v9768_v54, %v3981_v2  ;;  %v4931_v50 = vmul.f32 %v19099_v13, %v4930_v37 }
 0x414   : > { %v3781_v63 = vadd.f32 1.0, %v3780_v26  ;;  %9777 = vlog2.f32 %v4551_v20  ;;  %v9770_v1 = vpop.eup %9769  ;;  %vm14801_vm15 = vcmp.lt.f32.partialorder %v4932_v0, 0.0004427343  ;;  %v9234_v18 = vpack.c.bf16 %v6939_v40, %v6938_v24  ;;  %v19116_v26 = vld [vmem:[#allocation307_spill] sm:$0xff]  ;;  %v19117_v40 = vld [vmem:[#allocation356_spill] sm:$0xff]  ;;  %v19118_v20 = vld [vmem:[#allocation309_spill] sm:$0xff] }
 0x415   : > { %9779 = vpow2.f32 %v4292_v28  ;;  %v4555_v39 = vadd.f32 1.0, %v4554_v34  ;;  %v4365_v41 = vadd.f32 %v14703_v33, %v4317_v7  ;;  %v4928_v25 = vmul.f32 0.6931472, %v9770_v1  ;;  %v14828_v1 = vpop.f32.mrb[218].mxu1 }
 0x416   : > { %9781 = vpow2.f32 %v4676_v53  ;;  %v4167_v48 = vadd.f32 1.0, %v19113_v38  ;;  %v9772_v9 = vpop.eup %9771  ;;  %v3782_v2 = vmul.f32 %v19109_v4, %v3781_v63  ;;  %vm14808_vm2 = vcmp.lt.f32.partialorder %v3783_v56, 0.0004427343  ;;  %9235 = vmatpush3.bf16.msra.mxu0 %v9234_v18 }
 0x417   : > { %v4557_v0 = vand.u32 2147483647, %v19110_v52  ;;  %v4170_v37 = vmul.f32 -0.5, %v19113_v38  ;;  %vm3657_vm3 = vcmp.gt.f32.partialorder %v19116_v26, 20.0  ;;  %v4701_v24 = vmul.f32 %v9766_v60, %v4365_v41 }
 0x418   : > { %v4934_v33 = vsel %vm14801_vm15, %v4931_v50, %v4928_v25  ;;  %9783 = vlog2.f32 %v4167_v48  ;;  %v4935_v53 = vadd.f32 1.0, %v19117_v40  ;;  %vm4431_vm4 = vcmp.gt.f32.partialorder %v19118_v20, 20.0  ;;  %v19119_v50 = vld [vmem:[#allocation50_spill] sm:$0xff] }
 0x419   : > { %v5022_v4 = vsel %vm4814_vm14, %v19107_v32, %v4934_v33  ;;  %v4556_v56 = vmul.f32 %v19110_v52, %v4555_v39  ;;  %v4173_v54 = vand.u32 2147483647, %v19113_v38  ;;  %v4938_v28 = vmul.f32 -0.5, %v19117_v40  ;;  %v9774_v34 = vpop.eup %9773  ;;  %v19120_v52 = vld [vmem:[#allocation172_spill] sm:$0xff] }
 0x41a   : > { %v4749_v60 = vadd.f32 %v14670_v12, %v4701_v24  ;;  %v5038_v7 = vmul.f32 %v14731_v61, %v5022_v4  ;;  %v5102_v63 = vmul.f32 %v5022_v4, %v19119_v50  ;;  %9785 = vlog2.f32 %v4935_v53  ;;  %v19121_v24 = vld [vmem:[#allocation311_spill] sm:$0xff] }
 0x41b   : > { %v3934_v11 = vmul.f32 0.0, %v9774_v34  ;;  %v4171_v18 = vadd.f32 1.0, %v4170_v37  ;;  %v4939_v25 = vadd.f32 1.0, %v4938_v28  ;;  %v4941_v32 = vand.u32 2147483647, %v19117_v40  ;;  %v19126_v28 = vld [vmem:[#allocation173_spill] sm:$0xff] }
 0x41c   : > { %v14832_v39 = vmul.f32 %v4749_v60, %v19120_v52  ;;  %v5085_v48 = vmul.f32 %v9772_v9, %v4749_v60  ;;  %v5060_v33 = vmul.f32 1.442695, %v5038_v7  ;;  %v14835_v45 = vmul.f32 %v5102_v63, %v14080_v43  ;;  %v19128_v7 = vld [vmem:[#allocation166_spill] sm:$0xff]  ;;  %v19130_v63 = vld [vmem:[#allocation175_spill] sm:$0xff] }
 0x41d   : > { %v9776_v12 = vpop.eup %9775  ;;  %vm4047_vm5 = vcmp.gt.f32.partialorder %v19121_v24, 20.0  ;;  %v3982_v53 = vadd.f32 %v14753_v22, %v3934_v11  ;;  %vm14839_vm6 = vcmp.lt.f32.partialorder %v4557_v0, 0.0004427343  ;;  %vm14843_vm7 = vcmp.lt.f32.partialorder %v4173_v54, 0.0004427343  ;;  %v19129_v0 = vld [vmem:[#allocation313_spill] sm:$0xff] }
 0x41e   : > { %v4381_v34 = vmul.f32 %v4365_v41, %v19126_v28  ;;  %v9778_v9 = vpop.eup %9777  ;;  %v14849_v60 = vadd.f32 %v14713_v36, %v5085_v48  ;;  %9787 = vpow2.f32 %v5060_v33  ;;  %v3779_v43 = vmul.f32 0.6931472, %v9776_v12  ;;  %v19131_v41 = vld [vmem:[#allocation358_spill] sm:$0xff] }
 0x41f   : > { %v5147_v50 = vmul.f32 %v14601_v6, %v19128_v7  ;;  %v9780_v22 = vpop.eup %9779  ;;  %vm4815_vm8 = vcmp.gt.f32.partialorder %v19129_v0, 20.0  ;;  %v14855_v11 = vmul.f32 %v3982_v53, %v19130_v63  ;;  %v4553_v54 = vmul.f32 0.6931472, %v9778_v9 }
 0x420   : > { %19127 = vst [vmem:[#allocation464_spill] sm:$0xff] %v14849_v60  ;;  %v4172_v52 = vmul.f32 %v19113_v38, %v4171_v18  ;;  %7080 = vmatprep.mubr.f32.mxu1 %v4381_v34  ;;  %v3786_v28 = vadd.f32 1.0, %v19131_v41  ;;  %v9782_v16 = vpop.eup %9781  ;;  %v4318_v36 = vmul.f32 %v9780_v22, %v3982_v53  ;;  %v3785_v48 = vsel %vm14808_vm2, %v3782_v2, %v3779_v43 }
 0x421   : > { %v4940_v33 = vmul.f32 %v19117_v40, %v4939_v25  ;;  %vm14862_vm9 = vcmp.lt.f32.partialorder %v4941_v32, 0.0004427343  ;;  %7215 = vmatprep.mubr.f32.mxu0 %v5147_v50  ;;  %7081 = vmatmul.mubr.f32.gmra.mrb[10].mxu1 %v14744_v42  ;;  %v3865_v38 = vsel %vm3657_vm3, %v19116_v26, %v3785_v48  ;;  %v4559_v18 = vsel %vm14839_vm6, %v4556_v56, %v4553_v54  ;;  %v19134_v32 = vld [vmem:[#allocation51_spill] sm:$0xff]  ;;  %v19135_v56 = vld [vmem:[#allocation52_spill] sm:$0xff] }
 0x422   : > { %9789 = vlog2.f32 %v3786_v28  ;;  %v3789_v13 = vmul.f32 -0.5, %v19131_v41  ;;  %7216 = vmatmul.mubr.f32.gmra.mrb[22].mxu0 %v14591_v46  ;;  %v9784_v2 = vpop.eup %9783  ;;  %v14875_v40 = vadd.f32 %v14794_v55, %v4318_v36  ;;  %v3887_v25 = vmul.f32 %v14731_v61, %v3865_v38  ;;  %v19136_v50 = vld [vmem:[#allocation360_spill] sm:$0xff]  ;;  %v14895_v36 = vpop.f32.mrb[234].mxu0  ;;  %v19137_v48 = vld [vmem:[#allocation315_spill] sm:$0xff] }
 0x423   : > { %v3951_v42 = vmul.f32 %v3865_v38, %v19134_v32  ;;  %v4639_v26 = vsel %vm4431_vm4, %v19118_v20, %v4559_v18  ;;  %v4169_v34 = vmul.f32 0.6931472, %v9784_v2  ;;  %v3792_v9 = vand.u32 2147483647, %v19131_v41  ;;  %v19140_v32 = vld [vmem:[#allocation176_spill] sm:$0xff] }
 0x424   : > { %v4655_v53 = vmul.f32 %v14731_v61, %v4639_v26  ;;  %v4719_v4 = vmul.f32 %v4639_v26, %v19135_v56  ;;  %v9786_v46 = vpop.eup %9785  ;;  %v4702_v43 = vmul.f32 %v9782_v16, %v14875_v40  ;;  %v3910_v55 = vmul.f32 1.442695, %v3887_v25 }
 0x425   : > { %v14887_v7 = vmul.f32 %v3951_v42, %v14140_v8  ;;  %v4560_v22 = vadd.f32 1.0, %v19136_v50  ;;  %v4175_v20 = vsel %vm14843_vm7, %v4172_v52, %v4169_v34  ;;  %v4937_v54 = vmul.f32 0.6931472, %v9786_v46  ;;  %v19139_v52 = vld [vmem:[#allocation53_spill] sm:$0xff] }
 0x426   : > { %v14891_v63 = vmul.f32 %v4719_v4, %v14209_v3  ;;  %v3790_v28 = vadd.f32 1.0, %v3789_v13  ;;  %vm3658_vm10 = vcmp.gt.f32.partialorder %v19137_v48, 20.0  ;;  %v4750_v16 = vadd.f32 %v14775_v21, %v4702_v43  ;;  %v14903_v3 = vpop.f32.mrb[219].mxu1  ;;  %v19142_v43 = vld [vmem:[#allocation362_spill] sm:$0xff] }
 0x427   : > { %9791 = vpow2.f32 %v3910_v55  ;;  %v4255_v8 = vsel %vm4047_vm5, %v19121_v24, %v4175_v20  ;;  %v4563_v38 = vmul.f32 -0.5, %v19136_v50  ;;  %19138 = vst [vmem:[#allocation28_spill] sm:$0xff] %v14903_v3  ;;  %v4678_v18 = vmul.f32 1.442695, %v4655_v53  ;;  %v14975_v6 = vpop.f32.mrb[220].mxu1 }
 0x428   : > { %v4271_v37 = vmul.f32 %v14731_v61, %v4255_v8  ;;  %v4335_v13 = vmul.f32 %v4255_v8, %v19139_v52  ;;  %v4943_v2 = vsel %vm14862_vm9, %v4940_v33, %v4937_v54  ;;  %v9788_v25 = vpop.eup %9787  ;;  %v14910_v21 = vmul.f32 %v4750_v16, %v19140_v32  ;;  %v19141_v33 = vld [vmem:[#allocation54_spill] sm:$0xff]  ;;  %v19145_v52 = vld [vmem:[#allocation317_spill] sm:$0xff]  ;;  %19154 = vst [vmem:[#allocation312_spill] sm:$0xff] %v14975_v6 }
 0x429   : > { %v5023_v24 = vsel %vm4815_vm8, %v19129_v0, %v4943_v2  ;;  %9793 = vlog2.f32 %v4560_v22  ;;  %v4564_v42 = vadd.f32 1.0, %v4563_v38  ;;  %v5086_v26 = vmul.f32 %v9788_v25, %v4750_v16  ;;  %v6925_v16 = vld [vmem:[%s17998_s6 + $0x2a8] sm:$0xff]  ;;  %v19146_v2 = vld [vmem:[#allocation364_spill] sm:$0xff] }
 0x42a   : > { %v4294_v56 = vmul.f32 1.442695, %v4271_v37  ;;  %v14916_v53 = vmul.f32 %v4335_v13, %v14211_v57  ;;  %v5039_v4 = vmul.f32 %v14731_v61, %v5023_v24  ;;  %v5103_v34 = vmul.f32 %v5023_v24, %v19141_v33  ;;  %v6924_v57 = vld [vmem:[%s17998_s6 + $0x2a0] sm:$0xff]  ;;  %v19149_v33 = vld [vmem:[#allocation55_spill] sm:$0xff] }
 0x42b   : > { %v4566_v46 = vand.u32 2147483647, %v19136_v50  ;;  %v4176_v55 = vadd.f32 1.0, %v19142_v43  ;;  %v14924_v0 = vadd.f32 %v14835_v45, %v5086_v26  ;;  %v4179_v54 = vmul.f32 -0.5, %v19142_v43  ;;  %v14937_v45 = vpop.f32.mrb[235].mxu0  ;;  %v19219_v6 = vld [vmem:[#allocation337_spill] sm:$0xff] }
 0x42c   : > { %v9790_v20 = vpop.eup %9789  ;;  %9795 = vpow2.f32 %v4294_v56  ;;  %v5062_v22 = vmul.f32 1.442695, %v5039_v4  ;;  %v14934_v8 = vmul.f32 %v5103_v34, %v14243_v17  ;;  %v3791_v37 = vmul.f32 %v19131_v41, %v3790_v28  ;;  %19144 = vst [vmem:[#allocation29_spill] sm:$0xff] %v14937_v45  ;;  %v6908_v17 = vld [vmem:[%s17998_s6 + $0x220] sm:$0xff]  ;;  %v6909_v41 = vld [vmem:[%s17998_s6 + $0x228] sm:$0xff]  ;;  %v19221_v45 = vld [vmem:[#allocation187_spill] sm:$0xff] }
 0x42d   : > { %19143 = vst [vmem:[#allocation465_spill] sm:$0xff] %v14924_v0  ;;  %v3788_v38 = vmul.f32 0.6931472, %v9790_v20  ;;  %9797 = vlog2.f32 %v4176_v55  ;;  %vm4432_vm11 = vcmp.gt.f32.partialorder %v19145_v52, 20.0  ;;  %vm3793_vm12 = vcmp.lt.f32.partialorder %v3792_v9, 0.0004427343 }
 0x42e   : > { %9799 = vpow2.f32 %v4678_v18  ;;  %v4565_v13 = vmul.f32 %v19136_v50, %v4564_v42  ;;  %v4944_v25 = vadd.f32 1.0, %v19146_v2  ;;  %v4180_v24 = vadd.f32 1.0, %v4179_v54  ;;  %v6956_v18 = vld [vmem:[%s17998_s6 + $0x3a0] sm:$0xff]  ;;  %v6957_v42 = vld [vmem:[%s17998_s6 + $0x3a8] sm:$0xff]  ;;  %v19150_v55 = vld [vmem:[#allocation319_spill] sm:$0xff] }
 0x42f   : > { %9801 = vpow2.f32 %v5062_v22  ;;  %v3794_v32 = vsel %vm3793_vm12, %v3791_v37, %v3788_v38  ;;  %v9204_v26 = vpack.c.bf16 %v6925_v16, %v6924_v57  ;;  %vm14951_vm13 = vcmp.lt.f32.partialorder %v4566_v46, 0.0004427343  ;;  %v19151_v54 = vld [vmem:[#allocation177_spill] sm:$0xff]  ;;  %v19152_v16 = vld [vmem:[#allocation170_spill] sm:$0xff] }
 0x430   : > { %v3866_v9 = vsel %vm3658_vm10, %v19137_v48, %v3794_v32  ;;  %v4182_v28 = vand.u32 2147483647, %v19142_v43  ;;  %9803 = vlog2.f32 %v4944_v25  ;;  %v4947_v34 = vmul.f32 -0.5, %v19146_v2  ;;  %v19153_v32 = vld [vmem:[#allocation281_spill] sm:$0xff] }
 0x431   : > { %v9792_v56 = vpop.eup %9791  ;;  %v3888_v4 = vmul.f32 %v14731_v61, %v3866_v9  ;;  %v3952_v48 = vmul.f32 %v3866_v9, %v19149_v33  ;;  %v4950_v46 = vand.u32 2147483647, %v19146_v2  ;;  %9205 = vmatprep.subr.bf16.mxu1 %v9204_v26  ;;  %vm4048_vm14 = vcmp.gt.f32.partialorder %v19150_v55, 20.0  ;;  %v14977_v26 = vpop.f32.mrb[236].mxu0 }
 0x432   : > { %v3935_v20 = vmul.f32 0.0, %v9792_v56  ;;  %v9206_v22 = vpack.c.bf16 %v6909_v41, %v6908_v17  ;;  %v4382_v57 = vmul.f32 %v14875_v40, %v19151_v54  ;;  %v5148_v38 = vmul.f32 %v14691_v10, %v19152_v16  ;;  %19155 = vst [vmem:[#allocation30_spill] sm:$0xff] %v14977_v26  ;;  %v19158_v56 = vld [vmem:[#allocation366_spill] sm:$0xff]  ;;  %v19160_v54 = vld [vmem:[#allocation321_spill] sm:$0xff] }
 0x433   : > { %v9794_v37 = vpop.eup %9793  ;;  %v3912_v25 = vmul.f32 1.442695, %v3888_v4  ;;  %v14972_v12 = vmul.f32 %v3952_v48, %v19153_v32  ;;  %v4181_v9 = vmul.f32 %v19142_v43, %v4180_v24  ;;  %v9236_v33 = vpack.c.bf16 %v6957_v42, %v6956_v18  ;;  %v14985_v48 = vpop.f32.mrb[221].mxu1  ;;  %v19162_v42 = vld [vmem:[#allocation179_spill] sm:$0xff]  ;;  %v6941_v16 = vld [vmem:[%s17998_s6 + $0x328] sm:$0xff] }
 0x434   : > { %v3983_v17 = vadd.f32 %v14887_v7, %v3935_v20  ;;  %v4562_v41 = vmul.f32 0.6931472, %v9794_v37  ;;  %vm14980_vm15 = vcmp.lt.f32.partialorder %v4182_v28, 0.0004427343  ;;  %9207 = vmatpush3.bf16.msra.mxu1 %v9206_v22  ;;  %7085 = vmatprep.mubr.f32.mxu1 %v4382_v57  ;;  %v3795_v4 = vadd.f32 1.0, %v19158_v56  ;;  %19159 = vst [vmem:[#allocation468_spill] sm:$0xff] %v14985_v48 }
 0x435   : > { %vm4816_vm2 = vcmp.gt.f32.partialorder %v19160_v54, 20.0  ;;  %9805 = vpow2.f32 %v3912_v25  ;;  %v4948_v43 = vadd.f32 1.0, %v4947_v34  ;;  %7220 = vmatprep.mubr.f32.mxu0 %v5148_v38  ;;  %9237 = vmatprep.subr.bf16.mxu0 %v9236_v33  ;;  %v3798_v24 = vmul.f32 -0.5, %v19158_v56  ;;  %v19161_v7 = vld [vmem:[#allocation368_spill] sm:$0xff]  ;;  %v19166_v10 = vld [vmem:[#allocation310_spill] sm:$0xff]  ;;  %v19172_v40 = vld [vmem:[#allocation57_spill] sm:$0xff] }
 0x436   : > { %v4569_v18 = vadd.f32 1.0, %v19161_v7  ;;  %v9796_v28 = vpop.eup %9795  ;;  %v14991_v20 = vmul.f32 %v3983_v17, %v19162_v42  ;;  %v4568_v22 = vsel %vm14951_vm13, %v4565_v13, %v4562_v41  ;;  %9807 = vlog2.f32 %v3795_v4  ;;  %7086 = vmatmul.mubr.f32.gmra.mrb[12].mxu1 %v14855_v11  ;;  %7221 = vmatmul.mubr.f32.gmra.mrb[24].mxu0 %v14677_v14  ;;  %v6940_v34 = vld [vmem:[%s17998_s6 + $0x320] sm:$0xff] }
 0x437   : > { %v3801_v57 = vand.u32 2147483647, %v19158_v56  ;;  %v9798_v38 = vpop.eup %9797  ;;  %v4319_v37 = vmul.f32 %v9796_v28, %v3983_v17  ;;  %v4640_v13 = vsel %vm4432_vm11, %v19145_v52, %v4568_v22  ;;  %v4572_v50 = vmul.f32 -0.5, %v19161_v7  ;;  %v19163_v25 = vld [vmem:[#allocation56_spill] sm:$0xff] }
 0x438   : > { %9809 = vlog2.f32 %v4569_v18  ;;  %v9800_v11 = vpop.eup %9799  ;;  %v4656_v14 = vmul.f32 %v14731_v61, %v4640_v13  ;;  %v4720_v32 = vmul.f32 %v4640_v13, %v19163_v25  ;;  %v4178_v33 = vmul.f32 0.6931472, %v9798_v38  ;;  %v19169_v13 = vld [vmem:[#allocation370_spill] sm:$0xff] }
 0x439   : > { %vm15010_vm3 = vcmp.lt.f32.partialorder %v4950_v46, 0.0004427343  ;;  %v9802_v4 = vpop.eup %9801  ;;  %v15015_v17 = vadd.f32 %v14916_v53, %v4319_v37  ;;  %v4949_v28 = vmul.f32 %v19146_v2, %v4948_v43  ;;  %v3799_v52 = vadd.f32 1.0, %v3798_v24  ;;  %v19170_v53 = vld [vmem:[#allocation323_spill] sm:$0xff] }
 0x43a   : > { %v9238_v18 = vpack.c.bf16 %v6941_v16, %v6940_v34  ;;  %v9804_v42 = vpop.eup %9803  ;;  %v4680_v22 = vmul.f32 1.442695, %v4656_v14  ;;  %v15019_v48 = vmul.f32 %v4720_v32, %v19166_v10  ;;  %v4184_v38 = vsel %vm14980_vm15, %v4181_v9, %v4178_v33  ;;  %v19171_v34 = vld [vmem:[#allocation325_spill] sm:$0xff]  ;;  %v15041_v14 = vpop.f32.mrb[237].mxu0  ;;  %v19174_v32 = vld [vmem:[#allocation282_spill] sm:$0xff] }
 0x43b   : > { %vm15023_vm4 = vcmp.lt.f32.partialorder %v3801_v57, 0.0004427343  ;;  %v4185_v25 = vadd.f32 1.0, %v19169_v13  ;;  %vm3659_vm5 = vcmp.gt.f32.partialorder %v19170_v53, 20.0  ;;  %v4703_v2 = vmul.f32 %v9800_v11, %v15015_v17  ;;  %19173 = vst [vmem:[#allocation469_spill] sm:$0xff] %v15041_v14 }
 0x43c   : > { %v4256_v43 = vsel %vm4048_vm14, %v19150_v55, %v4184_v38  ;;  %v4946_v24 = vmul.f32 0.6931472, %v9804_v42  ;;  %v4573_v10 = vadd.f32 1.0, %v4572_v50  ;;  %9239 = vmatpush3.bf16.msra.mxu0 %v9238_v18  ;;  %vm4433_vm6 = vcmp.gt.f32.partialorder %v19171_v34, 20.0 }
 0x43d   : > { %9811 = vpow2.f32 %v4680_v22  ;;  %v4272_v9 = vmul.f32 %v14731_v61, %v4256_v43  ;;  %v4336_v57 = vmul.f32 %v4256_v43, %v19172_v40  ;;  %v4575_v16 = vand.u32 2147483647, %v19161_v7 }
 0x43e   : > { %v4751_v37 = vadd.f32 %v14891_v63, %v4703_v2  ;;  %v4952_v11 = vsel %vm15010_vm3, %v4949_v28, %v4946_v24  ;;  %9813 = vlog2.f32 %v4185_v25  ;;  %v4188_v55 = vmul.f32 -0.5, %v19169_v13  ;;  %v19175_v63 = vld [vmem:[#allocation180_spill] sm:$0xff]  ;;  %v19176_v25 = vld [vmem:[#allocation58_spill] sm:$0xff] }
 0x43f   : > { %v4296_v50 = vmul.f32 1.442695, %v4272_v9  ;;  %v15044_v33 = vmul.f32 %v4336_v57, %v19174_v32  ;;  %v5024_v18 = vsel %vm4816_vm2, %v19160_v54, %v4952_v11  ;;  %v4191_v42 = vand.u32 2147483647, %v19169_v13  ;;  %v9806_v22 = vpop.eup %9805 }
 0x440   : > { %v15051_v38 = vmul.f32 %v4751_v37, %v19175_v63  ;;  %v5087_v41 = vmul.f32 %v9802_v4, %v4751_v37  ;;  %v5040_v28 = vmul.f32 %v14731_v61, %v5024_v18  ;;  %v5104_v2 = vmul.f32 %v5024_v18, %v19176_v25  ;;  %v9808_v43 = vpop.eup %9807  ;;  %v19178_v37 = vld [vmem:[#allocation327_spill] sm:$0xff] }
 0x441   : > { %v3936_v24 = vmul.f32 0.0, %v9806_v22  ;;  %9815 = vpow2.f32 %v4296_v50  ;;  %v3800_v9 = vmul.f32 %v19158_v56, %v3799_v52  ;;  %v4574_v40 = vmul.f32 %v19161_v7, %v4573_v10  ;;  %v19179_v50 = vld [vmem:[#allocation372_spill] sm:$0xff]  ;;  %v19182_v7 = vld [vmem:[#allocation183_spill] sm:$0xff] }
 0x442   : > { %v9810_v57 = vpop.eup %9809  ;;  %v15058_v54 = vadd.f32 %v14934_v8, %v5087_v41  ;;  %v15061_v11 = vmul.f32 %v5104_v2, %v14363_v58  ;;  %v3797_v32 = vmul.f32 0.6931472, %v9808_v43  ;;  %v4189_v4 = vadd.f32 1.0, %v4188_v55  ;;  %v15079_v55 = vpop.f32.mrb[222].mxu1 }
 0x443   : > { %vm4049_vm7 = vcmp.gt.f32.partialorder %v19178_v37, 20.0  ;;  %v3984_v18 = vadd.f32 %v14972_v12, %v3936_v24  ;;  %v5064_v63 = vmul.f32 1.442695, %v5040_v28  ;;  %v4571_v22 = vmul.f32 0.6931472, %v9810_v57  ;;  %19183 = vst [vmem:[#allocation31_spill] sm:$0xff] %v15079_v55 }
 0x444   : > { %19177 = vst [vmem:[#allocation451_spill] sm:$0xff] %v15058_v54  ;;  %v4953_v25 = vadd.f32 1.0, %v19179_v50  ;;  %v3803_v56 = vsel %vm15023_vm4, %v3800_v9, %v3797_v32  ;;  %vm4576_vm8 = vcmp.lt.f32.partialorder %v4575_v16, 0.0004427343  ;;  %vm15068_vm9 = vcmp.lt.f32.partialorder %v4191_v42, 0.0004427343 }
 0x445   : > { %v4956_v58 = vmul.f32 -0.5, %v19179_v50  ;;  %v15074_v52 = vmul.f32 %v3984_v18, %v19182_v7  ;;  %v3867_v12 = vsel %vm3659_vm5, %v19170_v53, %v3803_v56  ;;  %v4577_v10 = vsel %vm4576_vm8, %v4574_v40, %v4571_v22  ;;  %v19184_v16 = vld [vmem:[#allocation59_spill] sm:$0xff]  ;;  %v19185_v24 = vld [vmem:[#allocation60_spill] sm:$0xff]  ;;  %v19186_v9 = vld [vmem:[#allocation181_spill] sm:$0xff] }
 0x446   : > { %9817 = vlog2.f32 %v4953_v25  ;;  %v3889_v46 = vmul.f32 %v14731_v61, %v3867_v12  ;;  %v3953_v42 = vmul.f32 %v3867_v12, %v19184_v16  ;;  %v4641_v41 = vsel %vm4433_vm6, %v19171_v34, %v4577_v10  ;;  %v19187_v56 = vld [vmem:[#allocation174_spill] sm:$0xff]  ;;  %v19190_v16 = vld [vmem:[#allocation329_spill] sm:$0xff] }
 0x447   : > { %v4190_v28 = vmul.f32 %v19169_v13, %v4189_v4  ;;  %v9812_v2 = vpop.eup %9811  ;;  %9819 = vpow2.f32 %v5064_v63  ;;  %v4657_v43 = vmul.f32 %v14731_v61, %v4641_v41  ;;  %v4721_v53 = vmul.f32 %v4641_v41, %v19185_v24  ;;  %v19188_v13 = vld [vmem:[#allocation284_spill] sm:$0xff]  ;;  %v19189_v12 = vld [vmem:[#allocation374_spill] sm:$0xff]  ;;  %v15105_v41 = vpop.f32.mrb[238].mxu0 }
 0x448   : > { %v4383_v40 = vmul.f32 %v15015_v17, %v19186_v9  ;;  %v9814_v57 = vpop.eup %9813  ;;  %v3914_v32 = vmul.f32 1.442695, %v3889_v46  ;;  %v15092_v22 = vmul.f32 %v3953_v42, %v14387_v31  ;;  %v4959_v25 = vand.u32 2147483647, %v19179_v50  ;;  %v19191_v46 = vld [vmem:[#allocation376_spill] sm:$0xff]  ;;  %19192 = vst [vmem:[#allocation314_spill] sm:$0xff] %v15105_v41 }
 0x449   : > { %v5149_v34 = vmul.f32 %v14849_v60, %v19187_v56  ;;  %v15098_v4 = vmul.f32 %v4721_v53, %v19188_v13  ;;  %v4187_v63 = vmul.f32 0.6931472, %v9814_v57  ;;  %v4957_v7 = vadd.f32 1.0, %v4956_v58  ;;  %v19193_v53 = vld [vmem:[#allocation520_spill] sm:$0xff]  ;;  %v6958_v41 = vld [vmem:[%s17998_s6 + $0x3b0] sm:$0xff] }
 0x44a   : > { %7090 = vmatprep.mubr.f32.mxu1 %v4383_v40  ;;  %v3804_v10 = vadd.f32 1.0, %v19189_v12  ;;  %vm4817_vm10 = vcmp.gt.f32.partialorder %v19190_v16, 20.0  ;;  %9821 = vpow2.f32 %v3914_v32  ;;  %v4682_v17 = vmul.f32 1.442695, %v4657_v43  ;;  %v15116_v32 = vpop.f32.mrb[223].mxu1 }
 0x44b   : > { %7225 = vmatprep.mubr.f32.mxu0 %v5149_v34  ;;  %v3807_v31 = vmul.f32 -0.5, %v19189_v12  ;;  %v4578_v42 = vadd.f32 1.0, %v19191_v46  ;;  %7091 = vmatmul.mubr.f32.gmra.mrb[14].mxu1 %v14991_v20  ;;  %v9816_v24 = vpop.eup %9815  ;;  %v19194_v9 = vmin.f32 %v19193_v53, 20.0  ;;  %v4193_v40 = vsel %vm15068_vm9, %v4190_v28, %v4187_v63  ;;  %19196 = vst [vmem:[#allocation151_spill] sm:$0xff] %v15116_v32  ;;  %v19211_v32 = vld [vmem:[#allocation62_spill] sm:$0xff]  ;;  %v15184_v55 = vpop.f32.mrb[224].mxu1 }
 0x44c   : > { %v3810_v57 = vand.u32 2147483647, %v19189_v12  ;;  %v4581_v43 = vmul.f32 -0.5, %v19191_v46  ;;  %7226 = vmatmul.mubr.f32.gmra.mrb[26].mxu0 %v14832_v39  ;;  %v4320_v56 = vmul.f32 %v9816_v24, %v3984_v18  ;;  %v4257_v20 = vsel %vm4049_vm7, %v19178_v37, %v4193_v40  ;;  %v19201_v40 = vld [vmem:[#allocation378_spill] sm:$0xff]  ;;  %19212 = vst [vmem:[#allocation153_spill] sm:$0xff] %v15184_v55 }
 0x44d   : > { %v15109_v58 = vmul.f32 1.442695, %v19194_v9  ;;  %9823 = vlog2.f32 %v3804_v10  ;;  %v3808_v34 = vadd.f32 1.0, %v3807_v31  ;;  %v4273_v13 = vmul.f32 %v14731_v61, %v4257_v20  ;;  %v19197_v9 = vld [vmem:[#allocation61_spill] sm:$0xff]  ;;  %v19200_v10 = vld [vmem:[#allocation24_spill] sm:$0xff] }
 0x44e   : > { %v4337_v8 = vmul.f32 %v4257_v20, %v19197_v9  ;;  %9825 = vlog2.f32 %v4578_v42  ;;  %v4584_v28 = vand.u32 2147483647, %v19191_v46  ;;  %v4368_v63 = vadd.f32 %v15044_v33, %v4320_v56  ;;  %v15135_v20 = vpop.f32.mrb[239].mxu0  ;;  %v19205_v56 = vld [vmem:[#allocation331_spill] sm:$0xff] }
 0x44f   : > { %19195 = vst [vmem:[#allocation287_spill] sm:$0xff] %v15109_v58  ;;  %9827 = vpow2.f32 %v4682_v17  ;;  %v4958_v39 = vmul.f32 %v19179_v50, %v4957_v7  ;;  %vm15126_vm11 = vcmp.lt.f32.partialorder %v4959_v25, 0.0004427343  ;;  %v4298_v37 = vmul.f32 1.442695, %v4273_v13  ;;  %19202 = vst [vmem:[#allocation316_spill] sm:$0xff] %v15135_v20 }
 0x450   : > { %v9818_v24 = vpop.eup %9817  ;;  %v15131_v31 = vmul.f32 %v4337_v8, %v19200_v10  ;;  %v4194_v53 = vadd.f32 1.0, %v19201_v40  ;;  %v4197_v42 = vmul.f32 -0.5, %v19201_v40  ;;  %v4704_v9 = vmul.f32 %v9812_v2, %v4368_v63  ;;  %v19208_v8 = vld [vmem:[#allocation380_spill] sm:$0xff] }
 0x451   : > { %v4955_v33 = vmul.f32 0.6931472, %v9818_v24  ;;  %v15138_v17 = vmul.f32 %v19189_v12, %v3808_v34  ;;  %vm15140_vm12 = vcmp.lt.f32.partialorder %v3810_v57, 0.0004427343  ;;  %v4582_v25 = vadd.f32 1.0, %v4581_v43  ;;  %v9820_v7 = vpop.eup %9819  ;;  %v19209_v24 = vld [vmem:[#allocation333_spill] sm:$0xff] }
 0x452   : > { %vm3660_vm13 = vcmp.gt.f32.partialorder %v19205_v56, 20.0  ;;  %9829 = vpow2.f32 %v4298_v37  ;;  %vm15145_vm14 = vcmp.lt.f32.partialorder %v4584_v28, 0.0004427343  ;;  %v4962_v10 = vadd.f32 1.0, %v19208_v8  ;;  %v6926_v34 = vld [vmem:[%s17998_s6 + $0x2b0] sm:$0xff]  ;;  %v6927_v28 = vld [vmem:[%s17998_s6 + $0x2b8] sm:$0xff] }
 0x453   : > { %v4965_v2 = vmul.f32 -0.5, %v19208_v8  ;;  %vm4434_vm15 = vcmp.gt.f32.partialorder %v19209_v24, 20.0  ;;  %v4752_v12 = vadd.f32 %v15019_v48, %v4704_v9  ;;  %v4961_v57 = vsel %vm15126_vm11, %v4958_v39, %v4955_v33  ;;  %v6911_v39 = vld [vmem:[%s17998_s6 + $0x238] sm:$0xff] }
 0x454   : > { %9831 = vlog2.f32 %v4194_v53  ;;  %v4200_v43 = vand.u32 2147483647, %v19201_v40  ;;  %v5025_v37 = vsel %vm4817_vm10, %v19190_v16, %v4961_v57  ;;  %v4198_v60 = vadd.f32 1.0, %v4197_v42  ;;  %v6910_v53 = vld [vmem:[%s17998_s6 + $0x230] sm:$0xff]  ;;  %v9822_v18 = vpop.eup %9821  ;;  %v19210_v9 = vld [vmem:[#allocation184_spill] sm:$0xff] }
 0x455   : > { %9833 = vlog2.f32 %v4962_v10  ;;  %v4966_v48 = vadd.f32 1.0, %v4965_v2  ;;  %v15172_v33 = vmul.f32 %v4752_v12, %v19210_v9  ;;  %v5088_v58 = vmul.f32 %v9820_v7, %v4752_v12  ;;  %v6959_v9 = vld [vmem:[%s17998_s6 + $0x3b8] sm:$0xff] }
 0x456   : > { %v5041_v20 = vmul.f32 %v14731_v61, %v5025_v37  ;;  %v5105_v16 = vmul.f32 %v5025_v37, %v19211_v32  ;;  %v3937_v42 = vmul.f32 0.0, %v9822_v18  ;;  %v4583_v10 = vmul.f32 %v19191_v46, %v4582_v25  ;;  %v19214_v37 = vld [vmem:[#allocation25_spill] sm:$0xff]  ;;  %v19217_v18 = vld [vmem:[#allocation335_spill] sm:$0xff] }
 0x457   : > { %v4968_v2 = vand.u32 2147483647, %v19208_v8  ;;  %v9208_v57 = vpack.c.bf16 %v6927_v28, %v6926_v34  ;;  %v9824_v7 = vpop.eup %9823  ;;  %v15187_v12 = vadd.f32 %v15061_v11, %v5088_v58  ;;  %vm15192_vm2 = vcmp.lt.f32.partialorder %v4200_v43, 0.0004427343  ;;  %v19218_v11 = vld [vmem:[#allocation185_spill] sm:$0xff]  ;;  %v6943_v25 = vld [vmem:[%s17998_s6 + $0x338] sm:$0xff] }
 0x458   : > { %v5066_v32 = vmul.f32 1.442695, %v5041_v20  ;;  %v15190_v46 = vmul.f32 %v5105_v16, %v19214_v37  ;;  %v9210_v34 = vpack.c.bf16 %v6911_v39, %v6910_v53  ;;  %v9826_v28 = vpop.eup %9825  ;;  %vm4050_vm3 = vcmp.gt.f32.partialorder %v19217_v18, 20.0  ;;  %v19220_v37 = vld [vmem:[#allocation178_spill] sm:$0xff] }
 0x459   : > { %19213 = vst [vmem:[#allocation288_spill] sm:$0xff] %v15187_v12  ;;  %v3985_v14 = vadd.f32 %v15092_v22, %v3937_v42  ;;  %v3806_v26 = vmul.f32 0.6931472, %v9824_v7  ;;  %v4199_v55 = vmul.f32 %v19201_v40, %v4198_v60  ;;  %9209 = vmatprep.subr.bf16.mxu1 %v9208_v57  ;;  %v4384_v58 = vmul.f32 %v4368_v63, %v19218_v11  ;;  %v9828_v20 = vpop.eup %9827  ;;  %v19222_v22 = vld [vmem:[#allocation382_spill] sm:$0xff]  ;;  %v15211_v40 = vpop.f32.mrb[240].mxu0  ;;  %v19227_v11 = vld [vmem:[#allocation285_spill] sm:$0xff] }
 0x45a   : > { %vm4818_vm4 = vcmp.gt.f32.partialorder %v19219_v6, 20.0  ;;  %v4580_v16 = vmul.f32 0.6931472, %v9826_v28  ;;  %v4967_v43 = vmul.f32 %v19208_v8, %v4966_v48  ;;  %9211 = vmatpush3.bf16.msra.mxu1 %v9210_v34  ;;  %v5150_v53 = vmul.f32 %v14924_v0, %v19220_v37  ;;  %v15213_v42 = vpop.f32.mrb[225].mxu1  ;;  %v19225_v48 = vld [vmem:[#allocation63_spill] sm:$0xff]  ;;  %v19370_v0 = vld [vmem:[#allocation426_spill] sm:$0xff] }
 0x45b   : > { %v9240_v39 = vpack.c.bf16 %v6959_v9, %v6958_v41  ;;  %v15205_v3 = vmul.f32 %v3985_v14, %v19221_v45  ;;  %9835 = vpow2.f32 %v5066_v32  ;;  %v3812_v60 = vsel %vm15140_vm12, %v15138_v17, %v3806_v26  ;;  %7095 = vmatprep.mubr.f32.mxu1 %v4384_v58  ;;  %v19226_v9 = vld [vmem:[#allocation64_spill] sm:$0xff] }
 0x45c   : > { %v3813_v63 = vadd.f32 1.0, %v19222_v22  ;;  %v3868_v8 = vsel %vm3660_vm13, %v19205_v56, %v3812_v60  ;;  %v4586_v45 = vsel %vm15145_vm14, %v4583_v10, %v4580_v16  ;;  %vm15220_vm5 = vcmp.lt.f32.partialorder %v4968_v2, 0.0004427343  ;;  %7230 = vmatprep.mubr.f32.mxu0 %v5150_v53  ;;  %v9830_v17 = vpop.eup %9829  ;;  %7096 = vmatmul.mubr.f32.gmra.mrb[16].mxu1 %v15074_v52 }
 0x45d   : > { %9241 = vmatprep.subr.bf16.mxu0 %v9240_v39  ;;  %v3816_v26 = vmul.f32 -0.5, %v19222_v22  ;;  %v3890_v50 = vmul.f32 %v14731_v61, %v3868_v8  ;;  %v3954_v57 = vmul.f32 %v3868_v8, %v19225_v48  ;;  %v4642_v56 = vsel %vm4434_vm15, %v19209_v24, %v4586_v45  ;;  %7231 = vmatmul.mubr.f32.gmra.mrb[28].mxu0 %v14910_v21  ;;  %v19228_v24 = vld [vmem:[#allocation384_spill] sm:$0xff]  ;;  %v19229_v8 = vld [vmem:[#allocation339_spill] sm:$0xff]  ;;  %v19233_v48 = vld [vmem:[#allocation66_spill] sm:$0xff] }
 0x45e   : > { %9837 = vlog2.f32 %v3813_v63  ;;  %v9832_v13 = vpop.eup %9831  ;;  %v4321_v10 = vmul.f32 %v9830_v17, %v3985_v14  ;;  %v4658_v2 = vmul.f32 %v14731_v61, %v4642_v56  ;;  %v4722_v7 = vmul.f32 %v4642_v56, %v19226_v9 }
 0x45f   : > { %v3819_v32 = vand.u32 2147483647, %v19222_v22  ;;  %v9834_v34 = vpop.eup %9833  ;;  %v3916_v28 = vmul.f32 1.442695, %v3890_v50  ;;  %v15236_v58 = vmul.f32 %v3954_v57, %v19227_v11  ;;  %v4196_v16 = vmul.f32 0.6931472, %v9832_v13 }
 0x460   : > { %v4587_v37 = vadd.f32 1.0, %v19228_v24  ;;  %v4369_v52 = vadd.f32 %v15131_v31, %v4321_v10  ;;  %v15241_v21 = vmul.f32 %v4722_v7, %v14547_v51  ;;  %v4964_v14 = vmul.f32 0.6931472, %v9834_v34  ;;  %v15273_v7 = vpop.f32.mrb[241].mxu0 }
 0x461   : > { %v3817_v53 = vadd.f32 1.0, %v3816_v26  ;;  %9839 = vpow2.f32 %v3916_v28  ;;  %v4684_v39 = vmul.f32 1.442695, %v4658_v2  ;;  %v4202_v60 = vsel %vm15192_vm2, %v4199_v55, %v4196_v16  ;;  %v6942_v55 = vld [vmem:[%s17998_s6 + $0x330] sm:$0xff]  ;;  %v19232_v26 = vld [vmem:[#allocation65_spill] sm:$0xff] }
 0x462   : > { %v4590_v63 = vmul.f32 -0.5, %v19228_v24  ;;  %vm3661_vm6 = vcmp.gt.f32.partialorder %v19229_v8, 20.0  ;;  %v4705_v45 = vmul.f32 %v9828_v20, %v4369_v52  ;;  %v4258_v17 = vsel %vm4050_vm3, %v19217_v18, %v4202_v60 }
 0x463   : > { %v4970_v51 = vsel %vm15220_vm5, %v4967_v43, %v4964_v14  ;;  %vm15252_vm7 = vcmp.lt.f32.partialorder %v3819_v32, 0.0004427343  ;;  %v4274_v20 = vmul.f32 %v14731_v61, %v4258_v17  ;;  %v4338_v50 = vmul.f32 %v4258_v17, %v19232_v26  ;;  %v19234_v32 = vld [vmem:[#allocation188_spill] sm:$0xff] }
 0x464   : > { %v5026_v18 = vsel %vm4818_vm4, %v19219_v6, %v4970_v51  ;;  %9841 = vlog2.f32 %v4587_v37  ;;  %v4753_v43 = vadd.f32 %v15098_v4, %v4705_v45  ;;  %v4591_v56 = vadd.f32 1.0, %v4590_v63  ;;  %v19238_v51 = vld [vmem:[#allocation388_spill] sm:$0xff] }
 0x465   : > { %v5042_v41 = vmul.f32 %v14731_v61, %v5026_v18  ;;  %v5106_v57 = vmul.f32 %v5026_v18, %v19233_v48  ;;  %v9836_v13 = vpop.eup %9835  ;;  %9843 = vpow2.f32 %v4684_v39  ;;  %v4300_v10 = vmul.f32 1.442695, %v4274_v20  ;;  %v19236_v39 = vld [vmem:[#allocation341_spill] sm:$0xff]  ;;  %v19242_v48 = vld [vmem:[#allocation67_spill] sm:$0xff] }
 0x466   : > { %v15271_v2 = vmul.f32 %v4338_v50, %v14549_v47  ;;  %v9242_v9 = vpack.c.bf16 %v6943_v25, %v6942_v55  ;;  %v15276_v34 = vmul.f32 %v4753_v43, %v19234_v32  ;;  %v5089_v6 = vmul.f32 %v9836_v13, %v4753_v43  ;;  %v19235_v47 = vld [vmem:[#allocation386_spill] sm:$0xff]  ;;  %v19239_v20 = vld [vmem:[#allocation189_spill] sm:$0xff] }
 0x467   : > { %v5068_v28 = vmul.f32 1.442695, %v5042_v41  ;;  %v15279_v4 = vmul.f32 %v5106_v57, %v14574_v59  ;;  %9845 = vpow2.f32 %v4300_v10  ;;  %v3818_v16 = vmul.f32 %v19222_v22, %v3817_v53  ;;  %v19245_v10 = vld [vmem:[#allocation182_spill] sm:$0xff] }
 0x468   : > { %v9838_v11 = vpop.eup %9837  ;;  %v4593_v37 = vand.u32 2147483647, %v19228_v24  ;;  %9243 = vmatpush3.bf16.msra.mxu0 %v9242_v9  ;;  %v4203_v14 = vadd.f32 1.0, %v19235_v47  ;;  %vm4435_vm8 = vcmp.gt.f32.partialorder %v19236_v39, 20.0  ;;  %v15286_v60 = vadd.f32 %v15190_v46, %v5089_v6  ;;  %v19246_v32 = vld [vmem:[#allocation390_spill] sm:$0xff] }
 0x469   : > { %v3815_v63 = vmul.f32 0.6931472, %v9838_v11  ;;  %v4592_v45 = vmul.f32 %v19228_v24, %v4591_v56  ;;  %v4206_v59 = vmul.f32 -0.5, %v19235_v47  ;;  %v4209_v17 = vand.u32 2147483647, %v19235_v47 }
 0x46a   : > { %19237 = vst [vmem:[#allocation318_spill] sm:$0xff] %v15286_v60  ;;  %9847 = vlog2.f32 %v4203_v14  ;;  %v4971_v22 = vadd.f32 1.0, %v19238_v51  ;;  %v4974_v53 = vmul.f32 -0.5, %v19238_v51  ;;  %v4385_v46 = vmul.f32 %v4369_v52, %v19239_v20  ;;  %v15306_v52 = vpop.f32.mrb[226].mxu1 }
 0x46b   : > { %9849 = vpow2.f32 %v5068_v28  ;;  %v3821_v55 = vsel %vm15252_vm7, %v3818_v16, %v3815_v63  ;;  %v4207_v25 = vadd.f32 1.0, %v4206_v59  ;;  %v9840_v26 = vpop.eup %9839  ;;  %vm15299_vm9 = vcmp.lt.f32.partialorder %v4593_v37, 0.0004427343  ;;  %v19248_v59 = vld [vmem:[#allocation392_spill] sm:$0xff] }
 0x46c   : > { %v3869_v24 = vsel %vm3661_vm6, %v19229_v8, %v3821_v55  ;;  %9851 = vlog2.f32 %v4971_v22  ;;  %v4975_v18 = vadd.f32 1.0, %v4974_v53  ;;  %v3938_v43 = vmul.f32 0.0, %v9840_v26  ;;  %7100 = vmatprep.mubr.f32.mxu1 %v4385_v46  ;;  %v15325_v22 = vpop.f32.mrb[242].mxu0  ;;  %v19250_v53 = vld [vmem:[#allocation191_spill] sm:$0xff] }
 0x46d   : > { %v3891_v41 = vmul.f32 %v14731_v61, %v3869_v24  ;;  %v3955_v31 = vmul.f32 %v3869_v24, %v19242_v48  ;;  %v4977_v57 = vand.u32 2147483647, %v19238_v51  ;;  %v4208_v13 = vmul.f32 %v19235_v47, %v4207_v25  ;;  %7101 = vmatmul.mubr.f32.gmra.mrb[18].mxu1 %v15205_v3  ;;  %v19247_v61 = vld [vmem:[#allocation343_spill] sm:$0xff]  ;;  %v19249_v3 = vld [vmem:[#allocation345_spill] sm:$0xff]  ;;  %v15397_v48 = vpop.f32.mrb[243].mxu0 }
 0x46e   : > { %v9842_v56 = vpop.eup %9841  ;;  %vm15309_vm10 = vcmp.lt.f32.partialorder %v4209_v17, 0.0004427343  ;;  %v5151_v9 = vmul.f32 %v15058_v54, %v19245_v10  ;;  %v3822_v6 = vadd.f32 1.0, %v19246_v32  ;;  %vm4051_vm11 = vcmp.gt.f32.partialorder %v19247_v61, 20.0 }
 0x46f   : > { %v3986_v28 = vadd.f32 %v15236_v58, %v3938_v43  ;;  %v3918_v11 = vmul.f32 1.442695, %v3891_v41  ;;  %v15320_v16 = vmul.f32 %v3955_v31, %v14614_v35  ;;  %v4589_v37 = vmul.f32 0.6931472, %v9842_v56  ;;  %v9844_v47 = vpop.eup %9843  ;;  %v19254_v31 = vld [vmem:[#allocation394_spill] sm:$0xff] }
 0x470   : > { %v4976_v14 = vmul.f32 %v19238_v51, %v4975_v18  ;;  %7235 = vmatprep.mubr.f32.mxu0 %v5151_v9  ;;  %9853 = vlog2.f32 %v3822_v6  ;;  %v3825_v63 = vmul.f32 -0.5, %v19246_v32  ;;  %v4596_v17 = vadd.f32 1.0, %v19248_v59  ;;  %v15335_v51 = vpop.f32.mrb[227].mxu1 }
 0x471   : > { %vm4819_vm12 = vcmp.gt.f32.partialorder %v19249_v3, 20.0  ;;  %v15329_v58 = vmul.f32 %v3986_v28, %v19250_v53  ;;  %9855 = vpow2.f32 %v3918_v11  ;;  %v4595_v35 = vsel %vm15299_vm9, %v4592_v45, %v4589_v37  ;;  %7236 = vmatmul.mubr.f32.gmra.mrb[30].mxu0 %v15051_v38  ;;  %v9846_v25 = vpop.eup %9845  ;;  %v15344_v45 = vld [vmem:[%s17997_s5] ss:$0 sm:$0xff] }
 0x472   : > { %v4599_v55 = vmul.f32 -0.5, %v19248_v59  ;;  %v4643_v20 = vsel %vm4435_vm8, %v19236_v39, %v4595_v35  ;;  %v3826_v46 = vadd.f32 1.0, %v3825_v63  ;;  %v3828_v26 = vand.u32 2147483647, %v19246_v32  ;;  %v19251_v38 = vld [vmem:[#allocation68_spill] sm:$0xff] }
 0x473   : > { %9857 = vlog2.f32 %v4596_v17  ;;  %v4322_v24 = vmul.f32 %v9846_v25, %v3986_v28  ;;  %v4659_v50 = vmul.f32 %v15344_v45, %v4643_v20  ;;  %v4723_v18 = vmul.f32 %v4643_v20, %v19251_v38  ;;  %v19260_v20 = vld [vmem:[#allocation349_spill] sm:$0xff] }
 0x474   : > { %v4600_v43 = vadd.f32 1.0, %v4599_v55  ;;  %v9848_v41 = vpop.eup %9847  ;;  %vm15348_vm13 = vcmp.lt.f32.partialorder %v4977_v57, 0.0004427343  ;;  %v4602_v39 = vand.u32 2147483647, %v19248_v59  ;;  %v4212_v56 = vadd.f32 1.0, %v19254_v31 }
 0x475   : > { %v4215_v10 = vmul.f32 -0.5, %v19254_v31  ;;  %v9850_v9 = vpop.eup %9849  ;;  %v15356_v6 = vadd.f32 %v15271_v2, %v4322_v24  ;;  %v4686_v28 = vmul.f32 1.442695, %v4659_v50  ;;  %v15359_v11 = vmul.f32 %v4723_v18, %v14624_v23  ;;  %v19255_v57 = vld [vmem:[#allocation347_spill] sm:$0xff] }
 0x476   : > { %v4205_v37 = vmul.f32 0.6931472, %v9848_v41  ;;  %v9852_v63 = vpop.eup %9851  ;;  %vm3662_vm14 = vcmp.gt.f32.partialorder %v19255_v57, 20.0  ;;  %v3827_v17 = vmul.f32 %v19246_v32, %v3826_v46  ;;  %vm15363_vm15 = vcmp.lt.f32.partialorder %v3828_v26, 0.0004427343 }
 0x477   : > { %v4601_v35 = vmul.f32 %v19248_v59, %v4600_v43  ;;  %9859 = vlog2.f32 %v4212_v56  ;;  %v4706_v2 = vmul.f32 %v9844_v47, %v15356_v6  ;;  %v4973_v23 = vmul.f32 0.6931472, %v9852_v63  ;;  %v19261_v59 = vld [vmem:[#allocation396_spill] sm:$0xff] }
 0x478   : > { %v4211_v55 = vsel %vm15309_vm10, %v4208_v13, %v4205_v37  ;;  %vm15371_vm2 = vcmp.lt.f32.partialorder %v4602_v39, 0.0004427343  ;;  %vm4436_vm3 = vcmp.gt.f32.partialorder %v19260_v20, 20.0  ;;  %9861 = vpow2.f32 %v4686_v28  ;;  %v19262_v13 = vld [vmem:[#allocation69_spill] sm:$0xff]  ;;  %v19263_v39 = vld [vmem:[#allocation351_spill] sm:$0xff] }
 0x479   : > { %v4259_v32 = vsel %vm4051_vm11, %v19247_v61, %v4211_v55  ;;  %v4216_v46 = vadd.f32 1.0, %v4215_v10  ;;  %v4980_v26 = vadd.f32 1.0, %v19261_v59  ;;  %v4754_v47 = vadd.f32 %v15241_v21, %v4706_v2  ;;  %v19264_v21 = vld [vmem:[#allocation192_spill] sm:$0xff]  ;;  %v19265_v2 = vld [vmem:[#allocation70_spill] sm:$0xff] }
 0x47a   : > { %v4275_v8 = vmul.f32 %v15344_v45, %v4259_v32  ;;  %v4339_v24 = vmul.f32 %v4259_v32, %v19262_v13  ;;  %v4979_v50 = vsel %vm15348_vm13, %v4976_v14, %v4973_v23  ;;  %v9854_v38 = vpop.eup %9853  ;;  %v4218_v43 = vand.u32 2147483647, %v19254_v31 }
 0x47b   : > { %v5027_v18 = vsel %vm4819_vm12, %v19249_v3, %v4979_v50  ;;  %9863 = vlog2.f32 %v4980_v26  ;;  %v4983_v61 = vmul.f32 -0.5, %v19261_v59  ;;  %v9856_v41 = vpop.eup %9855  ;;  %vm4052_vm4 = vcmp.gt.f32.partialorder %v19263_v39, 20.0  ;;  %v19267_v50 = vld [vmem:[#allocation353_spill] sm:$0xff] }
 0x47c   : > { %v15392_v56 = vmul.f32 %v4754_v47, %v19264_v21  ;;  %v5090_v10 = vmul.f32 %v9850_v9, %v4754_v47  ;;  %v4302_v28 = vmul.f32 1.442695, %v4275_v8  ;;  %v15395_v14 = vmul.f32 %v4339_v24, %v14635_v62  ;;  %v6928_v24 = vld [vmem:[%s17998_s6 + $0x2c0] sm:$0xff]  ;;  %v19271_v21 = vld [vmem:[#allocation71_spill] sm:$0xff] }
 0x47d   : > { %v9858_v37 = vpop.eup %9857  ;;  %v3939_v3 = vmul.f32 0.0, %v9856_v41  ;;  %v5043_v63 = vmul.f32 %v15344_v45, %v5027_v18  ;;  %v5107_v55 = vmul.f32 %v5027_v18, %v19265_v2  ;;  %v3824_v23 = vmul.f32 0.6931472, %v9854_v38  ;;  %v19270_v18 = vld [vmem:[#allocation195_spill] sm:$0xff] }
 0x47e   : > { %v15402_v32 = vadd.f32 %v15279_v4, %v5090_v10  ;;  %9865 = vpow2.f32 %v4302_v28  ;;  %v4598_v26 = vmul.f32 0.6931472, %v9858_v37  ;;  %v4984_v13 = vadd.f32 1.0, %v4983_v61  ;;  %v6929_v4 = vld [vmem:[%s17998_s6 + $0x2c8] sm:$0xff]  ;;  %v15443_v37 = vpop.f32.mrb[228].mxu1 }
 0x47f   : > { %v3987_v9 = vadd.f32 %v15320_v16, %v3939_v3  ;;  %v5070_v47 = vmul.f32 1.442695, %v5043_v63  ;;  %v15406_v62 = vmul.f32 %v5107_v55, %v14710_v44  ;;  %v3830_v8 = vsel %vm15363_vm15, %v3827_v17, %v3824_v23  ;;  %v19272_v55 = vld [vmem:[#allocation72_spill] sm:$0xff] }
 0x480   : > { %19266 = vst [vmem:[#allocation155_spill] sm:$0xff] %v15402_v32  ;;  %vm4820_vm5 = vcmp.gt.f32.partialorder %v19267_v50, 20.0  ;;  %v3870_v16 = vsel %vm3662_vm14, %v19255_v57, %v3830_v8  ;;  %v4604_v44 = vsel %vm15371_vm2, %v4601_v35, %v4598_v26  ;;  %v4217_v53 = vmul.f32 %v19254_v31, %v4216_v46  ;;  %v6912_v57 = vld [vmem:[%s17998_s6 + $0x240] sm:$0xff]  ;;  %v6913_v31 = vld [vmem:[%s17998_s6 + $0x248] sm:$0xff] }
 0x481   : > { %vm15423_vm6 = vcmp.lt.f32.partialorder %v4218_v43, 0.0004427343  ;;  %v9860_v38 = vpop.eup %9859  ;;  %v15428_v61 = vmul.f32 %v3987_v9, %v19270_v18  ;;  %v3892_v41 = vmul.f32 %v15344_v45, %v3870_v16  ;;  %v3956_v10 = vmul.f32 %v3870_v16, %v19271_v21  ;;  %v6960_v26 = vld [vmem:[%s17998_s6 + $0x3c0] sm:$0xff] }
 0x482   : > { %v4985_v28 = vmul.f32 %v19261_v59, %v4984_v13  ;;  %v4644_v35 = vsel %vm4436_vm3, %v19260_v20, %v4604_v44  ;;  %v4214_v25 = vmul.f32 0.6931472, %v9860_v38  ;;  %v4986_v46 = vand.u32 2147483647, %v19261_v59  ;;  %v9862_v3 = vpop.eup %9861  ;;  %v6961_v20 = vld [vmem:[%s17998_s6 + $0x3c8] sm:$0xff]  ;;  %v15455_v59 = vpop.f32.mrb[244].mxu0 }
 0x483   : > { %v9212_v43 = vpack.c.bf16 %v6929_v4, %v6928_v24  ;;  %9867 = vpow2.f32 %v5070_v47  ;;  %v3920_v63 = vmul.f32 1.442695, %v3892_v41  ;;  %v15446_v2 = vmul.f32 %v3956_v10, %v14750_v49  ;;  %v15457_v13 = vpop.f32.mrb[229].mxu1  ;;  %v19273_v8 = vld [vmem:[#allocation193_spill] sm:$0xff]  ;;  %v19274_v4 = vld [vmem:[#allocation186_spill] sm:$0xff] }
 0x484   : > { %v4724_v23 = vmul.f32 %v4644_v35, %v19272_v55  ;;  %v4220_v47 = vsel %vm15423_vm6, %v4217_v53, %v4214_v25  ;;  %v9214_v49 = vpack.c.bf16 %v6913_v31, %v6912_v57  ;;  %v4386_v24 = vmul.f32 %v15356_v6, %v19273_v8  ;;  %v19275_v41 = vld [vmem:[#allocation73_spill] sm:$0xff]  ;;  %v19276_v57 = vld [vmem:[#allocation398_spill] sm:$0xff] }
 0x485   : > { %9213 = vmatprep.subr.bf16.mxu1 %v9212_v43  ;;  %v5152_v16 = vmul.f32 %v15187_v12, %v19274_v4  ;;  %v9864_v44 = vpop.eup %9863  ;;  %9869 = vpow2.f32 %v3920_v63  ;;  %v4660_v38 = vmul.f32 %v15344_v45, %v4644_v35  ;;  %v4260_v17 = vsel %vm4052_vm4, %v19263_v39, %v4220_v47  ;;  %v19277_v63 = vld [vmem:[#allocation400_spill] sm:$0xff] }
 0x486   : > { %v15467_v18 = vmul.f32 %v4724_v23, %v14763_v30  ;;  %v4276_v53 = vmul.f32 %v15344_v45, %v4260_v17  ;;  %v4340_v21 = vmul.f32 %v4260_v17, %v19275_v41  ;;  %v4982_v10 = vmul.f32 0.6931472, %v9864_v44  ;;  %9215 = vmatpush3.bf16.msra.mxu1 %v9214_v49  ;;  %7105 = vmatprep.mubr.f32.mxu1 %v4386_v24 }
 0x487   : > { %v9244_v6 = vpack.c.bf16 %v6961_v20, %v6960_v26  ;;  %9871 = vpow2.f32 %v14540_v5  ;;  %vm4987_vm7 = vcmp.lt.f32.partialorder %v4986_v46, 0.0004427343  ;;  %7240 = vmatprep.mubr.f32.mxu0 %v5152_v16  ;;  %v3831_v31 = vadd.f32 1.0, %v19276_v57  ;;  %7106 = vmatmul.mubr.f32.gmra.mrb[20].mxu1 %v15329_v58  ;;  %v6944_v58 = vld [vmem:[%s17998_s6 + $0x340] sm:$0xff]  ;;  %v19278_v26 = vld [vmem:[#allocation74_spill] sm:$0xff]  ;;  %v15495_v20 = vpop.f32.mrb[245].mxu0 }
 0x488   : > { %v3834_v30 = vmul.f32 -0.5, %v19276_v57  ;;  %v9866_v35 = vpop.eup %9865  ;;  %v4304_v39 = vmul.f32 1.442695, %v4276_v53  ;;  %v15479_v25 = vmul.f32 %v4340_v21, %v14765_v27  ;;  %v4988_v43 = vsel %vm4987_vm7, %v4985_v28, %v4982_v10  ;;  %7241 = vmatmul.mubr.f32.gmra.mrb[32].mxu0 %v15172_v33  ;;  %v6945_v27 = vld [vmem:[%s17998_s6 + $0x348] sm:$0xff] }
 0x489   : > { %9245 = vmatprep.subr.bf16.mxu0 %v9244_v6  ;;  %v4605_v55 = vadd.f32 1.0, %v19277_v63  ;;  %v4323_v5 = vmul.f32 %v9866_v35, %v3987_v9  ;;  %v4688_v46 = vmul.f32 1.442695, %v4660_v38  ;;  %v5028_v23 = vsel %vm4820_vm5, %v19267_v50, %v4988_v43  ;;  %v19282_v21 = vld [vmem:[#allocation402_spill] sm:$0xff]  ;;  %v19283_v6 = vld [vmem:[#allocation355_spill] sm:$0xff] }
 0x48a   : > { %9873 = vlog2.f32 %v3831_v31  ;;  %v5044_v28 = vmul.f32 %v15344_v45, %v5028_v23  ;;  %v5108_v33 = vmul.f32 %v5028_v23, %v19278_v26  ;;  %v3837_v9 = vand.u32 2147483647, %v19276_v57  ;;  %v19304_v31 = vld [vmem:[#allocation75_spill] sm:$0xff] }
 0x48b   : > { %9875 = vpow2.f32 %v4304_v39  ;;  %v4371_v50 = vadd.f32 %v15395_v14, %v4323_v5  ;;  %v3835_v47 = vadd.f32 1.0, %v3834_v30  ;;  %v4608_v49 = vmul.f32 -0.5, %v19277_v63  ;;  %v19287_v5 = vld [vmem:[#allocation357_spill] sm:$0xff] }
 0x48c   : > { %9877 = vlog2.f32 %v4605_v55  ;;  %v19279_v8 = vmin.f32 %v13996_v29, 20.0  ;;  %v19280_v4 = vmin.f32 %v14247_v15, 20.0  ;;  %v15508_v44 = vmul.f32 %v5108_v33, %v14798_v19  ;;  %v19286_v19 = vld [vmem:[#allocation404_spill] sm:$0xff] }
 0x48d   : > { %v9246_v38 = vpack.c.bf16 %v6945_v27, %v6944_v58  ;;  %v9868_v17 = vpop.eup %9867  ;;  %v4707_v53 = vmul.f32 %v9862_v3, %v4371_v50  ;;  %v5072_v41 = vmul.f32 1.442695, %v5044_v28  ;;  %v4611_v14 = vand.u32 2147483647, %v19277_v63  ;;  %v19289_v28 = vld [vmem:[#allocation196_spill] sm:$0xff] }
 0x48e   : > { %v15501_v24 = vmul.f32 1.442695, %v19279_v8  ;;  %v15505_v16 = vmul.f32 1.442695, %v19280_v4  ;;  %v4221_v10 = vadd.f32 1.0, %v19282_v21  ;;  %vm3663_vm8 = vcmp.gt.f32.partialorder %v19283_v6, 20.0 }
 0x48f   : > { %9879 = vpow2.f32 %v4688_v46  ;;  %vm15513_vm9 = vcmp.lt.f32.partialorder %v3837_v9, 0.0004427343  ;;  %9247 = vmatpush3.bf16.msra.mxu0 %v9246_v38  ;;  %v4224_v30 = vmul.f32 -0.5, %v19282_v21  ;;  %v4989_v35 = vadd.f32 1.0, %v19286_v19  ;;  %v9870_v39 = vpop.eup %9869  ;;  %v19293_v4 = vld [vmem:[#allocation190_spill] sm:$0xff]  ;;  %v19311_v15 = vld [vmem:[#allocation200_spill] sm:$0xff] }
 0x490   : > { %19281 = vst [vmem:[#allocation320_spill] sm:$0xff] %v15505_v16  ;;  %v4755_v3 = vadd.f32 %v15359_v11, %v4707_v53  ;;  %v3836_v43 = vmul.f32 %v19276_v57, %v3835_v47  ;;  %v4609_v55 = vadd.f32 1.0, %v4608_v49  ;;  %9881 = vlog2.f32 %v4221_v10  ;;  %v15533_v57 = vpop.f32.mrb[230].mxu1  ;;  %v19292_v49 = vld [vmem:[#allocation197_spill] sm:$0xff] }
 0x491   : > { %vm4437_vm10 = vcmp.gt.f32.partialorder %v19287_v5, 20.0  ;;  %v3940_v23 = vmul.f32 0.0, %v9870_v39  ;;  %v4227_v46 = vand.u32 2147483647, %v19282_v21  ;;  %9883 = vlog2.f32 %v4989_v35  ;;  %v15524_v27 = vpop.eup %9871 }
 0x492   : > { %v4992_v58 = vmul.f32 -0.5, %v19286_v19  ;;  %19288 = vst [vmem:[#allocation289_spill] sm:$0xff] %v15524_v27  ;;  %v15527_v26 = vmul.f32 %v4755_v3, %v19289_v28  ;;  %v5091_v33 = vmul.f32 %v9868_v17, %v4755_v3  ;;  %9885 = vpow2.f32 %v5072_v41  ;;  %v19296_v3 = vld [vmem:[#allocation199_spill] sm:$0xff] }
 0x493   : > { %vm15529_vm11 = vcmp.lt.f32.partialorder %v4611_v14, 0.0004427343  ;;  %v3988_v9 = vadd.f32 %v15446_v2, %v3940_v23  ;;  %v4225_v47 = vadd.f32 1.0, %v4224_v30  ;;  %v4387_v8 = vmul.f32 %v4371_v50, %v19292_v49  ;;  %v19295_v14 = vld [vmem:[#allocation406_spill] sm:$0xff] }
 0x494   : > { %v5153_v38 = vmul.f32 %v15286_v60, %v19293_v4  ;;  %v9874_v53 = vpop.eup %9873  ;;  %v15540_v10 = vadd.f32 %v15406_v62, %v5091_v33  ;;  %v4610_v17 = vmul.f32 %v19277_v63, %v4609_v55  ;;  %v4995_v41 = vand.u32 2147483647, %v19286_v19  ;;  %v19299_v63 = vld [vmem:[#allocation359_spill] sm:$0xff]  ;;  %v19300_v55 = vld [vmem:[#allocation361_spill] sm:$0xff]  ;;  %v19301_v4 = vld [vmem:[#allocation408_spill] sm:$0xff] }
 0x495   : > { %v3840_v35 = vadd.f32 1.0, %v19295_v14  ;;  %v9876_v39 = vpop.eup %9875  ;;  %v15546_v28 = vmul.f32 %v3988_v9, %v19296_v3  ;;  %v3833_v2 = vmul.f32 0.6931472, %v9874_v53  ;;  %vm15548_vm12 = vcmp.lt.f32.partialorder %v4227_v46, 0.0004427343  ;;  %7110 = vmatprep.mubr.f32.mxu1 %v4387_v8  ;;  %v19329_v60 = vld [vmem:[#allocation369_spill] sm:$0xff] }
 0x496   : > { %19294 = vst [vmem:[#allocation152_spill] sm:$0xff] %v15540_v10  ;;  %v4993_v30 = vadd.f32 1.0, %v4992_v58  ;;  %7245 = vmatprep.mubr.f32.mxu0 %v5153_v38  ;;  %v3843_v62 = vmul.f32 -0.5, %v19295_v14  ;;  %v9878_v23 = vpop.eup %9877  ;;  %vm4053_vm13 = vcmp.gt.f32.partialorder %v19299_v63, 20.0  ;;  %vm4821_vm14 = vcmp.gt.f32.partialorder %v19300_v55, 20.0  ;;  %7111 = vmatmul.mubr.f32.gmra.mrb[22].mxu1 %v15428_v61 }
 0x497   : > { %v4324_v33 = vmul.f32 %v9876_v39, %v3988_v9  ;;  %9887 = vlog2.f32 %v3840_v35  ;;  %v3846_v49 = vand.u32 2147483647, %v19295_v14  ;;  %v4614_v53 = vadd.f32 1.0, %v19301_v4  ;;  %7246 = vmatmul.mubr.f32.gmra.mrb[34].mxu0 %v15276_v34  ;;  %v15580_v39 = vpop.f32.mrb[231].mxu1 }
 0x498   : > { %v3839_v46 = vsel %vm15513_vm9, %v3836_v43, %v3833_v2  ;;  %v4607_v58 = vmul.f32 0.6931472, %v9878_v23  ;;  %v4226_v8 = vmul.f32 %v19282_v21, %v4225_v47  ;;  %v4617_v38 = vmul.f32 -0.5, %v19301_v4  ;;  %v15578_v47 = vpop.f32.mrb[246].mxu0 }
 0x499   : > { %v15564_v3 = vadd.f32 %v15479_v25, %v4324_v33  ;;  %v3871_v9 = vsel %vm3663_vm8, %v19283_v6, %v3839_v46  ;;  %vm15569_vm15 = vcmp.lt.f32.partialorder %v4995_v41, 0.0004427343  ;;  %9889 = vlog2.f32 %v4614_v53  ;;  %v9880_v34 = vpop.eup %9879  ;;  %v19308_v53 = vld [vmem:[#allocation76_spill] sm:$0xff] }
 0x49a   : > { %v3893_v61 = vmul.f32 %v15344_v45, %v3871_v9  ;;  %v3957_v43 = vmul.f32 %v3871_v9, %v19304_v31  ;;  %v4613_v21 = vsel %vm15529_vm11, %v4610_v17, %v4607_v58  ;;  %v4994_v25 = vmul.f32 %v19286_v19, %v4993_v30  ;;  %v9882_v6 = vpop.eup %9881  ;;  %v19307_v17 = vld [vmem:[#allocation363_spill] sm:$0xff] }
 0x49b   : > { %v4708_v41 = vmul.f32 %v9880_v34, %v15564_v3  ;;  %v4645_v2 = vsel %vm4437_vm10, %v19287_v5, %v4613_v21  ;;  %v3844_v23 = vadd.f32 1.0, %v3843_v62  ;;  %vm15586_vm2 = vcmp.lt.f32.partialorder %v3846_v49, 0.0004427343  ;;  %v9884_v11 = vpop.eup %9883  ;;  %v19309_v49 = vld [vmem:[#allocation365_spill] sm:$0xff] }
 0x49c   : > { %vm3664_vm3 = vcmp.gt.f32.partialorder %v19307_v17, 20.0  ;;  %v3922_v19 = vmul.f32 1.442695, %v3893_v61  ;;  %v15592_v30 = vmul.f32 %v3957_v43, %v14828_v1  ;;  %v4725_v46 = vmul.f32 %v4645_v2, %v19308_v53  ;;  %v9886_v9 = vpop.eup %9885  ;;  %v19310_v1 = vld [vmem:[#allocation410_spill] sm:$0xff] }
 0x49d   : > { %v4618_v58 = vadd.f32 1.0, %v4617_v38  ;;  %v4756_v34 = vadd.f32 %v15467_v18, %v4708_v41  ;;  %v4223_v31 = vmul.f32 0.6931472, %v9882_v6  ;;  %v4991_v5 = vmul.f32 0.6931472, %v9884_v11 }
 0x49e   : > { %v4620_v62 = vand.u32 2147483647, %v19301_v4  ;;  %vm4438_vm4 = vcmp.gt.f32.partialorder %v19309_v49, 20.0  ;;  %9891 = vpow2.f32 %v3922_v19  ;;  %v4661_v21 = vmul.f32 %v15344_v45, %v4645_v2 }
 0x49f   : > { %v15600_v61 = vmul.f32 %v4725_v46, %v14895_v36  ;;  %v4230_v43 = vadd.f32 1.0, %v19310_v1  ;;  %v15604_v53 = vmul.f32 %v4756_v34, %v19311_v15  ;;  %v5092_v38 = vmul.f32 %v9886_v9, %v4756_v34  ;;  %v15624_v46 = vpop.f32.mrb[247].mxu0  ;;  %v19314_v9 = vld [vmem:[#allocation78_spill] sm:$0xff] }
 0x4a0   : > { %v4229_v18 = vsel %vm15548_vm12, %v4226_v8, %v4223_v31  ;;  %v4997_v6 = vsel %vm15569_vm15, %v4994_v25, %v4991_v5  ;;  %v3845_v2 = vmul.f32 %v19295_v14, %v3844_v23  ;;  %v4233_v15 = vmul.f32 -0.5, %v19310_v1  ;;  %v19313_v8 = vld [vmem:[#allocation77_spill] sm:$0xff]  ;;  %v19315_v31 = vld [vmem:[#allocation28_spill] sm:$0xff] }
 0x4a1   : > { %v4261_v41 = vsel %vm4053_vm13, %v19299_v63, %v4229_v18  ;;  %v5029_v36 = vsel %vm4821_vm14, %v19300_v55, %v4997_v6  ;;  %v9888_v11 = vpop.eup %9887  ;;  %v15619_v19 = vadd.f32 %v15508_v44, %v5092_v38  ;;  %v4619_v25 = vmul.f32 %v19301_v4, %v4618_v58  ;;  %v19318_v18 = vld [vmem:[#allocation29_spill] sm:$0xff]  ;;  %v19323_v38 = vld [vmem:[#allocation80_spill] sm:$0xff] }
 0x4a2   : > { %v4277_v50 = vmul.f32 %v15344_v45, %v4261_v41  ;;  %v4341_v35 = vmul.f32 %v4261_v41, %v19313_v8  ;;  %v4690_v63 = vmul.f32 1.442695, %v4661_v21  ;;  %v5109_v34 = vmul.f32 %v5029_v36, %v19314_v9 }
 0x4a3   : > { %19312 = vst [vmem:[#allocation32_spill] sm:$0xff] %v15619_v19  ;;  %v3842_v55 = vmul.f32 0.6931472, %v9888_v11  ;;  %9893 = vlog2.f32 %v4230_v43  ;;  %v9890_v14 = vpop.eup %9889  ;;  %v5045_v44 = vmul.f32 %v15344_v45, %v5029_v36  ;;  %vm15631_vm5 = vcmp.lt.f32.partialorder %v4620_v62, 0.0004427343  ;;  %v19319_v36 = vld [vmem:[#allocation412_spill] sm:$0xff] }
 0x4a4   : > { %v4306_v23 = vmul.f32 1.442695, %v4277_v50  ;;  %v15628_v5 = vmul.f32 %v4341_v35, %v19315_v31  ;;  %v15636_v4 = vmul.f32 %v5109_v34, %v19318_v18  ;;  %v4616_v21 = vmul.f32 0.6931472, %v9890_v14  ;;  %v19320_v50 = vld [vmem:[#allocation79_spill] sm:$0xff]  ;;  %v19322_v31 = vld [vmem:[#allocation312_spill] sm:$0xff] }
 0x4a5   : > { %v3848_v58 = vsel %vm15586_vm2, %v3845_v2, %v3842_v55  ;;  %v4234_v6 = vadd.f32 1.0, %v4233_v15  ;;  %v4236_v41 = vand.u32 2147483647, %v19310_v1  ;;  %v4998_v62 = vadd.f32 1.0, %v19319_v36  ;;  %v6930_v2 = vld [vmem:[%s17998_s6 + $0x2d0] sm:$0xff]  ;;  %v6915_v34 = vld [vmem:[%s17998_s6 + $0x258] sm:$0xff] }
 0x4a6   : > { %9895 = vpow2.f32 %v4306_v23  ;;  %v3872_v43 = vsel %vm3664_vm3, %v19307_v17, %v3848_v58  ;;  %v4622_v33 = vsel %vm15631_vm5, %v4619_v25, %v4616_v21  ;;  %v6931_v17 = vld [vmem:[%s17998_s6 + $0x2d8] sm:$0xff]  ;;  %v5074_v35 = vmul.f32 1.442695, %v5045_v44  ;;  %v6914_v25 = vld [vmem:[%s17998_s6 + $0x250] sm:$0xff]  ;;  %v15666_v55 = vpop.f32.mrb[232].mxu1 }
 0x4a7   : > { %9897 = vpow2.f32 %v4690_v63  ;;  %v3894_v11 = vmul.f32 %v15344_v45, %v3872_v43  ;;  %v3958_v8 = vmul.f32 %v3872_v43, %v19320_v50  ;;  %v19321_v15 = vld [vmem:[#allocation367_spill] sm:$0xff]  ;;  %v4646_v63 = vsel %vm4438_vm4, %v19309_v49, %v4622_v33  ;;  %v15686_v33 = vpop.f32.mrb[233].mxu1 }
 0x4a8   : > { %vm4054_vm6 = vcmp.gt.f32.partialorder %v19321_v15, 20.0  ;;  %9899 = vlog2.f32 %v4998_v62  ;;  %v5001_v9 = vmul.f32 -0.5, %v19319_v36  ;;  %v9892_v14 = vpop.eup %9891  ;;  %v4662_v49 = vmul.f32 %v15344_v45, %v4646_v63  ;;  %v6962_v58 = vld [vmem:[%s17998_s6 + $0x3d0] sm:$0xff]  ;;  %v19335_v62 = vld [vmem:[#allocation81_spill] sm:$0xff] }
 0x4a9   : > { %v3924_v23 = vmul.f32 1.442695, %v3894_v11  ;;  %v15669_v44 = vmul.f32 %v3958_v8, %v19322_v31  ;;  %v4726_v18 = vmul.f32 %v4646_v63, %v19323_v38  ;;  %v3941_v21 = vmul.f32 0.0, %v9892_v14  ;;  %v6963_v11 = vld [vmem:[%s17998_s6 + $0x3d8] sm:$0xff]  ;;  %v15684_v8 = vpop.f32.mrb[248].mxu0  ;;  %v19326_v63 = vld [vmem:[#allocation30_spill] sm:$0xff] }
 0x4aa   : > { %v4235_v43 = vmul.f32 %v19310_v1, %v4234_v6  ;;  %vm15677_vm7 = vcmp.lt.f32.partialorder %v4236_v41, 0.0004427343  ;;  %v9216_v50 = vpack.c.bf16 %v6931_v17, %v6930_v2  ;;  %v5004_v14 = vand.u32 2147483647, %v19319_v36  ;;  %v19327_v2 = vld [vmem:[#allocation201_spill] sm:$0xff]  ;;  %v19328_v38 = vld [vmem:[#allocation194_spill] sm:$0xff] }
 0x4ab   : > { %9901 = vpow2.f32 %v3924_v23  ;;  %v15689_v31 = vmul.f32 %v4726_v18, %v19326_v63  ;;  %v9218_v1 = vpack.c.bf16 %v6915_v34, %v6914_v25  ;;  %v3989_v6 = vadd.f32 %v15592_v30, %v3941_v21  ;;  %v19330_v63 = vld [vmem:[#allocation414_spill] sm:$0xff] }
 0x4ac   : > { %v5002_v41 = vadd.f32 1.0, %v5001_v9  ;;  %9217 = vmatprep.subr.bf16.mxu1 %v9216_v50  ;;  %v4388_v17 = vmul.f32 %v15564_v3, %v19327_v2  ;;  %v5154_v29 = vmul.f32 %v15402_v32, %v19328_v38  ;;  %vm4822_vm8 = vcmp.gt.f32.partialorder %v19329_v60, 20.0  ;;  %v6946_v30 = vld [vmem:[%s17998_s6 + $0x350] sm:$0xff]  ;;  %v6947_v3 = vld [vmem:[%s17998_s6 + $0x358] sm:$0xff] }
 0x4ad   : > { %v9894_v27 = vpop.eup %9893  ;;  %v4692_v23 = vmul.f32 1.442695, %v4662_v49  ;;  %9219 = vmatpush3.bf16.msra.mxu1 %v9218_v1  ;;  %v9248_v18 = vpack.c.bf16 %v6963_v11, %v6962_v58  ;;  %v3849_v12 = vadd.f32 1.0, %v19330_v63  ;;  %v3852_v25 = vmul.f32 -0.5, %v19330_v63  ;;  %v19331_v9 = vld [vmem:[#allocation203_spill] sm:$0xff]  ;;  %v19332_v49 = vld [vmem:[#allocation416_spill] sm:$0xff] }
 0x4ae   : > { %v15707_v34 = vmul.f32 %v3989_v6, %v19331_v9  ;;  %9903 = vpow2.f32 %v5074_v35  ;;  %v4232_v21 = vmul.f32 0.6931472, %v9894_v27  ;;  %7115 = vmatprep.mubr.f32.mxu1 %v4388_v17  ;;  %7250 = vmatprep.mubr.f32.mxu0 %v5154_v29  ;;  %v4623_v58 = vadd.f32 1.0, %v19332_v49  ;;  %v19340_v9 = vld [vmem:[#allocation468_spill] sm:$0xff]  ;;  %v19349_v32 = vld [vmem:[#allocation207_spill] sm:$0xff] }
 0x4af   : > { %vm15710_vm9 = vcmp.lt.f32.partialorder %v5004_v14, 0.0004427343  ;;  %9249 = vmatprep.subr.bf16.mxu0 %v9248_v18  ;;  %9905 = vlog2.f32 %v3849_v12  ;;  %v3853_v11 = vadd.f32 1.0, %v3852_v25  ;;  %v3855_v1 = vand.u32 2147483647, %v19330_v63  ;;  %7116 = vmatmul.mubr.f32.gmra.mrb[24].mxu1 %v15546_v28 }
 0x4b0   : > { %v9896_v2 = vpop.eup %9895  ;;  %v4238_v35 = vsel %vm15677_vm7, %v4235_v43, %v4232_v21  ;;  %v5003_v27 = vmul.f32 %v19319_v36, %v5002_v41  ;;  %9907 = vlog2.f32 %v4623_v58  ;;  %7251 = vmatmul.mubr.f32.gmra.mrb[36].mxu0 %v15392_v56  ;;  %v9250_v29 = vpack.c.bf16 %v6947_v3, %v6946_v30  ;;  %v19336_v41 = vld [vmem:[#allocation418_spill] sm:$0xff]  ;;  %v19356_v30 = vld [vmem:[#allocation377_spill] sm:$0xff] }
 0x4b1   : > { %v9898_v14 = vpop.eup %9897  ;;  %v4325_v17 = vmul.f32 %v9896_v2, %v3989_v6  ;;  %9909 = vpow2.f32 %v4692_v23  ;;  %v4262_v12 = vsel %vm4054_vm6, %v19321_v15, %v4238_v35  ;;  %v4626_v38 = vmul.f32 -0.5, %v19332_v49  ;;  %v19339_v15 = vld [vmem:[#allocation371_spill] sm:$0xff]  ;;  %v15739_v2 = vpop.f32.mrb[249].mxu0 }
 0x4b2   : > { %v9900_v28 = vpop.eup %9899  ;;  %v4278_v18 = vmul.f32 %v15344_v45, %v4262_v12  ;;  %v4342_v43 = vmul.f32 %v4262_v12, %v19335_v62  ;;  %v4629_v36 = vand.u32 2147483647, %v19332_v49  ;;  %9251 = vmatpush3.bf16.msra.mxu0 %v9250_v29  ;;  %v4239_v56 = vadd.f32 1.0, %v19336_v41 }
 0x4b3   : > { %v4373_v25 = vadd.f32 %v15628_v5, %v4325_v17  ;;  %v5000_v6 = vmul.f32 0.6931472, %v9900_v28  ;;  %v3854_v23 = vmul.f32 %v19330_v63, %v3853_v11  ;;  %vm15730_vm10 = vcmp.lt.f32.partialorder %v3855_v1, 0.0004427343  ;;  %v19341_v5 = vld [vmem:[#allocation373_spill] sm:$0xff]  ;;  %v19342_v1 = vld [vmem:[#allocation420_spill] sm:$0xff] }
 0x4b4   : > { %vm3665_vm11 = vcmp.gt.f32.partialorder %v19339_v15, 20.0  ;;  %v4308_v3 = vmul.f32 1.442695, %v4278_v18  ;;  %v15736_v21 = vmul.f32 %v4342_v43, %v19340_v9  ;;  %9911 = vlog2.f32 %v4239_v56  ;;  %v19343_v56 = vld [vmem:[#allocation82_spill] sm:$0xff]  ;;  %v19346_v9 = vld [vmem:[#allocation375_spill] sm:$0xff] }
 0x4b5   : > { %v4242_v58 = vmul.f32 -0.5, %v19336_v41  ;;  %v9902_v35 = vpop.eup %9901  ;;  %vm4439_vm12 = vcmp.gt.f32.partialorder %v19341_v5, 20.0  ;;  %v4709_v29 = vmul.f32 %v9898_v14, %v4373_v25  ;;  %v5006_v63 = vsel %vm15710_vm9, %v5003_v27, %v5000_v6 }
 0x4b6   : > { %v4627_v11 = vadd.f32 1.0, %v4626_v38  ;;  %v5007_v17 = vadd.f32 1.0, %v19342_v1  ;;  %v3942_v12 = vmul.f32 0.0, %v9902_v35  ;;  %9913 = vpow2.f32 %v4308_v3  ;;  %v19347_v35 = vld [vmem:[#allocation204_spill] sm:$0xff] }
 0x4b7   : > { %v5030_v28 = vsel %vm4822_vm8, %v19329_v60, %v5006_v63  ;;  %v4245_v18 = vand.u32 2147483647, %v19336_v41  ;;  %v4757_v62 = vadd.f32 %v15600_v61, %v4709_v29  ;;  %vm15752_vm13 = vcmp.lt.f32.partialorder %v4629_v36, 0.0004427343 }
 0x4b8   : > { %v5046_v43 = vmul.f32 %v15344_v45, %v5030_v28  ;;  %v5110_v14 = vmul.f32 %v5030_v28, %v19343_v56  ;;  %v9904_v27 = vpop.eup %9903  ;;  %v3990_v38 = vadd.f32 %v15669_v44, %v3942_v12  ;;  %v4243_v6 = vadd.f32 1.0, %v4242_v58  ;;  %v19348_v28 = vld [vmem:[#allocation469_spill] sm:$0xff]  ;;  %v15773_v12 = vpop.f32.mrb[234].mxu1 }
 0x4b9   : > { %9915 = vlog2.f32 %v5007_v17  ;;  %v5010_v3 = vmul.f32 -0.5, %v19342_v1  ;;  %v9906_v60 = vpop.eup %9905  ;;  %vm4055_vm14 = vcmp.gt.f32.partialorder %v19346_v9, 20.0  ;;  %v15760_v61 = vmul.f32 %v4757_v62, %v19347_v35  ;;  %v15800_v50 = vpop.f32.mrb[235].mxu1 }
 0x4ba   : > { %v5093_v29 = vmul.f32 %v9904_v27, %v4757_v62  ;;  %v5076_v63 = vmul.f32 1.442695, %v5046_v43  ;;  %v15763_v36 = vmul.f32 %v5110_v14, %v19348_v28  ;;  %v9908_v56 = vpop.eup %9907  ;;  %v15766_v54 = vmul.f32 %v3990_v38, %v19349_v32  ;;  %v19353_v27 = vld [vmem:[#allocation205_spill] sm:$0xff]  ;;  %19359 = vst [vmem:[#allocation156_spill] sm:$0xff] %v15800_v50 }
 0x4bb   : > { %v3851_v44 = vmul.f32 0.6931472, %v9906_v60  ;;  %v4628_v58 = vmul.f32 %v19332_v49, %v4627_v11  ;;  %vm15769_vm15 = vcmp.lt.f32.partialorder %v4245_v18, 0.0004427343  ;;  %v9910_v35 = vpop.eup %9909  ;;  %v4625_v43 = vmul.f32 0.6931472, %v9908_v56 }
 0x4bc   : > { %v15776_v62 = vadd.f32 %v15636_v4, %v5093_v29  ;;  %v5013_v14 = vand.u32 2147483647, %v19342_v1  ;;  %v4389_v28 = vmul.f32 %v4373_v25, %v19353_v27  ;;  %v4244_v49 = vmul.f32 %v19336_v41, %v4243_v6  ;;  %v19354_v11 = vld [vmem:[#allocation198_spill] sm:$0xff] }
 0x4bd   : > { %v3857_v32 = vsel %vm15730_vm10, %v3854_v23, %v3851_v44  ;;  %v5155_v18 = vmul.f32 %v15540_v10, %v19354_v11  ;;  %v19355_v60 = vld [vmem:[#allocation422_spill] sm:$0xff]  ;;  %9917 = vpow2.f32 %v5076_v63  ;;  %v4631_v29 = vsel %vm15752_vm13, %v4628_v58, %v4625_v43  ;;  %v19357_v23 = vld [vmem:[#allocation83_spill] sm:$0xff]  ;;  %v19360_v44 = vld [vmem:[#allocation84_spill] sm:$0xff] }
 0x4be   : > { %19352 = vst [vmem:[#allocation290_spill] sm:$0xff] %v15776_v62  ;;  %v5256_v16 = vadd.f32 1.0, %v19355_v60  ;;  %v3873_v4 = vsel %vm3665_vm11, %v19339_v15, %v3857_v32  ;;  %v5011_v56 = vadd.f32 1.0, %v5010_v3  ;;  %7120 = vmatprep.mubr.f32.mxu1 %v4389_v28  ;;  %v9912_v25 = vpop.eup %9911  ;;  %vm4823_vm2 = vcmp.gt.f32.partialorder %v19356_v30, 20.0  ;;  %v15798_v15 = vpop.f32.mrb[250].mxu0  ;;  %v19364_v11 = vld [vmem:[#allocation424_spill] sm:$0xff] }
 0x4bf   : > { %v3895_v41 = vmul.f32 %v15344_v45, %v3873_v4  ;;  %v3959_v6 = vmul.f32 %v3873_v4, %v19357_v23  ;;  %v4647_v63 = vsel %vm4439_vm12, %v19341_v5, %v4631_v29  ;;  %7255 = vmatprep.mubr.f32.mxu0 %v5155_v18  ;;  %7121 = vmatmul.mubr.f32.gmra.mrb[26].mxu1 %v15707_v34  ;;  %v4241_v43 = vmul.f32 0.6931472, %v9912_v25  ;;  %v19365_v29 = vld [vmem:[#allocation314_spill] sm:$0xff] }
 0x4c0   : > { %9919 = vlog2.f32 %v5256_v16  ;;  %19358 = vst [vmem:[#allocation291_spill] sm:$0xff] %v15798_v15  ;;  %v4663_v3 = vmul.f32 %v15344_v45, %v4647_v63  ;;  %v4727_v58 = vmul.f32 %v4647_v63, %v19360_v44  ;;  %vm15804_vm3 = vcmp.lt.f32.partialorder %v5013_v14, 0.0004427343  ;;  %7256 = vmatmul.mubr.f32.gmra.mrb[38].mxu0 %v15527_v26  ;;  %v9914_v5 = vpop.eup %9913  ;;  %v19363_v16 = vld [vmem:[#allocation31_spill] sm:$0xff]  ;;  %v15824_v44 = vpop.f32.mrb[251].mxu0 }
 0x4c1   : > { %v3926_v28 = vmul.f32 1.442695, %v3895_v41  ;;  %v15810_v32 = vmul.f32 %v3959_v6, %v19363_v16  ;;  %v5259_v34 = vmul.f32 -0.5, %v19355_v60  ;;  %v6024_v18 = vadd.f32 1.0, %v19364_v11  ;;  %19366 = vst [vmem:[#allocation33_spill] sm:$0xff] %v15824_v44 }
 0x4c2   : > { %v4326_v4 = vmul.f32 %v9914_v5, %v3990_v38  ;;  %v15815_v23 = vmul.f32 %v4727_v58, %v19365_v29  ;;  %v4247_v14 = vsel %vm15769_vm15, %v4244_v49, %v4241_v43  ;;  %v5262_v25 = vand.u32 2147483647, %v19355_v60  ;;  %v19367_v38 = vld [vmem:[#allocation379_spill] sm:$0xff]  ;;  %v19368_v49 = vld [vmem:[#allocation85_spill] sm:$0xff] }
 0x4c3   : > { %v9916_v63 = vpop.eup %9915  ;;  %9921 = vpow2.f32 %v3926_v28  ;;  %v4694_v26 = vmul.f32 1.442695, %v4663_v3  ;;  %v4263_v41 = vsel %vm4055_vm14, %v19346_v9, %v4247_v14  ;;  %v6027_v6 = vmul.f32 -0.5, %v19364_v11  ;;  %v19369_v14 = vld [vmem:[#allocation151_spill] sm:$0xff] }
 0x4c4   : > { %vm5192_vm4 = vcmp.gt.f32.partialorder %v19367_v38, 20.0  ;;  %v4374_v58 = vadd.f32 %v15736_v21, %v4326_v4  ;;  %v4279_v17 = vmul.f32 %v15344_v45, %v4263_v41  ;;  %v4343_v43 = vmul.f32 %v4263_v41, %v19368_v49  ;;  %v19376_v49 = vld [vmem:[#allocation208_spill] sm:$0xff] }
 0x4c5   : > { %v5012_v5 = vmul.f32 %v19342_v1, %v5011_v56  ;;  %v5009_v28 = vmul.f32 0.6931472, %v9916_v63  ;;  %v5260_v3 = vadd.f32 1.0, %v5259_v34  ;;  %9923 = vlog2.f32 %v6024_v18 }
 0x4c6   : > { %v6028_v16 = vadd.f32 1.0, %v6027_v6  ;;  %v4710_v29 = vmul.f32 %v9910_v35, %v4374_v58  ;;  %v4310_v9 = vmul.f32 1.442695, %v4279_v17  ;;  %v15832_v10 = vmul.f32 %v4343_v43, %v19369_v14  ;;  %v6932_v6 = vld [vmem:[%s17998_s6 + $0x2e0] sm:$0xff] }
 0x4c7   : > { %v5640_v44 = vadd.f32 1.0, %v19370_v0  ;;  %9925 = vpow2.f32 %v4694_v26  ;;  %v5015_v21 = vsel %vm15804_vm3, %v5012_v5, %v5009_v28  ;;  %vm15837_vm5 = vcmp.lt.f32.partialorder %v5262_v25, 0.0004427343  ;;  %v9918_v56 = vpop.eup %9917  ;;  %v19373_v26 = vld [vmem:[#allocation86_spill] sm:$0xff]  ;;  %v19375_v17 = vld [vmem:[#allocation381_spill] sm:$0xff] }
 0x4c8   : > { %v5643_v1 = vmul.f32 -0.5, %v19370_v0  ;;  %v4758_v34 = vadd.f32 %v15689_v31, %v4710_v29  ;;  %9927 = vpow2.f32 %v4310_v9  ;;  %v5031_v35 = vsel %vm4823_vm2, %v19356_v30, %v5015_v21  ;;  %v15853_v31 = vpop.f32.mrb[236].mxu1  ;;  %v19377_v9 = vld [vmem:[#allocation316_spill] sm:$0xff] }
 0x4c9   : > { %v6030_v18 = vand.u32 2147483647, %v19364_v11  ;;  %v5047_v27 = vmul.f32 %v15344_v45, %v5031_v35  ;;  %v5111_v25 = vmul.f32 %v5031_v35, %v19373_v26  ;;  %v5261_v41 = vmul.f32 %v19355_v60, %v5260_v3  ;;  %19374 = vst [vmem:[#allocation159_spill] sm:$0xff] %v15853_v31  ;;  %v6933_v60 = vld [vmem:[%s17998_s6 + $0x2e8] sm:$0xff] }
 0x4ca   : > { %v9920_v63 = vpop.eup %9919  ;;  %9929 = vlog2.f32 %v5640_v44  ;;  %vm5960_vm6 = vcmp.gt.f32.partialorder %v19375_v17, 20.0  ;;  %v15857_v30 = vmul.f32 %v4758_v34, %v19376_v49  ;;  %v5094_v43 = vmul.f32 %v9918_v56, %v4758_v34  ;;  %v6916_v44 = vld [vmem:[%s17998_s6 + $0x260] sm:$0xff]  ;;  %v6917_v3 = vld [vmem:[%s17998_s6 + $0x268] sm:$0xff] }
 0x4cb   : > { %v5258_v5 = vmul.f32 0.6931472, %v9920_v63  ;;  %v6029_v28 = vmul.f32 %v19364_v11, %v6028_v16  ;;  %v5078_v29 = vmul.f32 1.442695, %v5047_v27  ;;  %v15870_v14 = vmul.f32 %v5111_v25, %v19377_v9  ;;  %v19378_v56 = vld [vmem:[#allocation428_spill] sm:$0xff] }
 0x4cc   : > { %v5644_v21 = vadd.f32 1.0, %v5643_v1  ;;  %v6408_v34 = vadd.f32 1.0, %v19378_v56  ;;  %v15874_v11 = vadd.f32 %v15763_v36, %v5094_v43  ;;  %vm15878_vm7 = vcmp.lt.f32.partialorder %v6030_v18, 0.0004427343  ;;  %v19382_v36 = vld [vmem:[#allocation383_spill] sm:$0xff] }
 0x4cd   : > { %v5264_v16 = vsel %vm15837_vm5, %v5261_v41, %v5258_v5  ;;  %v5646_v63 = vand.u32 2147483647, %v19370_v0  ;;  %v9922_v26 = vpop.eup %9921  ;;  %v6411_v1 = vmul.f32 -0.5, %v19378_v56  ;;  %v9220_v25 = vpack.c.bf16 %v6933_v60, %v6932_v6  ;;  %v19383_v18 = vld [vmem:[#allocation87_spill] sm:$0xff]  ;;  %v6964_v5 = vld [vmem:[%s17998_s6 + $0x3e0] sm:$0xff] }
 0x4ce   : > { %19379 = vst [vmem:[#allocation322_spill] sm:$0xff] %v15874_v11  ;;  %v5400_v27 = vsel %vm5192_vm4, %v19367_v38, %v5264_v16  ;;  %v9222_v49 = vpack.c.bf16 %v6917_v3, %v6916_v44  ;;  %vm5576_vm8 = vcmp.gt.f32.partialorder %v19382_v36, 20.0  ;;  %v3943_v43 = vmul.f32 0.0, %v9922_v26  ;;  %v6965_v38 = vld [vmem:[%s17998_s6 + $0x3e8] sm:$0xff] }
 0x4cf   : > { %v5416_v4 = vmul.f32 %v15344_v45, %v5400_v27  ;;  %v5480_v41 = vmul.f32 %v5400_v27, %v19383_v18  ;;  %9931 = vlog2.f32 %v6408_v34  ;;  %v9924_v9 = vpop.eup %9923  ;;  %v5645_v6 = vmul.f32 %v19370_v0, %v5644_v21  ;;  %9221 = vmatprep.subr.bf16.mxu1 %v9220_v25  ;;  %v19384_v60 = vld [vmem:[#allocation209_spill] sm:$0xff]  ;;  %v19385_v3 = vld [vmem:[#allocation202_spill] sm:$0xff]  ;;  %v15907_v25 = vpop.f32.mrb[252].mxu0 }
 0x4d0   : > { %9933 = vpow2.f32 %v5078_v29  ;;  %v4390_v44 = vmul.f32 %v4374_v58, %v19384_v60  ;;  %v5156_v16 = vmul.f32 %v15619_v19, %v19385_v3  ;;  %v3991_v34 = vadd.f32 %v15810_v32, %v3943_v43  ;;  %v19386_v27 = vld [vmem:[#allocation153_spill] sm:$0xff]  ;;  %9223 = vmatpush3.bf16.msra.mxu1 %v9222_v49  ;;  %v15909_v60 = vpop.f32.mrb[237].mxu1  ;;  %v19388_v43 = vld [vmem:[#allocation211_spill] sm:$0xff] }
 0x4d1   : > { %v5432_v26 = vmul.f32 1.442695, %v5416_v4  ;;  %v15902_v18 = vmul.f32 %v5480_v41, %v19386_v27  ;;  %v6026_v31 = vmul.f32 0.6931472, %v9924_v9  ;;  %v9926_v50 = vpop.eup %9925  ;;  %v6414_v15 = vand.u32 2147483647, %v19378_v56 }
 0x4d2   : > { %7125 = vmatprep.mubr.f32.mxu1 %v4390_v44  ;;  %7260 = vmatprep.mubr.f32.mxu0 %v5156_v16  ;;  %v9252_v0 = vpack.c.bf16 %v6965_v38, %v6964_v5  ;;  %v19387_v29 = vld [vmem:[#allocation429_spill] sm:$0xff]  ;;  %v9928_v32 = vpop.eup %9927  ;;  %v15912_v4 = vmul.f32 %v3991_v34, %v19388_v43  ;;  %v6412_v41 = vadd.f32 1.0, %v6411_v1  ;;  %v19391_v16 = vld [vmem:[#allocation287_spill] sm:$0xff]  ;;  %vm5647_vm10 = vcmp.lt.f32.partialorder %v5646_v63, 0.0004427343 }
 0x4d3   : > { %v5265_v21 = vadd.f32 1.0, %v19387_v29  ;;  %v5268_v58 = vmul.f32 -0.5, %v19387_v29  ;;  %9935 = vpow2.f32 %v5432_v26  ;;  %v6032_v49 = vsel %vm15878_vm7, %v6029_v28, %v6026_v31  ;;  %7126 = vmatmul.mubr.f32.gmra.mrb[28].mxu1 %v15766_v54  ;;  %7261 = vmatmul.mubr.f32.gmra.mrb[40].mxu0 %v15604_v53  ;;  %v19389_v38 = vld [vmem:[#allocation385_spill] sm:$0xff]  ;;  %v19390_v31 = vld [vmem:[#allocation88_spill] sm:$0xff] }
 0x4d4   : > { %v9930_v5 = vpop.eup %9929  ;;  %vm6344_vm9 = vcmp.gt.f32.partialorder %v19389_v38, 20.0  ;;  %v4327_v9 = vmul.f32 %v9928_v32, %v3991_v34  ;;  %v6168_v44 = vsel %vm5960_vm6, %v19375_v17, %v6032_v49  ;;  %9253 = vmatprep.subr.bf16.mxu0 %v9252_v0  ;;  %v5271_v3 = vand.u32 2147483647, %v19387_v29  ;;  %v19392_v34 = vld [vmem:[#allocation431_spill] sm:$0xff]  ;;  %v15953_v32 = vld [vmem:[%s17997_s5] ss:$0 sm:$0xff] }
 0x4d5   : > { %9937 = vlog2.f32 %v5265_v21  ;;  %v6184_v35 = vmul.f32 %v15344_v45, %v6168_v44  ;;  %v6248_v28 = vmul.f32 %v6168_v44, %v19390_v31  ;;  %v5642_v1 = vmul.f32 0.6931472, %v9930_v5  ;;  %v6948_v45 = vld [vmem:[%s17998_s6 + $0x360] sm:$0xff]  ;;  %v15959_v5 = vpop.f32.mrb[253].mxu0  ;;  %v19405_v21 = vld [vmem:[#allocation90_spill] sm:$0xff] }
 0x4d6   : > { %v5269_v54 = vadd.f32 1.0, %v5268_v58  ;;  %9939 = vpow2.f32 %v19391_v16  ;;  %v4375_v53 = vadd.f32 %v15832_v10, %v4327_v9  ;;  %v6033_v26 = vadd.f32 1.0, %v19392_v34  ;;  %v6949_v10 = vld [vmem:[%s17998_s6 + $0x368] sm:$0xff] }
 0x4d7   : > { %v15929_v27 = vmul.f32 %v6248_v28, %v15211_v40  ;;  %v5648_v17 = vsel %vm5647_vm10, %v5645_v6, %v5642_v1  ;;  %v6413_v0 = vmul.f32 %v19378_v56, %v6412_v41  ;;  %vm15932_vm11 = vcmp.lt.f32.partialorder %v6414_v15, 0.0004427343  ;;  %v19397_v6 = vld [vmem:[#allocation387_spill] sm:$0xff]  ;;  %v19398_v43 = vld [vmem:[#allocation89_spill] sm:$0xff] }
 0x4d8   : > { %v4711_v63 = vmul.f32 %v9926_v50, %v4375_v53  ;;  %v6200_v58 = vmul.f32 1.442695, %v6184_v35  ;;  %v5784_v40 = vsel %vm5576_vm8, %v19382_v36, %v5648_v17  ;;  %vm15945_vm12 = vcmp.lt.f32.partialorder %v5271_v3, 0.0004427343  ;;  %v19399_v16 = vld [vmem:[#allocation433_spill] sm:$0xff] }
 0x4d9   : > { %9941 = vlog2.f32 %v6033_v26  ;;  %v9932_v15 = vpop.eup %9931  ;;  %vm5193_vm13 = vcmp.gt.f32.partialorder %v19397_v6, 20.0  ;;  %v5800_v50 = vmul.f32 %v15953_v32, %v5784_v40  ;;  %v5864_v49 = vmul.f32 %v5784_v40, %v19398_v43 }
 0x4da   : > { %v5270_v41 = vmul.f32 %v19387_v29, %v5269_v54  ;;  %v6036_v36 = vmul.f32 -0.5, %v19392_v34  ;;  %v9934_v9 = vpop.eup %9933  ;;  %v4759_v44 = vadd.f32 %v15815_v23, %v4711_v63  ;;  %v6410_v3 = vmul.f32 0.6931472, %v9932_v15  ;;  %v19400_v29 = vld [vmem:[#allocation212_spill] sm:$0xff]  ;;  %v19401_v15 = vld [vmem:[#allocation389_spill] sm:$0xff] }
 0x4db   : > { %v6039_v35 = vand.u32 2147483647, %v19392_v34  ;;  %v9254_v31 = vpack.c.bf16 %v6949_v10, %v6948_v45  ;;  %v5816_v28 = vmul.f32 1.442695, %v5800_v50  ;;  %v15964_v1 = vmul.f32 %v5864_v49, %v15213_v42  ;;  %v19402_v10 = vld [vmem:[#allocation435_spill] sm:$0xff] }
 0x4dc   : > { %v5649_v26 = vadd.f32 1.0, %v19399_v16  ;;  %v5652_v17 = vmul.f32 -0.5, %v19399_v16  ;;  %v15969_v54 = vmul.f32 %v4759_v44, %v19400_v29  ;;  %v5095_v40 = vmul.f32 %v9934_v9, %v4759_v44 }
 0x4dd   : > { %9943 = vpow2.f32 %v6200_v58  ;;  %v6416_v23 = vsel %vm15932_vm11, %v6413_v0, %v6410_v3  ;;  %9255 = vmatpush3.bf16.msra.mxu0 %v9254_v31  ;;  %v9936_v63 = vpop.eup %9935  ;;  %vm5961_vm14 = vcmp.gt.f32.partialorder %v19401_v15, 20.0  ;;  %v6037_v45 = vadd.f32 1.0, %v6036_v36  ;;  %v19404_v58 = vld [vmem:[#allocation283_spill] sm:$0xff]  ;;  %v15988_v36 = vpop.f32.mrb[238].mxu1 }
 0x4de   : > { %9945 = vpow2.f32 %v5816_v28  ;;  %v6552_v42 = vsel %vm6344_vm9, %v19389_v38, %v6416_v23  ;;  %v6417_v50 = vadd.f32 1.0, %v19402_v10  ;;  %v15979_v49 = vadd.f32 %v15870_v14, %v5095_v40  ;;  %v16012_v56 = vpop.f32.mrb[239].mxu1 }
 0x4df   : > { %v9938_v43 = vpop.eup %9937  ;;  %v5464_v9 = vmul.f32 %v9936_v63, %v19404_v58  ;;  %v6568_v0 = vmul.f32 %v15953_v32, %v6552_v42  ;;  %v6632_v44 = vmul.f32 %v6552_v42, %v19405_v21  ;;  %vm15984_vm15 = vcmp.lt.f32.partialorder %v6039_v35, 0.0004427343 }
 0x4e0   : > { %19403 = vst [vmem:[#allocation34_spill] sm:$0xff] %v15979_v49  ;;  %v5267_v3 = vmul.f32 0.6931472, %v9938_v43  ;;  %9947 = vlog2.f32 %v5649_v26  ;;  %v5653_v38 = vadd.f32 1.0, %v5652_v17  ;;  %v15990_v28 = vpop.eup %9939  ;;  %v5655_v40 = vand.u32 2147483647, %v19399_v16 }
 0x4e1   : > { %19408 = vst [vmem:[#allocation324_spill] sm:$0xff] %v15990_v28  ;;  %v5512_v14 = vadd.f32 %v15902_v18, %v5464_v9  ;;  %v15994_v29 = vmul.f32 %v6632_v44, %v15273_v7  ;;  %9949 = vlog2.f32 %v6417_v50  ;;  %v6584_v23 = vmul.f32 1.442695, %v6568_v0  ;;  %v19409_v26 = vld [vmem:[#allocation213_spill] sm:$0xff]  ;;  %v19410_v43 = vld [vmem:[#allocation215_spill] sm:$0xff]  ;;  %v19411_v9 = vld [vmem:[#allocation206_spill] sm:$0xff] }
 0x4e2   : > { %v5273_v35 = vsel %vm15945_vm12, %v5270_v41, %v5267_v3  ;;  %v6038_v63 = vmul.f32 %v19392_v34, %v6037_v45  ;;  %v4391_v17 = vmul.f32 %v4375_v53, %v19409_v26  ;;  %v6420_v18 = vmul.f32 -0.5, %v19402_v10  ;;  %v16010_v0 = vpop.f32.mrb[254].mxu0  ;;  %v19412_v53 = vld [vmem:[#allocation91_spill] sm:$0xff] }
 0x4e3   : > { %v9942_v42 = vpop.eup %9941  ;;  %v16002_v58 = vmul.f32 %v5512_v14, %v19410_v43  ;;  %v5401_v7 = vsel %vm5193_vm13, %v19397_v6, %v5273_v35  ;;  %v5157_v50 = vmul.f32 %v15776_v62, %v19411_v9  ;;  %v5654_v21 = vmul.f32 %v19399_v16, %v5653_v38  ;;  %v19413_v44 = vld [vmem:[#allocation391_spill] sm:$0xff]  ;;  %v19416_v35 = vld [vmem:[#allocation436_spill] sm:$0xff] }
 0x4e4   : > { %v5417_v34 = vmul.f32 %v15953_v32, %v5401_v7  ;;  %v5481_v41 = vmul.f32 %v5401_v7, %v19412_v53  ;;  %v6035_v45 = vmul.f32 0.6931472, %v9942_v42  ;;  %7130 = vmatprep.mubr.f32.mxu1 %v4391_v17  ;;  %vm5577_vm2 = vcmp.gt.f32.partialorder %v19413_v44, 20.0  ;;  %v19417_v7 = vld [vmem:[#allocation393_spill] sm:$0xff] }
 0x4e5   : > { %vm16018_vm3 = vcmp.lt.f32.partialorder %v5655_v40, 0.0004427343  ;;  %v6423_v3 = vand.u32 2147483647, %v19402_v10  ;;  %7265 = vmatprep.mubr.f32.mxu0 %v5157_v50  ;;  %v5274_v26 = vadd.f32 1.0, %v19416_v35  ;;  %v5277_v43 = vmul.f32 -0.5, %v19416_v35  ;;  %7131 = vmatmul.mubr.f32.gmra.mrb[30].mxu1 %v15912_v4 }
 0x4e6   : > { %vm6345_vm4 = vcmp.gt.f32.partialorder %v19417_v7, 20.0  ;;  %9951 = vpow2.f32 %v6584_v23  ;;  %v5434_v16 = vmul.f32 1.442695, %v5417_v34  ;;  %v16028_v38 = vmul.f32 %v5481_v41, %v15306_v52  ;;  %7266 = vmatmul.mubr.f32.gmra.mrb[42].mxu0 %v15760_v61  ;;  %v6934_v23 = vld [vmem:[%s17998_s6 + $0x2f0] sm:$0xff]  ;;  %v6935_v52 = vld [vmem:[%s17998_s6 + $0x2f8] sm:$0xff] }
 0x4e7   : > { %v6041_v40 = vsel %vm15984_vm15, %v6038_v63, %v6035_v45  ;;  %v9944_v17 = vpop.eup %9943  ;;  %v6421_v9 = vadd.f32 1.0, %v6420_v18  ;;  %9953 = vlog2.f32 %v5274_v26  ;;  %v5280_v4 = vand.u32 2147483647, %v19416_v35  ;;  %v19418_v63 = vld [vmem:[#allocation92_spill] sm:$0xff]  ;;  %v19419_v34 = vld [vmem:[#allocation438_spill] sm:$0xff] }
 0x4e8   : > { %v6169_v42 = vsel %vm5961_vm14, %v19401_v15, %v6041_v40  ;;  %v9946_v31 = vpop.eup %9945  ;;  %9955 = vpow2.f32 %v5434_v16  ;;  %v6042_v15 = vadd.f32 1.0, %v19419_v34  ;;  %vm16046_vm5 = vcmp.lt.f32.partialorder %v6423_v3, 0.0004427343 }
 0x4e9   : > { %v6185_v61 = vmul.f32 %v15953_v32, %v6169_v42  ;;  %v6249_v50 = vmul.f32 %v6169_v42, %v19418_v63  ;;  %v5848_v18 = vmul.f32 %v9946_v31, %v5512_v14  ;;  %v5278_v41 = vadd.f32 1.0, %v5277_v43  ;;  %v19424_v43 = vld [vmem:[#allocation395_spill] sm:$0xff] }
 0x4ea   : > { %v6045_v45 = vmul.f32 -0.5, %v19419_v34  ;;  %v9948_v26 = vpop.eup %9947  ;;  %9957 = vlog2.f32 %v6042_v15  ;;  %v6048_v16 = vand.u32 2147483647, %v19419_v34  ;;  %v9224_v28 = vpack.c.bf16 %v6935_v52, %v6934_v23  ;;  %v16066_v52 = vpop.f32.mrb[255].mxu0 }
 0x4eb   : > { %v16052_v40 = vmul.f32 %v6249_v50, %v15325_v22  ;;  %v9950_v62 = vpop.eup %9949  ;;  %v16056_v42 = vadd.f32 %v15964_v1, %v5848_v18  ;;  %v6202_v14 = vmul.f32 1.442695, %v6185_v61  ;;  %v5651_v3 = vmul.f32 0.6931472, %v9948_v26  ;;  %v19425_v50 = vld [vmem:[#allocation440_spill] sm:$0xff] }
 0x4ec   : > { %vm16058_vm6 = vcmp.lt.f32.partialorder %v5280_v4, 0.0004427343  ;;  %vm5194_vm7 = vcmp.gt.f32.partialorder %v19424_v43, 20.0  ;;  %v6419_v63 = vmul.f32 0.6931472, %v9950_v62  ;;  %v6422_v22 = vmul.f32 %v19402_v10, %v6421_v9  ;;  %9225 = vmatprep.subr.bf16.mxu1 %v9224_v28  ;;  %v19428_v9 = vld [vmem:[#allocation397_spill] sm:$0xff] }
 0x4ed   : > { %v5658_v15 = vadd.f32 1.0, %v19425_v50  ;;  %v5661_v23 = vmul.f32 -0.5, %v19425_v50  ;;  %v6232_v1 = vmul.f32 %v9944_v17, %v16056_v42  ;;  %v5657_v4 = vsel %vm16018_vm3, %v5654_v21, %v5651_v3 }
 0x4ee   : > { %v5279_v61 = vmul.f32 %v19416_v35, %v5278_v41  ;;  %v6046_v18 = vadd.f32 1.0, %v6045_v45  ;;  %v5785_v62 = vsel %vm5577_vm2, %v19413_v44, %v5657_v4  ;;  %v6425_v10 = vsel %vm16046_vm5, %v6422_v22, %v6419_v63  ;;  %v19429_v35 = vld [vmem:[#allocation93_spill] sm:$0xff]  ;;  %v19430_v45 = vld [vmem:[#allocation94_spill] sm:$0xff]  ;;  %v19431_v63 = vld [vmem:[#allocation216_spill] sm:$0xff] }
 0x4ef   : > { %vm16077_vm8 = vcmp.lt.f32.partialorder %v6048_v16, 0.0004427343  ;;  %9959 = vlog2.f32 %v5658_v15  ;;  %vm5962_vm9 = vcmp.gt.f32.partialorder %v19428_v9, 20.0  ;;  %v6280_v6 = vadd.f32 %v15929_v27, %v6232_v1 }
 0x4f0   : > { %v5801_v21 = vmul.f32 %v15953_v32, %v5785_v62  ;;  %v5865_v17 = vmul.f32 %v5785_v62, %v19429_v35  ;;  %v6553_v44 = vsel %vm6345_vm4, %v19417_v7, %v6425_v10  ;;  %v9952_v41 = vpop.eup %9951  ;;  %9961 = vpow2.f32 %v6202_v14  ;;  %v6918_v7 = vld [vmem:[%s17998_s6 + $0x270] sm:$0xff]  ;;  %v6919_v14 = vld [vmem:[%s17998_s6 + $0x278] sm:$0xff]  ;;  %v16107_v35 = vpop.f32.mrb[240].mxu1 }
 0x4f1   : > { %v6569_v53 = vmul.f32 %v15953_v32, %v6553_v44  ;;  %v6633_v26 = vmul.f32 %v6553_v44, %v19430_v45  ;;  %v5662_v16 = vadd.f32 1.0, %v5661_v23  ;;  %v9954_v3 = vpop.eup %9953  ;;  %v16091_v22 = vmul.f32 %v6280_v6, %v19431_v63  ;;  %19433 = vst [vmem:[#allocation35_spill] sm:$0xff] %v16107_v35  ;;  %v19435_v44 = vld [vmem:[#allocation23_spill] sm:$0xff] }
 0x4f2   : > { %v6616_v27 = vmul.f32 %v9952_v41, %v6280_v6  ;;  %v5818_v15 = vmul.f32 1.442695, %v5801_v21  ;;  %v16094_v1 = vmul.f32 %v5865_v17, %v15335_v51  ;;  %v9956_v4 = vpop.eup %9955  ;;  %v5276_v62 = vmul.f32 0.6931472, %v9954_v3  ;;  %v19432_v6 = vld [vmem:[#allocation442_spill] sm:$0xff]  ;;  %v19434_v51 = vld [vmem:[#allocation399_spill] sm:$0xff] }
 0x4f3   : > { %v16103_v23 = vmul.f32 %v6633_v26, %v15397_v48  ;;  %v5664_v10 = vand.u32 2147483647, %v19425_v50  ;;  %v6426_v21 = vadd.f32 1.0, %v19432_v6  ;;  %vm5578_vm10 = vcmp.gt.f32.partialorder %v19434_v51, 20.0 }
 0x4f4   : > { %v16111_v17 = vadd.f32 %v15994_v29, %v6616_v27  ;;  %v5465_v41 = vmul.f32 %v9956_v4, %v19435_v44  ;;  %9963 = vpow2.f32 %v5818_v15  ;;  %v6047_v45 = vmul.f32 %v19419_v34, %v6046_v18  ;;  %v9958_v63 = vpop.eup %9957  ;;  %v19436_v4 = vld [vmem:[#allocation95_spill] sm:$0xff] }
 0x4f5   : > { %v6586_v48 = vmul.f32 1.442695, %v6569_v53  ;;  %v5282_v26 = vsel %vm16058_vm6, %v5279_v61, %v5276_v62  ;;  %v5663_v3 = vmul.f32 %v19425_v50, %v5662_v16  ;;  %v9226_v19 = vpack.c.bf16 %v6919_v14, %v6918_v7  ;;  %v19439_v50 = vld [vmem:[#allocation219_spill] sm:$0xff]  ;;  %v19440_v16 = vld [vmem:[#allocation210_spill] sm:$0xff]  ;;  %v19441_v14 = vld [vmem:[#allocation217_spill] sm:$0xff]  ;;  %v16144_v62 = vpop.f32.mrb[0].mxu0 }
 0x4f6   : > { %v5513_v35 = vadd.f32 %v16028_v38, %v5465_v41  ;;  %v5402_v29 = vsel %vm5194_vm7, %v19424_v43, %v5282_v26  ;;  %v6044_v27 = vmul.f32 0.6931472, %v9958_v63  ;;  %9965 = vlog2.f32 %v6426_v21  ;;  %v6966_v38 = vld [vmem:[%s17998_s6 + $0x3f0] sm:$0xff]  ;;  %v6967_v43 = vld [vmem:[%s17998_s6 + $0x3f8] sm:$0xff] }
 0x4f7   : > { %v5418_v15 = vmul.f32 %v15953_v32, %v5402_v29  ;;  %v5482_v34 = vmul.f32 %v5402_v29, %v19436_v4  ;;  %vm16124_vm11 = vcmp.lt.f32.partialorder %v5664_v10, 0.0004427343  ;;  %v6429_v31 = vmul.f32 -0.5, %v19432_v6  ;;  %9227 = vmatpush3.bf16.msra.mxu1 %v9226_v19  ;;  %v16146_v10 = vpop.f32.mrb[241].mxu1  ;;  %v19442_v63 = vld [vmem:[#allocation96_spill] sm:$0xff]  ;;  %v19443_v4 = vld [vmem:[#allocation401_spill] sm:$0xff] }
 0x4f8   : > { %v16136_v61 = vmul.f32 %v5513_v35, %v19439_v50  ;;  %v6050_v53 = vsel %vm16077_vm8, %v6047_v45, %v6044_v27  ;;  %v5158_v7 = vmul.f32 %v15874_v11, %v19440_v16  ;;  %v5912_v19 = vmul.f32 %v16056_v42, %v19441_v14 }
 0x4f9   : > { %v9960_v21 = vpop.eup %9959  ;;  %9967 = vpow2.f32 %v6586_v48  ;;  %v5436_v44 = vmul.f32 1.442695, %v5418_v15  ;;  %v16149_v41 = vmul.f32 %v5482_v34, %v15443_v37  ;;  %v6170_v28 = vsel %vm5962_vm9, %v19428_v9, %v6050_v53  ;;  %v19444_v15 = vld [vmem:[#allocation444_spill] sm:$0xff] }
 0x4fa   : > { %v6186_v45 = vmul.f32 %v15953_v32, %v6170_v28  ;;  %v6250_v26 = vmul.f32 %v6170_v28, %v19442_v63  ;;  %v5660_v29 = vmul.f32 0.6931472, %v9960_v21  ;;  %7270 = vmatprep.mubr.f32.mxu0 %v5158_v7  ;;  %7345 = vmatprep.mubr.f32.mxu1 %v5912_v19  ;;  %v9256_v42 = vpack.c.bf16 %v6967_v43, %v6966_v38  ;;  %v9962_v27 = vpop.eup %9961  ;;  %v19445_v43 = vld [vmem:[#allocation446_spill] sm:$0xff]  ;;  %v19446_v7 = vld [vmem:[#allocation97_spill] sm:$0xff]  ;;  %v16187_v28 = vpop.f32.mrb[1].mxu0 }
 0x4fb   : > { %vm6346_vm12 = vcmp.gt.f32.partialorder %v19443_v4, 20.0  ;;  %9969 = vpow2.f32 %v5436_v44  ;;  %v6430_v48 = vadd.f32 1.0, %v6429_v31  ;;  %v6432_v37 = vand.u32 2147483647, %v19432_v6  ;;  %7271 = vmatmul.mubr.f32.gmra.mrb[44].mxu0 %v15857_v30  ;;  %7346 = vmatmul.mubr.f32.vlgmr.msra.gmra.mrb[32].mxu1 %v16002_v58  ;;  %v6951_v58 = vld [vmem:[%s17998_s6 + $0x378] sm:$0xff]  ;;  %v16214_v44 = vpop.f32.mrb[242].mxu1 }
 0x4fc   : > { %v5283_v34 = vadd.f32 1.0, %v19444_v15  ;;  %v16162_v9 = vmul.f32 %v6250_v26, %v15455_v59  ;;  %v5666_v50 = vsel %vm16124_vm11, %v5663_v3, %v5660_v29  ;;  %9257 = vmatprep.subr.bf16.mxu0 %v9256_v42  ;;  %v5286_v38 = vmul.f32 -0.5, %v19444_v15  ;;  %v6950_v59 = vld [vmem:[%s17998_s6 + $0x370] sm:$0xff] }
 0x4fd   : > { %v6051_v53 = vadd.f32 1.0, %v19445_v43  ;;  %v6204_v31 = vmul.f32 1.442695, %v6186_v45  ;;  %v5786_v16 = vsel %vm5578_vm10, %v19434_v51, %v5666_v50  ;;  %v5289_v30 = vand.u32 2147483647, %v19444_v15 }
 0x4fe   : > { %9971 = vlog2.f32 %v5283_v34  ;;  %v9964_v3 = vpop.eup %9963  ;;  %v5802_v18 = vmul.f32 %v15953_v32, %v5786_v16  ;;  %v5866_v14 = vmul.f32 %v5786_v16, %v19446_v7  ;;  %v6054_v51 = vmul.f32 -0.5, %v19445_v43  ;;  %v19452_v34 = vld [vmem:[#allocation403_spill] sm:$0xff] }
 0x4ff   : > { %9973 = vpow2.f32 %v15501_v24  ;;  %v5849_v19 = vmul.f32 %v9964_v3, %v5513_v35  ;;  %v6431_v21 = vmul.f32 %v19432_v6, %v6430_v48  ;;  %vm16183_vm13 = vcmp.lt.f32.partialorder %v6432_v37, 0.0004427343  ;;  %v19451_v48 = vld [vmem:[#allocation448_spill] sm:$0xff]  ;;  %v19469_v6 = vld [vmem:[#allocation453_spill] sm:$0xff] }
 0x500   : > { %9975 = vlog2.f32 %v6051_v53  ;;  %v9966_v45 = vpop.eup %9965  ;;  %v5820_v63 = vmul.f32 1.442695, %v5802_v18  ;;  %v16190_v24 = vmul.f32 %v5866_v14, %v15457_v13  ;;  %v5287_v26 = vadd.f32 1.0, %v5286_v38 }
 0x501   : > { %v9258_v29 = vpack.c.bf16 %v6951_v58, %v6950_v59  ;;  %v5897_v42 = vadd.f32 %v16094_v1, %v5849_v19  ;;  %9977 = vpow2.f32 %v6204_v31  ;;  %v6428_v35 = vmul.f32 0.6931472, %v9966_v45  ;;  %v19453_v31 = vld [vmem:[#allocation449_spill] sm:$0xff]  ;;  %v19455_v19 = vld [vmem:[#allocation98_spill] sm:$0xff] }
 0x502   : > { %vm16193_vm14 = vcmp.lt.f32.partialorder %v5289_v30, 0.0004427343  ;;  %v5667_v37 = vadd.f32 1.0, %v19451_v48  ;;  %vm5195_vm15 = vcmp.gt.f32.partialorder %v19452_v34, 20.0  ;;  %9979 = vpow2.f32 %v5820_v63  ;;  %v19454_v59 = vld [vmem:[#allocation405_spill] sm:$0xff]  ;;  %v19456_v45 = vld [vmem:[#allocation286_spill] sm:$0xff] }
 0x503   : > { %v6055_v50 = vadd.f32 1.0, %v6054_v51  ;;  %v6057_v53 = vand.u32 2147483647, %v19445_v43  ;;  %9259 = vmatpush3.bf16.msra.mxu0 %v9258_v29  ;;  %v5670_v13 = vmul.f32 -0.5, %v19451_v48  ;;  %v9968_v38 = vpop.eup %9967  ;;  %v6233_v16 = vmul.f32 %v9962_v27, %v5897_v42 }
 0x504   : > { %v6434_v1 = vsel %vm16183_vm13, %v6431_v21, %v6428_v35  ;;  %9981 = vlog2.f32 %v5667_v37  ;;  %v6435_v30 = vadd.f32 1.0, %v19453_v31  ;;  %vm5963_vm2 = vcmp.gt.f32.partialorder %v19454_v59, 20.0  ;;  %v19459_v35 = vld [vmem:[#allocation220_spill] sm:$0xff] }
 0x505   : > { %v6554_v58 = vsel %vm6346_vm12, %v19443_v4, %v6434_v1  ;;  %v5288_v3 = vmul.f32 %v19444_v15, %v5287_v26  ;;  %v5673_v18 = vand.u32 2147483647, %v19451_v48  ;;  %v6438_v7 = vmul.f32 -0.5, %v19453_v31  ;;  %v9970_v14 = vpop.eup %9969  ;;  %v19471_v15 = vld [vmem:[#allocation100_spill] sm:$0xff] }
 0x506   : > { %v6281_v27 = vadd.f32 %v16052_v40, %v6233_v16  ;;  %v6570_v51 = vmul.f32 %v15953_v32, %v6554_v58  ;;  %v6634_v21 = vmul.f32 %v6554_v58, %v19455_v19  ;;  %9983 = vlog2.f32 %v6435_v30 }
 0x507   : > { %v5466_v63 = vmul.f32 %v9970_v14, %v19456_v45  ;;  %v6056_v4 = vmul.f32 %v19445_v43, %v6055_v50  ;;  %vm16218_vm3 = vcmp.lt.f32.partialorder %v6057_v53, 0.0004427343  ;;  %v5671_v26 = vadd.f32 1.0, %v5670_v13  ;;  %v19463_v13 = vld [vmem:[#allocation407_spill] sm:$0xff] }
 0x508   : > { %v9972_v29 = vpop.eup %9971  ;;  %v16223_v37 = vmul.f32 %v6281_v27, %v19459_v35  ;;  %v6617_v40 = vmul.f32 %v9968_v38, %v6281_v27  ;;  %v6588_v16 = vmul.f32 1.442695, %v6570_v51  ;;  %v16226_v1 = vmul.f32 %v6634_v21, %v15495_v20  ;;  %v19464_v38 = vld [vmem:[#allocation214_spill] sm:$0xff]  ;;  %v19465_v27 = vld [vmem:[#allocation221_spill] sm:$0xff]  ;;  %v16249_v35 = vpop.f32.mrb[2].mxu0 }
 0x509   : > { %v16228_v30 = vpop.eup %9973  ;;  %v5514_v58 = vadd.f32 %v16149_v41, %v5466_v63  ;;  %v5285_v14 = vmul.f32 0.6931472, %v9972_v29  ;;  %vm16231_vm4 = vcmp.lt.f32.partialorder %v5673_v18, 0.0004427343  ;;  %v6439_v50 = vadd.f32 1.0, %v6438_v7  ;;  %v19466_v21 = vld [vmem:[#allocation409_spill] sm:$0xff] }
 0x50a   : > { %19460 = vst [vmem:[#allocation292_spill] sm:$0xff] %v16228_v30  ;;  %v9976_v53 = vpop.eup %9975  ;;  %vm5579_vm5 = vcmp.gt.f32.partialorder %v19463_v13, 20.0  ;;  %v16237_v19 = vadd.f32 %v16103_v23, %v6617_v40  ;;  %9985 = vpow2.f32 %v6588_v16  ;;  %v5159_v20 = vmul.f32 %v15979_v49, %v19464_v38  ;;  %v19467_v41 = vld [vmem:[#allocation223_spill] sm:$0xff]  ;;  %v19468_v63 = vld [vmem:[#allocation452_spill] sm:$0xff]  ;;  %v16251_v23 = vpop.f32.mrb[243].mxu1 }
 0x50b   : > { %v5913_v51 = vmul.f32 %v5897_v42, %v19465_v27  ;;  %vm6347_vm6 = vcmp.gt.f32.partialorder %v19466_v21, 20.0  ;;  %v16244_v18 = vmul.f32 %v5514_v58, %v19467_v41  ;;  %v5291_v7 = vsel %vm16193_vm14, %v5288_v3, %v5285_v14  ;;  %v9978_v40 = vpop.eup %9977  ;;  %v19470_v27 = vld [vmem:[#allocation99_spill] sm:$0xff] }
 0x50c   : > { %v6053_v45 = vmul.f32 0.6931472, %v9976_v53  ;;  %v5292_v29 = vadd.f32 1.0, %v19468_v63  ;;  %v5403_v42 = vsel %vm5195_vm15, %v19452_v34, %v5291_v7  ;;  %v5672_v16 = vmul.f32 %v19451_v48, %v5671_v26  ;;  %7275 = vmatprep.mubr.f32.mxu0 %v5159_v20  ;;  %v9980_v14 = vpop.eup %9979  ;;  %v19523_v30 = vld [vmem:[#allocation291_spill] sm:$0xff] }
 0x50d   : > { %v6441_v38 = vand.u32 2147483647, %v19453_v31  ;;  %7350 = vmatprep.mubr.f32.mxu1 %v5913_v51  ;;  %v6060_v3 = vadd.f32 1.0, %v19469_v6  ;;  %v5419_v53 = vmul.f32 %v15953_v32, %v5403_v42  ;;  %v5483_v41 = vmul.f32 %v5403_v42, %v19470_v27  ;;  %7276 = vmatmul.mubr.f32.gmra.mrb[46].mxu0 %v15969_v54 }
 0x50e   : > { %v6059_v49 = vsel %vm16218_vm3, %v6056_v4, %v6053_v45  ;;  %9987 = vlog2.f32 %v5292_v29  ;;  %7351 = vmatmul.mubr.f32.gmra.mrb[34].mxu1 %v16136_v61  ;;  %v9982_v48 = vpop.eup %9981  ;;  %v5850_v34 = vmul.f32 %v9980_v14, %v5514_v58  ;;  %v6440_v20 = vmul.f32 %v19453_v31, %v6439_v50 }
 0x50f   : > { %v6171_v26 = vsel %vm5963_vm2, %v19454_v59, %v6059_v49  ;;  %v5295_v51 = vmul.f32 -0.5, %v19468_v63  ;;  %v5438_v7 = vmul.f32 1.442695, %v5419_v53  ;;  %v16271_v42 = vmul.f32 %v5483_v41, %v15533_v57  ;;  %v19474_v59 = vld [vmem:[#allocation411_spill] sm:$0xff]  ;;  %v16288_v53 = vpop.f32.mrb[3].mxu0 }
 0x510   : > { %v6187_v4 = vmul.f32 %v15953_v32, %v6171_v26  ;;  %v6251_v54 = vmul.f32 %v6171_v26, %v19471_v15  ;;  %v9984_v45 = vpop.eup %9983  ;;  %v5898_v61 = vadd.f32 %v16190_v24, %v5850_v34  ;;  %v5669_v58 = vmul.f32 0.6931472, %v9982_v48  ;;  %v19475_v41 = vld [vmem:[#allocation455_spill] sm:$0xff] }
 0x511   : > { %vm16276_vm7 = vcmp.lt.f32.partialorder %v6441_v38, 0.0004427343  ;;  %9989 = vlog2.f32 %v6060_v3  ;;  %v6437_v31 = vmul.f32 0.6931472, %v9984_v45  ;;  %v5298_v57 = vand.u32 2147483647, %v19468_v63 }
 0x512   : > { %9991 = vpow2.f32 %v5438_v7  ;;  %v16281_v49 = vmul.f32 %v6251_v54, %v15578_v47  ;;  %vm5196_vm8 = vcmp.gt.f32.partialorder %v19474_v59, 20.0  ;;  %v6234_v50 = vmul.f32 %v9978_v40, %v5898_v61  ;;  %v19477_v7 = vld [vmem:[#allocation413_spill] sm:$0xff]  ;;  %v19479_v45 = vld [vmem:[#allocation224_spill] sm:$0xff] }
 0x513   : > { %v5675_v14 = vsel %vm16231_vm4, %v5672_v16, %v5669_v58  ;;  %v5296_v24 = vadd.f32 1.0, %v5295_v51  ;;  %v6063_v38 = vmul.f32 -0.5, %v19469_v6  ;;  %v6206_v27 = vmul.f32 1.442695, %v6187_v4  ;;  %v19476_v16 = vld [vmem:[#allocation101_spill] sm:$0xff]  ;;  %v19478_v4 = vld [vmem:[#allocation102_spill] sm:$0xff] }
 0x514   : > { %v5787_v47 = vsel %vm5579_vm5, %v19463_v13, %v5675_v14  ;;  %v6443_v3 = vsel %vm16276_vm7, %v6440_v20, %v6437_v31  ;;  %v5676_v48 = vadd.f32 1.0, %v19475_v41  ;;  %v9986_v34 = vpop.eup %9985  ;;  %v6282_v40 = vadd.f32 %v16162_v9, %v6234_v50 }
 0x515   : > { %v5803_v43 = vmul.f32 %v15953_v32, %v5787_v47  ;;  %v5867_v26 = vmul.f32 %v5787_v47, %v19476_v16  ;;  %v6555_v51 = vsel %vm6347_vm6, %v19466_v21, %v6443_v3  ;;  %vm5964_vm9 = vcmp.gt.f32.partialorder %v19477_v7, 20.0  ;;  %v19489_v47 = vld [vmem:[#allocation218_spill] sm:$0xff] }
 0x516   : > { %v6571_v13 = vmul.f32 %v15953_v32, %v6555_v51  ;;  %v6635_v15 = vmul.f32 %v6555_v51, %v19478_v4  ;;  %v6064_v20 = vadd.f32 1.0, %v6063_v38  ;;  %v6066_v54 = vand.u32 2147483647, %v19469_v6 }
 0x517   : > { %v16307_v58 = vmul.f32 %v6282_v40, %v19479_v45  ;;  %v6618_v9 = vmul.f32 %v9986_v34, %v6282_v40  ;;  %v5822_v29 = vmul.f32 1.442695, %v5803_v43  ;;  %v16310_v31 = vmul.f32 %v5867_v26, %v15580_v39  ;;  %v16323_v40 = vpop.f32.mrb[244].mxu1  ;;  %v19485_v26 = vld [vmem:[#allocation225_spill] sm:$0xff]  ;;  %v19487_v45 = vld [vmem:[#allocation26_spill] sm:$0xff] }
 0x518   : > { %v9988_v50 = vpop.eup %9987  ;;  %v6590_v14 = vmul.f32 1.442695, %v6571_v13  ;;  %v16313_v21 = vmul.f32 %v6635_v15, %v15624_v46  ;;  %vm16315_vm10 = vcmp.lt.f32.partialorder %v5298_v57, 0.0004427343  ;;  %9993 = vlog2.f32 %v5676_v48  ;;  %v19484_v57 = vld [vmem:[#allocation457_spill] sm:$0xff] }
 0x519   : > { %v16320_v38 = vadd.f32 %v16226_v1, %v6618_v9  ;;  %9995 = vpow2.f32 %v5822_v29  ;;  %v5294_v3 = vmul.f32 0.6931472, %v9988_v50  ;;  %v5297_v34 = vmul.f32 %v19468_v63, %v5296_v24  ;;  %v16335_v24 = vpop.f32.mrb[4].mxu0 }
 0x51a   : > { %9997 = vpow2.f32 %v6206_v27  ;;  %vm16325_vm11 = vcmp.lt.f32.partialorder %v6066_v54, 0.0004427343  ;;  %v5679_v46 = vmul.f32 -0.5, %v19475_v41  ;;  %v6444_v43 = vadd.f32 1.0, %v19484_v57  ;;  %v16337_v27 = vpop.f32.mrb[245].mxu1  ;;  %v19486_v54 = vld [vmem:[#allocation415_spill] sm:$0xff] }
 0x51b   : > { %v9990_v16 = vpop.eup %9989  ;;  %9999 = vpow2.f32 %v6590_v14  ;;  %v5300_v1 = vsel %vm16315_vm10, %v5297_v34, %v5294_v3  ;;  %v6065_v48 = vmul.f32 %v19469_v6, %v6064_v20  ;;  %v5914_v63 = vmul.f32 %v5898_v61, %v19485_v26  ;;  %v19488_v61 = vld [vmem:[#allocation103_spill] sm:$0xff] }
 0x51c   : > { %v9992_v51 = vpop.eup %9991  ;;  %v5404_v13 = vsel %vm5196_vm8, %v19474_v59, %v5300_v1  ;;  %v6062_v4 = vmul.f32 0.6931472, %v9990_v16  ;;  %10001 = vlog2.f32 %v6444_v43  ;;  %v6447_v15 = vmul.f32 -0.5, %v19484_v57 }
 0x51d   : > { %vm5580_vm12 = vcmp.gt.f32.partialorder %v19486_v54, 20.0  ;;  %v5467_v9 = vmul.f32 %v9992_v51, %v19487_v45  ;;  %v5420_v6 = vmul.f32 %v15953_v32, %v5404_v13  ;;  %v5484_v20 = vmul.f32 %v5404_v13, %v19488_v61  ;;  %7355 = vmatprep.mubr.f32.mxu1 %v5914_v63  ;;  %v19491_v63 = vld [vmem:[#allocation459_spill] sm:$0xff]  ;;  %v19492_v51 = vld [vmem:[#allocation417_spill] sm:$0xff] }
 0x51e   : > { %v5682_v29 = vand.u32 2147483647, %v19475_v41  ;;  %v6068_v50 = vsel %vm16325_vm11, %v6065_v48, %v6062_v4  ;;  %v5680_v14 = vadd.f32 1.0, %v5679_v46  ;;  %v6450_v59 = vand.u32 2147483647, %v19484_v57  ;;  %7356 = vmatmul.mubr.f32.gmra.mrb[36].mxu1 %v16244_v18  ;;  %v19490_v46 = vld [vmem:[#allocation104_spill] sm:$0xff] }
 0x51f   : > { %v6680_v3 = vmul.f32 %v16111_v17, %v19489_v47  ;;  %v5515_v34 = vadd.f32 %v16271_v42, %v5467_v9  ;;  %v5440_v43 = vmul.f32 1.442695, %v5420_v6  ;;  %v16356_v16 = vmul.f32 %v5484_v20, %v15666_v55  ;;  %v19493_v18 = vld [vmem:[#allocation227_spill] sm:$0xff] }
 0x520   : > { %v6172_v1 = vsel %vm5964_vm9, %v19477_v7, %v6068_v50  ;;  %v6448_v26 = vadd.f32 1.0, %v6447_v15  ;;  %v5301_v17 = vadd.f32 1.0, %v19491_v63  ;;  %vm6348_vm13 = vcmp.gt.f32.partialorder %v19492_v51, 20.0  ;;  %v19494_v15 = vld [vmem:[#allocation460_spill] sm:$0xff] }
 0x521   : > { %v6188_v39 = vmul.f32 %v15953_v32, %v6172_v1  ;;  %v6252_v48 = vmul.f32 %v6172_v1, %v19490_v46  ;;  %7490 = vmatprep.mubr.f32.mxu0 %v6680_v3  ;;  %v16366_v42 = vmul.f32 %v5515_v34, %v19493_v18  ;;  %10003 = vpow2.f32 %v5440_v43  ;;  %v19497_v1 = vld [vmem:[#allocation462_spill] sm:$0xff] }
 0x522   : > { %v5304_v55 = vmul.f32 -0.5, %v19491_v63  ;;  %v5307_v13 = vand.u32 2147483647, %v19491_v63  ;;  %7491 = vmatmul.mubr.f32.vlgmr.msra.gmra.mrb[48].mxu0 %v16091_v22  ;;  %v9994_v7 = vpop.eup %9993  ;;  %10005 = vlog2.f32 %v5301_v17  ;;  %v6069_v9 = vadd.f32 1.0, %v19494_v15 }
 0x523   : > { %v6208_v4 = vmul.f32 1.442695, %v6188_v39  ;;  %v16372_v45 = vmul.f32 %v6252_v48, %v15684_v8  ;;  %v9996_v6 = vpop.eup %9995  ;;  %v5678_v61 = vmul.f32 0.6931472, %v9994_v7  ;;  %v5681_v20 = vmul.f32 %v19475_v41, %v5680_v14  ;;  %v19509_v41 = vld [vmem:[#allocation106_spill] sm:$0xff] }
 0x524   : > { %vm16376_vm14 = vcmp.lt.f32.partialorder %v5682_v29, 0.0004427343  ;;  %v5305_v47 = vadd.f32 1.0, %v5304_v55  ;;  %v9998_v3 = vpop.eup %9997  ;;  %v5851_v43 = vmul.f32 %v9996_v6, %v5515_v34  ;;  %v6072_v22 = vmul.f32 -0.5, %v19494_v15  ;;  %v16389_v29 = vpop.f32.mrb[5].mxu0  ;;  %v19503_v55 = vld [vmem:[#allocation105_spill] sm:$0xff] }
 0x525   : > { %10007 = vpow2.f32 %v6208_v4  ;;  %v5685_v8 = vadd.f32 1.0, %v19497_v1  ;;  %v10000_v39 = vpop.eup %9999  ;;  %v5684_v46 = vsel %vm16376_vm14, %v5681_v20, %v5678_v61  ;;  %v6449_v48 = vmul.f32 %v19484_v57, %v6448_v26  ;;  %v16456_v18 = vpop.f32.mrb[6].mxu0 }
 0x526   : > { %vm16385_vm15 = vcmp.lt.f32.partialorder %v6450_v59, 0.0004427343  ;;  %10009 = vlog2.f32 %v6069_v9  ;;  %v10002_v14 = vpop.eup %10001  ;;  %v5899_v34 = vadd.f32 %v16310_v31, %v5851_v43  ;;  %v5788_v17 = vsel %vm5580_vm12, %v19486_v54, %v5684_v46  ;;  %v19502_v59 = vld [vmem:[#allocation419_spill] sm:$0xff]  ;;  %v19504_v43 = vld [vmem:[#allocation466_spill] sm:$0xff]  ;;  %v19505_v46 = vld [vmem:[#allocation421_spill] sm:$0xff] }
 0x527   : > { %vm16395_vm2 = vcmp.lt.f32.partialorder %v5307_v13, 0.0004427343  ;;  %v6075_v57 = vand.u32 2147483647, %v19494_v15  ;;  %10011 = vlog2.f32 %v5685_v8  ;;  %vm5197_vm3 = vcmp.gt.f32.partialorder %v19502_v59, 20.0 }
 0x528   : > { %v5804_v26 = vmul.f32 %v15953_v32, %v5788_v17  ;;  %v5868_v7 = vmul.f32 %v5788_v17, %v19503_v55  ;;  %v6446_v4 = vmul.f32 0.6931472, %v10002_v14  ;;  %v5306_v31 = vmul.f32 %v19491_v63, %v5305_v47 }
 0x529   : > { %v6235_v9 = vmul.f32 %v9998_v3, %v5899_v34  ;;  %v6073_v6 = vadd.f32 1.0, %v6072_v22  ;;  %v5688_v54 = vmul.f32 -0.5, %v19497_v1  ;;  %v5691_v13 = vand.u32 2147483647, %v19497_v1  ;;  %v19508_v22 = vld [vmem:[#allocation423_spill] sm:$0xff] }
 0x52a   : > { %v5824_v61 = vmul.f32 1.442695, %v5804_v26  ;;  %v16407_v20 = vmul.f32 %v5868_v7, %v15686_v33  ;;  %v6452_v50 = vsel %vm16385_vm15, %v6449_v48, %v6446_v4  ;;  %v6453_v8 = vadd.f32 1.0, %v19504_v43  ;;  %v19510_v7 = vld [vmem:[#allocation228_spill] sm:$0xff]  ;;  %v19511_v4 = vld [vmem:[#allocation27_spill] sm:$0xff] }
 0x52b   : > { %vm5965_vm4 = vcmp.gt.f32.partialorder %v19505_v46, 20.0  ;;  %v6283_v14 = vadd.f32 %v16281_v49, %v6235_v9  ;;  %v6556_v63 = vsel %vm6348_vm13, %v19492_v51, %v6452_v50  ;;  %vm16417_vm5 = vcmp.lt.f32.partialorder %v6075_v57, 0.0004427343  ;;  %v10004_v3 = vpop.eup %10003  ;;  %v16425_v49 = vpop.f32.mrb[246].mxu1 }
 0x52c   : > { %v6456_v33 = vmul.f32 -0.5, %v19504_v43  ;;  %vm5581_vm6 = vcmp.gt.f32.partialorder %v19508_v22, 20.0  ;;  %10013 = vpow2.f32 %v5824_v61  ;;  %v6572_v48 = vmul.f32 %v15953_v32, %v6556_v63  ;;  %v10006_v55 = vpop.eup %10005 }
 0x52d   : > { %v6636_v17 = vmul.f32 %v6556_v63, %v19509_v41  ;;  %v5689_v26 = vadd.f32 1.0, %v5688_v54  ;;  %v16428_v51 = vmul.f32 %v6283_v14, %v19510_v7  ;;  %v6619_v57 = vmul.f32 %v10000_v39, %v6283_v14  ;;  %v19516_v7 = vld [vmem:[#allocation231_spill] sm:$0xff] }
 0x52e   : > { %v5468_v9 = vmul.f32 %v10004_v3, %v19511_v4  ;;  %v6074_v50 = vmul.f32 %v19494_v15, %v6073_v6  ;;  %v5303_v61 = vmul.f32 0.6931472, %v10006_v55  ;;  %vm16435_vm7 = vcmp.lt.f32.partialorder %v5691_v13, 0.0004427343  ;;  %v19514_v6 = vld [vmem:[#allocation229_spill] sm:$0xff] }
 0x52f   : > { %v16433_v11 = vmul.f32 %v6636_v17, %v15739_v2  ;;  %10015 = vlog2.f32 %v6453_v8  ;;  %v10008_v54 = vpop.eup %10007  ;;  %v16440_v63 = vadd.f32 %v16313_v21, %v6619_v57  ;;  %v6592_v39 = vmul.f32 1.442695, %v6572_v48  ;;  %v19515_v17 = vld [vmem:[#allocation222_spill] sm:$0xff] }
 0x530   : > { %v5516_v41 = vadd.f32 %v16356_v16, %v5468_v9  ;;  %v6457_v14 = vadd.f32 1.0, %v6456_v33  ;;  %v10010_v3 = vpop.eup %10009  ;;  %v5309_v15 = vsel %vm16395_vm2, %v5306_v31, %v5303_v61  ;;  %v5690_v2 = vmul.f32 %v19497_v1, %v5689_v26  ;;  %v16458_v31 = vpop.f32.mrb[247].mxu1  ;;  %v19518_v26 = vld [vmem:[#allocation470_spill] sm:$0xff]  ;;  %v19519_v9 = vld [vmem:[#allocation425_spill] sm:$0xff] }
 0x531   : > { %v5915_v13 = vmul.f32 %v5899_v34, %v19514_v6  ;;  %v6681_v55 = vmul.f32 %v16237_v19, %v19515_v17  ;;  %v10012_v8 = vpop.eup %10011  ;;  %v5405_v21 = vsel %vm5197_vm3, %v19502_v59, %v5309_v15  ;;  %v6071_v16 = vmul.f32 0.6931472, %v10010_v3  ;;  %v19517_v34 = vld [vmem:[#allocation107_spill] sm:$0xff]  ;;  %v19520_v3 = vld [vmem:[#allocation472_spill] sm:$0xff] }
 0x532   : > { %v16450_v4 = vmul.f32 %v5516_v41, %v19516_v7  ;;  %v6459_v33 = vand.u32 2147483647, %v19504_v43  ;;  %v5421_v1 = vmul.f32 %v15953_v32, %v5405_v21  ;;  %v5485_v48 = vmul.f32 %v5405_v21, %v19517_v34 }
 0x533   : > { %v5687_v19 = vmul.f32 0.6931472, %v10012_v8  ;;  %7360 = vmatprep.mubr.f32.mxu1 %v5915_v13  ;;  %7495 = vmatprep.mubr.f32.mxu0 %v6681_v55  ;;  %v5310_v57 = vadd.f32 1.0, %v19518_v26  ;;  %vm6349_vm8 = vcmp.gt.f32.partialorder %v19519_v9, 20.0  ;;  %10017 = vpow2.f32 %v6592_v39  ;;  %v19521_v39 = vld [vmem:[#allocation108_spill] sm:$0xff]  ;;  %v19522_v8 = vld [vmem:[#allocation109_spill] sm:$0xff] }
 0x534   : > { %v6077_v59 = vsel %vm16417_vm5, %v6074_v50, %v6071_v16  ;;  %v5313_v61 = vmul.f32 -0.5, %v19518_v26  ;;  %v6078_v15 = vadd.f32 1.0, %v19520_v3  ;;  %7361 = vmatmul.mubr.f32.gmra.mrb[38].mxu1 %v16366_v42  ;;  %7496 = vmatmul.mubr.f32.gmra.mrb[50].mxu0 %v16223_v37  ;;  %v5442_v6 = vmul.f32 1.442695, %v5421_v1 }
 0x535   : > { %v16471_v13 = vmul.f32 %v5485_v48, %v15773_v12  ;;  %v6173_v17 = vsel %vm5965_vm4, %v19505_v46, %v6077_v59  ;;  %v5693_v47 = vsel %vm16435_vm7, %v5690_v2, %v5687_v19  ;;  %10019 = vlog2.f32 %v5310_v57  ;;  %v19524_v19 = vld [vmem:[#allocation156_spill] sm:$0xff]  ;;  %v16497_v59 = vpop.f32.mrb[7].mxu0 }
 0x536   : > { %v6189_v50 = vmul.f32 %v15953_v32, %v6173_v17  ;;  %v6253_v55 = vmul.f32 %v6173_v17, %v19521_v39  ;;  %v5789_v42 = vsel %vm5581_vm6, %v19508_v22, %v5693_v47  ;;  %v10014_v37 = vpop.eup %10013  ;;  %10021 = vpow2.f32 %v5442_v6  ;;  %v19527_v6 = vld [vmem:[#allocation427_spill] sm:$0xff]  ;;  %v19528_v47 = vld [vmem:[#allocation473_spill] sm:$0xff]  ;;  %v19537_v57 = vld [vmem:[#allocation232_spill] sm:$0xff] }
 0x537   : > { %v5805_v12 = vmul.f32 %v15953_v32, %v5789_v42  ;;  %v5869_v7 = vmul.f32 %v5789_v42, %v19522_v8  ;;  %v6458_v46 = vmul.f32 %v19504_v43, %v6457_v14  ;;  %v5852_v21 = vmul.f32 %v10014_v37, %v5516_v41 }
 0x538   : > { %v16487_v2 = vmul.f32 %v6253_v55, %v19523_v30  ;;  %v5314_v16 = vadd.f32 1.0, %v5313_v61  ;;  %v5316_v1 = vand.u32 2147483647, %v19518_v26  ;;  %vm16493_vm9 = vcmp.lt.f32.partialorder %v6459_v33, 0.0004427343 }
 0x539   : > { %v10016_v34 = vpop.eup %10015  ;;  %v5826_v48 = vmul.f32 1.442695, %v5805_v12  ;;  %v16491_v22 = vmul.f32 %v5869_v7, %v19524_v19  ;;  %10023 = vlog2.f32 %v6078_v15  ;;  %v5900_v43 = vadd.f32 %v16407_v20, %v5852_v21  ;;  %v19531_v7 = vld [vmem:[#allocation430_spill] sm:$0xff] }
 0x53a   : > { %v6210_v41 = vmul.f32 1.442695, %v6189_v50  ;;  %v6455_v14 = vmul.f32 0.6931472, %v10016_v34  ;;  %v6081_v61 = vmul.f32 -0.5, %v19520_v3  ;;  %vm5198_vm10 = vcmp.gt.f32.partialorder %v19527_v6, 20.0 }
 0x53b   : > { %10025 = vpow2.f32 %v5826_v48  ;;  %v6084_v17 = vand.u32 2147483647, %v19520_v3  ;;  %v5694_v39 = vadd.f32 1.0, %v19528_v47  ;;  %v5697_v33 = vmul.f32 -0.5, %v19528_v47  ;;  %v16526_v48 = vpop.f32.mrb[248].mxu1 }
 0x53c   : > { %v6236_v55 = vmul.f32 %v10008_v54, %v5900_v43  ;;  %v6461_v15 = vsel %vm16493_vm9, %v6458_v46, %v6455_v14  ;;  %v5315_v42 = vmul.f32 %v19518_v26, %v5314_v16  ;;  %vm16508_vm11 = vcmp.lt.f32.partialorder %v5316_v1, 0.0004427343  ;;  %v19532_v26 = vld [vmem:[#allocation110_spill] sm:$0xff]  ;;  %19536 = vst [vmem:[#allocation36_spill] sm:$0xff] %v16526_v48 }
 0x53d   : > { %v6557_v50 = vsel %vm6349_vm8, %v19519_v9, %v6461_v15  ;;  %v6082_v37 = vadd.f32 1.0, %v6081_v61  ;;  %10027 = vlog2.f32 %v5694_v39  ;;  %v5700_v12 = vand.u32 2147483647, %v19528_v47  ;;  %v10018_v8 = vpop.eup %10017  ;;  %v19535_v9 = vld [vmem:[#allocation476_spill] sm:$0xff]  ;;  %v19538_v61 = vld [vmem:[#allocation33_spill] sm:$0xff] }
 0x53e   : > { %vm5966_vm12 = vcmp.gt.f32.partialorder %v19531_v7, 20.0  ;;  %v6284_v54 = vadd.f32 %v16372_v45, %v6236_v55  ;;  %v6573_v46 = vmul.f32 %v15953_v32, %v6557_v50  ;;  %v6637_v21 = vmul.f32 %v6557_v50, %v19532_v26  ;;  %v19539_v15 = vld [vmem:[#allocation432_spill] sm:$0xff] }
 0x53f   : > { %v5698_v30 = vadd.f32 1.0, %v5697_v33  ;;  %10029 = vpow2.f32 %v6210_v41  ;;  %vm16520_vm13 = vcmp.lt.f32.partialorder %v6084_v17, 0.0004427343  ;;  %v6462_v1 = vadd.f32 1.0, %v19535_v9  ;;  %v10020_v19 = vpop.eup %10019  ;;  %v19540_v26 = vld [vmem:[#allocation464_spill] sm:$0xff] }
 0x540   : > { %v6465_v34 = vmul.f32 -0.5, %v19535_v9  ;;  %v16529_v14 = vmul.f32 %v6284_v54, %v19537_v57  ;;  %v6620_v45 = vmul.f32 %v10018_v8, %v6284_v54  ;;  %v6594_v32 = vmul.f32 1.442695, %v6573_v46  ;;  %v10022_v41 = vpop.eup %10021  ;;  %v19541_v8 = vld [vmem:[#allocation233_spill] sm:$0xff] }
 0x541   : > { %v16532_v39 = vmul.f32 %v6637_v21, %v19538_v61  ;;  %v5312_v17 = vmul.f32 0.6931472, %v10020_v19  ;;  %v6083_v33 = vmul.f32 %v19520_v3, %v6082_v37  ;;  %10031 = vlog2.f32 %v6462_v1  ;;  %v19544_v37 = vld [vmem:[#allocation226_spill] sm:$0xff]  ;;  %v16555_v19 = vpop.f32.mrb[8].mxu0 }
 0x542   : > { %v6466_v55 = vadd.f32 1.0, %v6465_v34  ;;  %vm5582_vm14 = vcmp.gt.f32.partialorder %v19539_v15, 20.0  ;;  %v16537_v50 = vadd.f32 %v16433_v11, %v6620_v45  ;;  %v5469_v48 = vmul.f32 %v10022_v41, %v19540_v26 }
 0x543   : > { %v5699_v57 = vmul.f32 %v19528_v47, %v5698_v30  ;;  %v5916_v54 = vmul.f32 %v5900_v43, %v19541_v8  ;;  %v10024_v46 = vpop.eup %10023  ;;  %10033 = vpow2.f32 %v6594_v32  ;;  %v5318_v21 = vsel %vm16508_vm11, %v5315_v42, %v5312_v17  ;;  %v19545_v43 = vld [vmem:[#allocation477_spill] sm:$0xff]  ;;  %v16557_v42 = vpop.f32.mrb[249].mxu1  ;;  %v19547_v32 = vld [vmem:[#allocation235_spill] sm:$0xff]  ;;  %v19548_v8 = vld [vmem:[#allocation434_spill] sm:$0xff] }
 0x544   : > { %vm16544_vm15 = vcmp.lt.f32.partialorder %v5700_v12, 0.0004427343  ;;  %v6682_v1 = vmul.f32 %v16320_v38, %v19544_v37  ;;  %v5517_v11 = vadd.f32 %v16471_v13, %v5469_v48  ;;  %v5406_v47 = vsel %vm5198_vm10, %v19527_v6, %v5318_v21  ;;  %v16562_v12 = vld [vmem:[%s17997_s5] ss:$0 sm:$0xff]  ;;  %v19546_v13 = vld [vmem:[#allocation111_spill] sm:$0xff] }
 0x545   : > { %v6080_v30 = vmul.f32 0.6931472, %v10024_v46  ;;  %7365 = vmatprep.mubr.f32.mxu1 %v5916_v54  ;;  %v5319_v34 = vadd.f32 1.0, %v19545_v43  ;;  %v10026_v20 = vpop.eup %10025  ;;  %v5422_v38 = vmul.f32 %v16562_v12, %v5406_v47  ;;  %v5486_v48 = vmul.f32 %v5406_v47, %v19546_v13 }
 0x546   : > { %v6467_v6 = vmul.f32 %v19535_v9, %v6466_v55  ;;  %v6468_v45 = vand.u32 2147483647, %v19535_v9  ;;  %7500 = vmatprep.mubr.f32.mxu0 %v6682_v1  ;;  %7366 = vmatmul.mubr.f32.gmra.mrb[40].mxu1 %v16450_v4  ;;  %v16570_v61 = vmul.f32 %v5517_v11, %v19547_v32  ;;  %v5853_v41 = vmul.f32 %v10026_v20, %v5517_v11  ;;  %v19549_v55 = vld [vmem:[#allocation159_spill] sm:$0xff] }
 0x547   : > { %v6086_v17 = vsel %vm16520_vm13, %v6083_v33, %v6080_v30  ;;  %10035 = vlog2.f32 %v5319_v34  ;;  %7501 = vmatmul.mubr.f32.gmra.mrb[52].mxu0 %v16307_v58  ;;  %v10028_v26 = vpop.eup %10027  ;;  %vm6350_vm2 = vcmp.gt.f32.partialorder %v19548_v8, 20.0  ;;  %v5444_v54 = vmul.f32 1.442695, %v5422_v38  ;;  %v19550_v33 = vld [vmem:[#allocation112_spill] sm:$0xff]  ;;  %v19553_v30 = vld [vmem:[#allocation479_spill] sm:$0xff] }
 0x548   : > { %v16577_v46 = vmul.f32 %v5486_v48, %v19549_v55  ;;  %v6174_v4 = vsel %vm5966_vm12, %v19531_v7, %v6086_v17  ;;  %v5322_v9 = vmul.f32 -0.5, %v19545_v43  ;;  %v16584_v21 = vadd.f32 %v16491_v22, %v5853_v41  ;;  %v19554_v48 = vld [vmem:[#allocation437_spill] sm:$0xff] }
 0x549   : > { %v6190_v16 = vmul.f32 %v16562_v12, %v6174_v4  ;;  %v6254_v58 = vmul.f32 %v6174_v4, %v19550_v33  ;;  %v5696_v37 = vmul.f32 0.6931472, %v10028_v26  ;;  %v10030_v1 = vpop.eup %10029  ;;  %10037 = vpow2.f32 %v5444_v54 }
 0x54a   : > { %vm16588_vm3 = vcmp.lt.f32.partialorder %v6468_v45, 0.0004427343  ;;  %v5325_v47 = vand.u32 2147483647, %v19545_v43  ;;  %v6087_v7 = vadd.f32 1.0, %v19553_v30  ;;  %v6237_v34 = vmul.f32 %v10030_v1, %v16584_v21 }
 0x54b   : > { %v6212_v20 = vmul.f32 1.442695, %v6190_v16  ;;  %v16596_v22 = vmul.f32 %v6254_v58, %v15907_v25  ;;  %v5702_v38 = vsel %vm16544_vm15, %v5699_v57, %v5696_v37  ;;  %v10032_v13 = vpop.eup %10031  ;;  %vm5199_vm4 = vcmp.gt.f32.partialorder %v19554_v48, 20.0  ;;  %v19555_v25 = vld [vmem:[#allocation113_spill] sm:$0xff]  ;;  %v19557_v58 = vld [vmem:[#allocation236_spill] sm:$0xff] }
 0x54c   : > { %v5790_v45 = vsel %vm5582_vm14, %v19539_v15, %v5702_v38  ;;  %v5323_v32 = vadd.f32 1.0, %v5322_v9  ;;  %10039 = vlog2.f32 %v6087_v7  ;;  %v6090_v41 = vmul.f32 -0.5, %v19553_v30  ;;  %v19556_v16 = vld [vmem:[#allocation481_spill] sm:$0xff] }
 0x54d   : > { %v6285_v17 = vadd.f32 %v16487_v2, %v6237_v34  ;;  %v5806_v26 = vmul.f32 %v16562_v12, %v5790_v45  ;;  %v5870_v54 = vmul.f32 %v5790_v45, %v19555_v25  ;;  %v6093_v3 = vand.u32 2147483647, %v19553_v30  ;;  %v10034_v57 = vpop.eup %10033  ;;  %v16616_v2 = vpop.f32.mrb[9].mxu0  ;;  %v19564_v25 = vld [vmem:[#allocation483_spill] sm:$0xff] }
 0x54e   : > { %10041 = vpow2.f32 %v6212_v20  ;;  %v6464_v55 = vmul.f32 0.6931472, %v10032_v13  ;;  %v6091_v4 = vadd.f32 1.0, %v6090_v41  ;;  %v5703_v33 = vadd.f32 1.0, %v19556_v16  ;;  %v19558_v13 = vld [vmem:[#allocation439_spill] sm:$0xff] }
 0x54f   : > { %v16611_v15 = vmul.f32 %v6285_v17, %v19557_v58  ;;  %v6621_v9 = vmul.f32 %v10034_v57, %v6285_v17  ;;  %v5828_v37 = vmul.f32 1.442695, %v5806_v26  ;;  %v16614_v1 = vmul.f32 %v5870_v54, %v15909_v60 }
 0x550   : > { %v6470_v7 = vsel %vm16588_vm3, %v6467_v6, %v6464_v55  ;;  %v5324_v34 = vmul.f32 %v19545_v43, %v5323_v32  ;;  %10043 = vlog2.f32 %v5703_v33  ;;  %v5706_v20 = vmul.f32 -0.5, %v19556_v16  ;;  %v19561_v6 = vld [vmem:[#allocation114_spill] sm:$0xff] }
 0x551   : > { %v10036_v38 = vpop.eup %10035  ;;  %vm5967_vm5 = vcmp.gt.f32.partialorder %v19558_v13, 20.0  ;;  %v16624_v45 = vadd.f32 %v16532_v39, %v6621_v9  ;;  %10045 = vpow2.f32 %v5828_v37  ;;  %v6558_v60 = vsel %vm6350_vm2, %v19548_v8, %v6470_v7  ;;  %v19565_v9 = vld [vmem:[#allocation441_spill] sm:$0xff]  ;;  %v16654_v7 = vpop.f32.mrb[250].mxu1 }
 0x552   : > { %vm16629_vm6 = vcmp.lt.f32.partialorder %v5325_v47, 0.0004427343  ;;  %v6574_v43 = vmul.f32 %v16562_v12, %v6558_v60  ;;  %v6638_v11 = vmul.f32 %v6558_v60, %v19561_v6  ;;  %v5321_v32 = vmul.f32 0.6931472, %v10036_v38  ;;  %v19567_v38 = vld [vmem:[#allocation115_spill] sm:$0xff]  ;;  %v16661_v6 = vpop.f32.mrb[251].mxu1 }
 0x553   : > { %v5707_v17 = vadd.f32 1.0, %v5706_v20  ;;  %v6092_v26 = vmul.f32 %v19553_v30, %v6091_v4  ;;  %vm16636_vm7 = vcmp.lt.f32.partialorder %v6093_v3, 0.0004427343  ;;  %v6471_v54 = vadd.f32 1.0, %v19564_v25  ;;  %v10038_v47 = vpop.eup %10037  ;;  %v19566_v30 = vld [vmem:[#allocation465_spill] sm:$0xff]  ;;  %19569 = vst [vmem:[#allocation326_spill] sm:$0xff] %v16661_v6 }
 0x554   : > { %v6474_v8 = vmul.f32 -0.5, %v19564_v25  ;;  %v6596_v57 = vmul.f32 1.442695, %v6574_v43  ;;  %v16643_v55 = vmul.f32 %v6638_v11, %v15959_v5  ;;  %v5327_v33 = vsel %vm16629_vm6, %v5324_v34, %v5321_v32  ;;  %v16659_v43 = vpop.f32.mrb[10].mxu0  ;;  %v19570_v32 = vld [vmem:[#allocation237_spill] sm:$0xff] }
 0x555   : > { %v5709_v58 = vand.u32 2147483647, %v19556_v16  ;;  %vm5583_vm8 = vcmp.gt.f32.partialorder %v19565_v9, 20.0  ;;  %v5470_v3 = vmul.f32 %v10038_v47, %v19566_v30  ;;  %v5407_v4 = vsel %vm5199_vm4, %v19554_v48, %v5327_v33  ;;  %19568 = vst [vmem:[#allocation157_spill] sm:$0xff] %v16659_v43 }
 0x556   : > { %10047 = vlog2.f32 %v6471_v54  ;;  %v6477_v37 = vand.u32 2147483647, %v19564_v25  ;;  %v10040_v5 = vpop.eup %10039  ;;  %v5423_v20 = vmul.f32 %v16562_v12, %v5407_v4  ;;  %v5487_v34 = vmul.f32 %v5407_v4, %v19567_v38  ;;  %v19571_v4 = vld [vmem:[#allocation230_spill] sm:$0xff]  ;;  %v19573_v38 = vld [vmem:[#allocation239_spill] sm:$0xff] }
 0x557   : > { %v5708_v60 = vmul.f32 %v19556_v16, %v5707_v17  ;;  %v6475_v41 = vadd.f32 1.0, %v6474_v8  ;;  %v5518_v11 = vadd.f32 %v16577_v46, %v5470_v3  ;;  %10049 = vpow2.f32 %v6596_v57  ;;  %v19572_v17 = vld [vmem:[#allocation485_spill] sm:$0xff] }
 0x558   : > { %v6089_v48 = vmul.f32 0.6931472, %v10040_v5  ;;  %v5917_v54 = vmul.f32 %v16584_v21, %v19570_v32  ;;  %v10042_v47 = vpop.eup %10041  ;;  %v5446_v33 = vmul.f32 1.442695, %v5423_v20  ;;  %v16667_v30 = vmul.f32 %v5487_v34, %v15988_v36  ;;  %v19574_v5 = vld [vmem:[#allocation443_spill] sm:$0xff] }
 0x559   : > { %v6683_v16 = vmul.f32 %v16440_v63, %v19571_v4  ;;  %v5328_v8 = vadd.f32 1.0, %v19572_v17  ;;  %v16673_v43 = vmul.f32 %v5518_v11, %v19573_v38  ;;  %v5331_v57 = vmul.f32 -0.5, %v19572_v17  ;;  %v19575_v63 = vld [vmem:[#allocation487_spill] sm:$0xff] }
 0x55a   : > { %v6095_v46 = vsel %vm16636_vm7, %v6092_v26, %v6089_v48  ;;  %7370 = vmatprep.mubr.f32.mxu1 %v5917_v54  ;;  %v5334_v21 = vand.u32 2147483647, %v19572_v17  ;;  %v10044_v3 = vpop.eup %10043  ;;  %vm6351_vm9 = vcmp.gt.f32.partialorder %v19574_v5, 20.0  ;;  %10051 = vpow2.f32 %v5446_v33  ;;  %v19576_v48 = vld [vmem:[#allocation116_spill] sm:$0xff] }
 0x55b   : > { %v6175_v36 = vsel %vm5967_vm5, %v19558_v13, %v6095_v46  ;;  %7505 = vmatprep.mubr.f32.mxu0 %v6683_v16  ;;  %v6096_v20 = vadd.f32 1.0, %v19575_v63  ;;  %v6099_v34 = vmul.f32 -0.5, %v19575_v63  ;;  %7371 = vmatmul.mubr.f32.gmra.mrb[42].mxu1 %v16570_v61  ;;  %v10046_v26 = vpop.eup %10045  ;;  %v5705_v54 = vmul.f32 0.6931472, %v10044_v3  ;;  %v19577_v13 = vld [vmem:[#allocation320_spill] sm:$0xff]  ;;  %v16693_v46 = vpop.f32.mrb[11].mxu0 }
 0x55c   : > { %v6191_v39 = vmul.f32 %v16562_v12, %v6175_v36  ;;  %v6255_v32 = vmul.f32 %v6175_v36, %v19576_v48  ;;  %10053 = vlog2.f32 %v5328_v8  ;;  %7506 = vmatmul.mubr.f32.gmra.mrb[54].mxu0 %v16428_v51  ;;  %v5854_v33 = vmul.f32 %v10046_v26, %v5518_v11  ;;  %v19585_v48 = vld [vmem:[#allocation447_spill] sm:$0xff] }
 0x55d   : > { %vm5710_vm10 = vcmp.lt.f32.partialorder %v5709_v58, 0.0004427343  ;;  %v5332_v4 = vadd.f32 1.0, %v5331_v57  ;;  %10055 = vlog2.f32 %v6096_v20  ;;  %v6476_v51 = vmul.f32 %v19564_v25, %v6475_v41  ;;  %v19583_v20 = vld [vmem:[#allocation445_spill] sm:$0xff]  ;;  %v19584_v41 = vld [vmem:[#allocation491_spill] sm:$0xff]  ;;  %v19588_v58 = vld [vmem:[#allocation118_spill] sm:$0xff] }
 0x55e   : > { %10057 = vpow2.f32 %v19577_v13  ;;  %v6214_v16 = vmul.f32 1.442695, %v6191_v39  ;;  %v16691_v38 = vmul.f32 %v6255_v32, %v16010_v0  ;;  %v5711_v61 = vsel %vm5710_vm10, %v5708_v60, %v5705_v54  ;;  %v19580_v0 = vld [vmem:[#allocation117_spill] sm:$0xff]  ;;  %v19586_v54 = vld [vmem:[#allocation494_spill] sm:$0xff] }
 0x55f   : > { %v5902_v6 = vadd.f32 %v16614_v1, %v5854_v33  ;;  %v5791_v8 = vsel %vm5583_vm8, %v19565_v9, %v5711_v61  ;;  %vm16700_vm11 = vcmp.lt.f32.partialorder %v6477_v37, 0.0004427343  ;;  %v5333_v60 = vmul.f32 %v19572_v17, %v5332_v4 }
 0x560   : > { %v10048_v11 = vpop.eup %10047  ;;  %v5807_v57 = vmul.f32 %v16562_v12, %v5791_v8  ;;  %v5871_v3 = vmul.f32 %v5791_v8, %v19580_v0  ;;  %vm16707_vm12 = vcmp.lt.f32.partialorder %v5334_v21, 0.0004427343  ;;  %v6100_v1 = vadd.f32 1.0, %v6099_v34  ;;  %v19587_v8 = vld [vmem:[#allocation240_spill] sm:$0xff] }
 0x561   : > { %vm5200_vm13 = vcmp.gt.f32.partialorder %v19583_v20, 20.0  ;;  %v6238_v9 = vmul.f32 %v10042_v47, %v5902_v6  ;;  %v6473_v25 = vmul.f32 0.6931472, %v10048_v11  ;;  %v6102_v37 = vand.u32 2147483647, %v19575_v63  ;;  %v10050_v39 = vpop.eup %10049 }
 0x562   : > { %v5712_v26 = vadd.f32 1.0, %v19584_v41  ;;  %vm5968_vm14 = vcmp.gt.f32.partialorder %v19585_v48, 20.0  ;;  %10059 = vpow2.f32 %v6214_v16  ;;  %v5830_v32 = vmul.f32 1.442695, %v5807_v57 }
 0x563   : > { %v16716_v17 = vmul.f32 %v5871_v3, %v16012_v56  ;;  %v5715_v21 = vmul.f32 -0.5, %v19584_v41  ;;  %v6286_v34 = vadd.f32 %v16596_v22, %v6238_v9  ;;  %v6479_v47 = vsel %vm16700_vm11, %v6476_v51, %v6473_v25  ;;  %v16727_v56 = vpop.f32.mrb[252].mxu1  ;;  %v19589_v3 = vld [vmem:[#allocation451_spill] sm:$0xff]  ;;  %v19598_v25 = vld [vmem:[#allocation120_spill] sm:$0xff] }
 0x564   : > { %10061 = vlog2.f32 %v5712_v26  ;;  %v6480_v33 = vadd.f32 1.0, %v19586_v54  ;;  %v6559_v4 = vsel %vm6351_vm9, %v19574_v5, %v6479_v47  ;;  %v6101_v13 = vmul.f32 %v19575_v63, %v6100_v1  ;;  %v10052_v61 = vpop.eup %10051 }
 0x565   : > { %10063 = vpow2.f32 %v5830_v32  ;;  %v5716_v16 = vadd.f32 1.0, %v5715_v21  ;;  %v16730_v11 = vmul.f32 %v6286_v34, %v19587_v8  ;;  %v6622_v22 = vmul.f32 %v10050_v39, %v6286_v34  ;;  %v19592_v34 = vld [vmem:[#allocation450_spill] sm:$0xff]  ;;  %v19593_v8 = vld [vmem:[#allocation241_spill] sm:$0xff] }
 0x566   : > { %v6575_v51 = vmul.f32 %v16562_v12, %v6559_v4  ;;  %v6639_v57 = vmul.f32 %v6559_v4, %v19588_v58  ;;  %v10054_v0 = vpop.eup %10053  ;;  %v5471_v9 = vmul.f32 %v10052_v61, %v19589_v3  ;;  %vm16735_vm15 = vcmp.lt.f32.partialorder %v6102_v37, 0.0004427343  ;;  %v16757_v58 = vpop.f32.mrb[12].mxu0 }
 0x567   : > { %10065 = vlog2.f32 %v6480_v33  ;;  %v6483_v5 = vmul.f32 -0.5, %v19586_v54  ;;  %v10056_v63 = vpop.eup %10055  ;;  %v16741_v1 = vadd.f32 %v16643_v55, %v6622_v22  ;;  %v5330_v32 = vmul.f32 0.6931472, %v10054_v0  ;;  %v19595_v0 = vld [vmem:[#allocation243_spill] sm:$0xff] }
 0x568   : > { %v6598_v26 = vmul.f32 1.442695, %v6575_v51  ;;  %v16744_v39 = vmul.f32 %v6639_v57, %v16066_v52  ;;  %v16746_v21 = vpop.eup %10057  ;;  %vm5584_vm2 = vcmp.gt.f32.partialorder %v19592_v34, 20.0  ;;  %v5519_v37 = vadd.f32 %v16667_v30, %v5471_v9  ;;  %v19594_v52 = vld [vmem:[#allocation234_spill] sm:$0xff]  ;;  %v16759_v57 = vpop.f32.mrb[253].mxu1 }
 0x569   : > { %v6098_v47 = vmul.f32 0.6931472, %v10056_v63  ;;  %v5717_v33 = vmul.f32 %v19584_v41, %v5716_v16  ;;  %v5718_v4 = vand.u32 2147483647, %v19584_v41  ;;  %v5336_v55 = vsel %vm16707_vm12, %v5333_v60, %v5330_v32  ;;  %v19597_v16 = vld [vmem:[#allocation119_spill] sm:$0xff]  ;;  %v19599_v63 = vld [vmem:[#allocation496_spill] sm:$0xff] }
 0x56a   : > { %v6484_v61 = vadd.f32 1.0, %v6483_v5  ;;  %v5918_v22 = vmul.f32 %v5902_v6, %v19593_v8  ;;  %v6684_v51 = vmul.f32 %v16537_v50, %v19594_v52  ;;  %v16762_v30 = vmul.f32 %v5519_v37, %v19595_v0  ;;  %v19596_v6 = vld [vmem:[#allocation454_spill] sm:$0xff]  ;;  %v19600_v8 = vld [vmem:[#allocation35_spill] sm:$0xff] }
 0x56b   : > { %v5408_v41 = vsel %vm5200_vm13, %v19583_v20, %v5336_v55  ;;  %v6104_v60 = vsel %vm16735_vm15, %v6101_v13, %v6098_v47  ;;  %v6486_v36 = vand.u32 2147483647, %v19586_v54  ;;  %vm6352_vm3 = vcmp.gt.f32.partialorder %v19596_v6, 20.0 }
 0x56c   : > { %10067 = vpow2.f32 %v6598_v26  ;;  %v5424_v50 = vmul.f32 %v16562_v12, %v5408_v41  ;;  %v5488_v3 = vmul.f32 %v5408_v41, %v19597_v16  ;;  %v6176_v9 = vsel %vm5968_vm14, %v19585_v48, %v6104_v60  ;;  %7375 = vmatprep.mubr.f32.mxu1 %v5918_v22  ;;  %7510 = vmatprep.mubr.f32.mxu0 %v6684_v51  ;;  %v10060_v5 = vpop.eup %10059  ;;  %v19601_v22 = vld [vmem:[#allocation498_spill] sm:$0xff] }
 0x56d   : > { %v6192_v20 = vmul.f32 %v16562_v12, %v6176_v9  ;;  %v6256_v13 = vmul.f32 %v6176_v9, %v19598_v25  ;;  %v5337_v32 = vadd.f32 1.0, %v19599_v63  ;;  %v5340_v47 = vmul.f32 -0.5, %v19599_v63  ;;  %7376 = vmatmul.mubr.f32.gmra.mrb[44].mxu1 %v16673_v43  ;;  %7511 = vmatmul.mubr.f32.gmra.mrb[56].mxu0 %v16529_v14  ;;  %v19611_v25 = vld [vmem:[#allocation458_spill] sm:$0xff] }
 0x56e   : > { %v10062_v26 = vpop.eup %10061  ;;  %v5448_v55 = vmul.f32 1.442695, %v5424_v50  ;;  %v16783_v52 = vmul.f32 %v5488_v3, %v19600_v8  ;;  %v5343_v48 = vand.u32 2147483647, %v19599_v63  ;;  %v6105_v51 = vadd.f32 1.0, %v19601_v22 }
 0x56f   : > { %v10064_v0 = vpop.eup %10063  ;;  %v6216_v41 = vmul.f32 1.442695, %v6192_v20  ;;  %v16788_v60 = vmul.f32 %v6256_v13, %v16144_v62  ;;  %v5714_v16 = vmul.f32 0.6931472, %v10062_v26  ;;  %10069 = vlog2.f32 %v5337_v32  ;;  %v19604_v13 = vld [vmem:[#allocation121_spill] sm:$0xff] }
 0x570   : > { %v5855_v9 = vmul.f32 %v10064_v0, %v5519_v37  ;;  %10071 = vpow2.f32 %v5448_v55  ;;  %vm5719_vm4 = vcmp.lt.f32.partialorder %v5718_v4, 0.0004427343  ;;  %v5341_v14 = vadd.f32 1.0, %v5340_v47  ;;  %v19608_v26 = vld [vmem:[#allocation501_spill] sm:$0xff] }
 0x571   : > { %v10066_v43 = vpop.eup %10065  ;;  %v5720_v50 = vsel %vm5719_vm4, %v5717_v33, %v5714_v16  ;;  %v6485_v3 = vmul.f32 %v19586_v54, %v6484_v61  ;;  %vm16791_vm5 = vcmp.lt.f32.partialorder %v6486_v36, 0.0004427343  ;;  %v6108_v8 = vmul.f32 -0.5, %v19601_v22  ;;  %v16807_v36 = vpop.f32.mrb[13].mxu0 }
 0x572   : > { %v5903_v20 = vadd.f32 %v16716_v17, %v5855_v9  ;;  %10073 = vpow2.f32 %v6216_v41  ;;  %v5792_v62 = vsel %vm5584_vm2, %v19592_v34, %v5720_v50  ;;  %v6482_v37 = vmul.f32 0.6931472, %v10066_v43  ;;  %v19607_v17 = vld [vmem:[#allocation456_spill] sm:$0xff]  ;;  %v19609_v43 = vld [vmem:[#allocation122_spill] sm:$0xff] }
 0x573   : > { %v5808_v4 = vmul.f32 %v16562_v12, %v5792_v62  ;;  %v5872_v33 = vmul.f32 %v5792_v62, %v19604_v13  ;;  %vm16802_vm6 = vcmp.lt.f32.partialorder %v5343_v48, 0.0004427343  ;;  %10075 = vlog2.f32 %v6105_v51  ;;  %v19612_v62 = vld [vmem:[#allocation244_spill] sm:$0xff] }
 0x574   : > { %v6111_v61 = vand.u32 2147483647, %v19601_v22  ;;  %vm5201_vm7 = vcmp.gt.f32.partialorder %v19607_v17, 20.0  ;;  %v6239_v32 = vmul.f32 %v10060_v5, %v5903_v20  ;;  %v6488_v34 = vsel %vm16791_vm5, %v6485_v3, %v6482_v37 }
 0x575   : > { %v5342_v47 = vmul.f32 %v19599_v63, %v5341_v14  ;;  %v5721_v55 = vadd.f32 1.0, %v19608_v26  ;;  %v5832_v0 = vmul.f32 1.442695, %v5808_v4  ;;  %v16815_v48 = vmul.f32 %v5872_v33, %v16146_v10  ;;  %v19610_v10 = vld [vmem:[#allocation503_spill] sm:$0xff] }
 0x576   : > { %v6560_v51 = vsel %vm6352_vm3, %v19596_v6, %v6488_v34  ;;  %v6109_v41 = vadd.f32 1.0, %v6108_v8  ;;  %v10068_v16 = vpop.eup %10067  ;;  %v6287_v9 = vadd.f32 %v16691_v38, %v6239_v32  ;;  %v5724_v63 = vmul.f32 -0.5, %v19608_v26  ;;  %v16838_v34 = vpop.f32.mrb[254].mxu1 }
 0x577   : > { %v6576_v5 = vmul.f32 %v16562_v12, %v6560_v51  ;;  %v6640_v50 = vmul.f32 %v6560_v51, %v19609_v43  ;;  %10077 = vlog2.f32 %v5721_v55  ;;  %v5727_v14 = vand.u32 2147483647, %v19608_v26  ;;  %19615 = vst [vmem:[#allocation293_spill] sm:$0xff] %v16838_v34  ;;  %v16860_v34 = vpop.f32.mrb[255].mxu1 }
 0x578   : > { %10079 = vpow2.f32 %v5832_v0  ;;  %v6489_v3 = vadd.f32 1.0, %v19610_v10  ;;  %vm5969_vm8 = vcmp.gt.f32.partialorder %v19611_v25, 20.0  ;;  %v16828_v6 = vmul.f32 %v6287_v9, %v19612_v62  ;;  %19623 = vst [vmem:[#allocation328_spill] sm:$0xff] %v16860_v34 }
 0x579   : > { %v6623_v8 = vmul.f32 %v10068_v16, %v6287_v9  ;;  %v6600_v37 = vmul.f32 1.442695, %v6576_v5  ;;  %v16831_v38 = vmul.f32 %v6640_v50, %v16187_v28  ;;  %v10070_v4 = vpop.eup %10069  ;;  %vm16833_vm9 = vcmp.lt.f32.partialorder %v6111_v61, 0.0004427343  ;;  %v19618_v61 = vld [vmem:[#allocation461_spill] sm:$0xff]  ;;  %v19619_v9 = vld [vmem:[#allocation288_spill] sm:$0xff] }
 0x57a   : > { %v5725_v33 = vadd.f32 1.0, %v5724_v63  ;;  %10081 = vlog2.f32 %v6489_v3  ;;  %v6492_v32 = vmul.f32 -0.5, %v19610_v10  ;;  %v10072_v55 = vpop.eup %10071  ;;  %v5339_v51 = vmul.f32 0.6931472, %v10070_v4  ;;  %v19620_v50 = vld [vmem:[#allocation245_spill] sm:$0xff]  ;;  %v16858_v4 = vpop.f32.mrb[14].mxu0 }
 0x57b   : > { %v16841_v0 = vadd.f32 %v16744_v39, %v6623_v8  ;;  %v6110_v16 = vmul.f32 %v19601_v22, %v6109_v41  ;;  %vm16844_vm10 = vcmp.lt.f32.partialorder %v5727_v14, 0.0004427343  ;;  %vm5585_vm11 = vcmp.gt.f32.partialorder %v19618_v61, 20.0  ;;  %v19621_v22 = vld [vmem:[#allocation238_spill] sm:$0xff]  ;;  %v19622_v14 = vld [vmem:[#allocation505_spill] sm:$0xff]  ;;  %v16893_v13 = vpop.f32.mrb[15].mxu0 }
 0x57c   : > { %v5472_v5 = vmul.f32 %v10072_v55, %v19619_v9  ;;  %10083 = vpow2.f32 %v6600_v37  ;;  %v6495_v43 = vand.u32 2147483647, %v19610_v10  ;;  %v5919_v63 = vmul.f32 %v5903_v20, %v19620_v50  ;;  %v10074_v3 = vpop.eup %10073  ;;  %v19625_v9 = vld [vmem:[#allocation463_spill] sm:$0xff]  ;;  %19631 = vst [vmem:[#allocation330_spill] sm:$0xff] %v16893_v13 }
 0x57d   : > { %v5345_v39 = vsel %vm16802_vm6, %v5342_v47, %v5339_v51  ;;  %v5726_v62 = vmul.f32 %v19608_v26, %v5725_v33  ;;  %v6685_v41 = vmul.f32 %v16624_v45, %v19621_v22  ;;  %v5346_v8 = vadd.f32 1.0, %v19622_v14  ;;  %v10076_v37 = vpop.eup %10075  ;;  %v19624_v45 = vld [vmem:[#allocation123_spill] sm:$0xff] }
 0x57e   : > { %v5520_v55 = vadd.f32 %v16783_v52, %v5472_v5  ;;  %v5409_v20 = vsel %vm5201_vm7, %v19607_v17, %v5345_v39  ;;  %v6493_v54 = vadd.f32 1.0, %v6492_v32  ;;  %7380 = vmatprep.mubr.f32.mxu1 %v5919_v63  ;;  %v5349_v47 = vmul.f32 -0.5, %v19622_v14  ;;  %v19626_v52 = vld [vmem:[#allocation247_spill] sm:$0xff] }
 0x57f   : > { %v5425_v26 = vmul.f32 %v16562_v12, %v5409_v20  ;;  %v5489_v33 = vmul.f32 %v5409_v20, %v19624_v45  ;;  %v6107_v51 = vmul.f32 0.6931472, %v10076_v37  ;;  %7515 = vmatprep.mubr.f32.mxu0 %v6685_v41  ;;  %10085 = vlog2.f32 %v5346_v8  ;;  %7381 = vmatmul.mubr.f32.gmra.mrb[46].mxu1 %v16762_v30  ;;  %v19629_v50 = vld [vmem:[#allocation507_spill] sm:$0xff] }
 0x580   : > { %vm6353_vm12 = vcmp.gt.f32.partialorder %v19625_v9, 20.0  ;;  %v16872_v5 = vmul.f32 %v5520_v55, %v19626_v52  ;;  %vm16874_vm13 = vcmp.lt.f32.partialorder %v6495_v43, 0.0004427343  ;;  %v5350_v32 = vadd.f32 1.0, %v5349_v47  ;;  %7516 = vmatmul.mubr.f32.gmra.mrb[58].mxu0 %v16611_v15 }
 0x581   : > { %v6114_v63 = vadd.f32 1.0, %v19629_v50  ;;  %v10078_v39 = vpop.eup %10077  ;;  %v5450_v22 = vmul.f32 1.442695, %v5425_v26  ;;  %v16881_v41 = vmul.f32 %v5489_v33, %v16214_v44  ;;  %v6113_v30 = vsel %vm16833_vm9, %v6110_v16, %v6107_v51  ;;  %v19630_v26 = vld [vmem:[#allocation124_spill] sm:$0xff]  ;;  %v19632_v51 = vld [vmem:[#allocation467_spill] sm:$0xff] }
 0x582   : > { %v6117_v8 = vmul.f32 -0.5, %v19629_v50  ;;  %v10080_v37 = vpop.eup %10079  ;;  %v6177_v43 = vsel %vm5969_vm8, %v19611_v25, %v6113_v30  ;;  %v5723_v20 = vmul.f32 0.6931472, %v10078_v39  ;;  %v6494_v47 = vmul.f32 %v19610_v10, %v6493_v54 }
 0x583   : > { %v5352_v15 = vand.u32 2147483647, %v19622_v14  ;;  %v5856_v45 = vmul.f32 %v10080_v37, %v5520_v55  ;;  %10087 = vpow2.f32 %v5450_v22  ;;  %v6193_v44 = vmul.f32 %v16562_v12, %v6177_v43 }
 0x584   : > { %v6257_v33 = vmul.f32 %v6177_v43, %v19630_v26  ;;  %v10082_v16 = vpop.eup %10081  ;;  %vm5202_vm14 = vcmp.gt.f32.partialorder %v19632_v51, 20.0  ;;  %v5729_v52 = vsel %vm16844_vm10, %v5726_v62, %v5723_v20  ;;  %v5351_v25 = vmul.f32 %v19622_v14, %v5350_v32  ;;  %v19633_v43 = vld [vmem:[#allocation125_spill] sm:$0xff] }
 0x585   : > { %10089 = vlog2.f32 %v6114_v63  ;;  %v6118_v10 = vadd.f32 1.0, %v6117_v8  ;;  %v5904_v54 = vadd.f32 %v16815_v48, %v5856_v45  ;;  %v6218_v55 = vmul.f32 1.442695, %v6193_v44 }
 0x586   : > { %v16901_v39 = vmul.f32 %v6257_v33, %v16249_v35  ;;  %v5793_v22 = vsel %vm5585_vm11, %v19618_v61, %v5729_v52  ;;  %v10084_v30 = vpop.eup %10083  ;;  %v6491_v62 = vmul.f32 0.6931472, %v10082_v16  ;;  %vm16908_vm15 = vcmp.lt.f32.partialorder %v5352_v15, 0.0004427343  ;;  %v19636_v35 = vld [vmem:[#allocation509_spill] sm:$0xff]  ;;  %v19637_v15 = vld [vmem:[#allocation471_spill] sm:$0xff] }
 0x587   : > { %v5809_v37 = vmul.f32 %v16562_v12, %v5793_v22  ;;  %v5873_v28 = vmul.f32 %v5793_v22, %v19633_v43  ;;  %v6240_v32 = vmul.f32 %v10074_v3, %v5904_v54  ;;  %10091 = vpow2.f32 %v6218_v55  ;;  %v19638_v16 = vld [vmem:[#allocation126_spill] sm:$0xff]  ;;  %v19639_v52 = vld [vmem:[#allocation248_spill] sm:$0xff] }
 0x588   : > { %v6120_v48 = vand.u32 2147483647, %v19629_v50  ;;  %v5730_v63 = vadd.f32 1.0, %v19636_v35  ;;  %v6497_v61 = vsel %vm16874_vm13, %v6494_v47, %v6491_v62  ;;  %v5733_v45 = vmul.f32 -0.5, %v19636_v35 }
 0x589   : > { %v5834_v8 = vmul.f32 1.442695, %v5809_v37  ;;  %v16915_v20 = vmul.f32 %v5873_v28, %v16251_v23  ;;  %v10086_v44 = vpop.eup %10085  ;;  %vm5970_vm2 = vcmp.gt.f32.partialorder %v19637_v15, 20.0  ;;  %v6288_v26 = vadd.f32 %v16788_v60, %v6240_v32 }
 0x58a   : > { %v6561_v3 = vsel %vm6353_vm12, %v19625_v9, %v6497_v61  ;;  %v6119_v33 = vmul.f32 %v19629_v50, %v6118_v10  ;;  %10093 = vlog2.f32 %v5730_v63  ;;  %v5348_v47 = vmul.f32 0.6931472, %v10086_v44  ;;  %v19640_v50 = vld [vmem:[#allocation510_spill] sm:$0xff] }
 0x58b   : > { %10095 = vpow2.f32 %v5834_v8  ;;  %v6577_v23 = vmul.f32 %v16562_v12, %v6561_v3  ;;  %v6641_v17 = vmul.f32 %v6561_v3, %v19638_v16  ;;  %v16929_v55 = vmul.f32 %v6288_v26, %v19639_v52  ;;  %v19643_v61 = vld [vmem:[#allocation474_spill] sm:$0xff]  ;;  %v16955_v3 = vpop.f32.mrb[16].mxu0 }
 0x58c   : > { %v6624_v22 = vmul.f32 %v10084_v30, %v6288_v26  ;;  %v5734_v37 = vadd.f32 1.0, %v5733_v45  ;;  %v5736_v60 = vand.u32 2147483647, %v19636_v35  ;;  %v5354_v9 = vsel %vm16908_vm15, %v5351_v25, %v5348_v47  ;;  %v19644_v25 = vld [vmem:[#allocation318_spill] sm:$0xff]  ;;  %v16953_v26 = vpop.f32.mrb[0].mxu1 }
 0x58d   : > { %v6602_v43 = vmul.f32 1.442695, %v6577_v23  ;;  %v16933_v28 = vmul.f32 %v6641_v17, %v16288_v53  ;;  %v6498_v10 = vadd.f32 1.0, %v19640_v50  ;;  %v10088_v62 = vpop.eup %10087  ;;  %v5410_v30 = vsel %vm5202_vm14, %v19632_v51, %v5354_v9  ;;  %v16962_v16 = vpop.f32.mrb[1].mxu1 }
 0x58e   : > { %v16939_v32 = vadd.f32 %v16831_v38, %v6624_v22  ;;  %vm16944_vm3 = vcmp.lt.f32.partialorder %v6120_v48, 0.0004427343  ;;  %v6501_v53 = vmul.f32 -0.5, %v19640_v50  ;;  %vm5586_vm4 = vcmp.gt.f32.partialorder %v19643_v61, 20.0  ;;  %v19645_v38 = vld [vmem:[#allocation127_spill] sm:$0xff]  ;;  %v19648_v22 = vld [vmem:[#allocation249_spill] sm:$0xff] }
 0x58f   : > { %v10090_v8 = vpop.eup %10089  ;;  %v5473_v14 = vmul.f32 %v10088_v62, %v19644_v25  ;;  %10097 = vpow2.f32 %v6602_v43  ;;  %v5426_v45 = vmul.f32 %v16562_v12, %v5410_v30  ;;  %v5490_v44 = vmul.f32 %v5410_v30, %v19645_v38  ;;  %v16969_v9 = vpop.f32.mrb[2].mxu1  ;;  %v19650_v30 = vld [vmem:[#allocation242_spill] sm:$0xff]  ;;  %v19652_v25 = vld [vmem:[#allocation251_spill] sm:$0xff] }
 0x590   : > { %v6116_v51 = vmul.f32 0.6931472, %v10090_v8  ;;  %v5735_v48 = vmul.f32 %v19636_v35, %v5734_v37  ;;  %vm16958_vm5 = vcmp.lt.f32.partialorder %v5736_v60, 0.0004427343  ;;  %10099 = vlog2.f32 %v6498_v10  ;;  %v16971_v62 = vpop.f32.mrb[17].mxu0  ;;  %v16978_v8 = vpop.f32.mrb[3].mxu1 }
 0x591   : > { %v5521_v17 = vadd.f32 %v16881_v41, %v5473_v14  ;;  %v5452_v47 = vmul.f32 1.442695, %v5426_v45  ;;  %v16966_v52 = vmul.f32 %v5490_v44, %v16323_v40  ;;  %v5920_v43 = vmul.f32 %v5904_v54, %v19648_v22  ;;  %19649 = vst [vmem:[#allocation294_spill] sm:$0xff] %v16971_v62  ;;  %v10092_v35 = vpop.eup %10091  ;;  %v16980_v40 = vpop.f32.mrb[18].mxu0  ;;  %v19655_v44 = vld [vmem:[#allocation128_spill] sm:$0xff] }
 0x592   : > { %v6122_v37 = vsel %vm16944_vm3, %v6119_v33, %v6116_v51  ;;  %v6502_v60 = vadd.f32 1.0, %v6501_v53  ;;  %v6504_v10 = vand.u32 2147483647, %v19640_v50  ;;  %v6686_v41 = vmul.f32 %v16741_v1, %v19650_v30  ;;  %19651 = vst [vmem:[#allocation37_spill] sm:$0xff] %v16980_v40  ;;  %v19653_v33 = vld [vmem:[#allocation511_spill] sm:$0xff]  ;;  %v16989_v53 = vpop.f32.mrb[4].mxu1 }
 0x593   : > { %v16983_v54 = vmul.f32 %v5521_v17, %v19652_v25  ;;  %10101 = vpow2.f32 %v5452_v47  ;;  %v6178_v14 = vsel %vm5970_vm2, %v19637_v15, %v6122_v37  ;;  %7385 = vmatprep.mubr.f32.mxu1 %v5920_v43  ;;  %v5355_v63 = vadd.f32 1.0, %v19653_v33  ;;  %v16991_v45 = vpop.f32.mrb[19].mxu0  ;;  %v16998_v15 = vpop.f32.mrb[5].mxu1  ;;  %v19657_v25 = vld [vmem:[#allocation512_spill] sm:$0xff] }
 0x594   : > { %19654 = vst [vmem:[#allocation295_spill] sm:$0xff] %v16991_v45  ;;  %v10094_v1 = vpop.eup %10093  ;;  %v6194_v38 = vmul.f32 %v16562_v12, %v6178_v14  ;;  %v6258_v51 = vmul.f32 %v6178_v14, %v19655_v44  ;;  %7520 = vmatprep.mubr.f32.mxu0 %v6686_v41  ;;  %v5358_v22 = vmul.f32 -0.5, %v19653_v33  ;;  %v5361_v47 = vand.u32 2147483647, %v19653_v33  ;;  %7386 = vmatmul.mubr.f32.gmra.mrb[48].mxu1 %v16872_v5  ;;  %v17000_v43 = vpop.f32.mrb[20].mxu0 }
 0x595   : > { %19656 = vst [vmem:[#allocation332_spill] sm:$0xff] %v17000_v43  ;;  %v10096_v37 = vpop.eup %10095  ;;  %v5732_v30 = vmul.f32 0.6931472, %v10094_v1  ;;  %10103 = vlog2.f32 %v5355_v63  ;;  %v6123_v13 = vadd.f32 1.0, %v19657_v25  ;;  %v6126_v45 = vmul.f32 -0.5, %v19657_v25  ;;  %7521 = vmatmul.mubr.f32.gmra.mrb[60].mxu0 %v16730_v11  ;;  %v17005_v41 = vpop.f32.mrb[6].mxu1 }
 0x596   : > { %19658 = vst [vmem:[#allocation296_spill] sm:$0xff] %v17005_v41  ;;  %v17007_v14 = vpop.f32.mrb[21].mxu0  ;;  %v5857_v44 = vmul.f32 %v10096_v37, %v5521_v17  ;;  %v6220_v40 = vmul.f32 1.442695, %v6194_v38  ;;  %v17010_v5 = vmul.f32 %v6258_v51, %v16335_v24  ;;  %v5359_v34 = vadd.f32 1.0, %v5358_v22  ;;  %v17012_v43 = vpop.f32.mrb[7].mxu1 }
 0x597   : > { %19659 = vst [vmem:[#allocation38_spill] sm:$0xff] %v17007_v14  ;;  %v17014_v1 = vpop.f32.mrb[22].mxu0  ;;  %v19661_v63 = vld [vmem:[#allocation475_spill] sm:$0xff]  ;;  %v5738_v62 = vsel %vm16958_vm5, %v5735_v48, %v5732_v30  ;;  %10105 = vlog2.f32 %v6123_v13  ;;  %v6127_v11 = vadd.f32 1.0, %v6126_v45  ;;  %v17019_v41 = vpop.f32.mrb[8].mxu1  ;;  %v6503_v38 = vmul.f32 %v19640_v50, %v6502_v60  ;;  %v19673_v60 = vld [vmem:[#allocation478_spill] sm:$0xff] }
 0x598   : > { %19660 = vst [vmem:[#allocation160_spill] sm:$0xff] %v17014_v1  ;;  %vm6354_vm6 = vcmp.gt.f32.partialorder %v19661_v63, 20.0  ;;  %19662 = vst [vmem:[#allocation297_spill] sm:$0xff] %v17019_v41  ;;  %v17021_v14 = vpop.f32.mrb[23].mxu0  ;;  %v17024_v17 = vadd.f32 %v16915_v20, %v5857_v44  ;;  %v5794_v24 = vsel %vm5586_vm4, %v19643_v61, %v5738_v62  ;;  %vm17030_vm7 = vcmp.lt.f32.partialorder %v6504_v10, 0.0004427343 }
 0x599   : > { %19663 = vst [vmem:[#allocation163_spill] sm:$0xff] %v17021_v14  ;;  %v17034_v48 = vpop.f32.mrb[9].mxu1  ;;  %v17036_v13 = vpop.f32.mrb[24].mxu0  ;;  %10107 = vpow2.f32 %v6220_v40  ;;  %v5810_v45 = vmul.f32 %v16562_v12, %v5794_v24  ;;  %v19668_v20 = vld [vmem:[#allocation129_spill] sm:$0xff]  ;;  %vm17040_vm8 = vcmp.lt.f32.partialorder %v5361_v47, 0.0004427343  ;;  %v5360_v30 = vmul.f32 %v19653_v33, %v5359_v34 }
 0x59a   : > { %19666 = vst [vmem:[#allocation161_spill] sm:$0xff] %v17034_v48  ;;  %19667 = vst [vmem:[#allocation154_spill] sm:$0xff] %v17036_v13  ;;  %v10098_v23 = vpop.eup %10097  ;;  %v5874_v22 = vmul.f32 %v5794_v24, %v19668_v20  ;;  %v17044_v61 = vpop.f32.mrb[10].mxu1  ;;  %vm5203_vm9 = vcmp.gt.f32.partialorder %v19673_v60, 20.0  ;;  %v6241_v10 = vmul.f32 %v10092_v35, %v17024_v17  ;;  %v19674_v40 = vld [vmem:[#allocation513_spill] sm:$0xff]  ;;  %v17061_v1 = vmul.f32 %v19657_v25, %v6127_v11  ;;  %v19684_v41 = vld [vmem:[#allocation155_spill] sm:$0xff] }
 0x59b   : > { %19671 = vst [vmem:[#allocation39_spill] sm:$0xff] %v17044_v61  ;;  %v17046_v50 = vpop.f32.mrb[25].mxu0  ;;  %v10100_v62 = vpop.eup %10099  ;;  %v5739_v44 = vadd.f32 1.0, %v19674_v40  ;;  %v5742_v13 = vmul.f32 -0.5, %v19674_v40  ;;  %v5836_v20 = vmul.f32 1.442695, %v5810_v45 }
 0x59c   : > { %19672 = vst [vmem:[#allocation334_spill] sm:$0xff] %v17046_v50  ;;  %v17053_v24 = vpop.f32.mrb[11].mxu1  ;;  %v17055_v47 = vpop.f32.mrb[26].mxu0  ;;  %v17058_v14 = vmul.f32 %v5874_v22, %v16337_v27  ;;  %v6500_v50 = vmul.f32 0.6931472, %v10100_v62  ;;  %v19677_v61 = vld [vmem:[#allocation480_spill] sm:$0xff]  ;;  %v6289_v34 = vadd.f32 %v16901_v39, %v6241_v10 }
 0x59d   : > { %19675 = vst [vmem:[#allocation40_spill] sm:$0xff] %v17053_v24  ;;  %19676 = vst [vmem:[#allocation41_spill] sm:$0xff] %v17055_v47  ;;  %vm5971_vm10 = vcmp.gt.f32.partialorder %v19677_v61, 20.0  ;;  %v6129_v35 = vand.u32 2147483647, %v19657_v25  ;;  %10109 = vlog2.f32 %v5739_v44  ;;  %v17067_v24 = vpop.f32.mrb[12].mxu1  ;;  %v10102_v45 = vpop.eup %10101 }
 0x59e   : > { %v5745_v33 = vand.u32 2147483647, %v19674_v40  ;;  %19678 = vst [vmem:[#allocation489_spill] sm:$0xff] %v17067_v24  ;;  %v17069_v47 = vpop.f32.mrb[27].mxu0  ;;  %10111 = vpow2.f32 %v5836_v20  ;;  %v6506_v27 = vsel %vm17030_vm7, %v6503_v38, %v6500_v50  ;;  %v5743_v11 = vadd.f32 1.0, %v5742_v13  ;;  %v19680_v22 = vld [vmem:[#allocation514_spill] sm:$0xff] }
 0x59f   : > { %19679 = vst [vmem:[#allocation336_spill] sm:$0xff] %v17069_v47  ;;  %v6507_v62 = vadd.f32 1.0, %v19680_v22  ;;  %v17074_v48 = vpop.f32.mrb[13].mxu1  ;;  %v17076_v39 = vpop.f32.mrb[28].mxu0  ;;  %v19683_v25 = vld [vmem:[#allocation252_spill] sm:$0xff]  ;;  %v6625_v44 = vmul.f32 %v10098_v23, %v6289_v34  ;;  %v5474_v24 = vmul.f32 %v10102_v45, %v19684_v41  ;;  %v6562_v20 = vsel %vm6354_vm6, %v19661_v63, %v6506_v27  ;;  %v19686_v50 = vld [vmem:[#allocation130_spill] sm:$0xff] }
 0x5a0   : > { %19681 = vst [vmem:[#allocation298_spill] sm:$0xff] %v17074_v48  ;;  %19682 = vst [vmem:[#allocation42_spill] sm:$0xff] %v17076_v39  ;;  %v17079_v10 = vmul.f32 %v6289_v34, %v19683_v25  ;;  %v17085_v47 = vpop.f32.mrb[14].mxu1  ;;  %v17087_v38 = vpop.f32.mrb[29].mxu0  ;;  %v6578_v13 = vmul.f32 %v16562_v12, %v6562_v20  ;;  %v6642_v48 = vmul.f32 %v6562_v20, %v19686_v50  ;;  %v6510_v25 = vmul.f32 -0.5, %v19680_v22  ;;  %v19693_v50 = vld [vmem:[#allocation482_spill] sm:$0xff] }
 0x5a1   : > { %19685 = vst [vmem:[#allocation490_spill] sm:$0xff] %v17087_v38  ;;  %v10104_v51 = vpop.eup %10103  ;;  %10113 = vlog2.f32 %v6507_v62  ;;  %v17092_v39 = vpop.f32.mrb[15].mxu1  ;;  %v17097_v41 = vadd.f32 %v16933_v28, %v6625_v44  ;;  %v5522_v63 = vadd.f32 %v16966_v52, %v5474_v24  ;;  %vm17100_vm11 = vcmp.lt.f32.partialorder %v6129_v35, 0.0004427343  ;;  %v19696_v52 = vld [vmem:[#allocation253_spill] sm:$0xff] }
 0x5a2   : > { %19687 = vst [vmem:[#allocation338_spill] sm:$0xff] %v17092_v39  ;;  %v17094_v23 = vpop.f32.mrb[30].mxu0  ;;  %v5357_v34 = vmul.f32 0.6931472, %v10104_v51  ;;  %v17104_v27 = vpop.f32.mrb[16].mxu1  ;;  %vm5587_vm12 = vcmp.gt.f32.partialorder %v19693_v50, 20.0  ;;  %v5921_v24 = vmul.f32 %v17024_v17, %v19696_v52 }
 0x5a3   : > { %19688 = vst [vmem:[#allocation340_spill] sm:$0xff] %v17094_v23  ;;  %19691 = vst [vmem:[#allocation164_spill] sm:$0xff] %v17104_v27  ;;  %v17106_v20 = vpop.f32.mrb[31].mxu0  ;;  %v10106_v62 = vpop.eup %10105  ;;  %v6604_v38 = vmul.f32 1.442695, %v6578_v13  ;;  %v17110_v23 = vmul.f32 %v6642_v48, %v16389_v29  ;;  %v19698_v51 = vld [vmem:[#allocation255_spill] sm:$0xff]  ;;  %v5744_v29 = vmul.f32 %v19674_v40, %v5743_v11 }
 0x5a4   : > { %19692 = vst [vmem:[#allocation299_spill] sm:$0xff] %v17106_v20  ;;  %vm17112_vm13 = vcmp.lt.f32.partialorder %v5745_v33, 0.0004427343  ;;  %v17118_v35 = vpop.f32.mrb[17].mxu1  ;;  %v17120_v44 = vpop.f32.mrb[32].mxu0  ;;  %v17123_v20 = vmul.f32 %v5522_v63, %v19698_v51  ;;  %v5363_v13 = vsel %vm17040_vm8, %v5360_v30, %v5357_v34  ;;  %v6511_v52 = vadd.f32 1.0, %v6510_v25  ;;  %7390 = vmatprep.mubr.f32.mxu1 %v5921_v24 }
 0x5a5   : > { %19697 = vst [vmem:[#allocation165_spill] sm:$0xff] %v17120_v44  ;;  %v6125_v27 = vmul.f32 0.6931472, %v10106_v62  ;;  %v17128_v48 = vpop.f32.mrb[18].mxu1  ;;  %v17130_v33 = vpop.f32.mrb[33].mxu0  ;;  %v5411_v17 = vsel %vm5203_vm9, %v19673_v60, %v5363_v13  ;;  %v19701_v51 = vld [vmem:[#allocation246_spill] sm:$0xff]  ;;  %7391 = vmatmul.mubr.f32.gmra.mrb[50].mxu1 %v16983_v54  ;;  %10115 = vpow2.f32 %v6604_v38 }
 0x5a6   : > { %19699 = vst [vmem:[#allocation158_spill] sm:$0xff] %v17128_v48  ;;  %19700 = vst [vmem:[#allocation43_spill] sm:$0xff] %v17130_v33  ;;  %v10108_v39 = vpop.eup %10107  ;;  %v6513_v44 = vand.u32 2147483647, %v19680_v22  ;;  %v6687_v37 = vmul.f32 %v16841_v0, %v19701_v51  ;;  %v17138_v30 = vpop.f32.mrb[19].mxu1  ;;  %v19704_v40 = vld [vmem:[#allocation484_spill] sm:$0xff]  ;;  %v5427_v11 = vmul.f32 %v16562_v12, %v5411_v17 }
 0x5a7   : > { %19702 = vst [vmem:[#allocation300_spill] sm:$0xff] %v17138_v30  ;;  %v17140_v34 = vpop.f32.mrb[34].mxu0  ;;  %vm6355_vm14 = vcmp.gt.f32.partialorder %v19704_v40, 20.0  ;;  %v19705_v62 = vld [vmem:[#allocation131_spill] sm:$0xff]  ;;  %v6131_v60 = vsel %vm17100_vm11, %v17061_v1, %v6125_v27  ;;  %v17150_v24 = vpop.f32.mrb[20].mxu1 }
 0x5a8   : > { %19703 = vst [vmem:[#allocation342_spill] sm:$0xff] %v17140_v34  ;;  %v5491_v33 = vmul.f32 %v5411_v17, %v19705_v62  ;;  %v19706_v25 = vld [vmem:[#allocation515_spill] sm:$0xff]  ;;  %19707 = vst [vmem:[#allocation344_spill] sm:$0xff] %v17150_v24  ;;  %v17152_v0 = vpop.f32.mrb[35].mxu0  ;;  %v6179_v51 = vsel %vm5971_vm10, %v19677_v61, %v6131_v60  ;;  %7525 = vmatprep.mubr.f32.mxu0 %v6687_v37  ;;  %v19709_v17 = vld [vmem:[#allocation517_spill] sm:$0xff]  ;;  %v17159_v45 = vpop.f32.mrb[21].mxu1 }
 0x5a9   : > { %v5364_v13 = vadd.f32 1.0, %v19706_v25  ;;  %19708 = vst [vmem:[#allocation301_spill] sm:$0xff] %v17152_v0  ;;  %v5367_v12 = vmul.f32 -0.5, %v19706_v25  ;;  %v6132_v62 = vadd.f32 1.0, %v19709_v17  ;;  %19710 = vst [vmem:[#allocation167_spill] sm:$0xff] %v17159_v45  ;;  %v17161_v1 = vpop.f32.mrb[36].mxu0  ;;  %v10110_v27 = vpop.eup %10109  ;;  %7526 = vmatmul.mubr.f32.gmra.mrb[62].mxu0 %v16828_v6 }
 0x5aa   : > { %19711 = vst [vmem:[#allocation346_spill] sm:$0xff] %v17161_v1  ;;  %v5454_v54 = vmul.f32 1.442695, %v5427_v11  ;;  %v17164_v34 = vmul.f32 %v5491_v33, %v16425_v49  ;;  %v17169_v38 = vld [vmem:[%s17997_s5] ss:$0 sm:$0xff]  ;;  %v17174_v0 = vpop.f32.mrb[22].mxu1  ;;  %v10112_v1 = vpop.eup %10111  ;;  %v6512_v49 = vmul.f32 %v19680_v22, %v6511_v52 }
 0x5ab   : > { %v6195_v61 = vmul.f32 %v17169_v38, %v6179_v51  ;;  %v19712_v37 = vld [vmem:[#allocation132_spill] sm:$0xff]  ;;  %v17176_v45 = vpop.f32.mrb[37].mxu0  ;;  %v5741_v11 = vmul.f32 0.6931472, %v10110_v27  ;;  %10117 = vlog2.f32 %v5364_v13  ;;  %v5370_v33 = vand.u32 2147483647, %v19706_v25  ;;  %v10114_v27 = vpop.eup %10113 }
 0x5ac   : > { %v6259_v60 = vmul.f32 %v6179_v51, %v19712_v37  ;;  %19713 = vst [vmem:[#allocation44_spill] sm:$0xff] %v17176_v45  ;;  %v17180_v24 = vpop.f32.mrb[23].mxu1  ;;  %v5858_v30 = vmul.f32 %v10112_v1, %v5522_v63  ;;  %10119 = vpow2.f32 %v5454_v54  ;;  %vm17185_vm15 = vcmp.lt.f32.partialorder %v6513_v44, 0.0004427343  ;;  %v17191_v37 = vpop.f32.mrb[38].mxu0  ;;  %v19729_v6 = vld [vmem:[#allocation134_spill] sm:$0xff] }
 0x5ad   : > { %19714 = vst [vmem:[#allocation302_spill] sm:$0xff] %v17180_v24  ;;  %v17189_v51 = vpop.f32.mrb[24].mxu1  ;;  %19718 = vst [vmem:[#allocation168_spill] sm:$0xff] %v17191_v37  ;;  %v5747_v22 = vsel %vm17112_vm13, %v5744_v29, %v5741_v11  ;;  %v5368_v52 = vadd.f32 1.0, %v5367_v12  ;;  %10121 = vlog2.f32 %v6132_v62  ;;  %v6135_v63 = vmul.f32 -0.5, %v19709_v17  ;;  %v19722_v29 = vld [vmem:[#allocation133_spill] sm:$0xff] }
 0x5ae   : > { %v17183_v48 = vmul.f32 %v6259_v60, %v16456_v18  ;;  %19717 = vst [vmem:[#allocation303_spill] sm:$0xff] %v17189_v51  ;;  %v17196_v13 = vpop.f32.mrb[25].mxu1  ;;  %v17198_v18 = vpop.f32.mrb[39].mxu0  ;;  %v5906_v44 = vadd.f32 %v17058_v14, %v5858_v30  ;;  %v6222_v1 = vmul.f32 1.442695, %v6195_v61  ;;  %v5795_v54 = vsel %vm5587_vm12, %v19693_v50, %v5747_v22  ;;  %v19726_v14 = vld [vmem:[#allocation486_spill] sm:$0xff] }
 0x5af   : > { %19719 = vst [vmem:[#allocation45_spill] sm:$0xff] %v17196_v13  ;;  %19720 = vst [vmem:[#allocation46_spill] sm:$0xff] %v17198_v18  ;;  %v6509_v60 = vmul.f32 0.6931472, %v10114_v27  ;;  %v17204_v37 = vpop.f32.mrb[26].mxu1  ;;  %v5811_v28 = vmul.f32 %v17169_v38, %v5795_v54  ;;  %v5875_v12 = vmul.f32 %v5795_v54, %v19722_v29  ;;  %v6136_v11 = vadd.f32 1.0, %v6135_v63 }
 0x5b0   : > { %19721 = vst [vmem:[#allocation304_spill] sm:$0xff] %v17204_v37  ;;  %vm17208_vm2 = vcmp.lt.f32.partialorder %v5370_v33, 0.0004427343  ;;  %v17212_v18 = vpop.f32.mrb[27].mxu1  ;;  %vm5204_vm3 = vcmp.gt.f32.partialorder %v19726_v14, 20.0  ;;  %v6242_v30 = vmul.f32 %v10108_v39, %v5906_v44  ;;  %v19727_v27 = vld [vmem:[#allocation521_spill] sm:$0xff]  ;;  %10123 = vpow2.f32 %v6222_v1 }
 0x5b1   : > { %19725 = vst [vmem:[#allocation348_spill] sm:$0xff] %v17212_v18  ;;  %v6515_v50 = vsel %vm17185_vm15, %v6512_v49, %v6509_v60  ;;  %v6138_v61 = vand.u32 2147483647, %v19709_v17  ;;  %v5751_v22 = vmul.f32 -0.5, %v19727_v27  ;;  %v5838_v37 = vmul.f32 1.442695, %v5811_v28  ;;  %v10116_v18 = vpop.eup %10115 }
 0x5b2   : > { %v17220_v54 = vmul.f32 %v5875_v12, %v16458_v31  ;;  %v6563_v33 = vsel %vm6355_vm14, %v19704_v40, %v6515_v50  ;;  %v5748_v63 = vadd.f32 1.0, %v19727_v27  ;;  %v19728_v29 = vld [vmem:[#allocation488_spill] sm:$0xff]  ;;  %v6290_v39 = vadd.f32 %v17010_v5, %v6242_v30  ;;  %v19730_v12 = vld [vmem:[#allocation523_spill] sm:$0xff]  ;;  %v19743_v30 = vld [vmem:[#allocation493_spill] sm:$0xff] }
 0x5b3   : > { %vm5972_vm4 = vcmp.gt.f32.partialorder %v19728_v29, 20.0  ;;  %v6579_v49 = vmul.f32 %v17169_v38, %v6563_v33  ;;  %v6643_v60 = vmul.f32 %v6563_v33, %v19729_v6  ;;  %10125 = vpow2.f32 %v5838_v37  ;;  %v19731_v13 = vld [vmem:[#allocation256_spill] sm:$0xff]  ;;  %v17244_v37 = vpop.f32.mrb[28].mxu1 }
 0x5b4   : > { %v5369_v31 = vmul.f32 %v19706_v25, %v5368_v52  ;;  %v5752_v28 = vadd.f32 1.0, %v5751_v22  ;;  %v6516_v45 = vadd.f32 1.0, %v19730_v12  ;;  %v17233_v40 = vmul.f32 %v6290_v39, %v19731_v13  ;;  %v17246_v52 = vpop.f32.mrb[40].mxu0  ;;  %v19736_v33 = vld [vmem:[#allocation152_spill] sm:$0xff] }
 0x5b5   : > { %v6626_v50 = vmul.f32 %v10116_v18, %v6290_v39  ;;  %v6606_v51 = vmul.f32 1.442695, %v6579_v49  ;;  %v17236_v24 = vmul.f32 %v6643_v60, %v16497_v59  ;;  %v10118_v5 = vpop.eup %10117  ;;  %v6137_v1 = vmul.f32 %v19709_v17, %v6136_v11  ;;  %19734 = vst [vmem:[#allocation47_spill] sm:$0xff] %v17246_v52  ;;  %v17252_v17 = vpop.f32.mrb[29].mxu1  ;;  %v19737_v49 = vld [vmem:[#allocation257_spill] sm:$0xff] }
 0x5b6   : > { %vm17239_vm5 = vcmp.lt.f32.partialorder %v6138_v61, 0.0004427343  ;;  %10127 = vlog2.f32 %v5748_v63  ;;  %v6519_v25 = vmul.f32 -0.5, %v19730_v12  ;;  %v10120_v13 = vpop.eup %10119  ;;  %v5366_v59 = vmul.f32 0.6931472, %v10118_v5  ;;  %v17254_v11 = vpop.f32.mrb[41].mxu0 }
 0x5b7   : > { %v17249_v18 = vadd.f32 %v17110_v23, %v6626_v50  ;;  %10129 = vpow2.f32 %v6606_v51  ;;  %v5754_v22 = vand.u32 2147483647, %v19727_v27  ;;  %19735 = vst [vmem:[#allocation171_spill] sm:$0xff] %v17254_v11  ;;  %v10122_v61 = vpop.eup %10121  ;;  %v5475_v63 = vmul.f32 %v10120_v13, %v19736_v33  ;;  %v19738_v50 = vld [vmem:[#allocation250_spill] sm:$0xff] }
 0x5b8   : > { %v5753_v39 = vmul.f32 %v19727_v27, %v5752_v28  ;;  %10131 = vlog2.f32 %v6516_v45  ;;  %v5922_v6 = vmul.f32 %v5906_v44, %v19737_v49  ;;  %v5372_v23 = vsel %vm17208_vm2, %v5369_v31, %v5366_v59  ;;  %v19739_v45 = vld [vmem:[#allocation524_spill] sm:$0xff]  ;;  %v19741_v31 = vld [vmem:[#allocation135_spill] sm:$0xff] }
 0x5b9   : > { %v6134_v60 = vmul.f32 0.6931472, %v10122_v61  ;;  %v6522_v51 = vand.u32 2147483647, %v19730_v12  ;;  %v6688_v5 = vmul.f32 %v16939_v32, %v19738_v50  ;;  %v5523_v52 = vadd.f32 %v17164_v34, %v5475_v63  ;;  %v19740_v44 = vld [vmem:[#allocation492_spill] sm:$0xff]  ;;  %v19742_v34 = vld [vmem:[#allocation259_spill] sm:$0xff] }
 0x5ba   : > { %v5412_v13 = vsel %vm5204_vm3, %v19726_v14, %v5372_v23  ;;  %v6520_v33 = vadd.f32 1.0, %v6519_v25  ;;  %7395 = vmatprep.mubr.f32.mxu1 %v5922_v6  ;;  %v5373_v27 = vadd.f32 1.0, %v19739_v45  ;;  %vm5588_vm6 = vcmp.gt.f32.partialorder %v19740_v44, 20.0  ;;  %v10124_v63 = vpop.eup %10123  ;;  %v19744_v49 = vld [vmem:[#allocation36_spill] sm:$0xff] }
 0x5bb   : > { %v5428_v62 = vmul.f32 %v17169_v38, %v5412_v13  ;;  %v5492_v28 = vmul.f32 %v5412_v13, %v19741_v31  ;;  %v6140_v59 = vsel %vm17239_vm5, %v6137_v1, %v6134_v60  ;;  %7530 = vmatprep.mubr.f32.mxu0 %v6688_v5  ;;  %v5376_v32 = vmul.f32 -0.5, %v19739_v45  ;;  %7396 = vmatmul.mubr.f32.gmra.mrb[52].mxu1 %v17123_v20  ;;  %v19745_v23 = vld [vmem:[#allocation136_spill] sm:$0xff]  ;;  %v19748_v13 = vld [vmem:[#allocation525_spill] sm:$0xff] }
 0x5bc   : > { %v17277_v14 = vmul.f32 %v5523_v52, %v19742_v34  ;;  %v6180_v25 = vsel %vm5972_vm4, %v19728_v29, %v6140_v59  ;;  %10133 = vlog2.f32 %v5373_v27  ;;  %v5379_v61 = vand.u32 2147483647, %v19739_v45  ;;  %7531 = vmatmul.mubr.f32.gmra.mrb[64].mxu0 %v16929_v55  ;;  %v19757_v5 = vld [vmem:[#allocation137_spill] sm:$0xff] }
 0x5bd   : > { %vm6356_vm7 = vcmp.gt.f32.partialorder %v19743_v30, 20.0  ;;  %v5456_v1 = vmul.f32 1.442695, %v5428_v62  ;;  %v17286_v6 = vmul.f32 %v5492_v28, %v19744_v49  ;;  %v6196_v20 = vmul.f32 %v17169_v38, %v6180_v25  ;;  %v10126_v50 = vpop.eup %10125 }
 0x5be   : > { %v6260_v60 = vmul.f32 %v6180_v25, %v19745_v23  ;;  %vm17290_vm8 = vcmp.lt.f32.partialorder %v5754_v22, 0.0004427343  ;;  %v5377_v29 = vadd.f32 1.0, %v5376_v32  ;;  %v6141_v27 = vadd.f32 1.0, %v19748_v13  ;;  %v19759_v25 = vld [vmem:[#allocation138_spill] sm:$0xff] }
 0x5bf   : > { %v6144_v55 = vmul.f32 -0.5, %v19748_v13  ;;  %v5859_v31 = vmul.f32 %v10126_v50, %v5523_v52  ;;  %10135 = vpow2.f32 %v5456_v1  ;;  %v6224_v62 = vmul.f32 1.442695, %v6196_v20  ;;  %v19753_v1 = vld [vmem:[#allocation526_spill] sm:$0xff] }
 0x5c0   : > { %v17297_v28 = vmul.f32 %v6260_v60, %v16555_v19  ;;  %v10128_v59 = vpop.eup %10127  ;;  %v6521_v34 = vmul.f32 %v19730_v12, %v6520_v33  ;;  %vm17300_vm9 = vcmp.lt.f32.partialorder %v6522_v51, 0.0004427343  ;;  %10137 = vlog2.f32 %v6141_v27  ;;  %v19754_v60 = vld [vmem:[#allocation495_spill] sm:$0xff] }
 0x5c1   : > { %v6145_v22 = vadd.f32 1.0, %v6144_v55  ;;  %v10130_v32 = vpop.eup %10129  ;;  %v5907_v49 = vadd.f32 %v17220_v54, %v5859_v31  ;;  %v5750_v23 = vmul.f32 0.6931472, %v10128_v59  ;;  %vm17305_vm10 = vcmp.lt.f32.partialorder %v5379_v61, 0.0004427343 }
 0x5c2   : > { %v5757_v19 = vadd.f32 1.0, %v19753_v1  ;;  %v10132_v20 = vpop.eup %10131  ;;  %vm5205_vm11 = vcmp.gt.f32.partialorder %v19754_v60, 20.0  ;;  %10139 = vpow2.f32 %v6224_v62  ;;  %v5378_v12 = vmul.f32 %v19739_v45, %v5377_v29  ;;  %v19755_v62 = vld [vmem:[#allocation527_spill] sm:$0xff]  ;;  %v19756_v29 = vld [vmem:[#allocation497_spill] sm:$0xff] }
 0x5c3   : > { %v6147_v51 = vand.u32 2147483647, %v19748_v13  ;;  %v5760_v33 = vmul.f32 -0.5, %v19753_v1  ;;  %v6243_v50 = vmul.f32 %v10124_v63, %v5907_v49  ;;  %v5756_v54 = vsel %vm17290_vm8, %v5753_v39, %v5750_v23 }
 0x5c4   : > { %v6518_v61 = vmul.f32 0.6931472, %v10132_v20  ;;  %10141 = vlog2.f32 %v5757_v19  ;;  %v5796_v27 = vsel %vm5588_vm6, %v19740_v44, %v5756_v54  ;;  %v6146_v55 = vmul.f32 %v19748_v13, %v6145_v22  ;;  %v19758_v20 = vld [vmem:[#allocation260_spill] sm:$0xff] }
 0x5c5   : > { %v5763_v31 = vand.u32 2147483647, %v19753_v1  ;;  %v6525_v45 = vadd.f32 1.0, %v19755_v62  ;;  %vm5973_vm12 = vcmp.gt.f32.partialorder %v19756_v29, 20.0  ;;  %v6291_v59 = vadd.f32 %v17183_v48, %v6243_v50 }
 0x5c6   : > { %v5812_v63 = vmul.f32 %v17169_v38, %v5796_v27  ;;  %v5876_v39 = vmul.f32 %v5796_v27, %v19757_v5  ;;  %v6524_v23 = vsel %vm17300_vm9, %v6521_v34, %v6518_v61  ;;  %v10134_v19 = vpop.eup %10133  ;;  %v5761_v13 = vadd.f32 1.0, %v5760_v33  ;;  %v17338_v27 = vpop.f32.mrb[30].mxu1 }
 0x5c7   : > { %v6564_v44 = vsel %vm6356_vm7, %v19743_v30, %v6524_v23  ;;  %10143 = vlog2.f32 %v6525_v45  ;;  %v6528_v22 = vmul.f32 -0.5, %v19755_v62  ;;  %v17333_v54 = vmul.f32 %v6291_v59, %v19758_v20  ;;  %v17346_v33 = vpop.f32.mrb[42].mxu0  ;;  %v17348_v45 = vpop.f32.mrb[31].mxu1  ;;  %v19773_v30 = vld [vmem:[#allocation140_spill] sm:$0xff] }
 0x5c8   : > { %v6627_v48 = vmul.f32 %v10130_v32, %v6291_v59  ;;  %v5840_v50 = vmul.f32 1.442695, %v5812_v63  ;;  %v17336_v11 = vmul.f32 %v5876_v39, %v16557_v42  ;;  %v6580_v34 = vmul.f32 %v17169_v38, %v6564_v44  ;;  %19762 = vst [vmem:[#allocation48_spill] sm:$0xff] %v17346_v33  ;;  %v19763_v59 = vld [vmem:[#allocation499_spill] sm:$0xff]  ;;  %v19766_v39 = vld [vmem:[#allocation261_spill] sm:$0xff]  ;;  %v17359_v23 = vpop.f32.mrb[43].mxu0 }
 0x5c9   : > { %v6644_v61 = vmul.f32 %v6564_v44, %v19759_v25  ;;  %v5375_v5 = vmul.f32 0.6931472, %v10134_v19  ;;  %vm17342_vm13 = vcmp.lt.f32.partialorder %v6147_v51, 0.0004427343  ;;  %v10136_v32 = vpop.eup %10135  ;;  %vm5589_vm14 = vcmp.gt.f32.partialorder %v19763_v59, 20.0  ;;  %v19767_v44 = vld [vmem:[#allocation32_spill] sm:$0xff] }
 0x5ca   : > { %v17352_v42 = vadd.f32 %v17236_v24, %v6627_v48  ;;  %10145 = vpow2.f32 %v5840_v50  ;;  %vm17354_vm15 = vcmp.lt.f32.partialorder %v5763_v31, 0.0004427343  ;;  %v5923_v51 = vmul.f32 %v5907_v49, %v19766_v39  ;;  %v10138_v19 = vpop.eup %10137  ;;  %v19768_v48 = vld [vmem:[#allocation500_spill] sm:$0xff] }
 0x5cb   : > { %v5476_v20 = vmul.f32 %v10136_v32, %v19767_v44  ;;  %v17363_v25 = vmul.f32 %v6644_v61, %v16616_v2  ;;  %v5381_v33 = vsel %vm17305_vm10, %v5378_v12, %v5375_v5  ;;  %v5762_v24 = vmul.f32 %v19753_v1, %v5761_v13  ;;  %v19769_v12 = vld [vmem:[#allocation139_spill] sm:$0xff] }
 0x5cc   : > { %vm6357_vm2 = vcmp.gt.f32.partialorder %v19768_v48, 20.0  ;;  %v5413_v31 = vsel %vm5205_vm11, %v19754_v60, %v5381_v33  ;;  %v6143_v49 = vmul.f32 0.6931472, %v10138_v19  ;;  %v6529_v50 = vadd.f32 1.0, %v6528_v22  ;;  %7400 = vmatprep.mubr.f32.mxu1 %v5923_v51  ;;  %v10140_v32 = vpop.eup %10139  ;;  %v19770_v60 = vld [vmem:[#allocation254_spill] sm:$0xff]  ;;  %v19771_v33 = vld [vmem:[#allocation528_spill] sm:$0xff] }
 0x5cd   : > { %v6531_v39 = vand.u32 2147483647, %v19755_v62  ;;  %v5524_v2 = vadd.f32 %v17286_v6, %v5476_v20  ;;  %v6608_v61 = vmul.f32 1.442695, %v6580_v34  ;;  %v5429_v52 = vmul.f32 %v17169_v38, %v5413_v31  ;;  %7401 = vmatmul.mubr.f32.gmra.mrb[54].mxu1 %v17277_v14  ;;  %v19772_v44 = vld [vmem:[#allocation263_spill] sm:$0xff] }
 0x5ce   : > { %v5493_v5 = vmul.f32 %v5413_v31, %v19769_v12  ;;  %v10142_v1 = vpop.eup %10141  ;;  %v6149_v13 = vsel %vm17342_vm13, %v6146_v55, %v6143_v49  ;;  %v6689_v22 = vmul.f32 %v17097_v41, %v19770_v60  ;;  %v5382_v19 = vadd.f32 1.0, %v19771_v33 }
 0x5cf   : > { %v5385_v51 = vmul.f32 -0.5, %v19771_v33  ;;  %v17384_v6 = vmul.f32 %v5524_v2, %v19772_v44  ;;  %v5458_v34 = vmul.f32 1.442695, %v5429_v52  ;;  %v6181_v14 = vsel %vm5973_vm12, %v19756_v29, %v6149_v13  ;;  %v19774_v52 = vld [vmem:[#allocation279_spill] sm:$0xff] }
 0x5d0   : > { %v17387_v20 = vmul.f32 %v5493_v5, %v16654_v7  ;;  %v6197_v55 = vmul.f32 %v17169_v38, %v6181_v14  ;;  %v6261_v31 = vmul.f32 %v6181_v14, %v19773_v30  ;;  %v5759_v41 = vmul.f32 0.6931472, %v10142_v1  ;;  %7535 = vmatprep.mubr.f32.mxu0 %v6689_v22  ;;  %v19775_v7 = vld [vmem:[#allocation157_spill] sm:$0xff]  ;;  %v19778_v30 = vld [vmem:[#allocation326_spill] sm:$0xff] }
 0x5d1   : > { %10147 = vlog2.f32 %v5382_v19  ;;  %v10144_v49 = vpop.eup %10143  ;;  %v6530_v12 = vmul.f32 %v19755_v62, %v6529_v50  ;;  %v5386_v60 = vadd.f32 1.0, %v5385_v51  ;;  %v6150_v44 = vadd.f32 1.0, %v19774_v52  ;;  %7536 = vmatmul.mubr.f32.gmra.mrb[66].mxu0 %v17079_v10 }
 0x5d2   : > { %10149 = vpow2.f32 %v5458_v34  ;;  %v17398_v5 = vmul.f32 %v6261_v31, %v19775_v7  ;;  %v5765_v29 = vsel %vm17354_vm15, %v5762_v24, %v5759_v41  ;;  %v6527_v13 = vmul.f32 0.6931472, %v10144_v49  ;;  %v19777_v34 = vld [vmem:[#allocation502_spill] sm:$0xff]  ;;  %v19780_v7 = vld [vmem:[#allocation280_spill] sm:$0xff] }
 0x5d3   : > { %10151 = vpow2.f32 %v6608_v61  ;;  %v5797_v1 = vsel %vm5589_vm14, %v19763_v59, %v5765_v29  ;;  %vm6532_vm3 = vcmp.lt.f32.partialorder %v6531_v39, 0.0004427343  ;;  %v5388_v62 = vand.u32 2147483647, %v19771_v33  ;;  %v19776_v61 = vld [vmem:[#allocation141_spill] sm:$0xff]  ;;  %v19779_v41 = vld [vmem:[#allocation142_spill] sm:$0xff] }
 0x5d4   : > { %10153 = vlog2.f32 %v6150_v44  ;;  %v10146_v50 = vpop.eup %10145  ;;  %v6226_v22 = vmul.f32 1.442695, %v6197_v55  ;;  %v5813_v10 = vmul.f32 %v17169_v38, %v5797_v1  ;;  %v5877_v19 = vmul.f32 %v5797_v1, %v19776_v61 }
 0x5d5   : > { %v6533_v51 = vsel %vm6532_vm3, %v6530_v12, %v6527_v13  ;;  %vm5206_vm4 = vcmp.gt.f32.partialorder %v19777_v34, 20.0  ;;  %v5860_v63 = vmul.f32 %v10146_v50, %v5524_v2  ;;  %v5387_v59 = vmul.f32 %v19771_v33, %v5386_v60 }
 0x5d6   : > { %v6565_v24 = vsel %vm6357_vm2, %v19768_v48, %v6533_v51  ;;  %v6153_v39 = vmul.f32 -0.5, %v19774_v52  ;;  %v5842_v14 = vmul.f32 1.442695, %v5813_v10  ;;  %v17415_v31 = vmul.f32 %v5877_v19, %v19778_v30  ;;  %v19781_v48 = vld [vmem:[#allocation504_spill] sm:$0xff]  ;;  %v19784_v19 = vld [vmem:[#allocation306_spill] sm:$0xff] }
 0x5d7   : > { %v6581_v55 = vmul.f32 %v17169_v38, %v6565_v24  ;;  %v6645_v49 = vmul.f32 %v6565_v24, %v19779_v41  ;;  %v5908_v12 = vadd.f32 %v17336_v11, %v5860_v63  ;;  %v6156_v2 = vand.u32 2147483647, %v19774_v52 }
 0x5d8   : > { %v6154_v44 = vadd.f32 1.0, %v6153_v39  ;;  %v5766_v29 = vadd.f32 1.0, %v19780_v7  ;;  %vm5974_vm5 = vcmp.gt.f32.partialorder %v19781_v48, 20.0  ;;  %10155 = vpow2.f32 %v5842_v14  ;;  %v19787_v14 = vld [vmem:[#allocation290_spill] sm:$0xff] }
 0x5d9   : > { %v6610_v33 = vmul.f32 1.442695, %v6581_v55  ;;  %v17424_v60 = vmul.f32 %v6645_v49, %v16693_v46  ;;  %v5769_v13 = vmul.f32 -0.5, %v19780_v7  ;;  %v6244_v1 = vmul.f32 %v10140_v32, %v5908_v12  ;;  %v19788_v49 = vld [vmem:[#allocation264_spill] sm:$0xff] }
 0x5da   : > { %vm17427_vm6 = vcmp.lt.f32.partialorder %v5388_v62, 0.0004427343  ;;  %10157 = vlog2.f32 %v5766_v29  ;;  %v5772_v11 = vand.u32 2147483647, %v19780_v7  ;;  %v6534_v51 = vadd.f32 1.0, %v19784_v19 }
 0x5db   : > { %v10148_v10 = vpop.eup %10147  ;;  %10159 = vpow2.f32 %v6226_v22  ;;  %v5770_v61 = vadd.f32 1.0, %v5769_v13  ;;  %v6537_v63 = vmul.f32 -0.5, %v19784_v19  ;;  %v6292_v46 = vadd.f32 %v17297_v28, %v6244_v1  ;;  %v17452_v1 = vpop.f32.mrb[44].mxu0 }
 0x5dc   : > { %v10150_v24 = vpop.eup %10149  ;;  %10161 = vpow2.f32 %v6610_v33  ;;  %v5384_v39 = vmul.f32 0.6931472, %v10148_v10  ;;  %vm17435_vm7 = vcmp.lt.f32.partialorder %v6156_v2, 0.0004427343  ;;  %v6155_v55 = vmul.f32 %v19774_v52, %v6154_v44  ;;  %v17454_v52 = vpop.f32.mrb[32].mxu1  ;;  %v19791_v44 = vld [vmem:[#allocation506_spill] sm:$0xff] }
 0x5dd   : > { %v10152_v62 = vpop.eup %10151  ;;  %v5477_v30 = vmul.f32 %v10150_v24, %v19787_v14  ;;  %10163 = vlog2.f32 %v6534_v51  ;;  %v6540_v22 = vand.u32 2147483647, %v19784_v19  ;;  %v17443_v29 = vmul.f32 %v6292_v46, %v19788_v49  ;;  %v17461_v24 = vpop.f32.mrb[45].mxu0  ;;  %v19797_v49 = vld [vmem:[#allocation289_spill] sm:$0xff] }
 0x5de   : > { %v10154_v41 = vpop.eup %10153  ;;  %v6628_v13 = vmul.f32 %v10152_v62, %v6292_v46  ;;  %v5390_v28 = vsel %vm17427_vm6, %v5387_v59, %v5384_v39  ;;  %v5771_v2 = vmul.f32 %v19780_v7, %v5770_v61  ;;  %vm17448_vm8 = vcmp.lt.f32.partialorder %v5772_v11, 0.0004427343  ;;  %v17463_v7 = vpop.f32.mrb[33].mxu1  ;;  %v19793_v46 = vld [vmem:[#allocation143_spill] sm:$0xff]  ;;  %v19794_v62 = vld [vmem:[#allocation265_spill] sm:$0xff] }
 0x5df   : > { %vm5590_vm9 = vcmp.gt.f32.partialorder %v19791_v44, 20.0  ;;  %v5525_v10 = vadd.f32 %v17387_v20, %v5477_v30  ;;  %v5414_v51 = vsel %vm5206_vm4, %v19777_v34, %v5390_v28  ;;  %v6152_v50 = vmul.f32 0.6931472, %v10154_v41  ;;  %19792 = vst [vmem:[#allocation169_spill] sm:$0xff] %v17463_v7  ;;  %v19795_v20 = vld [vmem:[#allocation267_spill] sm:$0xff]  ;;  %v19798_v7 = vld [vmem:[#allocation508_spill] sm:$0xff] }
 0x5e0   : > { %v6538_v59 = vadd.f32 1.0, %v6537_v63  ;;  %v17466_v11 = vadd.f32 %v17363_v25, %v6628_v13  ;;  %v5430_v61 = vmul.f32 %v17169_v38, %v5414_v51  ;;  %v5494_v39 = vmul.f32 %v5414_v51, %v19793_v46  ;;  %v19796_v63 = vld [vmem:[#allocation258_spill] sm:$0xff] }
 0x5e1   : > { %v5924_v14 = vmul.f32 %v5908_v12, %v19794_v62  ;;  %v17472_v30 = vmul.f32 %v5525_v10, %v19795_v20  ;;  %v6158_v34 = vsel %vm17435_vm7, %v6155_v55, %v6152_v50  ;;  %v6690_v41 = vmul.f32 %v17249_v18, %v19796_v63  ;;  %v19799_v50 = vld [vmem:[#allocation144_spill] sm:$0xff] }
 0x5e2   : > { %v5391_v28 = vadd.f32 1.0, %v19797_v49  ;;  %vm6358_vm10 = vcmp.gt.f32.partialorder %v19798_v7, 20.0  ;;  %v5460_v25 = vmul.f32 1.442695, %v5430_v61  ;;  %v17481_v13 = vmul.f32 %v5494_v39, %v16727_v56  ;;  %v10156_v32 = vpop.eup %10155  ;;  %v19800_v62 = vld [vmem:[#allocation324_spill] sm:$0xff] }
 0x5e3   : > { %v6182_v12 = vsel %vm5974_vm5, %v19781_v48, %v6158_v34  ;;  %7405 = vmatprep.mubr.f32.mxu1 %v5924_v14  ;;  %v5394_v51 = vmul.f32 -0.5, %v19797_v49  ;;  %7540 = vmatprep.mubr.f32.mxu0 %v6690_v41  ;;  %v5397_v46 = vand.u32 2147483647, %v19797_v49  ;;  %v5861_v61 = vmul.f32 %v10156_v32, %v5525_v10  ;;  %v19805_v32 = vld [vmem:[#allocation292_spill] sm:$0xff] }
 0x5e4   : > { %v6198_v55 = vmul.f32 %v17169_v38, %v6182_v12  ;;  %v6262_v18 = vmul.f32 %v6182_v12, %v19799_v50  ;;  %10165 = vlog2.f32 %v5391_v28  ;;  %7406 = vmatmul.mubr.f32.gmra.mrb[56].mxu1 %v17384_v6  ;;  %v10158_v56 = vpop.eup %10157  ;;  %v6159_v48 = vadd.f32 1.0, %v19800_v62  ;;  %7541 = vmatmul.mubr.f32.gmra.mrb[68].mxu0 %v17233_v40 }
 0x5e5   : > { %10167 = vpow2.f32 %v5460_v25  ;;  %v5395_v39 = vadd.f32 1.0, %v5394_v51  ;;  %v10160_v14 = vpop.eup %10159  ;;  %v5768_v63 = vmul.f32 0.6931472, %v10158_v56  ;;  %vm17496_vm11 = vcmp.lt.f32.partialorder %v6540_v22, 0.0004427343 }
 0x5e6   : > { %v6228_v20 = vmul.f32 1.442695, %v6198_v55  ;;  %v17494_v34 = vmul.f32 %v6262_v18, %v16757_v58  ;;  %v10162_v28 = vpop.eup %10161  ;;  %v5909_v6 = vadd.f32 %v17415_v31, %v5861_v61  ;;  %v6539_v10 = vmul.f32 %v19784_v19, %v6538_v59  ;;  %v19806_v31 = vld [vmem:[#allocation519_spill] sm:$0xff] }
 0x5e7   : > { %10169 = vlog2.f32 %v6159_v48  ;;  %v6162_v25 = vmul.f32 -0.5, %v19800_v62  ;;  %v10164_v12 = vpop.eup %10163  ;;  %v5774_v40 = vsel %vm17448_vm8, %v5771_v2, %v5768_v63  ;;  %v5396_v58 = vmul.f32 %v19797_v49, %v5395_v39  ;;  %v19807_v49 = vld [vmem:[#allocation145_spill] sm:$0xff]  ;;  %v19810_v48 = vld [vmem:[#allocation520_spill] sm:$0xff] }
 0x5e8   : > { %vm17506_vm12 = vcmp.lt.f32.partialorder %v5397_v46, 0.0004427343  ;;  %v6165_v22 = vand.u32 2147483647, %v19800_v62  ;;  %v5775_v55 = vadd.f32 1.0, %v19805_v32  ;;  %vm5207_vm13 = vcmp.gt.f32.partialorder %v19806_v31, 20.0 }
 0x5e9   : > { %v6245_v19 = vmul.f32 %v10160_v14, %v5909_v6  ;;  %10171 = vpow2.f32 %v6228_v20  ;;  %v5798_v59 = vsel %vm5590_vm9, %v19791_v44, %v5774_v40  ;;  %v6536_v33 = vmul.f32 0.6931472, %v10164_v12  ;;  %v19811_v63 = vld [vmem:[#allocation268_spill] sm:$0xff]  ;;  %v19812_v12 = vld [vmem:[#allocation146_spill] sm:$0xff] }
 0x5ea   : > { %v5814_v2 = vmul.f32 %v17169_v38, %v5798_v59  ;;  %v5878_v50 = vmul.f32 %v5798_v59, %v19807_v49  ;;  %v6163_v18 = vadd.f32 1.0, %v6162_v25  ;;  %10173 = vlog2.f32 %v5775_v55 }
 0x5eb   : > { %v6293_v46 = vadd.f32 %v17398_v5, %v6245_v19  ;;  %v6542_v56 = vsel %vm17496_vm11, %v6539_v10, %v6536_v33  ;;  %vm17521_vm14 = vcmp.lt.f32.partialorder %v6165_v22, 0.0004427343  ;;  %v5778_v39 = vmul.f32 -0.5, %v19805_v32  ;;  %v19813_v33 = vld [vmem:[#allocation522_spill] sm:$0xff] }
 0x5ec   : > { %vm5975_vm15 = vcmp.gt.f32.partialorder %v19810_v48, 20.0  ;;  %v5844_v44 = vmul.f32 1.442695, %v5814_v2  ;;  %v17528_v14 = vmul.f32 %v5878_v50, %v16759_v57  ;;  %v6566_v20 = vsel %vm6358_vm10, %v19798_v7, %v6542_v56  ;;  %v19814_v50 = vld [vmem:[#allocation322_spill] sm:$0xff] }
 0x5ed   : > { %v5781_v5 = vand.u32 2147483647, %v19805_v32  ;;  %v17535_v41 = vmul.f32 %v6293_v46, %v19811_v63  ;;  %v6629_v10 = vmul.f32 %v10162_v28, %v6293_v46  ;;  %v6582_v25 = vmul.f32 %v17169_v38, %v6566_v20  ;;  %v19817_v63 = vld [vmem:[#allocation269_spill] sm:$0xff]  ;;  %v19829_v56 = vld [vmem:[#allocation518_spill] sm:$0xff] }
 0x5ee   : > { %v6646_v40 = vmul.f32 %v6566_v20, %v19812_v12  ;;  %v10166_v22 = vpop.eup %10165  ;;  %10175 = vpow2.f32 %v5844_v44  ;;  %v6164_v55 = vmul.f32 %v19800_v62, %v6163_v18  ;;  %v5779_v57 = vadd.f32 1.0, %v5778_v39  ;;  %v17552_v18 = vpop.f32.mrb[46].mxu0 }
 0x5ef   : > { %v6543_v19 = vadd.f32 1.0, %v16746_v21  ;;  %v10168_v59 = vpop.eup %10167  ;;  %vm5591_vm2 = vcmp.gt.f32.partialorder %v19813_v33, 20.0  ;;  %v6677_v7 = vadd.f32 %v17424_v60, %v6629_v10  ;;  %v6612_v2 = vmul.f32 1.442695, %v6582_v25  ;;  %v17554_v39 = vpop.f32.mrb[34].mxu1 }
 0x5f0   : > { %v17544_v49 = vmul.f32 %v6646_v40, %v16807_v36  ;;  %v5393_v28 = vmul.f32 0.6931472, %v10166_v22  ;;  %v5478_v46 = vmul.f32 %v10168_v59, %v19814_v50  ;;  %vm17547_vm3 = vcmp.lt.f32.partialorder %v5781_v5, 0.0004427343  ;;  %v17561_v10 = vpop.f32.mrb[47].mxu0  ;;  %v17563_v25 = vpop.f32.mrb[35].mxu1 }
 0x5f1   : > { %10177 = vlog2.f32 %v6543_v19  ;;  %v6546_v62 = vmul.f32 -0.5, %v16746_v21  ;;  %v10170_v44 = vpop.eup %10169  ;;  %v5780_v36 = vmul.f32 %v19805_v32, %v5779_v57  ;;  %v6549_v20 = vand.u32 2147483647, %v16746_v21  ;;  %v19818_v32 = vld [vmem:[#allocation147_spill] sm:$0xff] }
 0x5f2   : > { %v5399_v60 = vsel %vm17506_vm12, %v5396_v58, %v5393_v28  ;;  %v5925_v5 = vmul.f32 %v5909_v6, %v19817_v63  ;;  %v5526_v12 = vadd.f32 %v17481_v13, %v5478_v46  ;;  %v6161_v22 = vmul.f32 0.6931472, %v10170_v44  ;;  %v19819_v6 = vld [vmem:[#allocation262_spill] sm:$0xff]  ;;  %v19820_v50 = vld [vmem:[#allocation271_spill] sm:$0xff]  ;;  %v19824_v44 = vld [vmem:[#allocation308_spill] sm:$0xff] }
 0x5f3   : > { %v5415_v40 = vsel %vm5207_vm13, %v19806_v31, %v5399_v60  ;;  %v6547_v19 = vadd.f32 1.0, %v6546_v62  ;;  %v10172_v51 = vpop.eup %10171  ;;  %10179 = vpow2.f32 %v6612_v2  ;;  %v6691_v59 = vmul.f32 %v17352_v42, %v19819_v6  ;;  %v19823_v2 = vld [vmem:[#allocation266_spill] sm:$0xff]  ;;  %v19825_v60 = vld [vmem:[#allocation293_spill] sm:$0xff] }
 0x5f4   : > { %v5431_v58 = vmul.f32 %v17169_v38, %v5415_v40  ;;  %v5495_v57 = vmul.f32 %v5415_v40, %v19818_v32  ;;  %7410 = vmatprep.mubr.f32.mxu1 %v5925_v5  ;;  %v10174_v28 = vpop.eup %10173  ;;  %v5542_v63 = vmul.f32 %v5526_v12, %v19820_v50  ;;  %v6167_v13 = vsel %vm17521_vm14, %v6164_v55, %v6161_v22  ;;  %v19828_v32 = vld [vmem:[#allocation9_spill] sm:$0xff]  ;;  %v19840_v46 = vld [vmem:[#allocation150_spill] sm:$0xff] }
 0x5f5   : > { %v6548_v31 = vmul.f32 %v16746_v21, %v6547_v19  ;;  %vm17577_vm4 = vcmp.lt.f32.partialorder %v6549_v20, 0.0004427343  ;;  %7411 = vmatmul.mubr.f32.gmra.mrb[58].mxu1 %v17472_v30  ;;  %v6692_v62 = vmul.f32 %v17466_v11, %v19823_v2  ;;  %vm6359_vm5 = vcmp.gt.f32.partialorder %v19824_v44, 20.0  ;;  %7545 = vmatprep.mubr.f32.mxu0 %v6691_v59  ;;  %v19826_v20 = vld [vmem:[#allocation148_spill] sm:$0xff]  ;;  %v19827_v30 = vld [vmem:[#allocation270_spill] sm:$0xff]  ;;  %v19830_v6 = vld [vmem:[#allocation149_spill] sm:$0xff] }
 0x5f6   : > { %v5462_v42 = vmul.f32 1.442695, %v5431_v58  ;;  %v17586_v5 = vmul.f32 %v5495_v57, %v19825_v60  ;;  %v6183_v61 = vsel %vm5975_vm15, %v19810_v48, %v6167_v13  ;;  %v5777_v21 = vmul.f32 0.6931472, %v10174_v28  ;;  %7546 = vmatmul.mubr.f32.gmra.mrb[70].mxu0 %v17333_v54  ;;  %v17604_v58 = vld [vmem:[%s17999_s7] ss:$0 sm:$0xff] }
 0x5f7   : > { %v6199_v55 = vmul.f32 %v17169_v38, %v6183_v61  ;;  %v6263_v40 = vmul.f32 %v6183_v61, %v19826_v20  ;;  %v6693_v11 = vmul.f32 %v6677_v7, %v19827_v30  ;;  %v8486_v22 = vadd.f32 %v16962_v16, %v16953_v26  ;;  %7550 = vmatprep.mubr.f32.mxu0 %v6692_v62  ;;  %v19831_v28 = vld [vmem:[#allocation516_spill] sm:$0xff]  ;;  %v19832_v2 = vld [vmem:[#allocation294_spill] sm:$0xff]  ;;  %v19837_v30 = vld [vmem:[#allocation295_spill] sm:$0xff] }
 0x5f8   : > { %10181 = vpow2.f32 %v5462_v42  ;;  %v5783_v19 = vsel %vm17547_vm3, %v5780_v36, %v5777_v21  ;;  %v8489_v48 = vadd.f32 %v16978_v8, %v16969_v9  ;;  %v6977_v54 = vmul.f32 %v17604_v58, %v19828_v32  ;;  %v10176_v7 = vpop.eup %10175  ;;  %v19834_v61 = vld [vmem:[#allocation328_spill] sm:$0xff] }
 0x5f9   : > { %v6230_v57 = vmul.f32 1.442695, %v6199_v55  ;;  %v17609_v26 = vmul.f32 %v6263_v40, %v16858_v4  ;;  %v5799_v16 = vsel %vm5591_vm2, %v19813_v33, %v5783_v19  ;;  %v7058_v36 = vadd.f32 %v8486_v22, %v19829_v56  ;;  %v19833_v33 = vld [vmem:[#allocation10_spill] sm:$0xff]  ;;  %v19841_v56 = vld [vmem:[#allocation297_spill] sm:$0xff] }
 0x5fa   : > { %v5862_v9 = vmul.f32 %v10176_v7, %v5526_v12  ;;  %v5815_v8 = vmul.f32 %v17169_v38, %v5799_v16  ;;  %v5879_v59 = vmul.f32 %v5799_v16, %v19830_v6  ;;  %v7063_v50 = vadd.f32 %v8489_v48, %v19831_v28  ;;  %7551 = vmatmul.mubr.f32.gmra.mrb[72].mxu0 %v17443_v29  ;;  %v19835_v29 = vld [vmem:[#allocation296_spill] sm:$0xff]  ;;  %v19838_v48 = vld [vmem:[#allocation273_spill] sm:$0xff]  ;;  %v19846_v28 = vld [vmem:[#allocation39_spill] sm:$0xff] }
 0x5fb   : > { %v10178_v13 = vpop.eup %10177  ;;  %10183 = vpow2.f32 %v6230_v57  ;;  %v8492_v4 = vadd.f32 %v16998_v15, %v16989_v53  ;;  %v8566_v62 = vadd.f32 %v19832_v2, %v16955_v3  ;;  %v6978_v42 = vmul.f32 %v17604_v58, %v19833_v33  ;;  %7555 = vmatprep.mubr.f32.mxu0 %v6693_v11  ;;  %v19836_v15 = vld [vmem:[#allocation37_spill] sm:$0xff]  ;;  %v19845_v6 = vld [vmem:[#allocation12_spill] sm:$0xff] }
 0x5fc   : > { %v5910_v12 = vadd.f32 %v17528_v14, %v5862_v9  ;;  %v5846_v60 = vmul.f32 1.442695, %v5815_v8  ;;  %v17627_v21 = vmul.f32 %v5879_v59, %v19834_v61  ;;  %v6545_v55 = vmul.f32 0.6931472, %v10178_v13  ;;  %v19844_v8 = vld [vmem:[#allocation38_spill] sm:$0xff]  ;;  %v19850_v33 = vld [vmem:[#allocation272_spill] sm:$0xff] }
 0x5fd   : > { %v7068_v20 = vadd.f32 %v8492_v4, %v6977_v54  ;;  %v17629_v40 = vadd.f32 %v8566_v62, %v7058_v36  ;;  %v8495_v53 = vadd.f32 %v17012_v43, %v19835_v29  ;;  %v8569_v3 = vadd.f32 %v19837_v30, %v19836_v15  ;;  %v10180_v22 = vpop.eup %10179  ;;  %v19839_v43 = vld [vmem:[#allocation11_spill] sm:$0xff]  ;;  %v19842_v36 = vld [vmem:[#allocation161_spill] sm:$0xff]  ;;  %v19848_v4 = vld [vmem:[#allocation160_spill] sm:$0xff] }
 0x5fe   : > { %v6246_v19 = vmul.f32 %v10172_v51, %v5910_v12  ;;  %10185 = vpow2.f32 %v5846_v60  ;;  %v6551_v14 = vsel %vm17577_vm4, %v6548_v31, %v6545_v55  ;;  %v5926_v32 = vmul.f32 %v5910_v12, %v19838_v48  ;;  %7556 = vmatmul.mubr.f32.gmra.mrb[74].mxu0 %v17535_v41  ;;  %v19852_v29 = vld [vmem:[#allocation34_spill] sm:$0xff]  ;;  %v19853_v48 = vld [vmem:[#allocation13_spill] sm:$0xff] }
 0x5ff   : > { %v6567_v11 = vsel %vm6359_vm5, %v19824_v44, %v6551_v14  ;;  %v7073_v54 = vadd.f32 %v8495_v53, %v6978_v42  ;;  %v17642_v7 = vadd.f32 %v8569_v3, %v7063_v50  ;;  %v6979_v57 = vmul.f32 %v17604_v58, %v19839_v43  ;;  %v19843_v44 = vld [vmem:[#allocation332_spill] sm:$0xff] }
 0x600   : > { %v6294_v51 = vadd.f32 %v17494_v34, %v6246_v19  ;;  %v6583_v16 = vmul.f32 %v17169_v38, %v6567_v11  ;;  %v6647_v31 = vmul.f32 %v6567_v11, %v19840_v46  ;;  %7415 = vmatprep.mubr.f32.mxu1 %v5926_v32  ;;  %v8498_v9 = vadd.f32 %v19842_v36, %v19841_v56  ;;  %v19847_v50 = vld [vmem:[#allocation40_spill] sm:$0xff]  ;;  %v19849_v34 = vld [vmem:[#allocation163_spill] sm:$0xff]  ;;  %v17659_v38 = vpop.f32.mrb[36].mxu1  ;;  %v17675_v32 = vpop.f32.mrb[48].mxu0  ;;  %v19858_v56 = vld [vmem:[#allocation14_spill] sm:$0xff] }
 0x601   : > { %7416 = vmatmul.mubr.f32.gmra.mrb[60].mxu1 %v5542_v63  ;;  %v8572_v41 = vadd.f32 %v19844_v8, %v19843_v44  ;;  %v6980_v59 = vmul.f32 %v17604_v58, %v19845_v6  ;;  %v8501_v13 = vadd.f32 %v19847_v50, %v19846_v28  ;;  %v8575_v2 = vadd.f32 %v19849_v34, %v19848_v4  ;;  %v19851_v63 = vld [vmem:[#allocation330_spill] sm:$0xff]  ;;  %v17665_v55 = vpop.f32.mrb[37].mxu1  ;;  %v17684_v36 = vpop.f32.mrb[49].mxu0  ;;  %v19862_v6 = vld [vmem:[#allocation336_spill] sm:$0xff]  ;;  %v19864_v50 = vld [vmem:[#allocation275_spill] sm:$0xff] }
 0x602   : > { %v10182_v62 = vpop.eup %10181  ;;  %v6310_v42 = vmul.f32 %v6294_v51, %v19850_v33  ;;  %v6630_v12 = vmul.f32 %v10180_v22, %v6294_v51  ;;  %v6614_v60 = vmul.f32 1.442695, %v6583_v16  ;;  %v17663_v61 = vmul.f32 %v6647_v31, %v19851_v63  ;;  %v19854_v51 = vld [vmem:[#allocation489_spill] sm:$0xff]  ;;  %v19855_v16 = vld [vmem:[#allocation298_spill] sm:$0xff] }
 0x603   : > { %v5479_v53 = vmul.f32 %v10182_v62, %v19852_v29  ;;  %v7078_v15 = vadd.f32 %v8498_v9, %v6979_v57  ;;  %v17668_v30 = vadd.f32 %v8572_v41, %v7068_v20  ;;  %v7083_v3 = vadd.f32 %v8501_v13, %v6980_v59  ;;  %v19856_v57 = vld [vmem:[#allocation154_spill] sm:$0xff]  ;;  %v19861_v41 = vld [vmem:[#allocation41_spill] sm:$0xff] }
 0x604   : > { %v6678_v19 = vadd.f32 %v17544_v49, %v6630_v12  ;;  %10187 = vpow2.f32 %v6614_v60  ;;  %v17671_v14 = vadd.f32 %v8575_v2, %v7073_v54  ;;  %v6981_v22 = vmul.f32 %v17604_v58, %v19853_v48  ;;  %v19857_v20 = vld [vmem:[#allocation334_spill] sm:$0xff]  ;;  %v19865_v2 = vld [vmem:[#allocation164_spill] sm:$0xff] }
 0x605   : > { %v10184_v11 = vpop.eup %10183  ;;  %v5527_v43 = vadd.f32 %v17586_v5, %v5479_v53  ;;  %v8504_v46 = vadd.f32 %v19855_v16, %v19854_v51  ;;  %v8578_v31 = vadd.f32 %v19857_v20, %v19856_v57  ;;  %v6982_v49 = vmul.f32 %v17604_v58, %v19858_v56  ;;  %v19859_v54 = vld [vmem:[#allocation274_spill] sm:$0xff]  ;;  %v19863_v5 = vld [vmem:[#allocation15_spill] sm:$0xff]  ;;  %v19868_v53 = vld [vmem:[#allocation16_spill] sm:$0xff] }
 0x606   : > { %v6694_v9 = vmul.f32 %v6678_v19, %v19859_v54  ;;  %v19860_v44 = vld [vmem:[#allocation338_spill] sm:$0xff]  ;;  %v8581_v59 = vadd.f32 %v19862_v6, %v19861_v41  ;;  %v6983_v28 = vmul.f32 %v17604_v58, %v19863_v5  ;;  %v8510_v62 = vadd.f32 %v17118_v35, %v19865_v2  ;;  %v19872_v57 = vld [vmem:[#allocation299_spill] sm:$0xff]  ;;  %v19874_v56 = vld [vmem:[#allocation344_spill] sm:$0xff] }
 0x607   : > { %v8507_v8 = vadd.f32 %v19860_v44, %v17085_v47  ;;  %v5543_v13 = vmul.f32 %v5527_v43, %v19864_v50  ;;  %v7088_v4 = vadd.f32 %v8504_v46, %v6981_v22  ;;  %v17694_v34 = vadd.f32 %v8578_v31, %v7078_v15  ;;  %v19866_v47 = vld [vmem:[#allocation42_spill] sm:$0xff]  ;;  %v19870_v15 = vld [vmem:[#allocation300_spill] sm:$0xff]  ;;  %v19873_v31 = vld [vmem:[#allocation17_spill] sm:$0xff] }
 0x608   : > { %v10186_v33 = vpop.eup %10185  ;;  %7560 = vmatprep.mubr.f32.mxu0 %v6694_v9  ;;  %v17698_v60 = vadd.f32 %v8581_v59, %v7083_v3  ;;  %v19867_v63 = vld [vmem:[#allocation490_spill] sm:$0xff]  ;;  %v6984_v19 = vmul.f32 %v17604_v58, %v19868_v53  ;;  %v7098_v51 = vadd.f32 %v8510_v62, %v6983_v28  ;;  %v19871_v46 = vld [vmem:[#allocation340_spill] sm:$0xff]  ;;  %v6985_v3 = vmul.f32 %v17604_v58, %v19873_v31  ;;  %v19876_v9 = vld [vmem:[#allocation165_spill] sm:$0xff] }
 0x609   : > { %v7093_v12 = vadd.f32 %v8507_v8, %v6982_v49  ;;  %v8584_v29 = vadd.f32 %v19867_v63, %v19866_v47  ;;  %v5863_v48 = vmul.f32 %v10186_v33, %v5527_v43  ;;  %7561 = vmatmul.mubr.f32.gmra.mrb[76].mxu0 %v6310_v42  ;;  %v19869_v22 = vld [vmem:[#allocation158_spill] sm:$0xff]  ;;  %v8587_v35 = vadd.f32 %v19872_v57, %v19871_v46  ;;  %v19875_v49 = vld [vmem:[#allocation167_spill] sm:$0xff]  ;;  %v7635_v5 = vld [vmem:[%s18000_s8] sm:$0xff] }
 0x60a   : > { %v8513_v16 = vadd.f32 %v19870_v15, %v19869_v22  ;;  %v8516_v54 = vadd.f32 %v19875_v49, %v19874_v56  ;;  %v19877_v44 = vld [vmem:[#allocation43_spill] sm:$0xff]  ;;  %v19878_v6 = vld [vmem:[#allocation18_spill] sm:$0xff]  ;;  %v19881_v33 = vld [vmem:[#allocation301_spill] sm:$0xff]  ;;  %vm7961_vm6 = vcmask 254976  }
 0x60b   : > { %v17708_v20 = vadd.f32 %v8584_v29, %v7088_v4  ;;  %v8590_v8 = vadd.f32 %v19877_v44, %v19876_v9  ;;  %v5911_v42 = vadd.f32 %v17627_v21, %v5863_v48  ;;  %v17717_v41 = vadd.f32 %v8587_v35, %v7093_v12  ;;  %v7636_v28 = vld [vmem:[%s18000_s8 + $0x8] sm:$0xff]  ;;  %v19883_v53 = vld [vmem:[#allocation19_spill] sm:$0xff]  ;;  %v19887_v35 = vld [vmem:[#allocation44_spill] sm:$0xff] }
 0x60c   : > { %v7103_v43 = vadd.f32 %v8513_v16, %v6984_v19  ;;  %v6986_v59 = vmul.f32 %v17604_v58, %v19878_v6  ;;  %v7108_v50 = vadd.f32 %v8516_v54, %v6985_v3  ;;  %v19879_v2 = vld [vmem:[#allocation302_spill] sm:$0xff]  ;;  %v19882_v63 = vld [vmem:[#allocation277_spill] sm:$0xff]  ;;  %v6987_v19 = vmul.f32 %v17604_v58, %v19883_v53  ;;  %v19884_v48 = vld [vmem:[#allocation303_spill] sm:$0xff] }
 0x60d   : > { %v17727_v4 = vadd.f32 %v8590_v8, %v7098_v51  ;;  %v8519_v21 = vadd.f32 %v19879_v2, %v17174_v0  ;;  %v19880_v62 = vld [vmem:[#allocation342_spill] sm:$0xff]  ;;  %v6247_v47 = vmul.f32 %v10184_v11, %v5911_v42  ;;  %v5927_v29 = vmul.f32 %v5911_v42, %v19882_v63  ;;  %v19885_v22 = vld [vmem:[#allocation45_spill] sm:$0xff]  ;;  %v19888_v56 = vld [vmem:[#allocation20_spill] sm:$0xff] }
 0x60e   : > { %v8593_v12 = vadd.f32 %v19881_v33, %v19880_v62  ;;  %v8522_v15 = vadd.f32 %v19885_v22, %v19884_v48  ;;  %v10188_v16 = vpop.eup %10187  ;;  %v19886_v51 = vld [vmem:[#allocation346_spill] sm:$0xff]  ;;  %v9260_v0 = vpack.c.bf16 %v7636_v28, %v7635_v5  ;;  %v6988_v49 = vmul.f32 %v17604_v58, %v19888_v56  ;;  %v19889_v54 = vld [vmem:[#allocation304_spill] sm:$0xff] }
 0x60f   : > { %v7113_v46 = vadd.f32 %v8519_v21, %v6986_v59  ;;  %v8596_v31 = vadd.f32 %v19887_v35, %v19886_v51  ;;  %v6295_v3 = vadd.f32 %v17609_v26, %v6247_v47  ;;  %7420 = vmatprep.mubr.f32.mxu1 %v5927_v29  ;;  %v19890_v9 = vld [vmem:[#allocation348_spill] sm:$0xff]  ;;  %v19893_v59 = vld [vmem:[#allocation21_spill] sm:$0xff]  ;;  %v7637_v62 = vld [vmem:[%s18000_s8 + $0x10] sm:$0xff]  ;;  %v8528_v33 = vadd.f32 %v17252_v17, %v17244_v37 }
 0x610   : > { %v17738_v57 = vadd.f32 %v8593_v12, %v7103_v43  ;;  %v7118_v11 = vadd.f32 %v8522_v15, %v6987_v19  ;;  %v8525_v44 = vadd.f32 %v19890_v9, %v19889_v54  ;;  %7421 = vmatmul.mubr.f32.gmra.mrb[62].mxu1 %v5543_v13  ;;  %9261 = vmatprep.subr.bf16.mxu0 %v9260_v0  ;;  %v19891_v42 = vld [vmem:[#allocation168_spill] sm:$0xff]  ;;  %v19892_v43 = vld [vmem:[#allocation46_spill] sm:$0xff]  ;;  %v19895_v12 = vld [vmem:[#allocation47_spill] sm:$0xff]  ;;  %v7572_v54 = vpop.permute.xlu0 %7571 }
 0x611   : > { %v17747_v8 = vadd.f32 %v8596_v31, %v7108_v50  ;;  %v8599_v6 = vadd.f32 %v19892_v43, %v19891_v42  ;;  %v6989_v5 = vmul.f32 %v17604_v58, %v19893_v59  ;;  %v19894_v28 = vld [vmem:[#allocation276_spill] sm:$0xff]  ;;  %v6631_v2 = vmul.f32 %v10188_v16, %v6295_v3  ;;  %9263 = vmatpush3.bf16.msra.mxu0 %v9260_v0  ;;  %v19896_v47 = vld [vmem:[#allocation171_spill] sm:$0xff]  ;;  %v19897_v29 = vld [vmem:[#allocation22_spill] sm:$0xff] }
 0x612   : > { %v6311_v26 = vmul.f32 %v6295_v3, %v19894_v28  ;;  %9276 = vmatprep.subr.bf16.mxu1 %v9260_v0  ;;  %v7123_v21 = vadd.f32 %v8525_v44, %v6988_v49  ;;  %v7638_v13 = vld [vmem:[%s18000_s8 + $0x18] sm:$0xff]  ;;  %v8602_v63 = vadd.f32 %v19896_v47, %v19895_v12  ;;  %v6990_v53 = vmul.f32 %v17604_v58, %v19897_v29  ;;  %v19899_v37 = vld [vmem:[#allocation169_spill] sm:$0xff]  ;;  %v19900_v31 = vld [vmem:[#allocation278_spill] sm:$0xff] }
 0x613   : > { %9280 = vmatpush3.bf16.msra.mxu1 %v9260_v0  ;;  %v17760_v50 = vadd.f32 %v8599_v6, %v7113_v46  ;;  %v6679_v19 = vadd.f32 %v17663_v61, %v6631_v2  ;;  %v8531_v48 = vadd.f32 %v17348_v45, %v17338_v27  ;;  %v19898_v22 = vld [vmem:[#allocation48_spill] sm:$0xff]  ;;  %v8608_v16 = vadd.f32 %v17461_v24, %v17452_v1  ;;  %v8653_v45 = vpop.f32.mrb[38].mxu1  ;;  %v7640_v24 = vld [vmem:[%s18000_s8 + $0x28] sm:$0xff]  ;;  %v7641_v56 = vld [vmem:[%s18000_s8 + $0x30] sm:$0xff] }
 0x614   : > { %v8605_v15 = vadd.f32 %v17359_v23, %v19898_v22  ;;  %v7128_v46 = vadd.f32 %v8528_v33, %v6989_v5  ;;  %v17775_v51 = vadd.f32 %v8602_v63, %v7118_v11  ;;  %v8646_v17 = vadd.f32 %v19899_v37, %v17454_v52  ;;  %v8727_v23 = vpop.f32.mrb[50].mxu0  ;;  %v7639_v1 = vld [vmem:[%s18000_s8 + $0x20] sm:$0xff]  ;;  %v7642_v49 = vld [vmem:[%s18000_s8 + $0x38] sm:$0xff]  ;;  %v7576_v33 = vpop.permute.xlu1 %7575 }
 0x615   : > { %v9264_v35 = vpack.c.bf16 %v7638_v13, %v7637_v62  ;;  %v6695_v58 = vmul.f32 %v6679_v19, %v19900_v31  ;;  %v7133_v0 = vadd.f32 %v8531_v48, %v6990_v53  ;;  %v8611_v27 = vadd.f32 %v17561_v10, %v17552_v18  ;;  %v8654_v18 = vpop.f32.mrb[39].mxu1  ;;  %v8728_v10 = vpop.f32.mrb[51].mxu0 }
 0x616   : > { %v17780_v61 = vadd.f32 %v8605_v15, %v7123_v21  ;;  %v17790_v52 = vadd.f32 %v8608_v16, %v7128_v46  ;;  %v7348_v3 = vadd.f32 %v8646_v17, %v17629_v40  ;;  %v8649_v11 = vadd.f32 %v17563_v25, %v17554_v39 }
 0x617   : > { %9265 = vmatprep.subr.bf16.mxu0 %v9264_v35  ;;  %9277 = vmatprep.subr.bf16.mxu1 %v9264_v35  ;;  %v17801_v9 = vadd.f32 %v8611_v27, %v7133_v0  ;;  %v8652_v40 = vadd.f32 %v17665_v55, %v17659_v38  ;;  %v8726_v39 = vadd.f32 %v17684_v36, %v17675_v32  ;;  %v7574_v55 = vpop.permute.xlu0 %7573 }
 0x618   : > { %7565 = vmatprep.mubr.f32.mxu0 %v6695_v58  ;;  %9267 = vmatpush3.bf16.msra.mxu0 %v9264_v35  ;;  %v7353_v25 = vadd.f32 %v8649_v11, %v17642_v7  ;;  %v9268_v44 = vpack.c.bf16 %v7640_v24, %v7639_v1  ;;  %v8655_v42 = vadd.f32 %v8654_v18, %v8653_v45  ;;  %v7578_v16 = vpop.permute.xlu1 %7577 }
 0x619   : > { %7566 = vmatmul.mubr.f32.gmra.mrb[78].mxu0 %v6311_v26  ;;  %9281 = vmatpush3.bf16.msra.mxu1 %v9264_v35  ;;  %v7358_v43 = vadd.f32 %v8652_v40, %v17668_v30  ;;  %v7493_v6 = vadd.f32 %v8726_v39, %v7348_v3  ;;  %v8729_v59 = vadd.f32 %v8728_v10, %v8727_v23  ;;  %v8656_v30 = vpop.f32.mrb[40].mxu1 }
 0x61a   : > { %v9272_v5 = vpack.c.bf16 %v7642_v49, %v7641_v56  ;;  %9269 = vmatprep.subr.bf16.mxu0 %v9268_v44  ;;  %v7363_v28 = vadd.f32 %v8655_v42, %v17671_v14  ;;  %9278 = vmatprep.subr.bf16.mxu1 %v9268_v44  ;;  %v8730_v32 = vpop.f32.mrb[52].mxu0  ;;  %v8657_v36 = vpop.f32.mrb[41].mxu1 }
 0x61b   : > { %v7619_v2 = vmul.f32 %v7572_v54, %v7493_v6  ;;  %v7498_v38 = vadd.f32 %v8729_v59, %v7353_v25  ;;  %v8658_v26 = vadd.f32 %v8657_v36, %v8656_v30  ;;  %v8731_v14 = vpop.f32.mrb[53].mxu0  ;;  %v7580_v45 = vpop.permute.xlu0 %7579 }
 0x61c   : > { %9271 = vmatpush3.bf16.msra.mxu0 %v9268_v44  ;;  %v8732_v21 = vadd.f32 %v8731_v14, %v8730_v32  ;;  %v7582_v49 = vpop.permute.xlu1 %7581 }
 0x61d   : > { %9273 = vmatprep.subr.bf16.mxu0 %v9272_v5  ;;  %9282 = vmatpush3.bf16.msra.mxu1 %v9268_v44  ;;  %v7620_v7 = vmul.f32 %v7574_v55, %v7498_v38  ;;  %v7368_v62 = vadd.f32 %v8658_v26, %v17694_v34 }
 0x61e   : > { %8844 = vmatprep.mubr.msk.f32.mxu0 %vm1001_vm1, %v7619_v2  ;;  %9279 = vmatprep.subr.bf16.mxu1 %v9272_v5  ;;  %v7503_v13 = vadd.f32 %v8732_v21, %v7358_v43 }
 0x61f   : > { %v7584_v59 = vpop.permute.xlu0 %7583 }
 0x620   : > { %9275 = vmatpush3.bf16.msra.mxu0 %v9272_v5  ;;  %v7621_v12 = vmul.f32 %v7576_v33, %v7503_v13  ;;  %v7586_v36 = vpop.permute.xlu1 %7585 }
 0x621   : > { %9283 = vmatpush3.bf16.msra.mxu1 %v9272_v5 }
 0x622   : > { %8847 = vmatprep.mubr.msk.f32.mxu1 %vm1001_vm1, %v7621_v12 }
 0x623   : > { %8845 = vmatmul.mubr.msk.f32.vlgmr.msra.gmra.mrb[80].mxu0 %vm1001_vm1, %v7620_v7 }
 0x62e   : > { %v8659_v47 = vpop.f32.mrb[42].mxu1 }
 0x62f   : > { %v8733_v63 = vpop.f32.mrb[54].mxu0  ;;  %v8660_v29 = vpop.f32.mrb[43].mxu1 }
 0x630   : > { %v8661_v53 = vadd.f32 %v8660_v29, %v8659_v47  ;;  %v8734_v19 = vpop.f32.mrb[55].mxu0 }
 0x631   : > { %v8735_v48 = vadd.f32 %v8734_v19, %v8733_v63  ;;  %v7588_v63 = vpop.permute.xlu0 %7587 }
 0x632   : > { %v7373_v22 = vadd.f32 %v8661_v53, %v17698_v60 }
 0x633   : > { %v7508_v15 = vadd.f32 %v8735_v48, %v7363_v28 }
 0x635   : > { %v7622_v46 = vmul.f32 %v7578_v16, %v7508_v15 }
 0x637   : > { %8848 = vmatmul.mubr.msk.f32.vlgmr.msra.gmra.mrb[64].mxu1 %vm1001_vm1, %v7622_v46 }
 0x640   : > { %v8662_v37 = vpop.f32.mrb[44].mxu1  ;;  %v8736_v34 = vpop.f32.mrb[56].mxu0 }
 0x641   : > { %v8663_v17 = vpop.f32.mrb[45].mxu1  ;;  %v8737_v35 = vpop.f32.mrb[57].mxu0 }
 0x642   : > { %v8664_v31 = vadd.f32 %v8663_v17, %v8662_v37  ;;  %v8738_v58 = vadd.f32 %v8737_v35, %v8736_v34  ;;  %v7590_v37 = vpop.permute.xlu1 %7589 }
 0x644   : > { %v7378_v0 = vadd.f32 %v8664_v31, %v17708_v20  ;;  %v7513_v27 = vadd.f32 %v8738_v58, %v7368_v62 }
 0x646   : > { %v7623_v23 = vmul.f32 %v7580_v45, %v7513_v27 }
 0x648   : > { %8850 = vmatprep.mubr.msk.f32.mxu1 %vm1001_vm1, %v7623_v23  ;;  %v7592_v23 = vpop.permute.xlu0 %7591 }
 0x652   : > { %v8665_v1 = vpop.f32.mrb[46].mxu1 }
 0x653   : > { %v8739_v60 = vpop.f32.mrb[58].mxu0  ;;  %v8666_v24 = vpop.f32.mrb[47].mxu1 }
 0x654   : > { %v8667_v3 = vadd.f32 %v8666_v24, %v8665_v1  ;;  %v8740_v11 = vpop.f32.mrb[59].mxu0 }
 0x655   : > { %v8741_v18 = vadd.f32 %v8740_v11, %v8739_v60 }
 0x656   : > { %v7383_v10 = vadd.f32 %v8667_v3, %v17717_v41 }
 0x657   : > { %v7518_v56 = vadd.f32 %v8741_v18, %v7373_v22 }
 0x659   : > { %v7624_v54 = vmul.f32 %v7582_v49, %v7518_v56 }
 0x65b   : > { %8851 = vmatmul.mubr.msk.f32.gmra.mrb[66].mxu1 %vm1001_vm1, %v7624_v54  ;;  %v7594_v54 = vpop.permute.xlu1 %7593 }
 0x667   : > { %v8668_v40 = vpop.f32.mrb[48].mxu1 }
 0x668   : > { %v8742_v20 = vpop.f32.mrb[60].mxu0  ;;  %v8669_v39 = vpop.f32.mrb[49].mxu1 }
 0x669   : > { %v8670_v25 = vadd.f32 %v8669_v39, %v8668_v40  ;;  %v8743_v44 = vpop.f32.mrb[61].mxu0 }
 0x66a   : > { %v8744_v42 = vadd.f32 %v8743_v44, %v8742_v20  ;;  %v7596_v44 = vpop.permute.xlu0 %7595 }
 0x66b   : > { %v7388_v43 = vadd.f32 %v8670_v25, %v17727_v4 }
 0x66c   : > { %v7523_v6 = vadd.f32 %v8744_v42, %v7378_v0 }
 0x66e   : > { %v7625_v5 = vmul.f32 %v7584_v59, %v7523_v6 }
 0x670   : > { %8853 = vmatprep.mubr.msk.f32.mxu1 %vm1001_vm1, %v7625_v5 }
 0x678   : > { %v8671_v28 = vpop.f32.mrb[50].mxu1 }
 0x679   : > { %v8672_v41 = vpop.f32.mrb[51].mxu1 }
 0x67a   : > { %v8673_v38 = vadd.f32 %v8672_v41, %v8671_v28 }
 0x67c   : > { %v8745_v2 = vpop.f32.mrb[62].mxu0  ;;  %v7393_v7 = vadd.f32 %v8673_v38, %v17738_v57 }
 0x67d   : > { %v8746_v55 = vpop.f32.mrb[63].mxu0 }
 0x67e   : > { %v8747_v30 = vadd.f32 %v8746_v55, %v8745_v2 }
 0x680   : > { %v7528_v32 = vadd.f32 %v8747_v30, %v7383_v10 }
 0x682   : > { %v7626_v26 = vmul.f32 %v7586_v36, %v7528_v32  ;;  %v7600_v36 = vpop.permute.xlu0 %7599 }
 0x684   : > { %8854 = vmatmul.mubr.msk.f32.gmra.mrb[68].mxu1 %vm1001_vm1, %v7626_v26 }
 0x68e   : > { %v8674_v14 = vpop.f32.mrb[52].mxu1 }
 0x68f   : > { %v8748_v4 = vpop.f32.mrb[64].mxu0  ;;  %v8675_v21 = vpop.f32.mrb[53].mxu1 }
 0x690   : > { %v8676_v62 = vadd.f32 %v8675_v21, %v8674_v14  ;;  %v8749_v13 = vpop.f32.mrb[65].mxu0 }
 0x691   : > { %v8750_v33 = vadd.f32 %v8749_v13, %v8748_v4 }
 0x692   : > { %v7398_v12 = vadd.f32 %v8676_v62, %v17747_v8 }
 0x693   : > { %v7533_v47 = vadd.f32 %v8750_v33, %v7388_v43 }
 0x695   : > { %v7627_v29 = vmul.f32 %v7588_v63, %v7533_v47 }
 0x697   : > { %8856 = vmatprep.mubr.msk.f32.mxu1 %vm1001_vm1, %v7627_v29 }
 0x6a0   : > { %v8677_v57 = vpop.f32.mrb[54].mxu1 }
 0x6a1   : > { %v8678_v53 = vpop.f32.mrb[55].mxu1 }
 0x6a2   : > { %v8679_v19 = vadd.f32 %v8678_v53, %v8677_v57 }
 0x6a4   : > { %v8751_v48 = vpop.f32.mrb[66].mxu0  ;;  %v7403_v22 = vadd.f32 %v8679_v19, %v17760_v50 }
 0x6a5   : > { %v8752_v15 = vpop.f32.mrb[67].mxu0 }
 0x6a6   : > { %v8753_v16 = vadd.f32 %v8752_v15, %v8751_v48 }
 0x6a8   : > { %v7538_v46 = vadd.f32 %v8753_v16, %v7393_v7 }
 0x6aa   : > { %v7628_v34 = vmul.f32 %v7590_v37, %v7538_v46 }
 0x6ac   : > { %8857 = vmatmul.mubr.msk.f32.gmra.mrb[70].mxu1 %vm1001_vm1, %v7628_v34 }
 0x6b7   : > { %v8680_v17 = vpop.f32.mrb[56].mxu1  ;;  %v8754_v8 = vpop.f32.mrb[68].mxu0 }
 0x6b8   : > { %v8681_v35 = vpop.f32.mrb[57].mxu1  ;;  %v8755_v58 = vpop.f32.mrb[69].mxu0 }
 0x6b9   : > { %v8682_v31 = vadd.f32 %v8681_v35, %v8680_v17  ;;  %v8756_v0 = vadd.f32 %v8755_v58, %v8754_v8 }
 0x6bb   : > { %v7408_v27 = vadd.f32 %v8682_v31, %v17775_v51  ;;  %v7543_v45 = vadd.f32 %v8756_v0, %v7398_v12 }
 0x6bd   : > { %v7629_v1 = vmul.f32 %v7592_v23, %v7543_v45 }
 0x6bf   : > { %8859 = vmatprep.mubr.msk.f32.mxu1 %vm1001_vm1, %v7629_v1 }
 0x6c8   : > { %v8683_v50 = vpop.f32.mrb[58].mxu1 }
 0x6c9   : > { %v8684_v60 = vpop.f32.mrb[59].mxu1  ;;  %v8757_v24 = vpop.f32.mrb[70].mxu0 }
 0x6ca   : > { %v8685_v3 = vadd.f32 %v8684_v60, %v8683_v50  ;;  %v8758_v11 = vpop.f32.mrb[71].mxu0 }
 0x6cb   : > { %v8759_v10 = vadd.f32 %v8758_v11, %v8757_v24 }
 0x6cc   : > { %v7413_v18 = vadd.f32 %v8685_v3, %v17780_v61  ;;  %v7598_v61 = vpop.permute.xlu1 %7597 }
 0x6cd   : > { %v7548_v56 = vadd.f32 %v8759_v10, %v7403_v22  ;;  %v8760_v49 = vpop.f32.mrb[72].mxu0 }
 0x6ce   : > { %v8761_v40 = vpop.f32.mrb[73].mxu0 }
 0x6cf   : > { %v7630_v20 = vmul.f32 %v7594_v54, %v7548_v56  ;;  %v8762_v39 = vadd.f32 %v8761_v40, %v8760_v49 }
 0x6d0   : > { %v7602_v47 = vpop.permute.xlu1 %7601 }
 0x6d1   : > { %v7553_v51 = vadd.f32 %v8762_v39, %v7408_v27  ;;  %v8763_v25 = vpop.f32.mrb[74].mxu0  ;;  %8860 = vmatmul.mubr.msk.f32.gmra.mrb[72].mxu1 %vm1001_vm1, %v7630_v20 }
 0x6d2   : > { %v8764_v42 = vpop.f32.mrb[75].mxu0 }
 0x6d3   : > { %v7631_v6 = vmul.f32 %v7596_v44, %v7553_v51  ;;  %v8765_v59 = vadd.f32 %v8764_v42, %v8763_v25 }
 0x6d4   : > { %v8686_v43 = vpop.f32.mrb[60].mxu1 }
 0x6d5   : > { %v8687_v5 = vpop.f32.mrb[61].mxu1  ;;  %v7558_v41 = vadd.f32 %v8765_v59, %v7413_v18  ;;  %8862 = vmatprep.mubr.msk.f32.mxu1 %vm1001_vm1, %v7631_v6 }
 0x6d6   : > { %v8688_v28 = vadd.f32 %v8687_v5, %v8686_v43 }
 0x6d7   : > { %v7632_v38 = vmul.f32 %v7598_v61, %v7558_v41 }
 0x6d8   : > { %v7418_v2 = vadd.f32 %v8688_v28, %v17790_v52 }
 0x6d9   : > { %8863 = vmatmul.mubr.msk.f32.gmra.mrb[74].mxu1 %vm1001_vm1, %v7632_v38 }
 0x6dc   : > { %v8766_v55 = vpop.f32.mrb[76].mxu0 }
 0x6dd   : > { %v8767_v7 = vpop.f32.mrb[77].mxu0 }
 0x6de   : > { %v8768_v30 = vadd.f32 %v8767_v7, %v8766_v55 }
 0x6e0   : > { %v7563_v32 = vadd.f32 %v8768_v30, %v7418_v2 }
 0x6e2   : > { %v7633_v26 = vmul.f32 %v7600_v36, %v7563_v32 }
 0x6e3   : > { %v8689_v14 = vpop.f32.mrb[62].mxu1 }
 0x6e4   : > { %v8690_v4 = vpop.f32.mrb[63].mxu1  ;;  %8865 = vmatprep.mubr.msk.f32.mxu1 %vm1001_vm1, %v7633_v26 }
 0x6e5   : > { %v8691_v21 = vadd.f32 %v8690_v4, %v8689_v14 }
 0x6e7   : > { %v7423_v62 = vadd.f32 %v8691_v21, %v17801_v9 }
 0x6ec   : > { %v8769_v13 = vpop.f32.mrb[78].mxu0 }
 0x6ed   : > { %v8770_v33 = vpop.f32.mrb[79].mxu0 }
 0x6ee   : > { %v8771_v52 = vadd.f32 %v8770_v33, %v8769_v13 }
 0x6f0   : > { %v7568_v12 = vadd.f32 %v8771_v52, %v7423_v62 }
 0x6f2   : > { %v7634_v63 = vmul.f32 %v7602_v47, %v7568_v12 }
 0x6f4   : > { %8866 = vmatmul.mubr.msk.f32.gmra.mrb[76].mxu1 %vm1001_vm1, %v7634_v63  ;;  %vm7959_vm1 = vcmask 1040384  }
 0x6f6   : > { %v17845_v29 = vpop.f32.mrb[80].mxu0 }
 0x6f7   : > { %7837 = vst.msk [vmem:[%s17842_s12 + $0x8] sm:$0xff] %vm439_vm0, %v17845_v29  ;;  %v7853_v9 = vsel %vm439_vm0, %v17845_v29, 0.0  ;;  %v17852_v57 = vpop.f32.mrb[81].mxu0 }
 0x6f8   : > { %7836 = vst.msk [vmem:[%s17842_s12] sm:$0xff] %vm439_vm0, %v17852_v57  ;;  %v7852_v53 = vsel %vm439_vm0, %v17852_v57, 0.0 }
 0x6f9   : > { %v7854_v19 = vadd.f32 %v7853_v9, %v7852_v53 }
 0x70a   : > { %v17859_v48 = vpop.f32.mrb[64].mxu1 }
 0x70b   : > { %7839 = vst.msk [vmem:[%s17842_s12 + $0x18] sm:$0xff] %vm439_vm0, %v17859_v48  ;;  %v17864_v22 = vpop.f32.mrb[65].mxu1  ;;  %v7857_v46 = vsel %vm439_vm0, %v17859_v48, 0.0 }
 0x70c   : > { %7838 = vst.msk [vmem:[%s17842_s12 + $0x10] sm:$0xff] %vm439_vm0, %v17864_v22  ;;  %v7855_v15 = vsel %vm439_vm0, %v17864_v22, 0.0 }
 0x70d   : > { %v7856_v16 = vadd.f32 %v7855_v15, %v7854_v19 }
 0x70f   : > { %v7858_v37 = vadd.f32 %v7857_v46, %v7856_v16 }
 0x72e   : > { %v8852_v34 = vpop.f32.mrb[66].mxu1 }
 0x72f   : > { %7841 = vst.msk [vmem:[%s17842_s12 + $0x28] sm:$0xff] %vm439_vm0, %v8852_v34  ;;  %v7777_v17 = vpop.f32.mrb[67].mxu1  ;;  %v7861_v31 = vsel %vm439_vm0, %v8852_v34, 0.0 }
 0x730   : > { %7840 = vst.msk [vmem:[%s17842_s12 + $0x20] sm:$0xff] %vm439_vm0, %v7777_v17  ;;  %v7859_v8 = vsel %vm439_vm0, %v7777_v17, 0.0 }
 0x731   : > { %v7860_v35 = vadd.f32 %v7859_v8, %v7858_v37 }
 0x733   : > { %v7862_v58 = vadd.f32 %v7861_v31, %v7860_v35 }
 0x757   : > { %v8855_v0 = vpop.f32.mrb[68].mxu1 }
 0x758   : > { %7843 = vst.msk [vmem:[%s17842_s12 + $0x38] sm:$0xff] %vm439_vm0, %v8855_v0  ;;  %v7787_v27 = vpop.f32.mrb[69].mxu1  ;;  %v7865_v1 = vsel %vm439_vm0, %v8855_v0, 0.0 }
 0x759   : > { %7842 = vst.msk [vmem:[%s17842_s12 + $0x30] sm:$0xff] %vm439_vm0, %v7787_v27  ;;  %v7863_v45 = vsel %vm439_vm0, %v7787_v27, 0.0 }
 0x75a   : > { %v7864_v23 = vadd.f32 %v7863_v45, %v7862_v58 }
 0x75c   : > { %v7866_v50 = vadd.f32 %v7865_v1, %v7864_v23 }
 0x77f   : > { %v8858_v60 = vpop.f32.mrb[70].mxu1 }
 0x780   : > { %7845 = vst.msk [vmem:[%s17842_s12 + $0x48] sm:$0xff] %vm439_vm0, %v8858_v60  ;;  %v7797_v24 = vpop.f32.mrb[71].mxu1  ;;  %v7869_v18 = vsel %vm439_vm0, %v8858_v60, 0.0 }
 0x781   : > { %7844 = vst.msk [vmem:[%s17842_s12 + $0x40] sm:$0xff] %vm439_vm0, %v7797_v24  ;;  %v7867_v3 = vsel %vm439_vm0, %v7797_v24, 0.0 }
 0x782   : > { %v7868_v11 = vadd.f32 %v7867_v3, %v7866_v50 }
 0x784   : > { %v7870_v10 = vadd.f32 %v7869_v18, %v7868_v11 }
 0x7a4   : > { %v8861_v56 = vpop.f32.mrb[72].mxu1 }
 0x7a5   : > { %7847 = vst.msk [vmem:[%s17842_s12 + $0x58] sm:$0xff] %vm439_vm0, %v8861_v56  ;;  %v7807_v49 = vpop.f32.mrb[73].mxu1  ;;  %v7873_v20 = vsel %vm439_vm0, %v8861_v56, 0.0 }
 0x7a6   : > { %7846 = vst.msk [vmem:[%s17842_s12 + $0x50] sm:$0xff] %vm439_vm0, %v7807_v49  ;;  %v7871_v54 = vsel %vm439_vm0, %v7807_v49, 0.0 }
 0x7a7   : > { %v7872_v40 = vadd.f32 %v7871_v54, %v7870_v10 }
 0x7a9   : > { %v7874_v39 = vadd.f32 %v7873_v20, %v7872_v40 }
 0x7ac   : > { %v8864_v51 = vpop.f32.mrb[74].mxu1 }
 0x7ad   : > { %7849 = vst.msk [vmem:[%s17842_s12 + $0x68] sm:$0xff] %vm439_vm0, %v8864_v51  ;;  %v7817_v25 = vpop.f32.mrb[75].mxu1  ;;  %v7877_v43 = vsel %vm439_vm0, %v8864_v51, 0.0 }
 0x7ae   : > { %7848 = vst.msk [vmem:[%s17842_s12 + $0x60] sm:$0xff] %vm439_vm0, %v7817_v25  ;;  %v7875_v44 = vsel %vm439_vm0, %v7817_v25, 0.0 }
 0x7af   : > { %v7876_v42 = vadd.f32 %v7875_v44, %v7874_v39 }
 0x7b1   : > { %v7878_v6 = vadd.f32 %v7877_v43, %v7876_v42 }
 0x7c7   : > { %v8867_v59 = vpop.f32.mrb[76].mxu1 }
 0x7c8   : > { %7851 = vst.msk [vmem:[%s17842_s12 + $0x78] sm:$0xff] %vm439_vm0, %v8867_v59  ;;  %v7827_v5 = vpop.f32.mrb[77].mxu1  ;;  %v7881_v61 = vsel %vm439_vm0, %v8867_v59, 0.0 }
 0x7c9   : > { %7850 = vst.msk [vmem:[%s17842_s12 + $0x70] sm:$0xff] %vm439_vm0, %v7827_v5  ;;  %v7879_v28 = vsel %vm439_vm0, %v7827_v5, 0.0  ;;  %s10294_s12 = smov [#allocation3]  }
 0x7ca   : > { %v7880_v41 = vadd.f32 %v7879_v28, %v7878_v6  ;;  %s10200_s24 = sshll.u32 %s10294_s12, 4  ;;  %s10201_s24 = int_to_ptr.vmem [resolvable:$false] %s10200_s24 }
 0x7cb   : > { %s10202_s18 = scalar_lea.vmem %s10201_s24, 64  ;;  %p10203_p4 = scmp.lt.s32.totalorder %s17940_s28, %s10201_s24 }
 0x7cc   : > { %v7882_v2 = vadd.f32 %v7881_v61, %v7880_v41  ;;  %p10204_p5 = scmp.lt.s32.totalorder %s10202_s18, %s10196_s17 }
 0x7ce   : > { %v7883_v38 = vrot.slane %v7882_v2, 4  ;;  %p10205_p6 = por %p10204_p5, %p10203_p4 }
 0x7d0   : > { %v7884_v55 = vadd.f32 %v7883_v38, %v7882_v2  ;;  %p10206_p7 = pnand %p10205_p6, %p10199_p2 }
 0x7d2   : > { %v7885_v7 = vrot.slane %v7884_v55, 2 }
 0x7d4   : > { %v7886_v30 = vadd.f32 %v7885_v7, %v7884_v55 }
 0x7d6   : > { %v7887_v32 = vrot.slane %v7886_v30, 1 }
 0x7d8   : > { %v17909_v36 = vadd.f32 %v7887_v32, %v7886_v30 }
 0x7da   : > { %v7889_v26 = vmul.f32 0.0078125, %v17909_v36 }
 0x7dc   : > { %v7890_v14 = vsub.f32 %v17852_v57, %v7889_v26  ;;  %v7891_v4 = vsub.f32 %v17845_v29, %v7889_v26  ;;  %v7892_v21 = vsub.f32 %v17864_v22, %v7889_v26  ;;  %v7893_v62 = vsub.f32 %v17859_v48, %v7889_v26 }
 0x7dd   : > { %v7894_v13 = vsub.f32 %v7777_v17, %v7889_v26  ;;  %v7895_v33 = vsub.f32 %v8852_v34, %v7889_v26  ;;  %v7896_v52 = vsub.f32 %v7787_v27, %v7889_v26  ;;  %v7897_v12 = vsub.f32 %v8855_v0, %v7889_v26 }
 0x7de   : > { %v7898_v47 = vsub.f32 %v7797_v24, %v7889_v26  ;;  %v7899_v63 = vsub.f32 %v8858_v60, %v7889_v26  ;;  %v7900_v9 = vsub.f32 %v7807_v49, %v7889_v26  ;;  %v7901_v53 = vsub.f32 %v8861_v56, %v7889_v26 }
 0x7df   : > { %v7902_v19 = vsub.f32 %v7817_v25, %v7889_v26  ;;  %v7903_v15 = vsub.f32 %v8864_v51, %v7889_v26  ;;  %v7904_v16 = vsub.f32 %v7827_v5, %v7889_v26  ;;  %v7905_v46 = vsub.f32 %v8867_v59, %v7889_v26 }
 0x7e0   : > { %v7906_v37 = vmul.f32 %v7890_v14, %v7890_v14  ;;  %v7907_v57 = vmul.f32 %v7891_v4, %v7891_v4  ;;  %v7908_v8 = vmul.f32 %v7892_v21, %v7892_v21  ;;  %v7909_v29 = vmul.f32 %v7893_v62, %v7893_v62 }
 0x7e1   : > { %v7910_v34 = vmul.f32 %v7894_v13, %v7894_v13  ;;  %v7911_v58 = vmul.f32 %v7895_v33, %v7895_v33  ;;  %v7912_v45 = vmul.f32 %v7896_v52, %v7896_v52  ;;  %v7913_v50 = vmul.f32 %v7897_v12, %v7897_v12 }
 0x7e2   : > { %v7922_v22 = vsel %vm439_vm0, %v7906_v37, 0.0  ;;  %v7923_v48 = vsel %vm439_vm0, %v7907_v57, 0.0  ;;  %v7925_v35 = vsel %vm439_vm0, %v7908_v8, 0.0  ;;  %v7927_v0 = vsel %vm439_vm0, %v7909_v29, 0.0 }
 0x7e3   : > { %v7924_v17 = vadd.f32 %v7923_v48, %v7922_v22  ;;  %v7929_v23 = vsel %vm439_vm0, %v7910_v34, 0.0  ;;  %v7931_v60 = vsel %vm439_vm0, %v7911_v58, 0.0  ;;  %v7914_v3 = vmul.f32 %v7898_v47, %v7898_v47 }
 0x7e4   : > { %v7933_v11 = vsel %vm439_vm0, %v7912_v45, 0.0  ;;  %v7915_v10 = vmul.f32 %v7899_v63, %v7899_v63  ;;  %v7935_v56 = vsel %vm439_vm0, %v7913_v50, 0.0  ;;  %v7916_v54 = vmul.f32 %v7900_v9, %v7900_v9 }
 0x7e5   : > { %v7926_v31 = vadd.f32 %v7925_v35, %v7924_v17  ;;  %v7937_v40 = vsel %vm439_vm0, %v7914_v3, 0.0  ;;  %v7917_v39 = vmul.f32 %v7901_v53, %v7901_v53  ;;  %v7918_v44 = vmul.f32 %v7902_v19, %v7902_v19 }
 0x7e6   : > { %v7939_v51 = vsel %vm439_vm0, %v7915_v10, 0.0  ;;  %v7941_v42 = vsel %vm439_vm0, %v7916_v54, 0.0  ;;  %v7919_v6 = vmul.f32 %v7903_v15, %v7903_v15  ;;  %v7920_v28 = vmul.f32 %v7904_v16, %v7904_v16 }
 0x7e7   : > { %v7928_v27 = vadd.f32 %v7927_v0, %v7926_v31  ;;  %v7943_v59 = vsel %vm439_vm0, %v7917_v39, 0.0  ;;  %v7945_v41 = vsel %vm439_vm0, %v7918_v44, 0.0  ;;  %v7921_v2 = vmul.f32 %v7905_v46, %v7905_v46 }
 0x7e8   : > { %v7947_v38 = vsel %vm439_vm0, %v7919_v6, 0.0  ;;  %v7949_v7 = vsel %vm439_vm0, %v7920_v28, 0.0 }
 0x7e9   : > { %v7930_v1 = vadd.f32 %v7929_v23, %v7928_v27  ;;  %v7951_v32 = vsel %vm439_vm0, %v7921_v2, 0.0 }
 0x7eb   : > { %v7932_v24 = vadd.f32 %v7931_v60, %v7930_v1 }
 0x7ed   : > { %v7934_v18 = vadd.f32 %v7933_v11, %v7932_v24 }
 0x7ef   : > { %v7936_v49 = vadd.f32 %v7935_v56, %v7934_v18 }
 0x7f1   : > { %v7938_v20 = vadd.f32 %v7937_v40, %v7936_v49 }
 0x7f3   : > { %v7940_v25 = vadd.f32 %v7939_v51, %v7938_v20 }
 0x7f5   : > { %v7942_v43 = vadd.f32 %v7941_v42, %v7940_v25 }
 0x7f7   : > { %v7944_v5 = vadd.f32 %v7943_v59, %v7942_v43 }
 0x7f9   : > { %v7946_v61 = vadd.f32 %v7945_v41, %v7944_v5 }
 0x7fb   : > { %v7948_v55 = vadd.f32 %v7947_v38, %v7946_v61 }
 0x7fd   : > { %v7950_v30 = vadd.f32 %v7949_v7, %v7948_v55 }
 0x7ff   : > { %v7952_v26 = vadd.f32 %v7951_v32, %v7950_v30 }
 0x801   : > { %v7953_v14 = vrot.slane %v7952_v26, 4 }
 0x803   : > { %v7954_v4 = vadd.f32 %v7953_v14, %v7952_v26 }
 0x805   : > { %v7955_v21 = vrot.slane %v7954_v4, 2 }
 0x807   : > { %v7956_v62 = vadd.f32 %v7955_v21, %v7954_v4 }
 0x809   : > { %v7957_v13 = vrot.slane %v7956_v62, 1 }
 0x80b   : > { %v7958_v33 = vadd.f32 %v7957_v13, %v7956_v62 }
 0x80d   : > { %v7960_v52 = vsel %vm7959_vm1, %v17909_v36, %v7958_v33 }
 0x80e   : > { %7962 = vst.msk [vmem:[%s391_s25] sm:$0x3] %vm7961_vm6, %v7960_v52 }
 0x80f   : > { %10209 = shalt.err (!%p10206_p7)
}
 0x810   : > { %s10210_s23 = scalar_lea.hbm %s17938_s21, 32  ;;  %s10214_s25 = scalar_lea.hbm %s18002_s10, 128 }
 0x811   : > { %p10211_p9 = scmp.ne.s32.totalorder %s17938_s21, %s10210_s23  ;;  %p10215_p12 = scmp.lt.u32.totalorder %s17938_s21, %s18002_s10 }
 0x812   : > { %p10216_p13 = scmp.lt.u32.totalorder %s10214_s25, %s10210_s23  ;;  %p10218_p1 = scmp.lt.u32.totalorder %s10210_s23, %s17938_s21 }
 0x813   : > { %p10212_p10 = pnand %p10211_p9, %p10401_p3 }
 0x814   : > { %p10217_p0 = por %p10216_p13, %p10215_p12 }
 0x815   : > { %p10213_p11 = pneg %p10212_p10 }
 0x816   : > { %p10219_p2 = por %p10218_p1, %p10217_p0 }
 0x818   : > { %p10220_p4 = pnand %p10219_p2, %p10213_p11 }
 0x81a   : > { %10223 = shalt.err (!%p10220_p4)
}
 0x81b   : > { %9284 = dma.vmem_to_hbm [thread:$0]  (%p10401_p3), %s17940_s28, 32, %s17938_s21, %s7973_s16  }
 0x81c PF: > { %p9290_p5 = scmp.ge.s32.totalorder %s10290_s20, 2  ;;  %s8016_s17 = sand.u32 1, %s10262_s13  }
 0x81d   : > { %s8017_s12 = scalar_lea.sflag [#allocation4], %s8016_s17 }
 0x81e   : > { %p9287_p6 = pnand %p9290_p5, %p10410_p8 }
 0x820   : > { %10257 = dma.done.wait (!%p9287_p6), %s8017_s12, 32  }
 0x821   : > { %10259 = vsyncadd (!%p9287_p6), %s8017_s12, 4294967264  ;;  %s24_s20 = sadd.s32 1, %s10290_s20   ;;  %s19902_s16 = sld [smem:[#allocation6_spill]] }
 0x822   : > { %p21_p7 = scmp.ge.s32.totalorder %s24_s20, 6   ;;  %s19903_s18 = sld [smem:[#allocation7_spill]] }
 0x823   : > { %s19904_s26 = sld [smem:[#allocation8_spill]]  ;;  %s19905_s13 = smov %s10266_s14 }
 0x824   : > { %s19906_s14 = smov %s10270_s15  ;;  %s19907_s15 = smov %s10419_s11 }
 0x825   : > { %s19908_s17 = smov %s10286_s19  ;;  %23 = sbr.rel (!%p21_p7) target bundleno = 7 (0x7), region = 103 }
 0x829   : > { %s19909_s19 = smov %s19904_s26 }
 0x82c   :  { %8022 = vsyncpa [#allocation4], 1 }
 0x82d   :  { %8024 = vsyncpa [#allocation4 + $0x1], 1 }

</bundles_post_ra>
